<compile_context>
chip_gen: v7x
topology: tpu7x:2x2x1
jax: 0.10.0
libtpu: 0.0.40
codegen_flags: <defaults>
</compile_context>

<pallas_src>
import jax
import jax.numpy as jnp
from jax.experimental import pallas as pl
from jax.experimental.pallas import tpu as pltpu

INPUT_SIZE = 10
HIDDEN_SIZE = 128
NUM_LAYERS = 3
OUTPUT_SIZE = 1


# ---------------------------------------------------------------------------
# Fused Pallas kernel: 3 LSTM layers + Linear head, whole sequence per call.
# ---------------------------------------------------------------------------
def _fused_lstm_kernel(x_ref,
                       wih0_ref, whh0_ref, b0_ref,
                       wih1_ref, whh1_ref, b1_ref,
                       wih2_ref, whh2_ref, b2_ref,
                       fcw_ref, fcb_ref,
                       out_ref,
                       g0_sc):
    """x_ref: (T*Bp, D) time-major, batch-padded input (f32).

    wih*_ref : (D_in, 4H) bf16   W_ih^T per layer (g-gate columns pre-scaled x2)
    whh*_ref : (H, 4H)    bf16   W_hh^T per layer (g-gate columns pre-scaled x2)
    b*_ref   : (1, 4H)    f32    b_ih + b_hh per layer (g-gate slice pre-scaled x2)
    fcw_ref  : (1, H)     f32    FC weight row (output_size == 1)
    fcb_ref  : (1, 1)     f32
    out_ref  : (Bp, 1)    f32    final output (t = T-1 of last layer)
    g0_sc    : (T*Bp, 4H) f32    VMEM scratch, hoisted layer-0 gate pre-acts.
    """
    TB = x_ref.shape[0]
    H = whh0_ref.shape[0]
    Bp = out_ref.shape[0]
    T = TB // Bp

    # --- Hoisted layer-0 input projection (one big MXU matmul, bias folded
    # in once).  Stored to lane-dense VMEM scratch so the unrolled recurrence
    # only keeps one (Bp, 4H) slab live per step.
    g0_sc[...] = (
        jnp.dot(x_ref[...].astype(jnp.bfloat16), wih0_ref[...],
                preferred_element_type=jnp.float32)
        + b0_ref[...]
    )

    whh0 = whh0_ref[...]
    wih1 = wih1_ref[...]
    whh1 = whh1_ref[...]
    wih2 = wih2_ref[...]
    whh2 = whh2_ref[...]
    b1 = b1_ref[...]
    b2 = b2_ref[...]

    def lstm_step(pre, c):
        # One sigmoid across all 4H gate columns (single EUP push).  The
        # g-gate columns were pre-scaled by 2 at pack time, so
        # tanh(a_g) = 2*sigmoid(2*a_g) - 1 is recovered on the VPU.
        s = jax.nn.sigmoid(pre)
        i_g = s[:, 0 * H:1 * H]
        f_g = s[:, 1 * H:2 * H]
        g_g = 2.0 * s[:, 2 * H:3 * H] - 1.0
        o_g = s[:, 3 * H:4 * H]
        c_new = f_g * c + i_g * g_g
        h_new = o_g * jnp.tanh(c_new)        # remaining EUP op
        return h_new, c_new

    zeros = jnp.zeros((Bp, H), jnp.float32)
    h0, c0 = zeros, zeros
    h1, c1 = zeros, zeros
    h2, c2 = zeros, zeros

    # --- Cross-layer wavefront over the recurrence -------------------------
    # Virtual step s: layer0@t=s, layer1@t=s-1, layer2@t=s-2.  Serial chain
    # length T+2 instead of 3T; the three cell updates within one step are
    # independent so MXU / EUP / VPU work interleaves.
    # TODO(synk): for large T replace the Python unroll with
    # lax.fori_loop(..., unroll=4/8) and predicated boundary steps.
    for s in range(T + 2):
        h0_prev, h1_prev = h0, h1
        if s < T:                                   # layer 0 @ t = s
            pre0 = g0_sc[pl.ds(s * Bp, Bp), :] + jnp.dot(
                h0.astype(jnp.bfloat16), whh0,
                preferred_element_type=jnp.float32)
            h0, c0 = lstm_step(pre0, c0)
        if 1 <= s <= T:                             # layer 1 @ t = s-1
            pre1 = (jnp.dot(h0_prev.astype(jnp.bfloat16), wih1,
                            preferred_element_type=jnp.float32)
                    + jnp.dot(h1.astype(jnp.bfloat16), whh1,
                              preferred_element_type=jnp.float32)
                    + b1)
            h1, c1 = lstm_step(pre1, c1)
        if 2 <= s <= T + 1:                         # layer 2 @ t = s-2
            pre2 = (jnp.dot(h1_prev.astype(jnp.bfloat16), wih2,
                            preferred_element_type=jnp.float32)
                    + jnp.dot(h2.astype(jnp.bfloat16), whh2,
                              preferred_element_type=jnp.float32)
                    + b2)
            h2, c2 = lstm_step(pre2, c2)

    # --- FC head (output_size == 1): VPU multiply + lane reduction instead
    # of a degenerate N=1 MXU matmul.  (B,1) store is a masked 1-lane vst.
    out_ref[...] = (
        jnp.sum(h2 * fcw_ref[...], axis=-1, keepdims=True) + fcb_ref[...]
    )


# ---------------------------------------------------------------------------
# Parameter init / packing
# ---------------------------------------------------------------------------
def init_raw_params(key, input_size=INPUT_SIZE, hidden_size=HIDDEN_SIZE,
                    num_layers=NUM_LAYERS, output_size=OUTPUT_SIZE):
    """PyTorch-layout f32 params: U(-1/sqrt(H), 1/sqrt(H))."""
    k = 1.0 / jnp.sqrt(jnp.float32(hidden_size))
    layers = []
    for layer in range(num_layers):
        d_in = input_size if layer == 0 else hidden_size
        key, k1, k2, k3, k4 = jax.random.split(key, 5)
        layers.append({
            "w_ih": jax.random.uniform(k1, (4 * hidden_size, d_in),
                                       jnp.float32, -k, k),
            "w_hh": jax.random.uniform(k2, (4 * hidden_size, hidden_size),
                                       jnp.float32, -k, k),
            "b_ih": jax.random.uniform(k3, (4 * hidden_size,), jnp.float32, -k, k),
            "b_hh": jax.random.uniform(k4, (4 * hidden_size,), jnp.float32, -k, k),
        })
    key, k5, k6 = jax.random.split(key, 3)
    fc_w = jax.random.uniform(k5, (output_size, hidden_size), jnp.float32, -k, k)
    fc_b = jax.random.uniform(k6, (output_size,), jnp.float32, -k, k)
    return {"lstm": layers, "fc_w": fc_w, "fc_b": fc_b}


def pack_params(raw):
    """Kernel-ready params: transposed, g-gate pre-scaled x2, bf16 weights."""
    H = raw["lstm"][0]["w_hh"].shape[1]
    gate_scale = jnp.ones((1, 4 * H), jnp.float32).at[:, 2 * H:3 * H].set(2.0)

    def prep(layer):
        w_ih_t = layer["w_ih"].T * gate_scale          # (d_in, 4H)
        w_hh_t = layer["w_hh"].T * gate_scale          # (H, 4H)
        b = (layer["b_ih"] + layer["b_hh"]).reshape(1, -1) * gate_scale
        # x2 is a power of two -> exact in bf16 too.
        return w_ih_t.astype(jnp.bfloat16), w_hh_t.astype(jnp.bfloat16), b

    assert raw["fc_w"].shape[0] == 1, "VPU FC head assumes output_size == 1"
    packed = {}
    for i, layer in enumerate(raw["lstm"]):
        wih, whh, b = prep(layer)
        packed[f"wih{i}"] = wih
        packed[f"whh{i}"] = whh
        packed[f"b{i}"] = b
    packed["fcw"] = raw["fc_w"].reshape(1, -1).astype(jnp.float32)   # (1, H)
    packed["fcb"] = raw["fc_b"].reshape(1, 1).astype(jnp.float32)    # (1, 1)
    return packed


# ---------------------------------------------------------------------------
# Wrapper
# ---------------------------------------------------------------------------
def _full_spec(shape):
    nd = len(shape)
    return pl.BlockSpec(shape, lambda *_: (0,) * nd)


@jax.jit
def lstm_model_forward(params, x_btd):
    """Forward equivalent to LSTMModel.forward (inference).

    x_btd: (B, T, input_size) float32, batch_first like PyTorch.
    returns: (B, output_size)
    """
    B, T, D = x_btd.shape
    H = params["whh0"].shape[0]
    O = params["fcb"].shape[1]

    # Pad batch to the f32 sublane count so every vreg / MXU LHS row tile is
    # fully occupied; padded rows are sliced off afterwards.
    Bp = max(8, -(-B // 8) * 8)
    x_p = jnp.pad(x_btd, ((0, Bp - B), (0, 0), (0, 0)))
    # Time-major + flatten so each timestep is a contiguous, sublane-aligned
    # (Bp, D) slab of rows inside the kernel (negligible relayout at this size).
    x_tb = jnp.transpose(x_p, (1, 0, 2)).reshape(T * Bp, D)

    args = (
        x_tb,
        params["wih0"], params["whh0"], params["b0"],
        params["wih1"], params["whh1"], params["b1"],
        params["wih2"], params["whh2"], params["b2"],
        params["fcw"], params["fcb"],
    )

    out = pl.pallas_call(
        _fused_lstm_kernel,
        out_shape=jax.ShapeDtypeStruct((Bp, O), jnp.float32),
        in_specs=[_full_spec(a.shape) for a in args],
        out_specs=_full_spec((Bp, O)),
        scratch_shapes=[pltpu.VMEM((T * Bp, 4 * H), jnp.float32)],
        compiler_params=pltpu.CompilerParams(
            # Explicit budget: total footprint here is ~1 MiB; this cap is
            # safe on v5e (16 MiB default scoped) through v7x (64 MiB phys).
            vmem_limit_bytes=32 * 1024 * 1024),
    )(*args)
    return out[:B]


# ---------------------------------------------------------------------------
# Plain-JAX f32 reference (eval mode) for a numerical cross-check.
# ---------------------------------------------------------------------------
def _reference_forward(raw, x_btd):
    B, T, _ = x_btd.shape
    H = raw["lstm"][0]["w_hh"].shape[1]
    seq = x_btd
    for layer in raw["lstm"]:
        w_ih, w_hh = layer["w_ih"], layer["w_hh"]
        b = layer["b_ih"] + layer["b_hh"]
        h = jnp.zeros((B, H), jnp.float32)
        c = jnp.zeros((B, H), jnp.float32)
        hs = []
        for t in range(T):
            g = seq[:, t, :] @ w_ih.T + h @ w_hh.T + b
            i = jax.nn.sigmoid(g[:, 0 * H:1 * H])
            f = jax.nn.sigmoid(g[:, 1 * H:2 * H])
            gg = jnp.tanh(g[:, 2 * H:3 * H])
            o = jax.nn.sigmoid(g[:, 3 * H:4 * H])
            c = f * c + i * gg
            h = o * jnp.tanh(c)
            hs.append(h)
        seq = jnp.stack(hs, axis=1)
    return seq[:, -1, :] @ raw["fc_w"].T + raw["fc_b"]


if __name__ == "__main__":
    batch, seq_len = 2, 8
    x = jax.random.normal(jax.random.PRNGKey(0), (batch, seq_len, INPUT_SIZE),
                          dtype=jnp.float32)
    raw = init_raw_params(jax.random.PRNGKey(42))
    params = pack_params(raw)

    out = lstm_model_forward(params, x)
    out = jax.block_until_ready(out)
    assert out.shape == (batch, OUTPUT_SIZE), out.shape

    # Cross-check vs. f32 reference (loose tolerance: kernel uses bf16 weights
    # with f32 accumulation; gate/cell math is f32).
    ref = _reference_forward(raw, x)
    max_err = float(jnp.max(jnp.abs(out - ref)))
    assert max_err < 5e-2, f"max abs err {max_err}"

    print("KERNEL_OK")
</pallas_src>

<mosaic_0001>
module attributes {stable_mosaic.version = 11 : i64} {
  func.func @_fused_lstm_kernel(%arg0: memref<64x10xf32, #tpu.memory_space<vmem>>, %arg1: memref<10x512xbf16, #tpu.memory_space<vmem>>, %arg2: memref<128x512xbf16, #tpu.memory_space<vmem>>, %arg3: memref<1x512xf32, #tpu.memory_space<vmem>>, %arg4: memref<128x512xbf16, #tpu.memory_space<vmem>>, %arg5: memref<128x512xbf16, #tpu.memory_space<vmem>>, %arg6: memref<1x512xf32, #tpu.memory_space<vmem>>, %arg7: memref<128x512xbf16, #tpu.memory_space<vmem>>, %arg8: memref<128x512xbf16, #tpu.memory_space<vmem>>, %arg9: memref<1x512xf32, #tpu.memory_space<vmem>>, %arg10: memref<1x128xf32, #tpu.memory_space<vmem>>, %arg11: memref<1x1xf32, #tpu.memory_space<vmem>>, %arg12: memref<8x1xf32, #tpu.memory_space<vmem>>, %arg13: memref<64x512xf32, #tpu.memory_space<vmem>>) attributes {dimension_semantics = [], scalar_prefetch = 0 : i64, scratch_operands = 1 : i64, tpu.core_type = #tpu.core_type<tc>} {
    %c0 = arith.constant 0 : index
    %c0_0 = arith.constant 0 : index
    %0 = vector.load %arg0[%c0, %c0_0] : memref<64x10xf32, #tpu.memory_space<vmem>>, vector<64x10xf32>
    %1 = arith.truncf %0 : vector<64x10xf32> to vector<64x10xbf16>
    %c0_1 = arith.constant 0 : index
    %c0_2 = arith.constant 0 : index
    %2 = vector.load %arg1[%c0_1, %c0_2] : memref<10x512xbf16, #tpu.memory_space<vmem>>, vector<10x512xbf16>
    %cst = arith.constant dense<0.000000e+00> : vector<64x512xf32>
    %3 = tpu.matmul %1, %2, %cst {dimension_numbers = #tpu.dot_dimension_numbers<[1], [0], [0], [1], [0, 0, 1, 1], [], []>} : vector<64x10xbf16>, vector<10x512xbf16>, vector<64x512xf32> -> vector<64x512xf32>
    %c0_3 = arith.constant 0 : index
    %c0_4 = arith.constant 0 : index
    %4 = vector.load %arg3[%c0_3, %c0_4] : memref<1x512xf32, #tpu.memory_space<vmem>>, vector<1x512xf32>
    %5 = vector.broadcast %4 : vector<1x512xf32> to vector<64x512xf32>
    %6 = arith.addf %3, %5 : vector<64x512xf32>
    %c0_5 = arith.constant 0 : index
    %c0_6 = arith.constant 0 : index
    %7 = vector.load %arg13[%c0_5, %c0_6] : memref<64x512xf32, #tpu.memory_space<vmem>>, vector<64x512xf32>
    tpu.vector_store %arg13[%c0_5, %c0_6], %6 {strides = array<i32>} : memref<64x512xf32, #tpu.memory_space<vmem>>, vector<64x512xf32>,
    %c0_7 = arith.constant 0 : index
    %c0_8 = arith.constant 0 : index
    %8 = vector.load %arg2[%c0_7, %c0_8] : memref<128x512xbf16, #tpu.memory_space<vmem>>, vector<128x512xbf16>
    %c0_9 = arith.constant 0 : index
    %c0_10 = arith.constant 0 : index
    %9 = vector.load %arg4[%c0_9, %c0_10] : memref<128x512xbf16, #tpu.memory_space<vmem>>, vector<128x512xbf16>
    %c0_11 = arith.constant 0 : index
    %c0_12 = arith.constant 0 : index
    %10 = vector.load %arg5[%c0_11, %c0_12] : memref<128x512xbf16, #tpu.memory_space<vmem>>, vector<128x512xbf16>
    %c0_13 = arith.constant 0 : index
    %c0_14 = arith.constant 0 : index
    %11 = vector.load %arg7[%c0_13, %c0_14] : memref<128x512xbf16, #tpu.memory_space<vmem>>, vector<128x512xbf16>
    %c0_15 = arith.constant 0 : index
    %c0_16 = arith.constant 0 : index
    %12 = vector.load %arg8[%c0_15, %c0_16] : memref<128x512xbf16, #tpu.memory_space<vmem>>, vector<128x512xbf16>
    %c0_17 = arith.constant 0 : index
    %c0_18 = arith.constant 0 : index
    %13 = vector.load %arg6[%c0_17, %c0_18] : memref<1x512xf32, #tpu.memory_space<vmem>>, vector<1x512xf32>
    %c0_19 = arith.constant 0 : index
    %c0_20 = arith.constant 0 : index
    %14 = vector.load %arg9[%c0_19, %c0_20] : memref<1x512xf32, #tpu.memory_space<vmem>>, vector<1x512xf32>
    %cst_21 = arith.constant 0.000000e+00 : f32
    %15 = vector.broadcast %cst_21 : f32 to vector<8x128xf32>
    %c0_22 = arith.constant 0 : index
    %c0_23 = arith.constant 0 : index
    %16 = vector.load %arg13[%c0_22, %c0_23] : memref<64x512xf32, #tpu.memory_space<vmem>>, vector<8x512xf32>
    %17 = arith.truncf %15 : vector<8x128xf32> to vector<8x128xbf16>
    %cst_24 = arith.constant dense<0.000000e+00> : vector<8x512xf32>
    %18 = tpu.matmul %17, %8, %cst_24 {dimension_numbers = #tpu.dot_dimension_numbers<[1], [0], [0], [1], [0, 0, 1, 1], [], []>} : vector<8x128xbf16>, vector<128x512xbf16>, vector<8x512xf32> -> vector<8x512xf32>
    %19 = arith.addf %16, %18 : vector<8x512xf32>
    %20 = arith.negf %19 : vector<8x512xf32>
    %21 = math.exp %20 : vector<8x512xf32>
    %cst_25 = arith.constant 1.000000e+00 : f32
    %22 = vector.broadcast %cst_25 : f32 to vector<8x512xf32>
    %23 = arith.addf %22, %21 : vector<8x512xf32>
    %24 = arith.divf %22, %23 : vector<8x512xf32>
    %25 = vector.extract_strided_slice %24 {offsets = [0, 0], sizes = [8, 128], strides = [1, 1]} : vector<8x512xf32> to vector<8x128xf32>
    %26 = vector.extract_strided_slice %24 {offsets = [0, 128], sizes = [8, 128], strides = [1, 1]} : vector<8x512xf32> to vector<8x128xf32>
    %27 = vector.extract_strided_slice %24 {offsets = [0, 256], sizes = [8, 128], strides = [1, 1]} : vector<8x512xf32> to vector<8x128xf32>
    %cst_26 = arith.constant 2.000000e+00 : f32
    %28 = vector.broadcast %cst_26 : f32 to vector<8x128xf32>
    %29 = arith.mulf %28, %27 : vector<8x128xf32>
    %cst_27 = arith.constant 1.000000e+00 : f32
    %30 = vector.broadcast %cst_27 : f32 to vector<8x128xf32>
    %31 = arith.subf %29, %30 : vector<8x128xf32>
    %32 = vector.extract_strided_slice %24 {offsets = [0, 384], sizes = [8, 128], strides = [1, 1]} : vector<8x512xf32> to vector<8x128xf32>
    %33 = arith.mulf %26, %15 : vector<8x128xf32>
    %34 = arith.mulf %25, %31 : vector<8x128xf32>
    %35 = arith.addf %33, %34 : vector<8x128xf32>
    %36 = math.tanh %35 : vector<8x128xf32>
    %37 = arith.mulf %32, %36 : vector<8x128xf32>
    %c8 = arith.constant 8 : index
    %c0_28 = arith.constant 0 : index
    %38 = vector.load %arg13[%c8, %c0_28] : memref<64x512xf32, #tpu.memory_space<vmem>>, vector<8x512xf32>
    %39 = arith.truncf %37 : vector<8x128xf32> to vector<8x128xbf16>
    %cst_29 = arith.constant dense<0.000000e+00> : vector<8x512xf32>
    %40 = tpu.matmul %39, %8, %cst_29 {dimension_numbers = #tpu.dot_dimension_numbers<[1], [0], [0], [1], [0, 0, 1, 1], [], []>} : vector<8x128xbf16>, vector<128x512xbf16>, vector<8x512xf32> -> vector<8x512xf32>
    %41 = arith.addf %38, %40 : vector<8x512xf32>
    %42 = arith.negf %41 : vector<8x512xf32>
    %43 = math.exp %42 : vector<8x512xf32>
    %cst_30 = arith.constant 1.000000e+00 : f32
    %44 = vector.broadcast %cst_30 : f32 to vector<8x512xf32>
    %45 = arith.addf %44, %43 : vector<8x512xf32>
    %46 = arith.divf %44, %45 : vector<8x512xf32>
    %47 = vector.extract_strided_slice %46 {offsets = [0, 0], sizes = [8, 128], strides = [1, 1]} : vector<8x512xf32> to vector<8x128xf32>
    %48 = vector.extract_strided_slice %46 {offsets = [0, 128], sizes = [8, 128], strides = [1, 1]} : vector<8x512xf32> to vector<8x128xf32>
    %49 = vector.extract_strided_slice %46 {offsets = [0, 256], sizes = [8, 128], strides = [1, 1]} : vector<8x512xf32> to vector<8x128xf32>
    %cst_31 = arith.constant 2.000000e+00 : f32
    %50 = vector.broadcast %cst_31 : f32 to vector<8x128xf32>
    %51 = arith.mulf %50, %49 : vector<8x128xf32>
    %cst_32 = arith.constant 1.000000e+00 : f32
    %52 = vector.broadcast %cst_32 : f32 to vector<8x128xf32>
    %53 = arith.subf %51, %52 : vector<8x128xf32>
    %54 = vector.extract_strided_slice %46 {offsets = [0, 384], sizes = [8, 128], strides = [1, 1]} : vector<8x512xf32> to vector<8x128xf32>
    %55 = arith.mulf %48, %35 : vector<8x128xf32>
    %56 = arith.mulf %47, %53 : vector<8x128xf32>
    %57 = arith.addf %55, %56 : vector<8x128xf32>
    %58 = math.tanh %57 : vector<8x128xf32>
    %59 = arith.mulf %54, %58 : vector<8x128xf32>
    %60 = arith.truncf %37 : vector<8x128xf32> to vector<8x128xbf16>
    %cst_33 = arith.constant dense<0.000000e+00> : vector<8x512xf32>
    %61 = tpu.matmul %60, %9, %cst_33 {dimension_numbers = #tpu.dot_dimension_numbers<[1], [0], [0], [1], [0, 0, 1, 1], [], []>} : vector<8x128xbf16>, vector<128x512xbf16>, vector<8x512xf32> -> vector<8x512xf32>
    %62 = arith.truncf %15 : vector<8x128xf32> to vector<8x128xbf16>
    %cst_34 = arith.constant dense<0.000000e+00> : vector<8x512xf32>
    %63 = tpu.matmul %62, %10, %cst_34 {dimension_numbers = #tpu.dot_dimension_numbers<[1], [0], [0], [1], [0, 0, 1, 1], [], []>} : vector<8x128xbf16>, vector<128x512xbf16>, vector<8x512xf32> -> vector<8x512xf32>
    %64 = arith.addf %61, %63 : vector<8x512xf32>
    %65 = vector.broadcast %13 : vector<1x512xf32> to vector<8x512xf32>
    %66 = arith.addf %64, %65 : vector<8x512xf32>
    %67 = arith.negf %66 : vector<8x512xf32>
    %68 = math.exp %67 : vector<8x512xf32>
    %cst_35 = arith.constant 1.000000e+00 : f32
    %69 = vector.broadcast %cst_35 : f32 to vector<8x512xf32>
    %70 = arith.addf %69, %68 : vector<8x512xf32>
    %71 = arith.divf %69, %70 : vector<8x512xf32>
    %72 = vector.extract_strided_slice %71 {offsets = [0, 0], sizes = [8, 128], strides = [1, 1]} : vector<8x512xf32> to vector<8x128xf32>
    %73 = vector.extract_strided_slice %71 {offsets = [0, 128], sizes = [8, 128], strides = [1, 1]} : vector<8x512xf32> to vector<8x128xf32>
    %74 = vector.extract_strided_slice %71 {offsets = [0, 256], sizes = [8, 128], strides = [1, 1]} : vector<8x512xf32> to vector<8x128xf32>
    %cst_36 = arith.constant 2.000000e+00 : f32
    %75 = vector.broadcast %cst_36 : f32 to vector<8x128xf32>
    %76 = arith.mulf %75, %74 : vector<8x128xf32>
    %cst_37 = arith.constant 1.000000e+00 : f32
    %77 = vector.broadcast %cst_37 : f32 to vector<8x128xf32>
    %78 = arith.subf %76, %77 : vector<8x128xf32>
    %79 = vector.extract_strided_slice %71 {offsets = [0, 384], sizes = [8, 128], strides = [1, 1]} : vector<8x512xf32> to vector<8x128xf32>
    %80 = arith.mulf %73, %15 : vector<8x128xf32>
    %81 = arith.mulf %72, %78 : vector<8x128xf32>
    %82 = arith.addf %80, %81 : vector<8x128xf32>
    %83 = math.tanh %82 : vector<8x128xf32>
    %84 = arith.mulf %79, %83 : vector<8x128xf32>
    %c16 = arith.constant 16 : index
    %c0_38 = arith.constant 0 : index
    %85 = vector.load %arg13[%c16, %c0_38] : memref<64x512xf32, #tpu.memory_space<vmem>>, vector<8x512xf32>
    %86 = arith.truncf %59 : vector<8x128xf32> to vector<8x128xbf16>
    %cst_39 = arith.constant dense<0.000000e+00> : vector<8x512xf32>
    %87 = tpu.matmul %86, %8, %cst_39 {dimension_numbers = #tpu.dot_dimension_numbers<[1], [0], [0], [1], [0, 0, 1, 1], [], []>} : vector<8x128xbf16>, vector<128x512xbf16>, vector<8x512xf32> -> vector<8x512xf32>
    %88 = arith.addf %85, %87 : vector<8x512xf32>
    %89 = arith.negf %88 : vector<8x512xf32>
    %90 = math.exp %89 : vector<8x512xf32>
    %cst_40 = arith.constant 1.000000e+00 : f32
    %91 = vector.broadcast %cst_40 : f32 to vector<8x512xf32>
    %92 = arith.addf %91, %90 : vector<8x512xf32>
    %93 = arith.divf %91, %92 : vector<8x512xf32>
    %94 = vector.extract_strided_slice %93 {offsets = [0, 0], sizes = [8, 128], strides = [1, 1]} : vector<8x512xf32> to vector<8x128xf32>
    %95 = vector.extract_strided_slice %93 {offsets = [0, 128], sizes = [8, 128], strides = [1, 1]} : vector<8x512xf32> to vector<8x128xf32>
    %96 = vector.extract_strided_slice %93 {offsets = [0, 256], sizes = [8, 128], strides = [1, 1]} : vector<8x512xf32> to vector<8x128xf32>
    %cst_41 = arith.constant 2.000000e+00 : f32
    %97 = vector.broadcast %cst_41 : f32 to vector<8x128xf32>
    %98 = arith.mulf %97, %96 : vector<8x128xf32>
    %cst_42 = arith.constant 1.000000e+00 : f32
    %99 = vector.broadcast %cst_42 : f32 to vector<8x128xf32>
    %100 = arith.subf %98, %99 : vector<8x128xf32>
    %101 = vector.extract_strided_slice %93 {offsets = [0, 384], sizes = [8, 128], strides = [1, 1]} : vector<8x512xf32> to vector<8x128xf32>
    %102 = arith.mulf %95, %57 : vector<8x128xf32>
    %103 = arith.mulf %94, %100 : vector<8x128xf32>
    %104 = arith.addf %102, %103 : vector<8x128xf32>
    %105 = math.tanh %104 : vector<8x128xf32>
    %106 = arith.mulf %101, %105 : vector<8x128xf32>
    %107 = arith.truncf %59 : vector<8x128xf32> to vector<8x128xbf16>
    %cst_43 = arith.constant dense<0.000000e+00> : vector<8x512xf32>
    %108 = tpu.matmul %107, %9, %cst_43 {dimension_numbers = #tpu.dot_dimension_numbers<[1], [0], [0], [1], [0, 0, 1, 1], [], []>} : vector<8x128xbf16>, vector<128x512xbf16>, vector<8x512xf32> -> vector<8x512xf32>
    %109 = arith.truncf %84 : vector<8x128xf32> to vector<8x128xbf16>
    %cst_44 = arith.constant dense<0.000000e+00> : vector<8x512xf32>
    %110 = tpu.matmul %109, %10, %cst_44 {dimension_numbers = #tpu.dot_dimension_numbers<[1], [0], [0], [1], [0, 0, 1, 1], [], []>} : vector<8x128xbf16>, vector<128x512xbf16>, vector<8x512xf32> -> vector<8x512xf32>
    %111 = arith.addf %108, %110 : vector<8x512xf32>
    %112 = vector.broadcast %13 : vector<1x512xf32> to vector<8x512xf32>
    %113 = arith.addf %111, %112 : vector<8x512xf32>
    %114 = arith.negf %113 : vector<8x512xf32>
    %115 = math.exp %114 : vector<8x512xf32>
    %cst_45 = arith.constant 1.000000e+00 : f32
    %116 = vector.broadcast %cst_45 : f32 to vector<8x512xf32>
    %117 = arith.addf %116, %115 : vector<8x512xf32>
    %118 = arith.divf %116, %117 : vector<8x512xf32>
    %119 = vector.extract_strided_slice %118 {offsets = [0, 0], sizes = [8, 128], strides = [1, 1]} : vector<8x512xf32> to vector<8x128xf32>
    %120 = vector.extract_strided_slice %118 {offsets = [0, 128], sizes = [8, 128], strides = [1, 1]} : vector<8x512xf32> to vector<8x128xf32>
    %121 = vector.extract_strided_slice %118 {offsets = [0, 256], sizes = [8, 128], strides = [1, 1]} : vector<8x512xf32> to vector<8x128xf32>
    %cst_46 = arith.constant 2.000000e+00 : f32
    %122 = vector.broadcast %cst_46 : f32 to vector<8x128xf32>
    %123 = arith.mulf %122, %121 : vector<8x128xf32>
    %cst_47 = arith.constant 1.000000e+00 : f32
    %124 = vector.broadcast %cst_47 : f32 to vector<8x128xf32>
    %125 = arith.subf %123, %124 : vector<8x128xf32>
    %126 = vector.extract_strided_slice %118 {offsets = [0, 384], sizes = [8, 128], strides = [1, 1]} : vector<8x512xf32> to vector<8x128xf32>
    %127 = arith.mulf %120, %82 : vector<8x128xf32>
    %128 = arith.mulf %119, %125 : vector<8x128xf32>
    %129 = arith.addf %127, %128 : vector<8x128xf32>
    %130 = math.tanh %129 : vector<8x128xf32>
    %131 = arith.mulf %126, %130 : vector<8x128xf32>
    %132 = arith.truncf %84 : vector<8x128xf32> to vector<8x128xbf16>
    %cst_48 = arith.constant dense<0.000000e+00> : vector<8x512xf32>
    %133 = tpu.matmul %132, %11, %cst_48 {dimension_numbers = #tpu.dot_dimension_numbers<[1], [0], [0], [1], [0, 0, 1, 1], [], []>} : vector<8x128xbf16>, vector<128x512xbf16>, vector<8x512xf32> -> vector<8x512xf32>
    %134 = arith.truncf %15 : vector<8x128xf32> to vector<8x128xbf16>
    %cst_49 = arith.constant dense<0.000000e+00> : vector<8x512xf32>
    %135 = tpu.matmul %134, %12, %cst_49 {dimension_numbers = #tpu.dot_dimension_numbers<[1], [0], [0], [1], [0, 0, 1, 1], [], []>} : vector<8x128xbf16>, vector<128x512xbf16>, vector<8x512xf32> -> vector<8x512xf32>
    %136 = arith.addf %133, %135 : vector<8x512xf32>
    %137 = vector.broadcast %14 : vector<1x512xf32> to vector<8x512xf32>
    %138 = arith.addf %136, %137 : vector<8x512xf32>
    %139 = arith.negf %138 : vector<8x512xf32>
    %140 = math.exp %139 : vector<8x512xf32>
    %cst_50 = arith.constant 1.000000e+00 : f32
    %141 = vector.broadcast %cst_50 : f32 to vector<8x512xf32>
    %142 = arith.addf %141, %140 : vector<8x512xf32>
    %143 = arith.divf %141, %142 : vector<8x512xf32>
    %144 = vector.extract_strided_slice %143 {offsets = [0, 0], sizes = [8, 128], strides = [1, 1]} : vector<8x512xf32> to vector<8x128xf32>
    %145 = vector.extract_strided_slice %143 {offsets = [0, 128], sizes = [8, 128], strides = [1, 1]} : vector<8x512xf32> to vector<8x128xf32>
    %146 = vector.extract_strided_slice %143 {offsets = [0, 256], sizes = [8, 128], strides = [1, 1]} : vector<8x512xf32> to vector<8x128xf32>
    %cst_51 = arith.constant 2.000000e+00 : f32
    %147 = vector.broadcast %cst_51 : f32 to vector<8x128xf32>
    %148 = arith.mulf %147, %146 : vector<8x128xf32>
    %cst_52 = arith.constant 1.000000e+00 : f32
    %149 = vector.broadcast %cst_52 : f32 to vector<8x128xf32>
    %150 = arith.subf %148, %149 : vector<8x128xf32>
    %151 = vector.extract_strided_slice %143 {offsets = [0, 384], sizes = [8, 128], strides = [1, 1]} : vector<8x512xf32> to vector<8x128xf32>
    %152 = arith.mulf %145, %15 : vector<8x128xf32>
    %153 = arith.mulf %144, %150 : vector<8x128xf32>
    %154 = arith.addf %152, %153 : vector<8x128xf32>
    %155 = math.tanh %154 : vector<8x128xf32>
    %156 = arith.mulf %151, %155 : vector<8x128xf32>
    %c24 = arith.constant 24 : index
    %c0_53 = arith.constant 0 : index
    %157 = vector.load %arg13[%c24, %c0_53] : memref<64x512xf32, #tpu.memory_space<vmem>>, vector<8x512xf32>
    %158 = arith.truncf %106 : vector<8x128xf32> to vector<8x128xbf16>
    %cst_54 = arith.constant dense<0.000000e+00> : vector<8x512xf32>
    %159 = tpu.matmul %158, %8, %cst_54 {dimension_numbers = #tpu.dot_dimension_numbers<[1], [0], [0], [1], [0, 0, 1, 1], [], []>} : vector<8x128xbf16>, vector<128x512xbf16>, vector<8x512xf32> -> vector<8x512xf32>
    %160 = arith.addf %157, %159 : vector<8x512xf32>
    %161 = arith.negf %160 : vector<8x512xf32>
    %162 = math.exp %161 : vector<8x512xf32>
    %cst_55 = arith.constant 1.000000e+00 : f32
    %163 = vector.broadcast %cst_55 : f32 to vector<8x512xf32>
    %164 = arith.addf %163, %162 : vector<8x512xf32>
    %165 = arith.divf %163, %164 : vector<8x512xf32>
    %166 = vector.extract_strided_slice %165 {offsets = [0, 0], sizes = [8, 128], strides = [1, 1]} : vector<8x512xf32> to vector<8x128xf32>
    %167 = vector.extract_strided_slice %165 {offsets = [0, 128], sizes = [8, 128], strides = [1, 1]} : vector<8x512xf32> to vector<8x128xf32>
    %168 = vector.extract_strided_slice %165 {offsets = [0, 256], sizes = [8, 128], strides = [1, 1]} : vector<8x512xf32> to vector<8x128xf32>
    %cst_56 = arith.constant 2.000000e+00 : f32
    %169 = vector.broadcast %cst_56 : f32 to vector<8x128xf32>
    %170 = arith.mulf %169, %168 : vector<8x128xf32>
    %cst_57 = arith.constant 1.000000e+00 : f32
    %171 = vector.broadcast %cst_57 : f32 to vector<8x128xf32>
    %172 = arith.subf %170, %171 : vector<8x128xf32>
    %173 = vector.extract_strided_slice %165 {offsets = [0, 384], sizes = [8, 128], strides = [1, 1]} : vector<8x512xf32> to vector<8x128xf32>
    %174 = arith.mulf %167, %104 : vector<8x128xf32>
    %175 = arith.mulf %166, %172 : vector<8x128xf32>
    %176 = arith.addf %174, %175 : vector<8x128xf32>
    %177 = math.tanh %176 : vector<8x128xf32>
    %178 = arith.mulf %173, %177 : vector<8x128xf32>
    %179 = arith.truncf %106 : vector<8x128xf32> to vector<8x128xbf16>
    %cst_58 = arith.constant dense<0.000000e+00> : vector<8x512xf32>
    %180 = tpu.matmul %179, %9, %cst_58 {dimension_numbers = #tpu.dot_dimension_numbers<[1], [0], [0], [1], [0, 0, 1, 1], [], []>} : vector<8x128xbf16>, vector<128x512xbf16>, vector<8x512xf32> -> vector<8x512xf32>
    %181 = arith.truncf %131 : vector<8x128xf32> to vector<8x128xbf16>
    %cst_59 = arith.constant dense<0.000000e+00> : vector<8x512xf32>
    %182 = tpu.matmul %181, %10, %cst_59 {dimension_numbers = #tpu.dot_dimension_numbers<[1], [0], [0], [1], [0, 0, 1, 1], [], []>} : vector<8x128xbf16>, vector<128x512xbf16>, vector<8x512xf32> -> vector<8x512xf32>
    %183 = arith.addf %180, %182 : vector<8x512xf32>
    %184 = vector.broadcast %13 : vector<1x512xf32> to vector<8x512xf32>
    %185 = arith.addf %183, %184 : vector<8x512xf32>
    %186 = arith.negf %185 : vector<8x512xf32>
    %187 = math.exp %186 : vector<8x512xf32>
    %cst_60 = arith.constant 1.000000e+00 : f32
    %188 = vector.broadcast %cst_60 : f32 to vector<8x512xf32>
    %189 = arith.addf %188, %187 : vector<8x512xf32>
    %190 = arith.divf %188, %189 : vector<8x512xf32>
    %191 = vector.extract_strided_slice %190 {offsets = [0, 0], sizes = [8, 128], strides = [1, 1]} : vector<8x512xf32> to vector<8x128xf32>
    %192 = vector.extract_strided_slice %190 {offsets = [0, 128], sizes = [8, 128], strides = [1, 1]} : vector<8x512xf32> to vector<8x128xf32>
    %193 = vector.extract_strided_slice %190 {offsets = [0, 256], sizes = [8, 128], strides = [1, 1]} : vector<8x512xf32> to vector<8x128xf32>
    %cst_61 = arith.constant 2.000000e+00 : f32
    %194 = vector.broadcast %cst_61 : f32 to vector<8x128xf32>
    %195 = arith.mulf %194, %193 : vector<8x128xf32>
    %cst_62 = arith.constant 1.000000e+00 : f32
    %196 = vector.broadcast %cst_62 : f32 to vector<8x128xf32>
    %197 = arith.subf %195, %196 : vector<8x128xf32>
    %198 = vector.extract_strided_slice %190 {offsets = [0, 384], sizes = [8, 128], strides = [1, 1]} : vector<8x512xf32> to vector<8x128xf32>
    %199 = arith.mulf %192, %129 : vector<8x128xf32>
    %200 = arith.mulf %191, %197 : vector<8x128xf32>
    %201 = arith.addf %199, %200 : vector<8x128xf32>
    %202 = math.tanh %201 : vector<8x128xf32>
    %203 = arith.mulf %198, %202 : vector<8x128xf32>
    %204 = arith.truncf %131 : vector<8x128xf32> to vector<8x128xbf16>
    %cst_63 = arith.constant dense<0.000000e+00> : vector<8x512xf32>
    %205 = tpu.matmul %204, %11, %cst_63 {dimension_numbers = #tpu.dot_dimension_numbers<[1], [0], [0], [1], [0, 0, 1, 1], [], []>} : vector<8x128xbf16>, vector<128x512xbf16>, vector<8x512xf32> -> vector<8x512xf32>
    %206 = arith.truncf %156 : vector<8x128xf32> to vector<8x128xbf16>
    %cst_64 = arith.constant dense<0.000000e+00> : vector<8x512xf32>
    %207 = tpu.matmul %206, %12, %cst_64 {dimension_numbers = #tpu.dot_dimension_numbers<[1], [0], [0], [1], [0, 0, 1, 1], [], []>} : vector<8x128xbf16>, vector<128x512xbf16>, vector<8x512xf32> -> vector<8x512xf32>
    %208 = arith.addf %205, %207 : vector<8x512xf32>
    %209 = vector.broadcast %14 : vector<1x512xf32> to vector<8x512xf32>
    %210 = arith.addf %208, %209 : vector<8x512xf32>
    %211 = arith.negf %210 : vector<8x512xf32>
    %212 = math.exp %211 : vector<8x512xf32>
    %cst_65 = arith.constant 1.000000e+00 : f32
    %213 = vector.broadcast %cst_65 : f32 to vector<8x512xf32>
    %214 = arith.addf %213, %212 : vector<8x512xf32>
    %215 = arith.divf %213, %214 : vector<8x512xf32>
    %216 = vector.extract_strided_slice %215 {offsets = [0, 0], sizes = [8, 128], strides = [1, 1]} : vector<8x512xf32> to vector<8x128xf32>
    %217 = vector.extract_strided_slice %215 {offsets = [0, 128], sizes = [8, 128], strides = [1, 1]} : vector<8x512xf32> to vector<8x128xf32>
    %218 = vector.extract_strided_slice %215 {offsets = [0, 256], sizes = [8, 128], strides = [1, 1]} : vector<8x512xf32> to vector<8x128xf32>
    %cst_66 = arith.constant 2.000000e+00 : f32
    %219 = vector.broadcast %cst_66 : f32 to vector<8x128xf32>
    %220 = arith.mulf %219, %218 : vector<8x128xf32>
    %cst_67 = arith.constant 1.000000e+00 : f32
    %221 = vector.broadcast %cst_67 : f32 to vector<8x128xf32>
    %222 = arith.subf %220, %221 : vector<8x128xf32>
    %223 = vector.extract_strided_slice %215 {offsets = [0, 384], sizes = [8, 128], strides = [1, 1]} : vector<8x512xf32> to vector<8x128xf32>
    %224 = arith.mulf %217, %154 : vector<8x128xf32>
    %225 = arith.mulf %216, %222 : vector<8x128xf32>
    %226 = arith.addf %224, %225 : vector<8x128xf32>
    %227 = math.tanh %226 : vector<8x128xf32>
    %228 = arith.mulf %223, %227 : vector<8x128xf32>
    %c32 = arith.constant 32 : index
    %c0_68 = arith.constant 0 : index
    %229 = vector.load %arg13[%c32, %c0_68] : memref<64x512xf32, #tpu.memory_space<vmem>>, vector<8x512xf32>
    %230 = arith.truncf %178 : vector<8x128xf32> to vector<8x128xbf16>
    %cst_69 = arith.constant dense<0.000000e+00> : vector<8x512xf32>
    %231 = tpu.matmul %230, %8, %cst_69 {dimension_numbers = #tpu.dot_dimension_numbers<[1], [0], [0], [1], [0, 0, 1, 1], [], []>} : vector<8x128xbf16>, vector<128x512xbf16>, vector<8x512xf32> -> vector<8x512xf32>
    %232 = arith.addf %229, %231 : vector<8x512xf32>
    %233 = arith.negf %232 : vector<8x512xf32>
    %234 = math.exp %233 : vector<8x512xf32>
    %cst_70 = arith.constant 1.000000e+00 : f32
    %235 = vector.broadcast %cst_70 : f32 to vector<8x512xf32>
    %236 = arith.addf %235, %234 : vector<8x512xf32>
    %237 = arith.divf %235, %236 : vector<8x512xf32>
    %238 = vector.extract_strided_slice %237 {offsets = [0, 0], sizes = [8, 128], strides = [1, 1]} : vector<8x512xf32> to vector<8x128xf32>
    %239 = vector.extract_strided_slice %237 {offsets = [0, 128], sizes = [8, 128], strides = [1, 1]} : vector<8x512xf32> to vector<8x128xf32>
    %240 = vector.extract_strided_slice %237 {offsets = [0, 256], sizes = [8, 128], strides = [1, 1]} : vector<8x512xf32> to vector<8x128xf32>
    %cst_71 = arith.constant 2.000000e+00 : f32
    %241 = vector.broadcast %cst_71 : f32 to vector<8x128xf32>
    %242 = arith.mulf %241, %240 : vector<8x128xf32>
    %cst_72 = arith.constant 1.000000e+00 : f32
    %243 = vector.broadcast %cst_72 : f32 to vector<8x128xf32>
    %244 = arith.subf %242, %243 : vector<8x128xf32>
    %245 = vector.extract_strided_slice %237 {offsets = [0, 384], sizes = [8, 128], strides = [1, 1]} : vector<8x512xf32> to vector<8x128xf32>
    %246 = arith.mulf %239, %176 : vector<8x128xf32>
    %247 = arith.mulf %238, %244 : vector<8x128xf32>
    %248 = arith.addf %246, %247 : vector<8x128xf32>
    %249 = math.tanh %248 : vector<8x128xf32>
    %250 = arith.mulf %245, %249 : vector<8x128xf32>
    %251 = arith.truncf %178 : vector<8x128xf32> to vector<8x128xbf16>
    %cst_73 = arith.constant dense<0.000000e+00> : vector<8x512xf32>
    %252 = tpu.matmul %251, %9, %cst_73 {dimension_numbers = #tpu.dot_dimension_numbers<[1], [0], [0], [1], [0, 0, 1, 1], [], []>} : vector<8x128xbf16>, vector<128x512xbf16>, vector<8x512xf32> -> vector<8x512xf32>
    %253 = arith.truncf %203 : vector<8x128xf32> to vector<8x128xbf16>
    %cst_74 = arith.constant dense<0.000000e+00> : vector<8x512xf32>
    %254 = tpu.matmul %253, %10, %cst_74 {dimension_numbers = #tpu.dot_dimension_numbers<[1], [0], [0], [1], [0, 0, 1, 1], [], []>} : vector<8x128xbf16>, vector<128x512xbf16>, vector<8x512xf32> -> vector<8x512xf32>
    %255 = arith.addf %252, %254 : vector<8x512xf32>
    %256 = vector.broadcast %13 : vector<1x512xf32> to vector<8x512xf32>
    %257 = arith.addf %255, %256 : vector<8x512xf32>
    %258 = arith.negf %257 : vector<8x512xf32>
    %259 = math.exp %258 : vector<8x512xf32>
    %cst_75 = arith.constant 1.000000e+00 : f32
    %260 = vector.broadcast %cst_75 : f32 to vector<8x512xf32>
    %261 = arith.addf %260, %259 : vector<8x512xf32>
    %262 = arith.divf %260, %261 : vector<8x512xf32>
    %263 = vector.extract_strided_slice %262 {offsets = [0, 0], sizes = [8, 128], strides = [1, 1]} : vector<8x512xf32> to vector<8x128xf32>
    %264 = vector.extract_strided_slice %262 {offsets = [0, 128], sizes = [8, 128], strides = [1, 1]} : vector<8x512xf32> to vector<8x128xf32>
    %265 = vector.extract_strided_slice %262 {offsets = [0, 256], sizes = [8, 128], strides = [1, 1]} : vector<8x512xf32> to vector<8x128xf32>
    %cst_76 = arith.constant 2.000000e+00 : f32
    %266 = vector.broadcast %cst_76 : f32 to vector<8x128xf32>
    %267 = arith.mulf %266, %265 : vector<8x128xf32>
    %cst_77 = arith.constant 1.000000e+00 : f32
    %268 = vector.broadcast %cst_77 : f32 to vector<8x128xf32>
    %269 = arith.subf %267, %268 : vector<8x128xf32>
    %270 = vector.extract_strided_slice %262 {offsets = [0, 384], sizes = [8, 128], strides = [1, 1]} : vector<8x512xf32> to vector<8x128xf32>
    %271 = arith.mulf %264, %201 : vector<8x128xf32>
    %272 = arith.mulf %263, %269 : vector<8x128xf32>
    %273 = arith.addf %271, %272 : vector<8x128xf32>
    %274 = math.tanh %273 : vector<8x128xf32>
    %275 = arith.mulf %270, %274 : vector<8x128xf32>
    %276 = arith.truncf %203 : vector<8x128xf32> to vector<8x128xbf16>
    %cst_78 = arith.constant dense<0.000000e+00> : vector<8x512xf32>
    %277 = tpu.matmul %276, %11, %cst_78 {dimension_numbers = #tpu.dot_dimension_numbers<[1], [0], [0], [1], [0, 0, 1, 1], [], []>} : vector<8x128xbf16>, vector<128x512xbf16>, vector<8x512xf32> -> vector<8x512xf32>
    %278 = arith.truncf %228 : vector<8x128xf32> to vector<8x128xbf16>
    %cst_79 = arith.constant dense<0.000000e+00> : vector<8x512xf32>
    %279 = tpu.matmul %278, %12, %cst_79 {dimension_numbers = #tpu.dot_dimension_numbers<[1], [0], [0], [1], [0, 0, 1, 1], [], []>} : vector<8x128xbf16>, vector<128x512xbf16>, vector<8x512xf32> -> vector<8x512xf32>
    %280 = arith.addf %277, %279 : vector<8x512xf32>
    %281 = vector.broadcast %14 : vector<1x512xf32> to vector<8x512xf32>
    %282 = arith.addf %280, %281 : vector<8x512xf32>
    %283 = arith.negf %282 : vector<8x512xf32>
    %284 = math.exp %283 : vector<8x512xf32>
    %cst_80 = arith.constant 1.000000e+00 : f32
    %285 = vector.broadcast %cst_80 : f32 to vector<8x512xf32>
    %286 = arith.addf %285, %284 : vector<8x512xf32>
    %287 = arith.divf %285, %286 : vector<8x512xf32>
    %288 = vector.extract_strided_slice %287 {offsets = [0, 0], sizes = [8, 128], strides = [1, 1]} : vector<8x512xf32> to vector<8x128xf32>
    %289 = vector.extract_strided_slice %287 {offsets = [0, 128], sizes = [8, 128], strides = [1, 1]} : vector<8x512xf32> to vector<8x128xf32>
    %290 = vector.extract_strided_slice %287 {offsets = [0, 256], sizes = [8, 128], strides = [1, 1]} : vector<8x512xf32> to vector<8x128xf32>
    %cst_81 = arith.constant 2.000000e+00 : f32
    %291 = vector.broadcast %cst_81 : f32 to vector<8x128xf32>
    %292 = arith.mulf %291, %290 : vector<8x128xf32>
    %cst_82 = arith.constant 1.000000e+00 : f32
    %293 = vector.broadcast %cst_82 : f32 to vector<8x128xf32>
    %294 = arith.subf %292, %293 : vector<8x128xf32>
    %295 = vector.extract_strided_slice %287 {offsets = [0, 384], sizes = [8, 128], strides = [1, 1]} : vector<8x512xf32> to vector<8x128xf32>
    %296 = arith.mulf %289, %226 : vector<8x128xf32>
    %297 = arith.mulf %288, %294 : vector<8x128xf32>
    %298 = arith.addf %296, %297 : vector<8x128xf32>
    %299 = math.tanh %298 : vector<8x128xf32>
    %300 = arith.mulf %295, %299 : vector<8x128xf32>
    %c40 = arith.constant 40 : index
    %c0_83 = arith.constant 0 : index
    %301 = vector.load %arg13[%c40, %c0_83] : memref<64x512xf32, #tpu.memory_space<vmem>>, vector<8x512xf32>
    %302 = arith.truncf %250 : vector<8x128xf32> to vector<8x128xbf16>
    %cst_84 = arith.constant dense<0.000000e+00> : vector<8x512xf32>
    %303 = tpu.matmul %302, %8, %cst_84 {dimension_numbers = #tpu.dot_dimension_numbers<[1], [0], [0], [1], [0, 0, 1, 1], [], []>} : vector<8x128xbf16>, vector<128x512xbf16>, vector<8x512xf32> -> vector<8x512xf32>
    %304 = arith.addf %301, %303 : vector<8x512xf32>
    %305 = arith.negf %304 : vector<8x512xf32>
    %306 = math.exp %305 : vector<8x512xf32>
    %cst_85 = arith.constant 1.000000e+00 : f32
    %307 = vector.broadcast %cst_85 : f32 to vector<8x512xf32>
    %308 = arith.addf %307, %306 : vector<8x512xf32>
    %309 = arith.divf %307, %308 : vector<8x512xf32>
    %310 = vector.extract_strided_slice %309 {offsets = [0, 0], sizes = [8, 128], strides = [1, 1]} : vector<8x512xf32> to vector<8x128xf32>
    %311 = vector.extract_strided_slice %309 {offsets = [0, 128], sizes = [8, 128], strides = [1, 1]} : vector<8x512xf32> to vector<8x128xf32>
    %312 = vector.extract_strided_slice %309 {offsets = [0, 256], sizes = [8, 128], strides = [1, 1]} : vector<8x512xf32> to vector<8x128xf32>
    %cst_86 = arith.constant 2.000000e+00 : f32
    %313 = vector.broadcast %cst_86 : f32 to vector<8x128xf32>
    %314 = arith.mulf %313, %312 : vector<8x128xf32>
    %cst_87 = arith.constant 1.000000e+00 : f32
    %315 = vector.broadcast %cst_87 : f32 to vector<8x128xf32>
    %316 = arith.subf %314, %315 : vector<8x128xf32>
    %317 = vector.extract_strided_slice %309 {offsets = [0, 384], sizes = [8, 128], strides = [1, 1]} : vector<8x512xf32> to vector<8x128xf32>
    %318 = arith.mulf %311, %248 : vector<8x128xf32>
    %319 = arith.mulf %310, %316 : vector<8x128xf32>
    %320 = arith.addf %318, %319 : vector<8x128xf32>
    %321 = math.tanh %320 : vector<8x128xf32>
    %322 = arith.mulf %317, %321 : vector<8x128xf32>
    %323 = arith.truncf %250 : vector<8x128xf32> to vector<8x128xbf16>
    %cst_88 = arith.constant dense<0.000000e+00> : vector<8x512xf32>
    %324 = tpu.matmul %323, %9, %cst_88 {dimension_numbers = #tpu.dot_dimension_numbers<[1], [0], [0], [1], [0, 0, 1, 1], [], []>} : vector<8x128xbf16>, vector<128x512xbf16>, vector<8x512xf32> -> vector<8x512xf32>
    %325 = arith.truncf %275 : vector<8x128xf32> to vector<8x128xbf16>
    %cst_89 = arith.constant dense<0.000000e+00> : vector<8x512xf32>
    %326 = tpu.matmul %325, %10, %cst_89 {dimension_numbers = #tpu.dot_dimension_numbers<[1], [0], [0], [1], [0, 0, 1, 1], [], []>} : vector<8x128xbf16>, vector<128x512xbf16>, vector<8x512xf32> -> vector<8x512xf32>
    %327 = arith.addf %324, %326 : vector<8x512xf32>
    %328 = vector.broadcast %13 : vector<1x512xf32> to vector<8x512xf32>
    %329 = arith.addf %327, %328 : vector<8x512xf32>
    %330 = arith.negf %329 : vector<8x512xf32>
    %331 = math.exp %330 : vector<8x512xf32>
    %cst_90 = arith.constant 1.000000e+00 : f32
    %332 = vector.broadcast %cst_90 : f32 to vector<8x512xf32>
    %333 = arith.addf %332, %331 : vector<8x512xf32>
    %334 = arith.divf %332, %333 : vector<8x512xf32>
    %335 = vector.extract_strided_slice %334 {offsets = [0, 0], sizes = [8, 128], strides = [1, 1]} : vector<8x512xf32> to vector<8x128xf32>
    %336 = vector.extract_strided_slice %334 {offsets = [0, 128], sizes = [8, 128], strides = [1, 1]} : vector<8x512xf32> to vector<8x128xf32>
    %337 = vector.extract_strided_slice %334 {offsets = [0, 256], sizes = [8, 128], strides = [1, 1]} : vector<8x512xf32> to vector<8x128xf32>
    %cst_91 = arith.constant 2.000000e+00 : f32
    %338 = vector.broadcast %cst_91 : f32 to vector<8x128xf32>
    %339 = arith.mulf %338, %337 : vector<8x128xf32>
    %cst_92 = arith.constant 1.000000e+00 : f32
    %340 = vector.broadcast %cst_92 : f32 to vector<8x128xf32>
    %341 = arith.subf %339, %340 : vector<8x128xf32>
    %342 = vector.extract_strided_slice %334 {offsets = [0, 384], sizes = [8, 128], strides = [1, 1]} : vector<8x512xf32> to vector<8x128xf32>
    %343 = arith.mulf %336, %273 : vector<8x128xf32>
    %344 = arith.mulf %335, %341 : vector<8x128xf32>
    %345 = arith.addf %343, %344 : vector<8x128xf32>
    %346 = math.tanh %345 : vector<8x128xf32>
    %347 = arith.mulf %342, %346 : vector<8x128xf32>
    %348 = arith.truncf %275 : vector<8x128xf32> to vector<8x128xbf16>
    %cst_93 = arith.constant dense<0.000000e+00> : vector<8x512xf32>
    %349 = tpu.matmul %348, %11, %cst_93 {dimension_numbers = #tpu.dot_dimension_numbers<[1], [0], [0], [1], [0, 0, 1, 1], [], []>} : vector<8x128xbf16>, vector<128x512xbf16>, vector<8x512xf32> -> vector<8x512xf32>
    %350 = arith.truncf %300 : vector<8x128xf32> to vector<8x128xbf16>
    %cst_94 = arith.constant dense<0.000000e+00> : vector<8x512xf32>
    %351 = tpu.matmul %350, %12, %cst_94 {dimension_numbers = #tpu.dot_dimension_numbers<[1], [0], [0], [1], [0, 0, 1, 1], [], []>} : vector<8x128xbf16>, vector<128x512xbf16>, vector<8x512xf32> -> vector<8x512xf32>
    %352 = arith.addf %349, %351 : vector<8x512xf32>
    %353 = vector.broadcast %14 : vector<1x512xf32> to vector<8x512xf32>
    %354 = arith.addf %352, %353 : vector<8x512xf32>
    %355 = arith.negf %354 : vector<8x512xf32>
    %356 = math.exp %355 : vector<8x512xf32>
    %cst_95 = arith.constant 1.000000e+00 : f32
    %357 = vector.broadcast %cst_95 : f32 to vector<8x512xf32>
    %358 = arith.addf %357, %356 : vector<8x512xf32>
    %359 = arith.divf %357, %358 : vector<8x512xf32>
    %360 = vector.extract_strided_slice %359 {offsets = [0, 0], sizes = [8, 128], strides = [1, 1]} : vector<8x512xf32> to vector<8x128xf32>
    %361 = vector.extract_strided_slice %359 {offsets = [0, 128], sizes = [8, 128], strides = [1, 1]} : vector<8x512xf32> to vector<8x128xf32>
    %362 = vector.extract_strided_slice %359 {offsets = [0, 256], sizes = [8, 128], strides = [1, 1]} : vector<8x512xf32> to vector<8x128xf32>
    %cst_96 = arith.constant 2.000000e+00 : f32
    %363 = vector.broadcast %cst_96 : f32 to vector<8x128xf32>
    %364 = arith.mulf %363, %362 : vector<8x128xf32>
    %cst_97 = arith.constant 1.000000e+00 : f32
    %365 = vector.broadcast %cst_97 : f32 to vector<8x128xf32>
    %366 = arith.subf %364, %365 : vector<8x128xf32>
    %367 = vector.extract_strided_slice %359 {offsets = [0, 384], sizes = [8, 128], strides = [1, 1]} : vector<8x512xf32> to vector<8x128xf32>
    %368 = arith.mulf %361, %298 : vector<8x128xf32>
    %369 = arith.mulf %360, %366 : vector<8x128xf32>
    %370 = arith.addf %368, %369 : vector<8x128xf32>
    %371 = math.tanh %370 : vector<8x128xf32>
    %372 = arith.mulf %367, %371 : vector<8x128xf32>
    %c48 = arith.constant 48 : index
    %c0_98 = arith.constant 0 : index
    %373 = vector.load %arg13[%c48, %c0_98] : memref<64x512xf32, #tpu.memory_space<vmem>>, vector<8x512xf32>
    %374 = arith.truncf %322 : vector<8x128xf32> to vector<8x128xbf16>
    %cst_99 = arith.constant dense<0.000000e+00> : vector<8x512xf32>
    %375 = tpu.matmul %374, %8, %cst_99 {dimension_numbers = #tpu.dot_dimension_numbers<[1], [0], [0], [1], [0, 0, 1, 1], [], []>} : vector<8x128xbf16>, vector<128x512xbf16>, vector<8x512xf32> -> vector<8x512xf32>
    %376 = arith.addf %373, %375 : vector<8x512xf32>
    %377 = arith.negf %376 : vector<8x512xf32>
    %378 = math.exp %377 : vector<8x512xf32>
    %cst_100 = arith.constant 1.000000e+00 : f32
    %379 = vector.broadcast %cst_100 : f32 to vector<8x512xf32>
    %380 = arith.addf %379, %378 : vector<8x512xf32>
    %381 = arith.divf %379, %380 : vector<8x512xf32>
    %382 = vector.extract_strided_slice %381 {offsets = [0, 0], sizes = [8, 128], strides = [1, 1]} : vector<8x512xf32> to vector<8x128xf32>
    %383 = vector.extract_strided_slice %381 {offsets = [0, 128], sizes = [8, 128], strides = [1, 1]} : vector<8x512xf32> to vector<8x128xf32>
    %384 = vector.extract_strided_slice %381 {offsets = [0, 256], sizes = [8, 128], strides = [1, 1]} : vector<8x512xf32> to vector<8x128xf32>
    %cst_101 = arith.constant 2.000000e+00 : f32
    %385 = vector.broadcast %cst_101 : f32 to vector<8x128xf32>
    %386 = arith.mulf %385, %384 : vector<8x128xf32>
    %cst_102 = arith.constant 1.000000e+00 : f32
    %387 = vector.broadcast %cst_102 : f32 to vector<8x128xf32>
    %388 = arith.subf %386, %387 : vector<8x128xf32>
    %389 = vector.extract_strided_slice %381 {offsets = [0, 384], sizes = [8, 128], strides = [1, 1]} : vector<8x512xf32> to vector<8x128xf32>
    %390 = arith.mulf %383, %320 : vector<8x128xf32>
    %391 = arith.mulf %382, %388 : vector<8x128xf32>
    %392 = arith.addf %390, %391 : vector<8x128xf32>
    %393 = math.tanh %392 : vector<8x128xf32>
    %394 = arith.mulf %389, %393 : vector<8x128xf32>
    %395 = arith.truncf %322 : vector<8x128xf32> to vector<8x128xbf16>
    %cst_103 = arith.constant dense<0.000000e+00> : vector<8x512xf32>
    %396 = tpu.matmul %395, %9, %cst_103 {dimension_numbers = #tpu.dot_dimension_numbers<[1], [0], [0], [1], [0, 0, 1, 1], [], []>} : vector<8x128xbf16>, vector<128x512xbf16>, vector<8x512xf32> -> vector<8x512xf32>
    %397 = arith.truncf %347 : vector<8x128xf32> to vector<8x128xbf16>
    %cst_104 = arith.constant dense<0.000000e+00> : vector<8x512xf32>
    %398 = tpu.matmul %397, %10, %cst_104 {dimension_numbers = #tpu.dot_dimension_numbers<[1], [0], [0], [1], [0, 0, 1, 1], [], []>} : vector<8x128xbf16>, vector<128x512xbf16>, vector<8x512xf32> -> vector<8x512xf32>
    %399 = arith.addf %396, %398 : vector<8x512xf32>
    %400 = vector.broadcast %13 : vector<1x512xf32> to vector<8x512xf32>
    %401 = arith.addf %399, %400 : vector<8x512xf32>
    %402 = arith.negf %401 : vector<8x512xf32>
    %403 = math.exp %402 : vector<8x512xf32>
    %cst_105 = arith.constant 1.000000e+00 : f32
    %404 = vector.broadcast %cst_105 : f32 to vector<8x512xf32>
    %405 = arith.addf %404, %403 : vector<8x512xf32>
    %406 = arith.divf %404, %405 : vector<8x512xf32>
    %407 = vector.extract_strided_slice %406 {offsets = [0, 0], sizes = [8, 128], strides = [1, 1]} : vector<8x512xf32> to vector<8x128xf32>
    %408 = vector.extract_strided_slice %406 {offsets = [0, 128], sizes = [8, 128], strides = [1, 1]} : vector<8x512xf32> to vector<8x128xf32>
    %409 = vector.extract_strided_slice %406 {offsets = [0, 256], sizes = [8, 128], strides = [1, 1]} : vector<8x512xf32> to vector<8x128xf32>
    %cst_106 = arith.constant 2.000000e+00 : f32
    %410 = vector.broadcast %cst_106 : f32 to vector<8x128xf32>
    %411 = arith.mulf %410, %409 : vector<8x128xf32>
    %cst_107 = arith.constant 1.000000e+00 : f32
    %412 = vector.broadcast %cst_107 : f32 to vector<8x128xf32>
    %413 = arith.subf %411, %412 : vector<8x128xf32>
    %414 = vector.extract_strided_slice %406 {offsets = [0, 384], sizes = [8, 128], strides = [1, 1]} : vector<8x512xf32> to vector<8x128xf32>
    %415 = arith.mulf %408, %345 : vector<8x128xf32>
    %416 = arith.mulf %407, %413 : vector<8x128xf32>
    %417 = arith.addf %415, %416 : vector<8x128xf32>
    %418 = math.tanh %417 : vector<8x128xf32>
    %419 = arith.mulf %414, %418 : vector<8x128xf32>
    %420 = arith.truncf %347 : vector<8x128xf32> to vector<8x128xbf16>
    %cst_108 = arith.constant dense<0.000000e+00> : vector<8x512xf32>
    %421 = tpu.matmul %420, %11, %cst_108 {dimension_numbers = #tpu.dot_dimension_numbers<[1], [0], [0], [1], [0, 0, 1, 1], [], []>} : vector<8x128xbf16>, vector<128x512xbf16>, vector<8x512xf32> -> vector<8x512xf32>
    %422 = arith.truncf %372 : vector<8x128xf32> to vector<8x128xbf16>
    %cst_109 = arith.constant dense<0.000000e+00> : vector<8x512xf32>
    %423 = tpu.matmul %422, %12, %cst_109 {dimension_numbers = #tpu.dot_dimension_numbers<[1], [0], [0], [1], [0, 0, 1, 1], [], []>} : vector<8x128xbf16>, vector<128x512xbf16>, vector<8x512xf32> -> vector<8x512xf32>
    %424 = arith.addf %421, %423 : vector<8x512xf32>
    %425 = vector.broadcast %14 : vector<1x512xf32> to vector<8x512xf32>
    %426 = arith.addf %424, %425 : vector<8x512xf32>
    %427 = arith.negf %426 : vector<8x512xf32>
    %428 = math.exp %427 : vector<8x512xf32>
    %cst_110 = arith.constant 1.000000e+00 : f32
    %429 = vector.broadcast %cst_110 : f32 to vector<8x512xf32>
    %430 = arith.addf %429, %428 : vector<8x512xf32>
    %431 = arith.divf %429, %430 : vector<8x512xf32>
    %432 = vector.extract_strided_slice %431 {offsets = [0, 0], sizes = [8, 128], strides = [1, 1]} : vector<8x512xf32> to vector<8x128xf32>
    %433 = vector.extract_strided_slice %431 {offsets = [0, 128], sizes = [8, 128], strides = [1, 1]} : vector<8x512xf32> to vector<8x128xf32>
    %434 = vector.extract_strided_slice %431 {offsets = [0, 256], sizes = [8, 128], strides = [1, 1]} : vector<8x512xf32> to vector<8x128xf32>
    %cst_111 = arith.constant 2.000000e+00 : f32
    %435 = vector.broadcast %cst_111 : f32 to vector<8x128xf32>
    %436 = arith.mulf %435, %434 : vector<8x128xf32>
    %cst_112 = arith.constant 1.000000e+00 : f32
    %437 = vector.broadcast %cst_112 : f32 to vector<8x128xf32>
    %438 = arith.subf %436, %437 : vector<8x128xf32>
    %439 = vector.extract_strided_slice %431 {offsets = [0, 384], sizes = [8, 128], strides = [1, 1]} : vector<8x512xf32> to vector<8x128xf32>
    %440 = arith.mulf %433, %370 : vector<8x128xf32>
    %441 = arith.mulf %432, %438 : vector<8x128xf32>
    %442 = arith.addf %440, %441 : vector<8x128xf32>
    %443 = math.tanh %442 : vector<8x128xf32>
    %444 = arith.mulf %439, %443 : vector<8x128xf32>
    %c56 = arith.constant 56 : index
    %c0_113 = arith.constant 0 : index
    %445 = vector.load %arg13[%c56, %c0_113] : memref<64x512xf32, #tpu.memory_space<vmem>>, vector<8x512xf32>
    %446 = arith.truncf %394 : vector<8x128xf32> to vector<8x128xbf16>
    %cst_114 = arith.constant dense<0.000000e+00> : vector<8x512xf32>
    %447 = tpu.matmul %446, %8, %cst_114 {dimension_numbers = #tpu.dot_dimension_numbers<[1], [0], [0], [1], [0, 0, 1, 1], [], []>} : vector<8x128xbf16>, vector<128x512xbf16>, vector<8x512xf32> -> vector<8x512xf32>
    %448 = arith.addf %445, %447 : vector<8x512xf32>
    %449 = arith.negf %448 : vector<8x512xf32>
    %450 = math.exp %449 : vector<8x512xf32>
    %cst_115 = arith.constant 1.000000e+00 : f32
    %451 = vector.broadcast %cst_115 : f32 to vector<8x512xf32>
    %452 = arith.addf %451, %450 : vector<8x512xf32>
    %453 = arith.divf %451, %452 : vector<8x512xf32>
    %454 = vector.extract_strided_slice %453 {offsets = [0, 0], sizes = [8, 128], strides = [1, 1]} : vector<8x512xf32> to vector<8x128xf32>
    %455 = vector.extract_strided_slice %453 {offsets = [0, 128], sizes = [8, 128], strides = [1, 1]} : vector<8x512xf32> to vector<8x128xf32>
    %456 = vector.extract_strided_slice %453 {offsets = [0, 256], sizes = [8, 128], strides = [1, 1]} : vector<8x512xf32> to vector<8x128xf32>
    %cst_116 = arith.constant 2.000000e+00 : f32
    %457 = vector.broadcast %cst_116 : f32 to vector<8x128xf32>
    %458 = arith.mulf %457, %456 : vector<8x128xf32>
    %cst_117 = arith.constant 1.000000e+00 : f32
    %459 = vector.broadcast %cst_117 : f32 to vector<8x128xf32>
    %460 = arith.subf %458, %459 : vector<8x128xf32>
    %461 = vector.extract_strided_slice %453 {offsets = [0, 384], sizes = [8, 128], strides = [1, 1]} : vector<8x512xf32> to vector<8x128xf32>
    %462 = arith.mulf %455, %392 : vector<8x128xf32>
    %463 = arith.mulf %454, %460 : vector<8x128xf32>
    %464 = arith.addf %462, %463 : vector<8x128xf32>
    %465 = math.tanh %464 : vector<8x128xf32>
    %466 = arith.mulf %461, %465 : vector<8x128xf32>
    %467 = arith.truncf %394 : vector<8x128xf32> to vector<8x128xbf16>
    %cst_118 = arith.constant dense<0.000000e+00> : vector<8x512xf32>
    %468 = tpu.matmul %467, %9, %cst_118 {dimension_numbers = #tpu.dot_dimension_numbers<[1], [0], [0], [1], [0, 0, 1, 1], [], []>} : vector<8x128xbf16>, vector<128x512xbf16>, vector<8x512xf32> -> vector<8x512xf32>
    %469 = arith.truncf %419 : vector<8x128xf32> to vector<8x128xbf16>
    %cst_119 = arith.constant dense<0.000000e+00> : vector<8x512xf32>
    %470 = tpu.matmul %469, %10, %cst_119 {dimension_numbers = #tpu.dot_dimension_numbers<[1], [0], [0], [1], [0, 0, 1, 1], [], []>} : vector<8x128xbf16>, vector<128x512xbf16>, vector<8x512xf32> -> vector<8x512xf32>
    %471 = arith.addf %468, %470 : vector<8x512xf32>
    %472 = vector.broadcast %13 : vector<1x512xf32> to vector<8x512xf32>
    %473 = arith.addf %471, %472 : vector<8x512xf32>
    %474 = arith.negf %473 : vector<8x512xf32>
    %475 = math.exp %474 : vector<8x512xf32>
    %cst_120 = arith.constant 1.000000e+00 : f32
    %476 = vector.broadcast %cst_120 : f32 to vector<8x512xf32>
    %477 = arith.addf %476, %475 : vector<8x512xf32>
    %478 = arith.divf %476, %477 : vector<8x512xf32>
    %479 = vector.extract_strided_slice %478 {offsets = [0, 0], sizes = [8, 128], strides = [1, 1]} : vector<8x512xf32> to vector<8x128xf32>
    %480 = vector.extract_strided_slice %478 {offsets = [0, 128], sizes = [8, 128], strides = [1, 1]} : vector<8x512xf32> to vector<8x128xf32>
    %481 = vector.extract_strided_slice %478 {offsets = [0, 256], sizes = [8, 128], strides = [1, 1]} : vector<8x512xf32> to vector<8x128xf32>
    %cst_121 = arith.constant 2.000000e+00 : f32
    %482 = vector.broadcast %cst_121 : f32 to vector<8x128xf32>
    %483 = arith.mulf %482, %481 : vector<8x128xf32>
    %cst_122 = arith.constant 1.000000e+00 : f32
    %484 = vector.broadcast %cst_122 : f32 to vector<8x128xf32>
    %485 = arith.subf %483, %484 : vector<8x128xf32>
    %486 = vector.extract_strided_slice %478 {offsets = [0, 384], sizes = [8, 128], strides = [1, 1]} : vector<8x512xf32> to vector<8x128xf32>
    %487 = arith.mulf %480, %417 : vector<8x128xf32>
    %488 = arith.mulf %479, %485 : vector<8x128xf32>
    %489 = arith.addf %487, %488 : vector<8x128xf32>
    %490 = math.tanh %489 : vector<8x128xf32>
    %491 = arith.mulf %486, %490 : vector<8x128xf32>
    %492 = arith.truncf %419 : vector<8x128xf32> to vector<8x128xbf16>
    %cst_123 = arith.constant dense<0.000000e+00> : vector<8x512xf32>
    %493 = tpu.matmul %492, %11, %cst_123 {dimension_numbers = #tpu.dot_dimension_numbers<[1], [0], [0], [1], [0, 0, 1, 1], [], []>} : vector<8x128xbf16>, vector<128x512xbf16>, vector<8x512xf32> -> vector<8x512xf32>
    %494 = arith.truncf %444 : vector<8x128xf32> to vector<8x128xbf16>
    %cst_124 = arith.constant dense<0.000000e+00> : vector<8x512xf32>
    %495 = tpu.matmul %494, %12, %cst_124 {dimension_numbers = #tpu.dot_dimension_numbers<[1], [0], [0], [1], [0, 0, 1, 1], [], []>} : vector<8x128xbf16>, vector<128x512xbf16>, vector<8x512xf32> -> vector<8x512xf32>
    %496 = arith.addf %493, %495 : vector<8x512xf32>
    %497 = vector.broadcast %14 : vector<1x512xf32> to vector<8x512xf32>
    %498 = arith.addf %496, %497 : vector<8x512xf32>
    %499 = arith.negf %498 : vector<8x512xf32>
    %500 = math.exp %499 : vector<8x512xf32>
    %cst_125 = arith.constant 1.000000e+00 : f32
    %501 = vector.broadcast %cst_125 : f32 to vector<8x512xf32>
    %502 = arith.addf %501, %500 : vector<8x512xf32>
    %503 = arith.divf %501, %502 : vector<8x512xf32>
    %504 = vector.extract_strided_slice %503 {offsets = [0, 0], sizes = [8, 128], strides = [1, 1]} : vector<8x512xf32> to vector<8x128xf32>
    %505 = vector.extract_strided_slice %503 {offsets = [0, 128], sizes = [8, 128], strides = [1, 1]} : vector<8x512xf32> to vector<8x128xf32>
    %506 = vector.extract_strided_slice %503 {offsets = [0, 256], sizes = [8, 128], strides = [1, 1]} : vector<8x512xf32> to vector<8x128xf32>
    %cst_126 = arith.constant 2.000000e+00 : f32
    %507 = vector.broadcast %cst_126 : f32 to vector<8x128xf32>
    %508 = arith.mulf %507, %506 : vector<8x128xf32>
    %cst_127 = arith.constant 1.000000e+00 : f32
    %509 = vector.broadcast %cst_127 : f32 to vector<8x128xf32>
    %510 = arith.subf %508, %509 : vector<8x128xf32>
    %511 = vector.extract_strided_slice %503 {offsets = [0, 384], sizes = [8, 128], strides = [1, 1]} : vector<8x512xf32> to vector<8x128xf32>
    %512 = arith.mulf %505, %442 : vector<8x128xf32>
    %513 = arith.mulf %504, %510 : vector<8x128xf32>
    %514 = arith.addf %512, %513 : vector<8x128xf32>
    %515 = math.tanh %514 : vector<8x128xf32>
    %516 = arith.mulf %511, %515 : vector<8x128xf32>
    %517 = arith.truncf %466 : vector<8x128xf32> to vector<8x128xbf16>
    %cst_128 = arith.constant dense<0.000000e+00> : vector<8x512xf32>
    %518 = tpu.matmul %517, %9, %cst_128 {dimension_numbers = #tpu.dot_dimension_numbers<[1], [0], [0], [1], [0, 0, 1, 1], [], []>} : vector<8x128xbf16>, vector<128x512xbf16>, vector<8x512xf32> -> vector<8x512xf32>
    %519 = arith.truncf %491 : vector<8x128xf32> to vector<8x128xbf16>
    %cst_129 = arith.constant dense<0.000000e+00> : vector<8x512xf32>
    %520 = tpu.matmul %519, %10, %cst_129 {dimension_numbers = #tpu.dot_dimension_numbers<[1], [0], [0], [1], [0, 0, 1, 1], [], []>} : vector<8x128xbf16>, vector<128x512xbf16>, vector<8x512xf32> -> vector<8x512xf32>
    %521 = arith.addf %518, %520 : vector<8x512xf32>
    %522 = vector.broadcast %13 : vector<1x512xf32> to vector<8x512xf32>
    %523 = arith.addf %521, %522 : vector<8x512xf32>
    %524 = arith.negf %523 : vector<8x512xf32>
    %525 = math.exp %524 : vector<8x512xf32>
    %cst_130 = arith.constant 1.000000e+00 : f32
    %526 = vector.broadcast %cst_130 : f32 to vector<8x512xf32>
    %527 = arith.addf %526, %525 : vector<8x512xf32>
    %528 = arith.divf %526, %527 : vector<8x512xf32>
    %529 = vector.extract_strided_slice %528 {offsets = [0, 0], sizes = [8, 128], strides = [1, 1]} : vector<8x512xf32> to vector<8x128xf32>
    %530 = vector.extract_strided_slice %528 {offsets = [0, 128], sizes = [8, 128], strides = [1, 1]} : vector<8x512xf32> to vector<8x128xf32>
    %531 = vector.extract_strided_slice %528 {offsets = [0, 256], sizes = [8, 128], strides = [1, 1]} : vector<8x512xf32> to vector<8x128xf32>
    %cst_131 = arith.constant 2.000000e+00 : f32
    %532 = vector.broadcast %cst_131 : f32 to vector<8x128xf32>
    %533 = arith.mulf %532, %531 : vector<8x128xf32>
    %cst_132 = arith.constant 1.000000e+00 : f32
    %534 = vector.broadcast %cst_132 : f32 to vector<8x128xf32>
    %535 = arith.subf %533, %534 : vector<8x128xf32>
    %536 = vector.extract_strided_slice %528 {offsets = [0, 384], sizes = [8, 128], strides = [1, 1]} : vector<8x512xf32> to vector<8x128xf32>
    %537 = arith.mulf %530, %489 : vector<8x128xf32>
    %538 = arith.mulf %529, %535 : vector<8x128xf32>
    %539 = arith.addf %537, %538 : vector<8x128xf32>
    %540 = math.tanh %539 : vector<8x128xf32>
    %541 = arith.mulf %536, %540 : vector<8x128xf32>
    %542 = arith.truncf %491 : vector<8x128xf32> to vector<8x128xbf16>
    %cst_133 = arith.constant dense<0.000000e+00> : vector<8x512xf32>
    %543 = tpu.matmul %542, %11, %cst_133 {dimension_numbers = #tpu.dot_dimension_numbers<[1], [0], [0], [1], [0, 0, 1, 1], [], []>} : vector<8x128xbf16>, vector<128x512xbf16>, vector<8x512xf32> -> vector<8x512xf32>
    %544 = arith.truncf %516 : vector<8x128xf32> to vector<8x128xbf16>
    %cst_134 = arith.constant dense<0.000000e+00> : vector<8x512xf32>
    %545 = tpu.matmul %544, %12, %cst_134 {dimension_numbers = #tpu.dot_dimension_numbers<[1], [0], [0], [1], [0, 0, 1, 1], [], []>} : vector<8x128xbf16>, vector<128x512xbf16>, vector<8x512xf32> -> vector<8x512xf32>
    %546 = arith.addf %543, %545 : vector<8x512xf32>
    %547 = vector.broadcast %14 : vector<1x512xf32> to vector<8x512xf32>
    %548 = arith.addf %546, %547 : vector<8x512xf32>
    %549 = arith.negf %548 : vector<8x512xf32>
    %550 = math.exp %549 : vector<8x512xf32>
    %cst_135 = arith.constant 1.000000e+00 : f32
    %551 = vector.broadcast %cst_135 : f32 to vector<8x512xf32>
    %552 = arith.addf %551, %550 : vector<8x512xf32>
    %553 = arith.divf %551, %552 : vector<8x512xf32>
    %554 = vector.extract_strided_slice %553 {offsets = [0, 0], sizes = [8, 128], strides = [1, 1]} : vector<8x512xf32> to vector<8x128xf32>
    %555 = vector.extract_strided_slice %553 {offsets = [0, 128], sizes = [8, 128], strides = [1, 1]} : vector<8x512xf32> to vector<8x128xf32>
    %556 = vector.extract_strided_slice %553 {offsets = [0, 256], sizes = [8, 128], strides = [1, 1]} : vector<8x512xf32> to vector<8x128xf32>
    %cst_136 = arith.constant 2.000000e+00 : f32
    %557 = vector.broadcast %cst_136 : f32 to vector<8x128xf32>
    %558 = arith.mulf %557, %556 : vector<8x128xf32>
    %cst_137 = arith.constant 1.000000e+00 : f32
    %559 = vector.broadcast %cst_137 : f32 to vector<8x128xf32>
    %560 = arith.subf %558, %559 : vector<8x128xf32>
    %561 = vector.extract_strided_slice %553 {offsets = [0, 384], sizes = [8, 128], strides = [1, 1]} : vector<8x512xf32> to vector<8x128xf32>
    %562 = arith.mulf %555, %514 : vector<8x128xf32>
    %563 = arith.mulf %554, %560 : vector<8x128xf32>
    %564 = arith.addf %562, %563 : vector<8x128xf32>
    %565 = math.tanh %564 : vector<8x128xf32>
    %566 = arith.mulf %561, %565 : vector<8x128xf32>
    %567 = arith.truncf %541 : vector<8x128xf32> to vector<8x128xbf16>
    %cst_138 = arith.constant dense<0.000000e+00> : vector<8x512xf32>
    %568 = tpu.matmul %567, %11, %cst_138 {dimension_numbers = #tpu.dot_dimension_numbers<[1], [0], [0], [1], [0, 0, 1, 1], [], []>} : vector<8x128xbf16>, vector<128x512xbf16>, vector<8x512xf32> -> vector<8x512xf32>
    %569 = arith.truncf %566 : vector<8x128xf32> to vector<8x128xbf16>
    %cst_139 = arith.constant dense<0.000000e+00> : vector<8x512xf32>
    %570 = tpu.matmul %569, %12, %cst_139 {dimension_numbers = #tpu.dot_dimension_numbers<[1], [0], [0], [1], [0, 0, 1, 1], [], []>} : vector<8x128xbf16>, vector<128x512xbf16>, vector<8x512xf32> -> vector<8x512xf32>
    %571 = arith.addf %568, %570 : vector<8x512xf32>
    %572 = vector.broadcast %14 : vector<1x512xf32> to vector<8x512xf32>
    %573 = arith.addf %571, %572 : vector<8x512xf32>
    %574 = arith.negf %573 : vector<8x512xf32>
    %575 = math.exp %574 : vector<8x512xf32>
    %cst_140 = arith.constant 1.000000e+00 : f32
    %576 = vector.broadcast %cst_140 : f32 to vector<8x512xf32>
    %577 = arith.addf %576, %575 : vector<8x512xf32>
    %578 = arith.divf %576, %577 : vector<8x512xf32>
    %579 = vector.extract_strided_slice %578 {offsets = [0, 0], sizes = [8, 128], strides = [1, 1]} : vector<8x512xf32> to vector<8x128xf32>
    %580 = vector.extract_strided_slice %578 {offsets = [0, 128], sizes = [8, 128], strides = [1, 1]} : vector<8x512xf32> to vector<8x128xf32>
    %581 = vector.extract_strided_slice %578 {offsets = [0, 256], sizes = [8, 128], strides = [1, 1]} : vector<8x512xf32> to vector<8x128xf32>
    %cst_141 = arith.constant 2.000000e+00 : f32
    %582 = vector.broadcast %cst_141 : f32 to vector<8x128xf32>
    %583 = arith.mulf %582, %581 : vector<8x128xf32>
    %cst_142 = arith.constant 1.000000e+00 : f32
    %584 = vector.broadcast %cst_142 : f32 to vector<8x128xf32>
    %585 = arith.subf %583, %584 : vector<8x128xf32>
    %586 = vector.extract_strided_slice %578 {offsets = [0, 384], sizes = [8, 128], strides = [1, 1]} : vector<8x512xf32> to vector<8x128xf32>
    %587 = arith.mulf %580, %564 : vector<8x128xf32>
    %588 = arith.mulf %579, %585 : vector<8x128xf32>
    %589 = arith.addf %587, %588 : vector<8x128xf32>
    %590 = math.tanh %589 : vector<8x128xf32>
    %591 = arith.mulf %586, %590 : vector<8x128xf32>
    %c0_143 = arith.constant 0 : index
    %c0_144 = arith.constant 0 : index
    %592 = vector.load %arg10[%c0_143, %c0_144] : memref<1x128xf32, #tpu.memory_space<vmem>>, vector<1x128xf32>
    %593 = vector.broadcast %592 : vector<1x128xf32> to vector<8x128xf32>
    %594 = arith.mulf %591, %593 : vector<8x128xf32>
    %cst_145 = arith.constant dense<0.000000e+00> : vector<8xf32>
    %595 = vector.multi_reduction <add>, %594, %cst_145 [1] : vector<8x128xf32> to vector<8xf32>
    %596 = vector.shape_cast %595 : vector<8xf32> to vector<8x1xf32>
    %c0_146 = arith.constant 0 : index
    %c0_147 = arith.constant 0 : index
    %597 = vector.load %arg11[%c0_146, %c0_147] : memref<1x1xf32, #tpu.memory_space<vmem>>, vector<1x1xf32>
    %598 = vector.broadcast %597 : vector<1x1xf32> to vector<8x1xf32>
    %599 = arith.addf %596, %598 : vector<8x1xf32>
    %c0_148 = arith.constant 0 : index
    %c0_149 = arith.constant 0 : index
    %600 = vector.load %arg12[%c0_148, %c0_149] : memref<8x1xf32, #tpu.memory_space<vmem>>, vector<8x1xf32>
    tpu.vector_store %arg12[%c0_148, %c0_149], %599 {strides = array<i32>} : memref<8x1xf32, #tpu.memory_space<vmem>>, vector<8x1xf32>,
    return
  }
}

</mosaic_0001>

<bundles_post_ra>
// kernel: lstm_model_forward.1
= control target key start
LH: loop header
LB: loop body
LE: loop exit
PB: predicated region body
PF: predicated region fallthrough
CT: control target
= control target key end

     0   :  { %s10376_s0 = inlined_call_operand.vmem [shape: f32[64,10], index: 0, kind: input, shape index: {}]   ;;  %s10377_s1 = inlined_call_operand.vmem [shape: bf16[10,512], index: 1, kind: input, shape index: {}]   ;;  %s10378_s2 = inlined_call_operand.hbm [shape: bf16[128,512], index: 2, kind: input, shape index: {}]   ;;  %s10379_s3 = inlined_call_operand.vmem [shape: f32[1,512], index: 3, kind: input, shape index: {}]   ;;  %s10380_s4 = inlined_call_operand.hbm [shape: bf16[128,512], index: 4, kind: input, shape index: {}]   ;;  %s10381_s5 = inlined_call_operand.hbm [shape: bf16[128,512], index: 5, kind: input, shape index: {}]   ;;  %s10382_s6 = inlined_call_operand.vmem [shape: f32[1,512], index: 6, kind: input, shape index: {}]   ;;  %s10383_s7 = inlined_call_operand.hbm [shape: bf16[128,512], index: 7, kind: input, shape index: {}]   ;;  %s10384_s8 = inlined_call_operand.hbm [shape: bf16[128,512], index: 8, kind: input, shape index: {}]   ;;  %s10385_s9 = inlined_call_operand.vmem [shape: f32[1,512], index: 9, kind: input, shape index: {}]   ;;  %s10386_s10 = inlined_call_operand.vmem [shape: f32[1,128], index: 10, kind: input, shape index: {}]   ;;  %s10387_s11 = inlined_call_operand.<no memory space> [shape: f32[1,1], index: 11, kind: input, shape index: {}]   ;;  %s10388_s12 = inlined_call_operand.vmem [shape: f32[8,1], index: 12, kind: output, shape index: {}]  }
   0x1   :  { %v17_v0 = vstv %s10387_s11 }
   0x2   :  { %18 = vst [vmem:[#allocation3] sm:$0x1] %v17_v0 }
   0x3   :  { %19 = vsyncpa [#allocation5], 0 }
   0x4   :  { %20 = vsyncpa [#allocation7], 0 }
   0x5   :  { %21 = vsyncpa [#allocation10], 0  ;;  %s7154_s23 = smov [#allocation6]   ;;  %s7155_s25 = smov [#allocation9]  }
   0x6   :  { %s45_s24 = sshll.u32 %s7154_s23, 4  ;;  %s71_s26 = sshll.u32 %s7155_s25, 4  ;;  %s46_s24 = int_to_ptr.vmem [resolvable:$true] %s45_s24  ;;  %s7230_s26 = int_to_ptr.vmem [resolvable:$true] %s71_s26 }
   0x7   :  { %s7038_s29 = scalar_lea.hbm %s10380_s4, 4096 }
   0x8   :  { %p7039_p0 = scmp.ne.s32.totalorder %s10380_s4, %s7038_s29  ;;  %p7042_p1 = scmp.lt.u32.totalorder %s7038_s29, %s10380_s4 }
   0xa   :  { %p7044_p2 = pnand %p7042_p1, %p7039_p0 }
   0xc   :  { %7047 = shalt.err (!%p7044_p2)
}
   0xd   :  { %s7048_s15 = scalar_lea.vmem %s46_s24, 4096  ;;  %p7053_p4 = scmp.lt.s32.totalorder %s46_s24, %s46_s24 }
   0xe   :  { %p7049_p3 = scmp.ne.s32.totalorder %s46_s24, %s7048_s15  ;;  %p7054_p5 = scmp.lt.s32.totalorder %s7048_s15, %s7048_s15 }
  0x10   :  { %p7055_p6 = por %p7054_p5, %p7053_p4 }
  0x12   :  { %p7056_p7 = pnand %p7055_p6, %p7049_p3 }
  0x14   :  { %7059 = shalt.err (!%p7056_p7)
}
  0x15   :  { %s7156_s16 = smov 256   ;;  %s7157_s17 = smov 16  }
  0x16   :  { %51 = dma.hbm_to_vmem [thread:$0]  %s10380_s4, 4096, %s46_s24, [#allocation7], %s7156_s16, %s7156_s16, %s7157_s17  }
  0x17   :  { %s7060_s22 = scalar_lea.hbm %s10383_s7, 4096 }
  0x18   :  { %p7061_p8 = scmp.ne.s32.totalorder %s10383_s7, %s7060_s22  ;;  %p7064_p9 = scmp.lt.u32.totalorder %s7060_s22, %s10383_s7 }
  0x1a   :  { %p7066_p10 = pnand %p7064_p9, %p7061_p8 }
  0x1c   :  { %7069 = shalt.err (!%p7066_p10)
}
  0x1d   :  { %s7070_s29 = scalar_lea.vmem %s7230_s26, 4096  ;;  %p7075_p12 = scmp.lt.s32.totalorder %s7230_s26, %s7230_s26 }
  0x1e   :  { %p7071_p11 = scmp.ne.s32.totalorder %s7230_s26, %s7070_s29  ;;  %p7076_p13 = scmp.lt.s32.totalorder %s7070_s29, %s7070_s29 }
  0x20   :  { %p7077_p0 = por %p7076_p13, %p7075_p12 }
  0x22   :  { %p7078_p1 = pnand %p7077_p0, %p7071_p11 }
  0x24   :  { %7081 = shalt.err (!%p7078_p1)
}
  0x25   :  { %77 = dma.hbm_to_vmem [thread:$0]  %s10383_s7, 4096, %s7230_s26, [#allocation10], %s7156_s16, %s7156_s16, %s7157_s17  }
  0x26   :  { %s7158_s30 = smov [#allocation4]   ;;  %s7159_s11 = smov [#allocation8]  }
  0x27   :  { %s31_s13 = sshll.u32 %s7158_s30, 4  ;;  %s57_s14 = sshll.u32 %s7159_s11, 4  ;;  %s32_s13 = int_to_ptr.vmem [resolvable:$true] %s31_s13  ;;  %s7267_s14 = int_to_ptr.vmem [resolvable:$true] %s57_s14 }
  0x28   :  { %s7082_s19 = scalar_lea.hbm %s10378_s2, 4096 }
  0x29   :  { %p7083_p2 = scmp.ne.s32.totalorder %s10378_s2, %s7082_s19  ;;  %p7086_p3 = scmp.lt.u32.totalorder %s7082_s19, %s10378_s2 }
  0x2b   :  { %p7088_p4 = pnand %p7086_p3, %p7083_p2 }
  0x2d   :  { %7091 = shalt.err (!%p7088_p4)
}
  0x2e   :  { %s7092_s7 = scalar_lea.vmem %s32_s13, 4096  ;;  %p7097_p6 = scmp.lt.s32.totalorder %s32_s13, %s32_s13 }
  0x2f   :  { %p7093_p5 = scmp.ne.s32.totalorder %s32_s13, %s7092_s7  ;;  %p7098_p7 = scmp.lt.s32.totalorder %s7092_s7, %s7092_s7 }
  0x31   :  { %p7099_p8 = por %p7098_p7, %p7097_p6 }
  0x33   :  { %p7100_p9 = pnand %p7099_p8, %p7093_p5 }
  0x35   :  { %7103 = shalt.err (!%p7100_p9)
}
  0x36   :  { %37 = dma.hbm_to_vmem [thread:$0]  %s10378_s2, 4096, %s32_s13, [#allocation5], %s7156_s16, %s7156_s16, %s7157_s17  }
  0x37   :  { %s7104_s29 = scalar_lea.hbm %s10381_s5, 4096 }
  0x38   :  { %p7105_p10 = scmp.ne.s32.totalorder %s10381_s5, %s7104_s29  ;;  %p7108_p11 = scmp.lt.u32.totalorder %s7104_s29, %s10381_s5 }
  0x3a   :  { %p7110_p12 = pnand %p7108_p11, %p7105_p10 }
  0x3c   :  { %7113 = shalt.err (!%p7110_p12)
}
  0x3d   :  { %s7114_s15 = scalar_lea.vmem %s7267_s14, 4096  ;;  %p7119_p0 = scmp.lt.s32.totalorder %s7267_s14, %s7267_s14 }
  0x3e   :  { %p7115_p13 = scmp.ne.s32.totalorder %s7267_s14, %s7114_s15  ;;  %p7120_p1 = scmp.lt.s32.totalorder %s7114_s15, %s7114_s15 }
  0x40   :  { %p7121_p2 = por %p7120_p1, %p7119_p0 }
  0x42   :  { %p7122_p3 = pnand %p7121_p2, %p7115_p13 }
  0x44   :  { %7125 = shalt.err (!%p7122_p3)
}
  0x45   :  { %63 = dma.hbm_to_vmem [thread:$0]  %s10381_s5, 4096, %s7267_s14, [#allocation7], %s7156_s16, %s7156_s16, %s7157_s17  }
  0x46   :  { %s7160_s18 = smov [#allocation11]   ;;  %s7126_s22 = scalar_lea.hbm %s10384_s8, 4096 }
  0x47   :  { %s83_s19 = sshll.u32 %s7160_s18, 4  ;;  %p7127_p4 = scmp.ne.s32.totalorder %s10384_s8, %s7126_s22  ;;  %s84_s19 = int_to_ptr.vmem [resolvable:$true] %s83_s19 }
  0x48   :  { %p7130_p5 = scmp.lt.u32.totalorder %s7126_s22, %s10384_s8 }
  0x4a   :  { %p7132_p6 = pnand %p7130_p5, %p7127_p4 }
  0x4c   :  { %7135 = shalt.err (!%p7132_p6)
}
  0x4d   :  { %s7136_s27 = scalar_lea.vmem %s84_s19, 4096  ;;  %p7141_p8 = scmp.lt.s32.totalorder %s84_s19, %s84_s19 }
  0x4e   :  { %p7137_p7 = scmp.ne.s32.totalorder %s84_s19, %s7136_s27  ;;  %p7142_p9 = scmp.lt.s32.totalorder %s7136_s27, %s7136_s27 }
  0x50   :  { %p7143_p10 = por %p7142_p9, %p7141_p8 }
  0x52   :  { %p7144_p11 = pnand %p7143_p10, %p7137_p7 }
  0x54   :  { %7147 = shalt.err (!%p7144_p11)
}
  0x55   :  { %89 = dma.hbm_to_vmem [thread:$0]  %s10384_s8, 4096, %s84_s19, [#allocation10], %s7156_s16, %s7156_s16, %s7157_s17  }
  0x56   :  { %7148 = dma.done.wait [#allocation5], 4096  }
  0x57   :  { %7149 = vsyncadd [#allocation5], 4294963200 }
  0x58   :  { %7150 = dma.done.wait [#allocation7], 8192  }
  0x59   :  { %7151 = vsyncadd [#allocation7], 4294959104 }
  0x5a   :  { %7152 = dma.done.wait [#allocation10], 8192  }
  0x5b   :  { %7153 = vsyncadd [#allocation10], 4294959104  ;;  %v10389_v1 = vmov 0   ;;  %vm179_vm0 = vcmask 1044480   ;;  %v112_v6 = vld [vmem:[%s10376_s0] sm:$0xff]  ;;  %v113_v7 = vld [vmem:[%s10376_s0 + $0x8] sm:$0xff]  ;;  %v130_v54 = vlaneseq }
  0x5c   :  { %224 = vmatprep.mubr.bf16.mxu0 %v10389_v1  ;;  %297 = vmatprep.mubr.bf16.mxu1 %v10389_v1  ;;  %v5880_v2 = vld [vmem:[%s10377_s1 + $0x4] ss:$16 sps:$4 sm:$0x1f]   ;;  %v5882_v3 = vld [vmem:[%s10377_s1 + $0xc] ss:$16 sps:$4 sm:$0x1f]   ;;  %v120_v10 = vpack.c.bf16 %v113_v7, %v112_v6 }
  0x5d   :  { %5580 = vmatprep.subr.msk.bf16.mxu0 %vm179_vm0, %v5880_v2  ;;  %v5884_v4 = vld [vmem:[%s10377_s1] ss:$16 sps:$4 sm:$0x1f]   ;;  %v5885_v5 = vld [vmem:[%s10377_s1 + $0x8] ss:$16 sps:$4 sm:$0x1f]   ;;  %5585 = vmatprep.subr.msk.bf16.mxu1 %vm179_vm0, %v5882_v3 }
  0x5e   :  { %v181_v8 = vsel %vm179_vm0, %v5884_v4, 0  ;;  %v187_v9 = vsel %vm179_vm0, %v5885_v5, 0  ;;  %v7339_v11 = vld [vmem:[#allocation4 + $0x4] ss:$16 sps:$4 sm:$0xff]   ;;  %vm166_vm1 = vcmask 80896   ;;  %v131_v55 = vshrl.u32 %v130_v54, 7 }
  0x5f   :  { %193 = vmatpush1.bf16.msra.mxu0 %v181_v8  ;;  %266 = vmatpush1.bf16.msra.mxu1 %v187_v9  ;;  %v7341_v12 = vld [vmem:[#allocation4 + $0xc] ss:$16 sps:$4 sm:$0xff]   ;;  %v7343_v13 = vld [vmem:[#allocation4] ss:$16 sps:$4 sm:$0xff]   ;;  %v7346_v14 = vld [vmem:[#allocation4 + $0x8] ss:$16 sps:$4 sm:$0xff]  }
  0x60   :  { %696 = vmatprep.subr.bf16.mxu0 %v7339_v11  ;;  %737 = vmatprep.subr.bf16.mxu1 %v7341_v12  ;;  %v7349_v15 = vld [vmem:[#allocation4 + $0x24] ss:$16 sps:$4 sm:$0xff]   ;;  %v7353_v16 = vld [vmem:[#allocation4 + $0x2c] ss:$16 sps:$4 sm:$0xff]   ;;  %v7355_v17 = vld [vmem:[#allocation4 + $0x20] ss:$16 sps:$4 sm:$0xff]  }
  0x61   :  { %v7357_v18 = vld [vmem:[#allocation4 + $0x28] ss:$16 sps:$4 sm:$0xff]   ;;  %v114_v19 = vld [vmem:[%s10376_s0 + $0x10] sm:$0xff]  ;;  %v116_v30 = vld [vmem:[%s10376_s0 + $0x20] sm:$0xff]  ;;  %v7511_v56 = vsub.s32 0, %v131_v55  ;;  %v7513_v57 = vsub.s32 1, %v131_v55 }
  0x62   :  { %5581 = vmatmul.mubr.msk.bf16.vlgmr.msra.gmra.mrb[0].mxu0 %vm166_vm1, %v120_v10  ;;  %5586 = vmatmul.mubr.msk.bf16.vlgmr.msra.gmra.mrb[0].mxu1 %vm166_vm1, %v120_v10  ;;  %v115_v20 = vld [vmem:[%s10376_s0 + $0x18] sm:$0xff]  ;;  %v7375_v24 = vld [vmem:[#allocation4 + $0x40] ss:$16 sps:$4 sm:$0xff]   ;;  %v117_v31 = vld [vmem:[%s10376_s0 + $0x28] sm:$0xff]  ;;  %v7515_v58 = vsub.s32 2, %v131_v55  ;;  %v7520_v60 = vsub.s32 3, %v131_v55 }
  0x63   :  { %697 = vmatpush1.bf16.msra.mxu0 %v7343_v13  ;;  %738 = vmatpush1.bf16.msra.mxu1 %v7346_v14  ;;  %v7369_v21 = vld [vmem:[#allocation4 + $0x44] ss:$16 sps:$4 sm:$0xff]   ;;  %v7373_v22 = vld [vmem:[#allocation4 + $0x4c] ss:$16 sps:$4 sm:$0xff]   ;;  %v121_v23 = vpack.c.bf16 %v115_v20, %v114_v19  ;;  %v7379_v25 = vld [vmem:[#allocation4 + $0x48] ss:$16 sps:$4 sm:$0xff]   ;;  %v122_v34 = vpack.c.bf16 %v117_v31, %v116_v30 }
  0x64   :  { %698 = vmatprep.subr.bf16.mxu0 %v7349_v15  ;;  %739 = vmatprep.subr.bf16.mxu1 %v7353_v16  ;;  %v7383_v26 = vld [vmem:[#allocation4 + $0x64] ss:$16 sps:$4 sm:$0xff]   ;;  %v7385_v27 = vld [vmem:[#allocation4 + $0x6c] ss:$16 sps:$4 sm:$0xff]   ;;  %v7387_v28 = vld [vmem:[#allocation4 + $0x60] ss:$16 sps:$4 sm:$0xff]  }
  0x65   :  { %234 = vmatprep.mubr.bf16.mxu0 %v10389_v1  ;;  %307 = vmatprep.mubr.bf16.mxu1 %v10389_v1  ;;  %v7389_v29 = vld [vmem:[#allocation4 + $0x68] ss:$16 sps:$4 sm:$0xff]   ;;  %v7401_v32 = vld [vmem:[#allocation4 + $0x84] ss:$16 sps:$4 sm:$0xff]   ;;  %v7405_v33 = vld [vmem:[#allocation4 + $0x8c] ss:$16 sps:$4 sm:$0xff]  }
  0x66   :  { %v7409_v35 = vld [vmem:[#allocation4 + $0x80] ss:$16 sps:$4 sm:$0xff]   ;;  %v7413_v36 = vld [vmem:[#allocation4 + $0x88] ss:$16 sps:$4 sm:$0xff]   ;;  %v7415_v37 = vld [vmem:[#allocation4 + $0xa4] ss:$16 sps:$4 sm:$0xff]  }
  0x67   :  { %699 = vmatpush1.bf16.msra.mxu0 %v7355_v17  ;;  %740 = vmatpush1.bf16.msra.mxu1 %v7357_v18  ;;  %v7419_v38 = vld [vmem:[#allocation4 + $0xac] ss:$16 sps:$4 sm:$0xff]   ;;  %v7421_v39 = vld [vmem:[#allocation4 + $0xa0] ss:$16 sps:$4 sm:$0xff]   ;;  %v7423_v40 = vld [vmem:[#allocation4 + $0xa8] ss:$16 sps:$4 sm:$0xff]  }
  0x68   :  { %700 = vmatprep.subr.bf16.mxu0 %v7369_v21  ;;  %741 = vmatprep.subr.bf16.mxu1 %v7373_v22  ;;  %v118_v41 = vld [vmem:[%s10376_s0 + $0x30] sm:$0xff]  ;;  %v119_v42 = vld [vmem:[%s10376_s0 + $0x38] sm:$0xff]  ;;  %v128_v59 = vld [vmem:[%s10379_s3] sm:$0xf]  ;;  %vm5567_vm2 = vcmask 7168  }
  0x69   :  { %v7437_v43 = vld [vmem:[#allocation4 + $0xc4] ss:$16 sps:$4 sm:$0xff]   ;;  %v7439_v44 = vld [vmem:[#allocation4 + $0xcc] ss:$16 sps:$4 sm:$0xff]   ;;  %v7443_v45 = vld [vmem:[#allocation4 + $0xc0] ss:$16 sps:$4 sm:$0xff]   ;;  %v123_v47 = vpack.c.bf16 %v119_v42, %v118_v41  ;;  %v7523_v61 = vrot.slane %v128_v59, %v7511_v56  ;;  %v7530_v0 = vrot.slane %v128_v59, %v7513_v57  ;;  %v141_v2 = vrot.slane %v128_v59, %v7515_v58 }
  0x6a   :  { %5582 = vmatmul.mubr.msk.bf16.gmra.mrb[4].mxu0 %vm166_vm1, %v121_v23  ;;  %5587 = vmatmul.mubr.msk.bf16.gmra.mrb[4].mxu1 %vm166_vm1, %v121_v23  ;;  %v7445_v46 = vld [vmem:[#allocation4 + $0xc8] ss:$16 sps:$4 sm:$0xff]   ;;  %v7447_v48 = vld [vmem:[#allocation4 + $0xe4] ss:$16 sps:$4 sm:$0xff]   ;;  %v7449_v49 = vld [vmem:[#allocation4 + $0xec] ss:$16 sps:$4 sm:$0xff]   ;;  %v145_v5 = vrot.slane %v128_v59, %v7520_v60 }
  0x6b   :  { %701 = vmatpush1.bf16.msra.mxu0 %v7375_v24  ;;  %742 = vmatpush1.bf16.msra.mxu1 %v7379_v25  ;;  %v7455_v50 = vld [vmem:[#allocation4 + $0xe0] ss:$16 sps:$4 sm:$0xff]   ;;  %v7457_v51 = vld [vmem:[#allocation4 + $0xe8] ss:$16 sps:$4 sm:$0xff]   ;;  %v7505_v52 = vld [vmem:[#allocation8 + $0x4] ss:$16 sps:$4 sm:$0xff]  }
  0x6c   :  { %702 = vmatprep.subr.bf16.mxu0 %v7383_v26  ;;  %743 = vmatprep.subr.bf16.mxu1 %v7385_v27  ;;  %v7507_v53 = vld [vmem:[#allocation8 + $0xc] ss:$16 sps:$4 sm:$0xff]  }
  0x6d   :  { %244 = vmatprep.mubr.bf16.mxu0 %v10389_v1  ;;  %317 = vmatprep.mubr.bf16.mxu1 %v10389_v1 }
  0x6f   :  { %703 = vmatpush1.bf16.msra.mxu0 %v7387_v28  ;;  %744 = vmatpush1.bf16.msra.mxu1 %v7389_v29 }
  0x70   :  { %704 = vmatprep.subr.bf16.mxu0 %v7401_v32  ;;  %745 = vmatprep.subr.bf16.mxu1 %v7405_v33 }
  0x72   :  { %5583 = vmatmul.mubr.msk.bf16.gmra.mrb[8].mxu0 %vm166_vm1, %v122_v34  ;;  %5588 = vmatmul.mubr.msk.bf16.gmra.mrb[8].mxu1 %vm166_vm1, %v122_v34 }
  0x73   :  { %705 = vmatpush1.bf16.msra.mxu0 %v7409_v35  ;;  %746 = vmatpush1.bf16.msra.mxu1 %v7413_v36 }
  0x74   :  { %706 = vmatprep.subr.bf16.mxu0 %v7415_v37  ;;  %747 = vmatprep.subr.bf16.mxu1 %v7419_v38 }
  0x75   :  { %254 = vmatprep.mubr.bf16.mxu0 %v10389_v1  ;;  %327 = vmatprep.mubr.bf16.mxu1 %v10389_v1 }
  0x77   :  { %707 = vmatpush1.bf16.msra.mxu0 %v7421_v39  ;;  %748 = vmatpush1.bf16.msra.mxu1 %v7423_v40 }
  0x78   :  { %708 = vmatprep.subr.bf16.mxu0 %v7437_v43  ;;  %749 = vmatprep.subr.bf16.mxu1 %v7439_v44 }
  0x7a   :  { %5584 = vmatmul.mubr.msk.bf16.gmra.mrb[12].mxu0 %vm166_vm1, %v123_v47  ;;  %5589 = vmatmul.mubr.msk.bf16.gmra.mrb[12].mxu1 %vm166_vm1, %v123_v47 }
  0x7b   :  { %709 = vmatpush1.bf16.msra.mxu0 %v7443_v45  ;;  %750 = vmatpush1.bf16.msra.mxu1 %v7445_v46 }
  0x7c   :  { %710 = vmatprep.subr.bf16.mxu0 %v7447_v48  ;;  %751 = vmatprep.subr.bf16.mxu1 %v7449_v49 }
  0x7d   :  { %728 = vmatprep.mubr.bf16.mxu0 %v10389_v1  ;;  %769 = vmatprep.mubr.bf16.mxu1 %v10389_v1 }
  0x7f   :  { %711 = vmatpush1.bf16.msra.mxu0 %v7455_v50  ;;  %752 = vmatpush1.bf16.msra.mxu1 %v7457_v51 }
  0x80   :  { %818 = vmatprep.subr.bf16.mxu0 %v7339_v11  ;;  %859 = vmatprep.subr.bf16.mxu1 %v7341_v12 }
  0x82   :  { %729 = vmatmul.mubr.bf16.vlgmr.msra.gmra.mrb[16].mxu0 %v10389_v1  ;;  %770 = vmatmul.mubr.bf16.vlgmr.msra.gmra.mrb[16].mxu1 %v10389_v1 }
  0x83   :  { %819 = vmatpush1.bf16.msra.mxu0 %v7343_v13  ;;  %860 = vmatpush1.bf16.msra.mxu1 %v7346_v14 }
  0x84   :  { %820 = vmatprep.subr.bf16.mxu0 %v7349_v15  ;;  %861 = vmatprep.subr.bf16.mxu1 %v7353_v16 }
  0x85   :  { %850 = vmatprep.mubr.bf16.mxu0 %v10389_v1  ;;  %891 = vmatprep.mubr.bf16.mxu1 %v10389_v1 }
  0x87   :  { %821 = vmatpush1.bf16.msra.mxu0 %v7355_v17  ;;  %862 = vmatpush1.bf16.msra.mxu1 %v7357_v18 }
  0x88   :  { %822 = vmatprep.subr.bf16.mxu0 %v7369_v21  ;;  %863 = vmatprep.subr.bf16.mxu1 %v7373_v22 }
  0x8b   :  { %823 = vmatpush1.bf16.msra.mxu0 %v7375_v24  ;;  %864 = vmatpush1.bf16.msra.mxu1 %v7379_v25 }
  0x8c   :  { %824 = vmatprep.subr.bf16.mxu0 %v7383_v26  ;;  %865 = vmatprep.subr.bf16.mxu1 %v7385_v27 }
  0x8f   :  { %825 = vmatpush1.bf16.msra.mxu0 %v7387_v28  ;;  %866 = vmatpush1.bf16.msra.mxu1 %v7389_v29 }
  0x90   :  { %826 = vmatprep.subr.bf16.mxu0 %v7401_v32  ;;  %867 = vmatprep.subr.bf16.mxu1 %v7405_v33 }
  0x93   :  { %827 = vmatpush1.bf16.msra.mxu0 %v7409_v35  ;;  %868 = vmatpush1.bf16.msra.mxu1 %v7413_v36 }
  0x94   :  { %828 = vmatprep.subr.bf16.mxu0 %v7415_v37  ;;  %869 = vmatprep.subr.bf16.mxu1 %v7419_v38 }
  0x97   :  { %829 = vmatpush1.bf16.msra.mxu0 %v7421_v39  ;;  %870 = vmatpush1.bf16.msra.mxu1 %v7423_v40 }
  0x98   :  { %830 = vmatprep.subr.bf16.mxu0 %v7437_v43  ;;  %871 = vmatprep.subr.bf16.mxu1 %v7439_v44 }
  0x9b   :  { %831 = vmatpush1.bf16.msra.mxu0 %v7443_v45  ;;  %872 = vmatpush1.bf16.msra.mxu1 %v7445_v46 }
  0x9c   :  { %832 = vmatprep.subr.bf16.mxu0 %v7447_v48  ;;  %873 = vmatprep.subr.bf16.mxu1 %v7449_v49 }
  0x9f   :  { %833 = vmatpush1.bf16.msra.mxu0 %v7455_v50  ;;  %874 = vmatpush1.bf16.msra.mxu1 %v7457_v51 }
  0xa0   :  { %1095 = vmatprep.subr.bf16.mxu0 %v7505_v52  ;;  %1136 = vmatprep.subr.bf16.mxu1 %v7507_v53 }
 0x135   :  { %v7525_v62 = vpop.f32.mrb[0].mxu1  ;;  %v7527_v63 = vpop.f32.mrb[0].mxu0 }
 0x136   :  { %v301_v3 = vpop.f32.mrb[1].mxu1  ;;  %v228_v4 = vpop.f32.mrb[1].mxu0 }
 0x137   :  { %v303_v6 = vpop.f32.mrb[2].mxu1  ;;  %v230_v7 = vpop.f32.mrb[2].mxu0 }
 0x138   :  { %v7534_v8 = vadd.f32 %v303_v6, %v141_v2  ;;  %v7537_v9 = vadd.f32 %v230_v7, %v7523_v61  ;;  %v305_v10 = vpop.f32.mrb[3].mxu1  ;;  %v232_v11 = vpop.f32.mrb[3].mxu0 }
 0x139   :  { %v7539_v12 = vadd.f32 %v305_v10, %v145_v5  ;;  %v7542_v13 = vadd.f32 %v232_v11, %v7530_v0 }
 0x13d   :  { %v309_v14 = vpop.f32.mrb[4].mxu1  ;;  %v236_v15 = vpop.f32.mrb[4].mxu0 }
 0x13e   :  { %v7544_v16 = vadd.f32 %v309_v14, %v141_v2  ;;  %v7547_v17 = vadd.f32 %v236_v15, %v7523_v61  ;;  %v311_v18 = vpop.f32.mrb[5].mxu1  ;;  %v238_v19 = vpop.f32.mrb[5].mxu0 }
 0x13f   :  { %v7549_v20 = vadd.f32 %v311_v18, %v145_v5  ;;  %v7552_v21 = vadd.f32 %v238_v19, %v7530_v0  ;;  %v313_v22 = vpop.f32.mrb[6].mxu1  ;;  %v240_v23 = vpop.f32.mrb[6].mxu0 }
 0x140   :  { %10735 = vst [vmem:[#allocation15_spill] sm:$0xff] %v7544_v16  ;;  %10736 = vst [vmem:[#allocation16_spill] sm:$0xff] %v7547_v17  ;;  %v7554_v24 = vadd.f32 %v313_v22, %v141_v2  ;;  %v7557_v25 = vadd.f32 %v240_v23, %v7523_v61  ;;  %v315_v26 = vpop.f32.mrb[7].mxu1  ;;  %v242_v27 = vpop.f32.mrb[7].mxu0  ;;  %v7713_v16 = vld [vmem:[#allocation6 + $0x8] ss:$16 sps:$4 sm:$0xff]  }
 0x141   :  { %10737 = vst [vmem:[#allocation17_spill] sm:$0xff] %v7549_v20  ;;  %10738 = vst [vmem:[#allocation18_spill] sm:$0xff] %v7552_v21  ;;  %v7559_v28 = vadd.f32 %v315_v26, %v145_v5  ;;  %v7562_v29 = vadd.f32 %v242_v27, %v7530_v0  ;;  %v7707_v20 = vld [vmem:[#allocation6 + $0xc] ss:$16 sps:$4 sm:$0xff]   ;;  %v7711_v21 = vld [vmem:[#allocation6] ss:$16 sps:$4 sm:$0xff]  }
 0x142   :  { %10739 = vst [vmem:[#allocation19_spill] sm:$0xff] %v7554_v24  ;;  %10740 = vst [vmem:[#allocation20_spill] sm:$0xff] %v7557_v25  ;;  %v7701_v24 = vld [vmem:[#allocation8 + $0xe8] ss:$16 sps:$4 sm:$0xff]   ;;  %v7705_v25 = vld [vmem:[#allocation6 + $0x4] ss:$16 sps:$4 sm:$0xff]  }
 0x143   :  { %10741 = vst [vmem:[#allocation21_spill] sm:$0xff] %v7559_v28  ;;  %10742 = vst [vmem:[#allocation22_spill] sm:$0xff] %v7562_v29  ;;  %v7695_v28 = vld [vmem:[#allocation8 + $0xec] ss:$16 sps:$4 sm:$0xff]   ;;  %v7699_v29 = vld [vmem:[#allocation8 + $0xe0] ss:$16 sps:$4 sm:$0xff]  }
 0x144   :  { %10761 = vst [vmem:[#allocation40_spill] sm:$0xff] %v7695_v28  ;;  %10762 = vst [vmem:[#allocation41_spill] sm:$0xff] %v7699_v29  ;;  %v7717_v17 = vld [vmem:[#allocation6 + $0x24] ss:$16 sps:$4 sm:$0xff]  }
 0x145   :  { %v319_v30 = vpop.f32.mrb[8].mxu1  ;;  %v246_v31 = vpop.f32.mrb[8].mxu0  ;;  %10763 = vst [vmem:[#allocation42_spill] sm:$0xff] %v7701_v24  ;;  %10764 = vst [vmem:[#allocation43_spill] sm:$0xff] %v7705_v25 }
 0x146   :  { %v7564_v34 = vadd.f32 %v319_v30, %v141_v2  ;;  %v7567_v41 = vadd.f32 %v246_v31, %v7523_v61  ;;  %v321_v42 = vpop.f32.mrb[9].mxu1  ;;  %v248_v47 = vpop.f32.mrb[9].mxu0  ;;  %10765 = vst [vmem:[#allocation44_spill] sm:$0xff] %v7707_v20  ;;  %10766 = vst [vmem:[#allocation45_spill] sm:$0xff] %v7711_v21 }
 0x147   :  { %v7569_v54 = vadd.f32 %v321_v42, %v145_v5  ;;  %v7572_v55 = vadd.f32 %v248_v47, %v7530_v0  ;;  %v323_v59 = vpop.f32.mrb[10].mxu1  ;;  %v250_v6 = vpop.f32.mrb[10].mxu0  ;;  %10767 = vst [vmem:[#allocation46_spill] sm:$0xff] %v7713_v16  ;;  %10768 = vst [vmem:[#allocation47_spill] sm:$0xff] %v7717_v17 }
 0x148   :  { %10743 = vst [vmem:[#allocation23_spill] sm:$0xff] %v7564_v34  ;;  %10744 = vst [vmem:[#allocation24_spill] sm:$0xff] %v7567_v41  ;;  %v7574_v7 = vadd.f32 %v323_v59, %v141_v2  ;;  %v7577_v10 = vadd.f32 %v250_v6, %v7523_v61  ;;  %v325_v11 = vpop.f32.mrb[11].mxu1  ;;  %v252_v14 = vpop.f32.mrb[11].mxu0  ;;  %v7689_v34 = vld [vmem:[#allocation8 + $0xc8] ss:$16 sps:$4 sm:$0xff]  }
 0x149   :  { %10745 = vst [vmem:[#allocation25_spill] sm:$0xff] %v7569_v54  ;;  %10746 = vst [vmem:[#allocation26_spill] sm:$0xff] %v7572_v55  ;;  %v7579_v15 = vadd.f32 %v325_v11, %v145_v5  ;;  %v7582_v18 = vadd.f32 %v252_v14, %v7530_v0  ;;  %v7683_v54 = vld [vmem:[#allocation8 + $0xcc] ss:$16 sps:$4 sm:$0xff]   ;;  %v7687_v55 = vld [vmem:[#allocation8 + $0xc0] ss:$16 sps:$4 sm:$0xff]  }
 0x14a   :  { %10747 = vst [vmem:[#allocation27_spill] sm:$0xff] %v7574_v7  ;;  %10748 = vst [vmem:[#allocation28_spill] sm:$0xff] %v7577_v10  ;;  %v7681_v10 = vld [vmem:[#allocation8 + $0xc4] ss:$16 sps:$4 sm:$0xff]  }
 0x14b   :  { %10749 = vst [vmem:[#allocation29_spill] sm:$0xff] %v7579_v15  ;;  %10750 = vst [vmem:[#allocation30_spill] sm:$0xff] %v7582_v18  ;;  %v7693_v41 = vld [vmem:[#allocation8 + $0xe4] ss:$16 sps:$4 sm:$0xff]  }
 0x14c   :  { %10760 = vst [vmem:[#allocation39_spill] sm:$0xff] %v7693_v41 }
 0x14d   :  { %v329_v19 = vpop.f32.mrb[12].mxu1  ;;  %v256_v22 = vpop.f32.mrb[12].mxu0 }
 0x14e   :  { %v7584_v23 = vadd.f32 %v329_v19, %v141_v2  ;;  %v7587_v26 = vadd.f32 %v256_v22, %v7523_v61  ;;  %v331_v27 = vpop.f32.mrb[13].mxu1  ;;  %v258_v30 = vpop.f32.mrb[13].mxu0 }
 0x14f   :  { %v7589_v31 = vadd.f32 %v331_v27, %v145_v5  ;;  %v7592_v42 = vadd.f32 %v258_v30, %v7530_v0  ;;  %v333_v47 = vpop.f32.mrb[14].mxu1  ;;  %v260_v59 = vpop.f32.mrb[14].mxu0  ;;  %v300_v27 = vadd.f32 %v7525_v62, %v141_v2  ;;  %v227_v30 = vadd.f32 %v7527_v63, %v7523_v61 }
 0x150   :  { %10751 = vst [vmem:[#allocation31_spill] sm:$0xff] %v7584_v23  ;;  %10752 = vst [vmem:[#allocation32_spill] sm:$0xff] %v7587_v26  ;;  %v7594_v6 = vadd.f32 %v333_v47, %v141_v2  ;;  %v7597_v11 = vadd.f32 %v260_v59, %v7523_v61  ;;  %v335_v14 = vpop.f32.mrb[15].mxu1  ;;  %v262_v19 = vpop.f32.mrb[15].mxu0 }
 0x151   :  { %10753 = vst [vmem:[#allocation33_spill] sm:$0xff] %v7589_v31  ;;  %10754 = vst [vmem:[#allocation34_spill] sm:$0xff] %v7592_v42  ;;  %v7599_v1 = vadd.f32 %v335_v14, %v145_v5  ;;  %v7602_v22 = vadd.f32 %v262_v19, %v7530_v0  ;;  %v302_v31 = vadd.f32 %v301_v3, %v145_v5 }
 0x152   :  { %10755 = vst [vmem:[#allocation35_spill] sm:$0xff] %v7594_v6  ;;  %10756 = vst [vmem:[#allocation36_spill] sm:$0xff] %v7597_v11  ;;  %v229_v42 = vadd.f32 %v228_v4, %v7530_v0 }
 0x153   :  { %10757 = vst [vmem:[#allocation37_spill] sm:$0xff] %v7599_v1  ;;  %10758 = vst [vmem:[#allocation38_spill] sm:$0xff] %v7602_v22 }
 0x155   :  { %v730_v47 = vpop.f32.mrb[16].mxu0  ;;  %v771_v6 = vpop.f32.mrb[16].mxu1 }
 0x156   :  { %v778_v23 = vadd.f32 %v730_v47, %v227_v30  ;;  %v780_v59 = vadd.f32 %v771_v6, %v300_v27  ;;  %v732_v11 = vpop.f32.mrb[17].mxu0  ;;  %v773_v26 = vpop.f32.mrb[17].mxu1 }
 0x157   :  { %v779_v15 = vadd.f32 %v732_v11, %v229_v42  ;;  %v781_v14 = vadd.f32 %v773_v26, %v302_v31  ;;  %v775_v1 = vpop.f32.mrb[18].mxu1  ;;  %v734_v18 = vpop.f32.mrb[18].mxu0 }
 0x158   :  { %v5622_v19 = vmul.f32 -1.442695, %v778_v23  ;;  %v5624_v22 = vmul.f32 -1.442695, %v780_v59  ;;  %v776_v7 = vpop.f32.mrb[19].mxu1  ;;  %v735_v62 = vpop.f32.mrb[19].mxu0 }
 0x159   :  { %v5623_v2 = vmul.f32 -1.442695, %v779_v15  ;;  %v5625_v0 = vmul.f32 -1.442695, %v781_v14  ;;  %v7611_v59 = vld [vmem:[#allocation8] ss:$16 sps:$4 sm:$0xff]  }
 0x15a   :  { %6126 = vpow2.f32 %v5622_v19  ;;  %v7613_v14 = vld [vmem:[#allocation8 + $0x8] ss:$16 sps:$4 sm:$0xff]   ;;  %v7617_v62 = vld [vmem:[#allocation8 + $0x24] ss:$16 sps:$4 sm:$0xff]  }
 0x15b   :  { %6128 = vpow2.f32 %v5624_v22 }
 0x15c   :  { %6130 = vpow2.f32 %v5623_v2  ;;  %v7619_v2 = vld [vmem:[#allocation8 + $0x2c] ss:$16 sps:$4 sm:$0xff]  }
 0x164   :  { %v6127_v61 = vpop.eup %6126 }
 0x165   :  { %v6129_v63 = vpop.eup %6128  ;;  %v794_v6 = vadd.f32 1.0, %v6127_v61  ;;  %v7625_v61 = vld [vmem:[#allocation8 + $0x20] ss:$16 sps:$4 sm:$0xff]  }
 0x166   :  { %v6131_v3 = vpop.eup %6130  ;;  %v796_v4 = vadd.f32 1.0, %v6129_v63  ;;  %v7627_v63 = vld [vmem:[#allocation8 + $0x28] ss:$16 sps:$4 sm:$0xff]  }
 0x167   :  { %v795_v5 = vadd.f32 1.0, %v6131_v3  ;;  %v7633_v3 = vld [vmem:[#allocation8 + $0x4c] ss:$16 sps:$4 sm:$0xff]  }
 0x168   :  { %6132 = vrcp.f32 %v796_v4  ;;  %v10759_v4 = vmov 0  }
 0x169   :  { %6134 = vpow2.f32 %v5625_v0  ;;  %v7631_v0 = vld [vmem:[#allocation8 + $0x44] ss:$16 sps:$4 sm:$0xff]  }
 0x16a   :  { %6136 = vrcp.f32 %v795_v5  ;;  %v7639_v5 = vld [vmem:[#allocation8 + $0x40] ss:$16 sps:$4 sm:$0xff]  }
 0x16b   :  { %6138 = vrcp.f32 %v794_v6  ;;  %v7641_v6 = vld [vmem:[#allocation8 + $0x48] ss:$16 sps:$4 sm:$0xff]  }
 0x172   :  { %v6133_v1 = vpop.eup %6132 }
 0x173   :  { %v6135_v18 = vpop.eup %6134  ;;  %v806_v23 = vmul.f32 2.0, %v6133_v1  ;;  %v7645_v1 = vld [vmem:[#allocation8 + $0x64] ss:$16 sps:$4 sm:$0xff]  }
 0x174   :  { %v6137_v7 = vpop.eup %6136  ;;  %v797_v31 = vadd.f32 1.0, %v6135_v18  ;;  %v7647_v18 = vld [vmem:[#allocation8 + $0x6c] ss:$16 sps:$4 sm:$0xff]  }
 0x175   :  { %v5626_v26 = vadd.f32 -1.0, %v806_v23  ;;  %v6139_v15 = vpop.eup %6138  ;;  %v808_v11 = vmul.f32 0.0, %v6137_v7  ;;  %v7651_v23 = vld [vmem:[#allocation8 + $0x60] ss:$16 sps:$4 sm:$0xff]   ;;  %v7653_v7 = vld [vmem:[#allocation8 + $0x68] ss:$16 sps:$4 sm:$0xff]  }
 0x176   :  { %6140 = vrcp.f32 %v797_v31  ;;  %v7663_v31 = vld [vmem:[#allocation8 + $0x80] ss:$16 sps:$4 sm:$0xff]  }
 0x177   :  { %v809_v42 = vmul.f32 %v6139_v15, %v5626_v26  ;;  %v7657_v26 = vld [vmem:[#allocation8 + $0x84] ss:$16 sps:$4 sm:$0xff]   ;;  %v7659_v15 = vld [vmem:[#allocation8 + $0x8c] ss:$16 sps:$4 sm:$0xff]  }
 0x179   :  { %v7608_v22 = vadd.f32 %v809_v42, %v808_v11  ;;  %v7665_v42 = vld [vmem:[#allocation8 + $0x88] ss:$16 sps:$4 sm:$0xff]   ;;  %v7669_v11 = vld [vmem:[#allocation8 + $0xa4] ss:$16 sps:$4 sm:$0xff]  }
 0x17b   :  { %6142 = vtanh.f32 %v7608_v22 }
 0x180   :  { %v6141_v27 = vpop.eup %6140 }
 0x185   :  { %v6143_v30 = vpop.eup %6142 }
 0x186   :  { %v812_v47 = vmul.f32 %v6143_v30, %v6141_v27  ;;  %v7671_v27 = vld [vmem:[#allocation8 + $0xac] ss:$16 sps:$4 sm:$0xff]   ;;  %v7675_v30 = vld [vmem:[#allocation8 + $0xa0] ss:$16 sps:$4 sm:$0xff]  }
 0x188   :  { %v7615_v19 = vpack.c.bf16 %v812_v47, %v812_v47  ;;  %v7677_v47 = vld [vmem:[#allocation8 + $0xa8] ss:$16 sps:$4 sm:$0xff]  }
 0x18a   :  { %851 = vmatmul.mubr.bf16.vlgmr.msra.gmra.mrb[20].mxu0 %v7615_v19  ;;  %892 = vmatmul.mubr.bf16.vlgmr.msra.gmra.mrb[20].mxu1 %v7615_v19 }
 0x18b   :  { %1096 = vmatpush1.bf16.msra.mxu0 %v7611_v59  ;;  %1137 = vmatpush1.bf16.msra.mxu1 %v7613_v14 }
 0x18c   :  { %1097 = vmatprep.subr.bf16.mxu0 %v7617_v62  ;;  %1138 = vmatprep.subr.bf16.mxu1 %v7619_v2 }
 0x18d   :  { %1168 = vmatprep.mubr.bf16.mxu1 %v10759_v4  ;;  %1127 = vmatprep.mubr.bf16.mxu0 %v10759_v4 }
 0x18f   :  { %1098 = vmatpush1.bf16.msra.mxu0 %v7625_v61  ;;  %1139 = vmatpush1.bf16.msra.mxu1 %v7627_v63 }
 0x190   :  { %1099 = vmatprep.subr.bf16.mxu0 %v7631_v0  ;;  %1140 = vmatprep.subr.bf16.mxu1 %v7633_v3 }
 0x193   :  { %1100 = vmatpush1.bf16.msra.mxu0 %v7639_v5  ;;  %1141 = vmatpush1.bf16.msra.mxu1 %v7641_v6 }
 0x194   :  { %1101 = vmatprep.subr.bf16.mxu0 %v7645_v1  ;;  %1142 = vmatprep.subr.bf16.mxu1 %v7647_v18 }
 0x197   :  { %1102 = vmatpush1.bf16.msra.mxu0 %v7651_v23  ;;  %1143 = vmatpush1.bf16.msra.mxu1 %v7653_v7 }
 0x198   :  { %1103 = vmatprep.subr.bf16.mxu0 %v7657_v26  ;;  %1144 = vmatprep.subr.bf16.mxu1 %v7659_v15 }
 0x19b   :  { %1104 = vmatpush1.bf16.msra.mxu0 %v7663_v31  ;;  %1145 = vmatpush1.bf16.msra.mxu1 %v7665_v42 }
 0x19c   :  { %1105 = vmatprep.subr.bf16.mxu0 %v7669_v11  ;;  %1146 = vmatprep.subr.bf16.mxu1 %v7671_v27 }
 0x19f   :  { %1106 = vmatpush1.bf16.msra.mxu0 %v7675_v30  ;;  %1147 = vmatpush1.bf16.msra.mxu1 %v7677_v47 }
 0x1a0   :  { %1107 = vmatprep.subr.bf16.mxu0 %v7681_v10  ;;  %1148 = vmatprep.subr.bf16.mxu1 %v7683_v54 }
 0x1a3   :  { %1108 = vmatpush1.bf16.msra.mxu0 %v7687_v55  ;;  %1149 = vmatpush1.bf16.msra.mxu1 %v7689_v34 }
 0x1a4   :  { %1109 = vmatprep.subr.bf16.mxu0 %v7693_v41  ;;  %1150 = vmatprep.subr.bf16.mxu1 %v7695_v28  ;;  %v7719_v41 = vld [vmem:[#allocation6 + $0x2c] ss:$16 sps:$4 sm:$0xff]   ;;  %v7751_v28 = vld [vmem:[#allocation6 + $0x60] ss:$16 sps:$4 sm:$0xff]  }
 0x1a5   :  { %10769 = vst [vmem:[#allocation48_spill] sm:$0xff] %v7719_v41  ;;  %10778 = vst [vmem:[#allocation57_spill] sm:$0xff] %v7751_v28 }
 0x1a7   :  { %1110 = vmatpush1.bf16.msra.mxu0 %v7699_v29  ;;  %1151 = vmatpush1.bf16.msra.mxu1 %v7701_v24  ;;  %v7725_v24 = vld [vmem:[#allocation6 + $0x20] ss:$16 sps:$4 sm:$0xff]   ;;  %v7727_v29 = vld [vmem:[#allocation6 + $0x28] ss:$16 sps:$4 sm:$0xff]  }
 0x1a8   :  { %1337 = vmatprep.subr.bf16.mxu0 %v7705_v25  ;;  %1378 = vmatprep.subr.bf16.mxu1 %v7707_v20  ;;  %10770 = vst [vmem:[#allocation49_spill] sm:$0xff] %v7725_v24  ;;  %10771 = vst [vmem:[#allocation50_spill] sm:$0xff] %v7727_v29  ;;  %v7731_v20 = vld [vmem:[#allocation6 + $0x44] ss:$16 sps:$4 sm:$0xff]   ;;  %v7733_v25 = vld [vmem:[#allocation6 + $0x4c] ss:$16 sps:$4 sm:$0xff]  }
 0x1a9   :  { %10772 = vst [vmem:[#allocation51_spill] sm:$0xff] %v7731_v20  ;;  %10773 = vst [vmem:[#allocation52_spill] sm:$0xff] %v7733_v25 }
 0x1aa   :  { %1169 = vmatmul.mubr.bf16.vlgmr.msra.gmra.mrb[24].mxu1 %v10759_v4  ;;  %1128 = vmatmul.mubr.bf16.vlgmr.msra.gmra.mrb[24].mxu0 %v10759_v4 }
 0x1ab   :  { %1338 = vmatpush1.bf16.msra.mxu0 %v7711_v21  ;;  %1379 = vmatpush1.bf16.msra.mxu1 %v7713_v16  ;;  %v7739_v16 = vld [vmem:[#allocation6 + $0x40] ss:$16 sps:$4 sm:$0xff]   ;;  %v7741_v21 = vld [vmem:[#allocation6 + $0x48] ss:$16 sps:$4 sm:$0xff]  }
 0x1ac   :  { %1339 = vmatprep.subr.bf16.mxu0 %v7717_v17  ;;  %1380 = vmatprep.subr.bf16.mxu1 %v7719_v41  ;;  %10774 = vst [vmem:[#allocation53_spill] sm:$0xff] %v7739_v16  ;;  %10775 = vst [vmem:[#allocation54_spill] sm:$0xff] %v7741_v21  ;;  %v7745_v41 = vld [vmem:[#allocation6 + $0x64] ss:$16 sps:$4 sm:$0xff]   ;;  %v7747_v17 = vld [vmem:[#allocation6 + $0x6c] ss:$16 sps:$4 sm:$0xff]  }
 0x1ad   :  { %1369 = vmatprep.mubr.bf16.mxu0 %v10759_v4  ;;  %1410 = vmatprep.mubr.bf16.mxu1 %v10759_v4  ;;  %10776 = vst [vmem:[#allocation55_spill] sm:$0xff] %v7745_v41  ;;  %10777 = vst [vmem:[#allocation56_spill] sm:$0xff] %v7747_v17 }
 0x1af   :  { %1340 = vmatpush1.bf16.msra.mxu0 %v7725_v24  ;;  %1381 = vmatpush1.bf16.msra.mxu1 %v7727_v29  ;;  %v7753_v24 = vld [vmem:[#allocation6 + $0x68] ss:$16 sps:$4 sm:$0xff]   ;;  %v7757_v29 = vld [vmem:[#allocation6 + $0x84] ss:$16 sps:$4 sm:$0xff]  }
 0x1b0   :  { %1341 = vmatprep.subr.bf16.mxu0 %v7731_v20  ;;  %1382 = vmatprep.subr.bf16.mxu1 %v7733_v25  ;;  %10779 = vst [vmem:[#allocation58_spill] sm:$0xff] %v7753_v24  ;;  %10780 = vst [vmem:[#allocation59_spill] sm:$0xff] %v7757_v29  ;;  %v7759_v20 = vld [vmem:[#allocation6 + $0x8c] ss:$16 sps:$4 sm:$0xff]   ;;  %v7763_v25 = vld [vmem:[#allocation6 + $0x80] ss:$16 sps:$4 sm:$0xff]  }
 0x1b1   :  { %10781 = vst [vmem:[#allocation60_spill] sm:$0xff] %v7759_v20  ;;  %10782 = vst [vmem:[#allocation61_spill] sm:$0xff] %v7763_v25 }
 0x1b3   :  { %1342 = vmatpush1.bf16.msra.mxu0 %v7739_v16  ;;  %1383 = vmatpush1.bf16.msra.mxu1 %v7741_v21  ;;  %v7765_v16 = vld [vmem:[#allocation6 + $0x88] ss:$16 sps:$4 sm:$0xff]   ;;  %v7769_v21 = vld [vmem:[#allocation6 + $0xa4] ss:$16 sps:$4 sm:$0xff]  }
 0x1b4   :  { %1343 = vmatprep.subr.bf16.mxu0 %v7745_v41  ;;  %1384 = vmatprep.subr.bf16.mxu1 %v7747_v17  ;;  %10783 = vst [vmem:[#allocation62_spill] sm:$0xff] %v7765_v16  ;;  %10784 = vst [vmem:[#allocation63_spill] sm:$0xff] %v7769_v21  ;;  %v7771_v41 = vld [vmem:[#allocation6 + $0xac] ss:$16 sps:$4 sm:$0xff]   ;;  %v7775_v17 = vld [vmem:[#allocation6 + $0xa0] ss:$16 sps:$4 sm:$0xff]  }
 0x1b5   :  { %10785 = vst [vmem:[#allocation64_spill] sm:$0xff] %v7771_v41  ;;  %10786 = vst [vmem:[#allocation65_spill] sm:$0xff] %v7775_v17 }
 0x1b7   :  { %1344 = vmatpush1.bf16.msra.mxu0 %v7751_v28  ;;  %1385 = vmatpush1.bf16.msra.mxu1 %v7753_v24  ;;  %v7777_v28 = vld [vmem:[#allocation6 + $0xa8] ss:$16 sps:$4 sm:$0xff]   ;;  %v7781_v24 = vld [vmem:[#allocation6 + $0xc4] ss:$16 sps:$4 sm:$0xff]  }
 0x1b8   :  { %1345 = vmatprep.subr.bf16.mxu0 %v7757_v29  ;;  %1386 = vmatprep.subr.bf16.mxu1 %v7759_v20  ;;  %10787 = vst [vmem:[#allocation66_spill] sm:$0xff] %v7781_v24  ;;  %v7783_v29 = vld [vmem:[#allocation6 + $0xcc] ss:$16 sps:$4 sm:$0xff]   ;;  %v7787_v20 = vld [vmem:[#allocation6 + $0xc0] ss:$16 sps:$4 sm:$0xff]  }
 0x1b9   :  { %10788 = vst [vmem:[#allocation67_spill] sm:$0xff] %v7783_v29 }
 0x1bb   :  { %1346 = vmatpush1.bf16.msra.mxu0 %v7763_v25  ;;  %1387 = vmatpush1.bf16.msra.mxu1 %v7765_v16  ;;  %v7789_v25 = vld [vmem:[#allocation6 + $0xc8] ss:$16 sps:$4 sm:$0xff]   ;;  %v7793_v16 = vld [vmem:[#allocation6 + $0xe4] ss:$16 sps:$4 sm:$0xff]  }
 0x1bc   :  { %1347 = vmatprep.subr.bf16.mxu0 %v7769_v21  ;;  %1388 = vmatprep.subr.bf16.mxu1 %v7771_v41  ;;  %10789 = vst [vmem:[#allocation68_spill] sm:$0xff] %v7789_v25  ;;  %v7795_v21 = vld [vmem:[#allocation6 + $0xec] ss:$16 sps:$4 sm:$0xff]   ;;  %v7799_v41 = vld [vmem:[#allocation6 + $0xe0] ss:$16 sps:$4 sm:$0xff]  }
 0x1bd   :  { %10790 = vst [vmem:[#allocation69_spill] sm:$0xff] %v7795_v21 }
 0x1bf   :  { %1348 = vmatpush1.bf16.msra.mxu0 %v7775_v17  ;;  %1389 = vmatpush1.bf16.msra.mxu1 %v7777_v28  ;;  %v7801_v17 = vld [vmem:[#allocation6 + $0xe8] ss:$16 sps:$4 sm:$0xff]  }
 0x1c0   :  { %1349 = vmatprep.subr.bf16.mxu0 %v7781_v24  ;;  %1390 = vmatprep.subr.bf16.mxu1 %v7783_v29  ;;  %10791 = vst [vmem:[#allocation70_spill] sm:$0xff] %v7801_v17  ;;  %v7807_v29 = vld [vmem:[#allocation4 + $0x4] ss:$16 sps:$4 sm:$0xff]   ;;  %v7810_v24 = vld [vmem:[#allocation4 + $0xc] ss:$16 sps:$4 sm:$0xff]  }
 0x1c1   :  { %10792 = vst [vmem:[#allocation71_spill] sm:$0xff] %v7807_v29  ;;  %10793 = vst [vmem:[#allocation72_spill] sm:$0xff] %v7810_v24 }
 0x1c3   :  { %1350 = vmatpush1.bf16.msra.mxu0 %v7787_v20  ;;  %1391 = vmatpush1.bf16.msra.mxu1 %v7789_v25  ;;  %v7815_v25 = vld [vmem:[#allocation4] ss:$16 sps:$4 sm:$0xff]  }
 0x1c4   :  { %1351 = vmatprep.subr.bf16.mxu0 %v7793_v16  ;;  %1392 = vmatprep.subr.bf16.mxu1 %v7795_v21  ;;  %10794 = vst [vmem:[#allocation73_spill] sm:$0xff] %v7815_v25  ;;  %v7818_v21 = vld [vmem:[#allocation4 + $0x8] ss:$16 sps:$4 sm:$0xff]  }
 0x1c5   :  { %10795 = vst [vmem:[#allocation74_spill] sm:$0xff] %v7818_v21 }
 0x1c7   :  { %1352 = vmatpush1.bf16.msra.mxu0 %v7799_v41  ;;  %1393 = vmatpush1.bf16.msra.mxu1 %v7801_v17  ;;  %v7821_v17 = vld [vmem:[#allocation4 + $0x24] ss:$16 sps:$4 sm:$0xff]  }
 0x1c8   :  { %1480 = vmatprep.subr.bf16.mxu0 %v7807_v29  ;;  %1521 = vmatprep.subr.bf16.mxu1 %v7810_v24  ;;  %10796 = vst [vmem:[#allocation75_spill] sm:$0xff] %v7821_v17  ;;  %v7824_v29 = vld [vmem:[#allocation4 + $0x2c] ss:$16 sps:$4 sm:$0xff]   ;;  %v7844_v24 = vld [vmem:[#allocation4 + $0x48] ss:$16 sps:$4 sm:$0xff]  }
 0x1c9   :  { %10797 = vst [vmem:[#allocation76_spill] sm:$0xff] %v7824_v29 }
 0x1ca   :  { %1370 = vmatmul.mubr.bf16.vlgmr.msra.gmra.mrb[28].mxu0 %v7615_v19  ;;  %1411 = vmatmul.mubr.bf16.vlgmr.msra.gmra.mrb[28].mxu1 %v7615_v19  ;;  %v7829_v19 = vld [vmem:[#allocation4 + $0x20] ss:$16 sps:$4 sm:$0xff]  }
 0x1cb   :  { %1481 = vmatpush1.bf16.msra.mxu0 %v7815_v25  ;;  %1522 = vmatpush1.bf16.msra.mxu1 %v7818_v21  ;;  %10798 = vst [vmem:[#allocation77_spill] sm:$0xff] %v7829_v19  ;;  %v7832_v25 = vld [vmem:[#allocation4 + $0x28] ss:$16 sps:$4 sm:$0xff]   ;;  %v7835_v21 = vld [vmem:[#allocation4 + $0x44] ss:$16 sps:$4 sm:$0xff]  }
 0x1cc   :  { %1482 = vmatprep.subr.bf16.mxu0 %v7821_v17  ;;  %1523 = vmatprep.subr.bf16.mxu1 %v7824_v29  ;;  %10799 = vst [vmem:[#allocation78_spill] sm:$0xff] %v7832_v25  ;;  %10800 = vst [vmem:[#allocation79_spill] sm:$0xff] %v7835_v21  ;;  %v7838_v17 = vld [vmem:[#allocation4 + $0x4c] ss:$16 sps:$4 sm:$0xff]   ;;  %v7841_v29 = vld [vmem:[#allocation4 + $0x40] ss:$16 sps:$4 sm:$0xff]  }
 0x1cd   :  { %1512 = vmatprep.mubr.bf16.mxu0 %v10759_v4  ;;  %1553 = vmatprep.mubr.bf16.mxu1 %v10759_v4  ;;  %10801 = vst [vmem:[#allocation80_spill] sm:$0xff] %v7838_v17 }
 0x1cf   :  { %1483 = vmatpush1.bf16.msra.mxu0 %v7829_v19  ;;  %1524 = vmatpush1.bf16.msra.mxu1 %v7832_v25  ;;  %v7847_v19 = vld [vmem:[#allocation4 + $0x64] ss:$16 sps:$4 sm:$0xff]   ;;  %v7850_v25 = vld [vmem:[#allocation4 + $0x6c] ss:$16 sps:$4 sm:$0xff]  }
 0x1d0   :  { %1484 = vmatprep.subr.bf16.mxu0 %v7835_v21  ;;  %1525 = vmatprep.subr.bf16.mxu1 %v7838_v17  ;;  %v7853_v21 = vld [vmem:[#allocation4 + $0x60] ss:$16 sps:$4 sm:$0xff]   ;;  %v7856_v17 = vld [vmem:[#allocation4 + $0x68] ss:$16 sps:$4 sm:$0xff]  }
 0x1d3   :  { %1485 = vmatpush1.bf16.msra.mxu0 %v7841_v29  ;;  %1526 = vmatpush1.bf16.msra.mxu1 %v7844_v24 }
 0x1d4   :  { %1486 = vmatprep.subr.bf16.mxu0 %v7847_v19  ;;  %1527 = vmatprep.subr.bf16.mxu1 %v7850_v25 }
 0x1d7   :  { %1487 = vmatpush1.bf16.msra.mxu0 %v7853_v21  ;;  %1528 = vmatpush1.bf16.msra.mxu1 %v7856_v17 }
 0x1d8   :  { %1488 = vmatprep.subr.bf16.mxu0 %v7401_v32  ;;  %1529 = vmatprep.subr.bf16.mxu1 %v7405_v33 }
 0x1db   :  { %1489 = vmatpush1.bf16.msra.mxu0 %v7409_v35  ;;  %1530 = vmatpush1.bf16.msra.mxu1 %v7413_v36 }
 0x1dc   :  { %1490 = vmatprep.subr.bf16.mxu0 %v7415_v37  ;;  %1531 = vmatprep.subr.bf16.mxu1 %v7419_v38 }
 0x1df   :  { %1491 = vmatpush1.bf16.msra.mxu0 %v7421_v39  ;;  %1532 = vmatpush1.bf16.msra.mxu1 %v7423_v40 }
 0x1e0   :  { %1492 = vmatprep.subr.bf16.mxu0 %v7437_v43  ;;  %1533 = vmatprep.subr.bf16.mxu1 %v7439_v44 }
 0x1e3   :  { %1493 = vmatpush1.bf16.msra.mxu0 %v7443_v45  ;;  %1534 = vmatpush1.bf16.msra.mxu1 %v7445_v46 }
 0x1e4   :  { %1494 = vmatprep.subr.bf16.mxu0 %v7447_v48  ;;  %1535 = vmatprep.subr.bf16.mxu1 %v7449_v49 }
 0x1e7   :  { %1495 = vmatpush1.bf16.msra.mxu0 %v7455_v50  ;;  %1536 = vmatpush1.bf16.msra.mxu1 %v7457_v51 }
 0x1e8   :  { %1598 = vmatprep.subr.bf16.mxu0 %v7505_v52  ;;  %1639 = vmatprep.subr.bf16.mxu1 %v7507_v53 }
 0x25d   :  { %v852_v32 = vpop.f32.mrb[20].mxu0  ;;  %v893_v33 = vpop.f32.mrb[20].mxu1 }
 0x25e   :  { %v900_v35 = vadd.f32 %v852_v32, %v7537_v9  ;;  %v902_v36 = vadd.f32 %v893_v33, %v7534_v8  ;;  %v854_v37 = vpop.f32.mrb[21].mxu0  ;;  %v895_v38 = vpop.f32.mrb[21].mxu1 }
 0x25f   :  { %v901_v39 = vadd.f32 %v854_v37, %v7542_v13  ;;  %v903_v40 = vadd.f32 %v895_v38, %v7539_v12  ;;  %v856_v43 = vpop.f32.mrb[22].mxu0  ;;  %v897_v44 = vpop.f32.mrb[22].mxu1 }
 0x260   :  { %v5627_v45 = vmul.f32 -1.442695, %v900_v35  ;;  %v5629_v46 = vmul.f32 -1.442695, %v902_v36  ;;  %v857_v48 = vpop.f32.mrb[23].mxu0  ;;  %v898_v49 = vpop.f32.mrb[23].mxu1 }
 0x261   :  { %v5628_v50 = vmul.f32 -1.442695, %v901_v39  ;;  %v5630_v53 = vmul.f32 -1.442695, %v903_v40 }
 0x262   :  { %6144 = vpow2.f32 %v5627_v45 }
 0x263   :  { %6146 = vpow2.f32 %v5629_v46 }
 0x264   :  { %6148 = vpow2.f32 %v5628_v50 }
 0x26c   :  { %v6145_v51 = vpop.eup %6144 }
 0x26d   :  { %v6147_v52 = vpop.eup %6146  ;;  %v916_v33 = vadd.f32 1.0, %v6145_v51 }
 0x26e   :  { %v6149_v8 = vpop.eup %6148  ;;  %v918_v9 = vadd.f32 1.0, %v6147_v52 }
 0x26f   :  { %v917_v32 = vadd.f32 1.0, %v6149_v8 }
 0x270   :  { %6150 = vrcp.f32 %v918_v9 }
 0x271   :  { %6152 = vpow2.f32 %v5630_v53 }
 0x272   :  { %6154 = vrcp.f32 %v917_v32 }
 0x273   :  { %6156 = vrcp.f32 %v916_v33 }
 0x27a   :  { %v6151_v12 = vpop.eup %6150 }
 0x27b   :  { %v6153_v13 = vpop.eup %6152  ;;  %v928_v35 = vmul.f32 2.0, %v6151_v12 }
 0x27c   :  { %v6155_v36 = vpop.eup %6154  ;;  %v919_v44 = vadd.f32 1.0, %v6153_v13 }
 0x27d   :  { %v5631_v37 = vadd.f32 -1.0, %v928_v35  ;;  %v1170_v38 = vpop.f32.mrb[24].mxu1  ;;  %v1129_v39 = vpop.f32.mrb[24].mxu0  ;;  %v930_v48 = vmul.f32 %v6155_v36, %v7608_v22  ;;  %v530_v22 = vld [vmem:[%s10382_s6] sm:$0xf] }
 0x27e   :  { %v6157_v43 = vpop.eup %6156  ;;  %v1172_v45 = vpop.f32.mrb[25].mxu1  ;;  %6158 = vrcp.f32 %v919_v44 }
 0x27f   :  { %v1131_v46 = vpop.f32.mrb[25].mxu0  ;;  %v931_v40 = vmul.f32 %v6157_v43, %v5631_v37  ;;  %v1174_v49 = vpop.f32.mrb[26].mxu1 }
 0x280   :  { %v1133_v50 = vpop.f32.mrb[26].mxu0  ;;  %v1175_v51 = vpop.f32.mrb[27].mxu1 }
 0x281   :  { %v1134_v52 = vpop.f32.mrb[27].mxu0  ;;  %v7882_v53 = vadd.f32 %v931_v40, %v930_v48 }
 0x283   :  { %6160 = vtanh.f32 %v7882_v53 }
 0x288   :  { %v6159_v8 = vpop.eup %6158 }
 0x28d   :  { %v6161_v9 = vpop.eup %6160 }
 0x28e   :  { %v934_v32 = vmul.f32 %v6161_v9, %v6159_v8 }
 0x290   :  { %v7885_v33 = vpack.c.bf16 %v934_v32, %v934_v32 }
 0x292   :  { %1513 = vmatmul.mubr.bf16.vlgmr.msra.gmra.mrb[32].mxu0 %v7885_v33  ;;  %1554 = vmatmul.mubr.bf16.vlgmr.msra.gmra.mrb[32].mxu1 %v7885_v33 }
 0x293   :  { %1599 = vmatpush1.bf16.msra.mxu0 %v7611_v59  ;;  %1640 = vmatpush1.bf16.msra.mxu1 %v7613_v14  ;;  %v7905_v59 = vrot.slane %v530_v22, %v7511_v56  ;;  %v7908_v14 = vrot.slane %v530_v22, %v7515_v58 }
 0x294   :  { %1600 = vmatprep.subr.bf16.mxu0 %v7617_v62  ;;  %1641 = vmatprep.subr.bf16.mxu1 %v7619_v2 }
 0x295   :  { %1630 = vmatprep.mubr.bf16.mxu0 %v10759_v4  ;;  %1671 = vmatprep.mubr.bf16.mxu1 %v10759_v4 }
 0x297   :  { %1601 = vmatpush1.bf16.msra.mxu0 %v7625_v61  ;;  %1642 = vmatpush1.bf16.msra.mxu1 %v7627_v63  ;;  %v7913_v61 = vrot.slane %v530_v22, %v7513_v57 }
 0x298   :  { %1602 = vmatprep.subr.bf16.mxu0 %v7631_v0  ;;  %1643 = vmatprep.subr.bf16.mxu1 %v7633_v3 }
 0x29b   :  { %1603 = vmatpush1.bf16.msra.mxu0 %v7639_v5  ;;  %1644 = vmatpush1.bf16.msra.mxu1 %v7641_v6 }
 0x29c   :  { %1604 = vmatprep.subr.bf16.mxu0 %v7645_v1  ;;  %1645 = vmatprep.subr.bf16.mxu1 %v7647_v18 }
 0x29d   :  { %v1371_v62 = vpop.f32.mrb[28].mxu0  ;;  %v1412_v2 = vpop.f32.mrb[28].mxu1 }
 0x29e   :  { %v1372_v63 = vadd.f32 %v1371_v62, %v1129_v39  ;;  %v1413_v0 = vadd.f32 %v1412_v2, %v1170_v38  ;;  %v1373_v3 = vpop.f32.mrb[29].mxu0  ;;  %v1414_v5 = vpop.f32.mrb[29].mxu1 }
 0x29f   :  { %v1374_v6 = vadd.f32 %v1373_v3, %v1131_v46  ;;  %v1415_v12 = vadd.f32 %v1414_v5, %v1172_v45  ;;  %v1375_v13 = vpop.f32.mrb[30].mxu0  ;;  %v1416_v35 = vpop.f32.mrb[30].mxu1  ;;  %1605 = vmatpush1.bf16.msra.mxu0 %v7651_v23  ;;  %1646 = vmatpush1.bf16.msra.mxu1 %v7653_v7  ;;  %v7927_v23 = vrot.slane %v530_v22, %v7520_v60  ;;  %v10807_v45 = vld [vmem:[#allocation44_spill] sm:$0xff]  ;;  %v10809_v3 = vld [vmem:[#allocation46_spill] sm:$0xff]  ;;  %v10810_v5 = vld [vmem:[#allocation47_spill] sm:$0xff] }
 0x2a0   :  { %v1440_v1 = vadd.f32 %v7905_v59, %v1372_v63  ;;  %v1442_v18 = vadd.f32 %v7908_v14, %v1413_v0  ;;  %v1376_v36 = vpop.f32.mrb[31].mxu0  ;;  %v1417_v37 = vpop.f32.mrb[31].mxu1  ;;  %1606 = vmatprep.subr.bf16.mxu0 %v7657_v26  ;;  %1647 = vmatprep.subr.bf16.mxu1 %v7659_v15  ;;  %v10802_v26 = vld [vmem:[#allocation39_spill] sm:$0xff]  ;;  %v10803_v15 = vld [vmem:[#allocation40_spill] sm:$0xff]  ;;  %v10808_v0 = vld [vmem:[#allocation45_spill] sm:$0xff] }
 0x2a1   :  { %v1441_v38 = vadd.f32 %v7913_v61, %v1374_v6  ;;  %v1443_v7 = vadd.f32 %v7927_v23, %v1415_v12  ;;  %v10811_v6 = vld [vmem:[#allocation48_spill] sm:$0xff]  ;;  %v10812_v12 = vld [vmem:[#allocation49_spill] sm:$0xff]  ;;  %v10813_v13 = vld [vmem:[#allocation50_spill] sm:$0xff] }
 0x2a2   :  { %v5696_v39 = vmul.f32 -1.442695, %v1440_v1  ;;  %v5698_v43 = vmul.f32 -1.442695, %v1442_v18  ;;  %v10814_v35 = vld [vmem:[#allocation51_spill] sm:$0xff]  ;;  %v10815_v1 = vld [vmem:[#allocation52_spill] sm:$0xff] }
 0x2a3   :  { %v5697_v44 = vmul.f32 -1.442695, %v1441_v38  ;;  %1607 = vmatpush1.bf16.msra.mxu0 %v7663_v31  ;;  %1648 = vmatpush1.bf16.msra.mxu1 %v7665_v42  ;;  %v10816_v18 = vld [vmem:[#allocation53_spill] sm:$0xff]  ;;  %v10817_v36 = vld [vmem:[#allocation54_spill] sm:$0xff]  ;;  %v10818_v37 = vld [vmem:[#allocation55_spill] sm:$0xff] }
 0x2a4   :  { %6162 = vpow2.f32 %v5696_v39  ;;  %1608 = vmatprep.subr.bf16.mxu0 %v7669_v11  ;;  %1649 = vmatprep.subr.bf16.mxu1 %v7671_v27  ;;  %v5699_v11 = vmul.f32 -1.442695, %v1443_v7  ;;  %v10804_v27 = vld [vmem:[#allocation41_spill] sm:$0xff]  ;;  %v10819_v38 = vld [vmem:[#allocation56_spill] sm:$0xff] }
 0x2a5   :  { %6164 = vpow2.f32 %v5698_v43  ;;  %v10820_v39 = vld [vmem:[#allocation57_spill] sm:$0xff]  ;;  %v10821_v43 = vld [vmem:[#allocation58_spill] sm:$0xff]  ;;  %v10823_v7 = vld [vmem:[#allocation60_spill] sm:$0xff] }
 0x2a6   :  { %6166 = vpow2.f32 %v5697_v44  ;;  %v10822_v44 = vld [vmem:[#allocation59_spill] sm:$0xff] }
 0x2a7   :  { %1609 = vmatpush1.bf16.msra.mxu0 %v7675_v30  ;;  %1650 = vmatpush1.bf16.msra.mxu1 %v7677_v47  ;;  %v10805_v30 = vld [vmem:[#allocation42_spill] sm:$0xff] }
 0x2a8   :  { %1610 = vmatprep.subr.bf16.mxu0 %v7681_v10  ;;  %1651 = vmatprep.subr.bf16.mxu1 %v7683_v54  ;;  %v10806_v54 = vld [vmem:[#allocation43_spill] sm:$0xff] }
 0x2ab   :  { %1611 = vmatpush1.bf16.msra.mxu0 %v7687_v55  ;;  %1652 = vmatpush1.bf16.msra.mxu1 %v7689_v34 }
 0x2ac   :  { %1612 = vmatprep.subr.bf16.mxu0 %v10802_v26  ;;  %1653 = vmatprep.subr.bf16.mxu1 %v10803_v15  ;;  %v10824_v26 = vld [vmem:[#allocation61_spill] sm:$0xff]  ;;  %v10825_v15 = vld [vmem:[#allocation62_spill] sm:$0xff] }
 0x2ae   :  { %v6163_v31 = vpop.eup %6162 }
 0x2af   :  { %v6165_v42 = vpop.eup %6164  ;;  %1613 = vmatpush1.bf16.msra.mxu0 %v10804_v27  ;;  %1654 = vmatpush1.bf16.msra.mxu1 %v10805_v30  ;;  %v1456_v46 = vadd.f32 1.0, %v6163_v31  ;;  %v10826_v31 = vld [vmem:[#allocation63_spill] sm:$0xff]  ;;  %v10829_v27 = vld [vmem:[#allocation66_spill] sm:$0xff] }
 0x2b0   :  { %v6167_v10 = vpop.eup %6166  ;;  %v1458_v47 = vadd.f32 1.0, %v6165_v42  ;;  %1680 = vmatprep.subr.bf16.mxu0 %v10806_v54  ;;  %1721 = vmatprep.subr.bf16.mxu1 %v10807_v45  ;;  %v10827_v42 = vld [vmem:[#allocation64_spill] sm:$0xff]  ;;  %v10830_v30 = vld [vmem:[#allocation67_spill] sm:$0xff] }
 0x2b1   :  { %v1457_v55 = vadd.f32 1.0, %v6167_v10  ;;  %v10831_v10 = vld [vmem:[#allocation68_spill] sm:$0xff]  ;;  %v7979_v54 = vld [vmem:[#allocation11 + $0x4] ss:$16 sps:$4 sm:$0xff]  }
 0x2b2   :  { %6168 = vrcp.f32 %v1458_v47  ;;  %v10832_v47 = vld [vmem:[#allocation69_spill] sm:$0xff]  ;;  %v7981_v45 = vld [vmem:[#allocation11 + $0xc] ss:$16 sps:$4 sm:$0xff]  }
 0x2b3   :  { %6170 = vpow2.f32 %v5699_v11  ;;  %v10828_v11 = vld [vmem:[#allocation65_spill] sm:$0xff] }
 0x2b4   :  { %6172 = vrcp.f32 %v1457_v55  ;;  %v10833_v55 = vld [vmem:[#allocation70_spill] sm:$0xff] }
 0x2b5   :  { %6174 = vrcp.f32 %v1456_v46  ;;  %v7987_v46 = vld [vmem:[#allocation11 + $0x8] ss:$16 sps:$4 sm:$0xff]  }
 0x2bc   :  { %v6169_v34 = vpop.eup %6168 }
 0x2bd   :  { %v6171_v40 = vpop.eup %6170  ;;  %v1468_v48 = vmul.f32 2.0, %v6169_v34  ;;  %v8001_v34 = vld [vmem:[#allocation11 + $0x28] ss:$16 sps:$4 sm:$0xff]  }
 0x2be   :  { %v6173_v49 = vpop.eup %6172  ;;  %v1459_v52 = vadd.f32 1.0, %v6171_v40  ;;  %v8005_v40 = vld [vmem:[#allocation11 + $0x44] ss:$16 sps:$4 sm:$0xff]  }
 0x2bf   :  { %v5700_v50 = vadd.f32 -1.0, %v1468_v48  ;;  %v6175_v51 = vpop.eup %6174  ;;  %v1470_v9 = vmul.f32 0.0, %v6173_v49  ;;  %v8007_v48 = vld [vmem:[#allocation11 + $0x4c] ss:$16 sps:$4 sm:$0xff]   ;;  %v8015_v49 = vld [vmem:[#allocation11 + $0x48] ss:$16 sps:$4 sm:$0xff]  }
 0x2c0   :  { %6176 = vrcp.f32 %v1459_v52  ;;  %v8025_v52 = vld [vmem:[#allocation11 + $0x60] ss:$16 sps:$4 sm:$0xff]  }
 0x2c1   :  { %v1471_v8 = vmul.f32 %v6175_v51, %v5700_v50  ;;  %v8019_v50 = vld [vmem:[#allocation11 + $0x64] ss:$16 sps:$4 sm:$0xff]   ;;  %v8021_v51 = vld [vmem:[#allocation11 + $0x6c] ss:$16 sps:$4 sm:$0xff]  }
 0x2c3   :  { %v7942_v32 = vadd.f32 %v1471_v8, %v1470_v9  ;;  %v8027_v8 = vld [vmem:[#allocation11 + $0x68] ss:$16 sps:$4 sm:$0xff]   ;;  %v8031_v9 = vld [vmem:[#allocation11 + $0x84] ss:$16 sps:$4 sm:$0xff]  }
 0x2c5   :  { %6178 = vtanh.f32 %v7942_v32 }
 0x2ca   :  { %v6177_v22 = vpop.eup %6176 }
 0x2cf   :  { %v6179_v62 = vpop.eup %6178 }
 0x2d0   :  { %v1474_v2 = vmul.f32 %v6179_v62, %v6177_v22  ;;  %v8033_v22 = vld [vmem:[#allocation11 + $0x8c] ss:$16 sps:$4 sm:$0xff]   ;;  %v8037_v62 = vld [vmem:[#allocation11 + $0x80] ss:$16 sps:$4 sm:$0xff]  }
 0x2d2   :  { %v7945_v63 = vpack.c.bf16 %v1474_v2, %v1474_v2  ;;  %v8039_v2 = vld [vmem:[#allocation11 + $0x88] ss:$16 sps:$4 sm:$0xff]  }
 0x2d4   :  { %1631 = vmatmul.mubr.bf16.vlgmr.msra.gmra.mrb[36].mxu0 %v7945_v63  ;;  %1672 = vmatmul.mubr.bf16.vlgmr.msra.gmra.mrb[36].mxu1 %v7945_v63 }
 0x2d5   :  { %1681 = vmatpush1.bf16.msra.mxu0 %v10808_v0  ;;  %1722 = vmatpush1.bf16.msra.mxu1 %v10809_v3  ;;  %v8043_v0 = vld [vmem:[#allocation11 + $0xa4] ss:$16 sps:$4 sm:$0xff]   ;;  %v8045_v3 = vld [vmem:[#allocation11 + $0xac] ss:$16 sps:$4 sm:$0xff]  }
 0x2d6   :  { %1682 = vmatprep.subr.bf16.mxu0 %v10810_v5  ;;  %1723 = vmatprep.subr.bf16.mxu1 %v10811_v6  ;;  %v8049_v5 = vld [vmem:[#allocation11 + $0xa0] ss:$16 sps:$4 sm:$0xff]   ;;  %v8051_v6 = vld [vmem:[#allocation11 + $0xa8] ss:$16 sps:$4 sm:$0xff]  }
 0x2d7   :  { %1712 = vmatprep.mubr.bf16.mxu0 %v10759_v4  ;;  %1753 = vmatprep.mubr.bf16.mxu1 %v10759_v4 }
 0x2d9   :  { %1683 = vmatpush1.bf16.msra.mxu0 %v10812_v12  ;;  %1724 = vmatpush1.bf16.msra.mxu1 %v10813_v13  ;;  %v8055_v12 = vld [vmem:[#allocation11 + $0xc4] ss:$16 sps:$4 sm:$0xff]   ;;  %v8057_v13 = vld [vmem:[#allocation11 + $0xcc] ss:$16 sps:$4 sm:$0xff]  }
 0x2da   :  { %1684 = vmatprep.subr.bf16.mxu0 %v10814_v35  ;;  %1725 = vmatprep.subr.bf16.mxu1 %v10815_v1  ;;  %v8061_v35 = vld [vmem:[#allocation11 + $0xc0] ss:$16 sps:$4 sm:$0xff]   ;;  %v8063_v1 = vld [vmem:[#allocation11 + $0xc8] ss:$16 sps:$4 sm:$0xff]  }
 0x2dd   :  { %1685 = vmatpush1.bf16.msra.mxu0 %v10816_v18  ;;  %1726 = vmatpush1.bf16.msra.mxu1 %v10817_v36  ;;  %v8067_v18 = vld [vmem:[#allocation11 + $0xe4] ss:$16 sps:$4 sm:$0xff]   ;;  %v8069_v36 = vld [vmem:[#allocation11 + $0xec] ss:$16 sps:$4 sm:$0xff]  }
 0x2de   :  { %1686 = vmatprep.subr.bf16.mxu0 %v10818_v37  ;;  %1727 = vmatprep.subr.bf16.mxu1 %v10819_v38  ;;  %v8073_v37 = vld [vmem:[#allocation11 + $0xe0] ss:$16 sps:$4 sm:$0xff]   ;;  %v8075_v38 = vld [vmem:[#allocation11 + $0xe8] ss:$16 sps:$4 sm:$0xff]  }
 0x2df   :  { %10834 = vst [vmem:[#allocation39_spill] sm:$0xff] %v8075_v38 }
 0x2e1   :  { %1687 = vmatpush1.bf16.msra.mxu0 %v10820_v39  ;;  %1728 = vmatpush1.bf16.msra.mxu1 %v10821_v43  ;;  %v8079_v39 = vld [vmem:[#allocation9 + $0x4] ss:$16 sps:$4 sm:$0xff]   ;;  %v8081_v43 = vld [vmem:[#allocation9 + $0xc] ss:$16 sps:$4 sm:$0xff]  }
 0x2e2   :  { %1688 = vmatprep.subr.bf16.mxu0 %v10822_v44  ;;  %1729 = vmatprep.subr.bf16.mxu1 %v10823_v7  ;;  %10835 = vst [vmem:[#allocation40_spill] sm:$0xff] %v8079_v39  ;;  %10836 = vst [vmem:[#allocation41_spill] sm:$0xff] %v8081_v43  ;;  %v8085_v44 = vld [vmem:[#allocation9] ss:$16 sps:$4 sm:$0xff]   ;;  %v8087_v7 = vld [vmem:[#allocation9 + $0x8] ss:$16 sps:$4 sm:$0xff]  }
 0x2e3   :  { %10837 = vst [vmem:[#allocation42_spill] sm:$0xff] %v8085_v44  ;;  %10838 = vst [vmem:[#allocation43_spill] sm:$0xff] %v8087_v7 }
 0x2e5   :  { %1689 = vmatpush1.bf16.msra.mxu0 %v10824_v26  ;;  %1730 = vmatpush1.bf16.msra.mxu1 %v10825_v15  ;;  %v8091_v26 = vld [vmem:[#allocation9 + $0x24] ss:$16 sps:$4 sm:$0xff]   ;;  %v8093_v15 = vld [vmem:[#allocation9 + $0x2c] ss:$16 sps:$4 sm:$0xff]  }
 0x2e6   :  { %1690 = vmatprep.subr.bf16.mxu0 %v10826_v31  ;;  %1731 = vmatprep.subr.bf16.mxu1 %v10827_v42  ;;  %10839 = vst [vmem:[#allocation44_spill] sm:$0xff] %v8091_v26  ;;  %10840 = vst [vmem:[#allocation45_spill] sm:$0xff] %v8093_v15  ;;  %v8099_v31 = vld [vmem:[#allocation9 + $0x20] ss:$16 sps:$4 sm:$0xff]   ;;  %v8101_v42 = vld [vmem:[#allocation9 + $0x28] ss:$16 sps:$4 sm:$0xff]  }
 0x2e7   :  { %10841 = vst [vmem:[#allocation46_spill] sm:$0xff] %v8099_v31  ;;  %10842 = vst [vmem:[#allocation47_spill] sm:$0xff] %v8101_v42 }
 0x2e9   :  { %1691 = vmatpush1.bf16.msra.mxu0 %v10828_v11  ;;  %1732 = vmatpush1.bf16.msra.mxu1 %v7777_v28  ;;  %v7985_v28 = vld [vmem:[#allocation11] ss:$16 sps:$4 sm:$0xff]   ;;  %v8105_v11 = vld [vmem:[#allocation9 + $0x44] ss:$16 sps:$4 sm:$0xff]  }
 0x2ea   :  { %1692 = vmatprep.subr.bf16.mxu0 %v10829_v27  ;;  %1733 = vmatprep.subr.bf16.mxu1 %v10830_v30  ;;  %10843 = vst [vmem:[#allocation48_spill] sm:$0xff] %v8105_v11  ;;  %v8107_v27 = vld [vmem:[#allocation9 + $0x4c] ss:$16 sps:$4 sm:$0xff]   ;;  %v8113_v30 = vld [vmem:[#allocation9 + $0x40] ss:$16 sps:$4 sm:$0xff]  }
 0x2eb   :  { %10844 = vst [vmem:[#allocation49_spill] sm:$0xff] %v8107_v27  ;;  %10845 = vst [vmem:[#allocation50_spill] sm:$0xff] %v8113_v30 }
 0x2ed   :  { %1693 = vmatpush1.bf16.msra.mxu0 %v7787_v20  ;;  %1734 = vmatpush1.bf16.msra.mxu1 %v10831_v10  ;;  %v7991_v20 = vld [vmem:[#allocation11 + $0x24] ss:$16 sps:$4 sm:$0xff]   ;;  %v8115_v10 = vld [vmem:[#allocation9 + $0x48] ss:$16 sps:$4 sm:$0xff]  }
 0x2ee   :  { %1694 = vmatprep.subr.bf16.mxu0 %v7793_v16  ;;  %1735 = vmatprep.subr.bf16.mxu1 %v10832_v47  ;;  %v7993_v16 = vld [vmem:[#allocation11 + $0x2c] ss:$16 sps:$4 sm:$0xff]   ;;  %10846 = vst [vmem:[#allocation51_spill] sm:$0xff] %v8115_v10  ;;  %v8119_v47 = vld [vmem:[#allocation9 + $0x64] ss:$16 sps:$4 sm:$0xff]  }
 0x2ef   :  { %10847 = vst [vmem:[#allocation52_spill] sm:$0xff] %v8119_v47 }
 0x2f1   :  { %1695 = vmatpush1.bf16.msra.mxu0 %v7799_v41  ;;  %1736 = vmatpush1.bf16.msra.mxu1 %v10833_v55  ;;  %v7999_v41 = vld [vmem:[#allocation11 + $0x20] ss:$16 sps:$4 sm:$0xff]   ;;  %v8121_v55 = vld [vmem:[#allocation9 + $0x6c] ss:$16 sps:$4 sm:$0xff]  }
 0x2f2   :  { %1957 = vmatprep.subr.bf16.mxu0 %v7979_v54  ;;  %1998 = vmatprep.subr.bf16.mxu1 %v7981_v45  ;;  %10848 = vst [vmem:[#allocation53_spill] sm:$0xff] %v8121_v55 }
 0x2f4   :  { %1713 = vmatmul.mubr.bf16.vlgmr.msra.gmra.mrb[40].mxu0 %v7885_v33  ;;  %1754 = vmatmul.mubr.bf16.vlgmr.msra.gmra.mrb[40].mxu1 %v7885_v33  ;;  %v8013_v33 = vld [vmem:[#allocation11 + $0x40] ss:$16 sps:$4 sm:$0xff]  }
 0x2f5   :  { %1958 = vmatpush1.bf16.msra.mxu0 %v7985_v28  ;;  %1999 = vmatpush1.bf16.msra.mxu1 %v7987_v46 }
 0x2f6   :  { %1959 = vmatprep.subr.bf16.mxu0 %v7991_v20  ;;  %2000 = vmatprep.subr.bf16.mxu1 %v7993_v16 }
 0x2f7   :  { %2030 = vmatprep.mubr.bf16.mxu1 %v10759_v4  ;;  %1989 = vmatprep.mubr.bf16.mxu0 %v10759_v4 }
 0x2f9   :  { %1960 = vmatpush1.bf16.msra.mxu0 %v7999_v41  ;;  %2001 = vmatpush1.bf16.msra.mxu1 %v8001_v34 }
 0x2fa   :  { %1961 = vmatprep.subr.bf16.mxu0 %v8005_v40  ;;  %2002 = vmatprep.subr.bf16.mxu1 %v8007_v48 }
 0x2fd   :  { %1962 = vmatpush1.bf16.msra.mxu0 %v8013_v33  ;;  %2003 = vmatpush1.bf16.msra.mxu1 %v8015_v49 }
 0x2fe   :  { %1963 = vmatprep.subr.bf16.mxu0 %v8019_v50  ;;  %2004 = vmatprep.subr.bf16.mxu1 %v8021_v51 }
 0x301   :  { %1964 = vmatpush1.bf16.msra.mxu0 %v8025_v52  ;;  %2005 = vmatpush1.bf16.msra.mxu1 %v8027_v8 }
 0x302   :  { %1965 = vmatprep.subr.bf16.mxu0 %v8031_v9  ;;  %2006 = vmatprep.subr.bf16.mxu1 %v8033_v22 }
 0x305   :  { %1966 = vmatpush1.bf16.msra.mxu0 %v8037_v62  ;;  %2007 = vmatpush1.bf16.msra.mxu1 %v8039_v2 }
 0x306   :  { %1967 = vmatprep.subr.bf16.mxu0 %v8043_v0  ;;  %2008 = vmatprep.subr.bf16.mxu1 %v8045_v3 }
 0x309   :  { %1968 = vmatpush1.bf16.msra.mxu0 %v8049_v5  ;;  %2009 = vmatpush1.bf16.msra.mxu1 %v8051_v6 }
 0x30a   :  { %1969 = vmatprep.subr.bf16.mxu0 %v8055_v12  ;;  %2010 = vmatprep.subr.bf16.mxu1 %v8057_v13 }
 0x30d   :  { %1970 = vmatpush1.bf16.msra.mxu0 %v8061_v35  ;;  %2011 = vmatpush1.bf16.msra.mxu1 %v8063_v1 }
 0x30e   :  { %1971 = vmatprep.subr.bf16.mxu0 %v8067_v18  ;;  %2012 = vmatprep.subr.bf16.mxu1 %v8069_v36 }
 0x311   :  { %1972 = vmatpush1.bf16.msra.mxu0 %v8073_v37  ;;  %2013 = vmatpush1.bf16.msra.mxu1 %v8075_v38 }
 0x312   :  { %2199 = vmatprep.subr.bf16.mxu0 %v8079_v39  ;;  %2240 = vmatprep.subr.bf16.mxu1 %v8081_v43 }
 0x314   :  { %2031 = vmatmul.mubr.bf16.vlgmr.msra.gmra.mrb[44].mxu1 %v10759_v4  ;;  %1990 = vmatmul.mubr.bf16.vlgmr.msra.gmra.mrb[44].mxu0 %v10759_v4 }
 0x315   :  { %2200 = vmatpush1.bf16.msra.mxu0 %v8085_v44  ;;  %2241 = vmatpush1.bf16.msra.mxu1 %v8087_v7 }
 0x316   :  { %2201 = vmatprep.subr.bf16.mxu0 %v8091_v26  ;;  %2242 = vmatprep.subr.bf16.mxu1 %v8093_v15  ;;  %v8125_v15 = vld [vmem:[#allocation9 + $0x60] ss:$16 sps:$4 sm:$0xff]  }
 0x317   :  { %2231 = vmatprep.mubr.bf16.mxu0 %v10759_v4  ;;  %2272 = vmatprep.mubr.bf16.mxu1 %v10759_v4  ;;  %10849 = vst [vmem:[#allocation54_spill] sm:$0xff] %v8125_v15 }
 0x319   :  { %2202 = vmatpush1.bf16.msra.mxu0 %v8099_v31  ;;  %2243 = vmatpush1.bf16.msra.mxu1 %v8101_v42  ;;  %v8127_v31 = vld [vmem:[#allocation9 + $0x68] ss:$16 sps:$4 sm:$0xff]   ;;  %v8131_v42 = vld [vmem:[#allocation9 + $0x84] ss:$16 sps:$4 sm:$0xff]  }
 0x31a   :  { %2203 = vmatprep.subr.bf16.mxu0 %v8105_v11  ;;  %2244 = vmatprep.subr.bf16.mxu1 %v8107_v27  ;;  %10850 = vst [vmem:[#allocation55_spill] sm:$0xff] %v8127_v31  ;;  %10851 = vst [vmem:[#allocation56_spill] sm:$0xff] %v8131_v42  ;;  %v8133_v11 = vld [vmem:[#allocation9 + $0x8c] ss:$16 sps:$4 sm:$0xff]   ;;  %v8137_v27 = vld [vmem:[#allocation9 + $0x80] ss:$16 sps:$4 sm:$0xff]  }
 0x31b   :  { %10852 = vst [vmem:[#allocation57_spill] sm:$0xff] %v8133_v11  ;;  %10853 = vst [vmem:[#allocation58_spill] sm:$0xff] %v8137_v27 }
 0x31d   :  { %2204 = vmatpush1.bf16.msra.mxu0 %v8113_v30  ;;  %2245 = vmatpush1.bf16.msra.mxu1 %v8115_v10  ;;  %v8139_v30 = vld [vmem:[#allocation9 + $0x88] ss:$16 sps:$4 sm:$0xff]   ;;  %v8143_v10 = vld [vmem:[#allocation9 + $0xa4] ss:$16 sps:$4 sm:$0xff]  }
 0x31e   :  { %2205 = vmatprep.subr.bf16.mxu0 %v8119_v47  ;;  %2246 = vmatprep.subr.bf16.mxu1 %v8121_v55  ;;  %10854 = vst [vmem:[#allocation59_spill] sm:$0xff] %v8139_v30  ;;  %10855 = vst [vmem:[#allocation60_spill] sm:$0xff] %v8143_v10  ;;  %v8145_v47 = vld [vmem:[#allocation9 + $0xac] ss:$16 sps:$4 sm:$0xff]   ;;  %v8149_v55 = vld [vmem:[#allocation9 + $0xa0] ss:$16 sps:$4 sm:$0xff]  }
 0x31f   :  { %10856 = vst [vmem:[#allocation61_spill] sm:$0xff] %v8145_v47  ;;  %10857 = vst [vmem:[#allocation62_spill] sm:$0xff] %v8149_v55 }
 0x321   :  { %2206 = vmatpush1.bf16.msra.mxu0 %v8125_v15  ;;  %2247 = vmatpush1.bf16.msra.mxu1 %v8127_v31  ;;  %v8151_v15 = vld [vmem:[#allocation9 + $0xa8] ss:$16 sps:$4 sm:$0xff]   ;;  %v8155_v31 = vld [vmem:[#allocation9 + $0xc4] ss:$16 sps:$4 sm:$0xff]  }
 0x322   :  { %2207 = vmatprep.subr.bf16.mxu0 %v8131_v42  ;;  %2248 = vmatprep.subr.bf16.mxu1 %v8133_v11  ;;  %10858 = vst [vmem:[#allocation63_spill] sm:$0xff] %v8151_v15  ;;  %10859 = vst [vmem:[#allocation64_spill] sm:$0xff] %v8155_v31  ;;  %v8157_v42 = vld [vmem:[#allocation9 + $0xcc] ss:$16 sps:$4 sm:$0xff]   ;;  %v8161_v11 = vld [vmem:[#allocation9 + $0xc0] ss:$16 sps:$4 sm:$0xff]  }
 0x323   :  { %10860 = vst [vmem:[#allocation65_spill] sm:$0xff] %v8157_v42  ;;  %10861 = vst [vmem:[#allocation66_spill] sm:$0xff] %v8161_v11 }
 0x325   :  { %2208 = vmatpush1.bf16.msra.mxu0 %v8137_v27  ;;  %2249 = vmatpush1.bf16.msra.mxu1 %v8139_v30  ;;  %v8163_v27 = vld [vmem:[#allocation9 + $0xc8] ss:$16 sps:$4 sm:$0xff]   ;;  %v8167_v30 = vld [vmem:[#allocation9 + $0xe4] ss:$16 sps:$4 sm:$0xff]  }
 0x326   :  { %2209 = vmatprep.subr.bf16.mxu0 %v8143_v10  ;;  %2250 = vmatprep.subr.bf16.mxu1 %v8145_v47  ;;  %10862 = vst [vmem:[#allocation67_spill] sm:$0xff] %v8163_v27  ;;  %10863 = vst [vmem:[#allocation68_spill] sm:$0xff] %v8167_v30  ;;  %v8169_v10 = vld [vmem:[#allocation9 + $0xec] ss:$16 sps:$4 sm:$0xff]   ;;  %v8173_v47 = vld [vmem:[#allocation9 + $0xe0] ss:$16 sps:$4 sm:$0xff]  }
 0x327   :  { %10864 = vst [vmem:[#allocation69_spill] sm:$0xff] %v8169_v10  ;;  %10865 = vst [vmem:[#allocation70_spill] sm:$0xff] %v8173_v47 }
 0x329   :  { %2210 = vmatpush1.bf16.msra.mxu0 %v8149_v55  ;;  %2251 = vmatpush1.bf16.msra.mxu1 %v8151_v15  ;;  %v8175_v55 = vld [vmem:[#allocation9 + $0xe8] ss:$16 sps:$4 sm:$0xff]   ;;  %v10871_v15 = vld [vmem:[#allocation75_spill] sm:$0xff] }
 0x32a   :  { %2211 = vmatprep.subr.bf16.mxu0 %v8155_v31  ;;  %2252 = vmatprep.subr.bf16.mxu1 %v8157_v42  ;;  %10866 = vst [vmem:[#allocation81_spill] sm:$0xff] %v8175_v55  ;;  %v10867_v42 = vld [vmem:[#allocation71_spill] sm:$0xff]  ;;  %v10868_v31 = vld [vmem:[#allocation72_spill] sm:$0xff] }
 0x32d   :  { %2212 = vmatpush1.bf16.msra.mxu0 %v8161_v11  ;;  %2253 = vmatpush1.bf16.msra.mxu1 %v8163_v27  ;;  %v10869_v27 = vld [vmem:[#allocation73_spill] sm:$0xff]  ;;  %v10870_v11 = vld [vmem:[#allocation74_spill] sm:$0xff] }
 0x32e   :  { %2213 = vmatprep.subr.bf16.mxu0 %v8167_v30  ;;  %2254 = vmatprep.subr.bf16.mxu1 %v8169_v10  ;;  %v10872_v30 = vld [vmem:[#allocation76_spill] sm:$0xff] }
 0x331   :  { %2214 = vmatpush1.bf16.msra.mxu0 %v8173_v47  ;;  %2255 = vmatpush1.bf16.msra.mxu1 %v8175_v55  ;;  %v10873_v55 = vld [vmem:[#allocation77_spill] sm:$0xff]  ;;  %v10876_v47 = vld [vmem:[#allocation80_spill] sm:$0xff] }
 0x332   :  { %2342 = vmatprep.subr.bf16.mxu0 %v10867_v42  ;;  %2383 = vmatprep.subr.bf16.mxu1 %v10868_v31  ;;  %v10874_v42 = vld [vmem:[#allocation78_spill] sm:$0xff]  ;;  %v10875_v31 = vld [vmem:[#allocation79_spill] sm:$0xff] }
 0x334   :  { %2232 = vmatmul.mubr.bf16.vlgmr.msra.gmra.mrb[48].mxu0 %v7945_v63  ;;  %2273 = vmatmul.mubr.bf16.vlgmr.msra.gmra.mrb[48].mxu1 %v7945_v63  ;;  %v8201_v63 = vld [vmem:[#allocation4 + $0x84] ss:$16 sps:$4 sm:$0xff]  }
 0x335   :  { %2343 = vmatpush1.bf16.msra.mxu0 %v10869_v27  ;;  %2384 = vmatpush1.bf16.msra.mxu1 %v10870_v11  ;;  %10877 = vst [vmem:[#allocation71_spill] sm:$0xff] %v8201_v63  ;;  %v8207_v11 = vld [vmem:[#allocation4 + $0x80] ss:$16 sps:$4 sm:$0xff]   ;;  %v8228_v27 = vld [vmem:[#allocation4 + $0xcc] ss:$16 sps:$4 sm:$0xff]  }
 0x336   :  { %2344 = vmatprep.subr.bf16.mxu0 %v10871_v15  ;;  %2385 = vmatprep.subr.bf16.mxu1 %v10872_v30  ;;  %v8204_v15 = vld [vmem:[#allocation4 + $0x8c] ss:$16 sps:$4 sm:$0xff]   ;;  %10879 = vst [vmem:[#allocation73_spill] sm:$0xff] %v8207_v11  ;;  %10886 = vst [vmem:[#allocation80_spill] sm:$0xff] %v8228_v27  ;;  %v8231_v30 = vld [vmem:[#allocation4 + $0xc0] ss:$16 sps:$4 sm:$0xff]  }
 0x337   :  { %2374 = vmatprep.mubr.bf16.mxu0 %v10759_v4  ;;  %2415 = vmatprep.mubr.bf16.mxu1 %v10759_v4  ;;  %10878 = vst [vmem:[#allocation72_spill] sm:$0xff] %v8204_v15  ;;  %10887 = vst [vmem:[#allocation82_spill] sm:$0xff] %v8231_v30 }
 0x339   :  { %2345 = vmatpush1.bf16.msra.mxu0 %v10873_v55  ;;  %2386 = vmatpush1.bf16.msra.mxu1 %v10874_v42  ;;  %v8237_v55 = vld [vmem:[#allocation4 + $0xe4] ss:$16 sps:$4 sm:$0xff]   ;;  %v8240_v42 = vld [vmem:[#allocation4 + $0xec] ss:$16 sps:$4 sm:$0xff]  }
 0x33a   :  { %2346 = vmatprep.subr.bf16.mxu0 %v10875_v31  ;;  %2387 = vmatprep.subr.bf16.mxu1 %v10876_v47  ;;  %v8234_v47 = vld [vmem:[#allocation4 + $0xc8] ss:$16 sps:$4 sm:$0xff]   ;;  %10889 = vst [vmem:[#allocation84_spill] sm:$0xff] %v8237_v55  ;;  %10890 = vst [vmem:[#allocation85_spill] sm:$0xff] %v8240_v42  ;;  %v8243_v31 = vld [vmem:[#allocation4 + $0xe0] ss:$16 sps:$4 sm:$0xff]  }
 0x33b   :  { %10888 = vst [vmem:[#allocation83_spill] sm:$0xff] %v8234_v47  ;;  %10891 = vst [vmem:[#allocation86_spill] sm:$0xff] %v8243_v31 }
 0x33d   :  { %2347 = vmatpush1.bf16.msra.mxu0 %v7841_v29  ;;  %2388 = vmatpush1.bf16.msra.mxu1 %v7844_v24  ;;  %v8210_v24 = vld [vmem:[#allocation4 + $0x88] ss:$16 sps:$4 sm:$0xff]  }
 0x33e   :  { %2348 = vmatprep.subr.bf16.mxu0 %v7847_v19  ;;  %2389 = vmatprep.subr.bf16.mxu1 %v7850_v25  ;;  %10880 = vst [vmem:[#allocation74_spill] sm:$0xff] %v8210_v24  ;;  %v8213_v25 = vld [vmem:[#allocation4 + $0xa4] ss:$16 sps:$4 sm:$0xff]   ;;  %v8222_v29 = vld [vmem:[#allocation4 + $0xa8] ss:$16 sps:$4 sm:$0xff]  }
 0x33f   :  { %10881 = vst [vmem:[#allocation75_spill] sm:$0xff] %v8213_v25  ;;  %10884 = vst [vmem:[#allocation78_spill] sm:$0xff] %v8222_v29  ;;  %v8225_v19 = vld [vmem:[#allocation4 + $0xc4] ss:$16 sps:$4 sm:$0xff]  }
 0x340   :  { %10885 = vst [vmem:[#allocation79_spill] sm:$0xff] %v8225_v19 }
 0x341   :  { %2349 = vmatpush1.bf16.msra.mxu0 %v7853_v21  ;;  %2390 = vmatpush1.bf16.msra.mxu1 %v7856_v17  ;;  %v8216_v17 = vld [vmem:[#allocation4 + $0xac] ss:$16 sps:$4 sm:$0xff]   ;;  %v8219_v21 = vld [vmem:[#allocation4 + $0xa0] ss:$16 sps:$4 sm:$0xff]  }
 0x342   :  { %2350 = vmatprep.subr.bf16.mxu0 %v8201_v63  ;;  %2391 = vmatprep.subr.bf16.mxu1 %v8204_v15  ;;  %10882 = vst [vmem:[#allocation76_spill] sm:$0xff] %v8216_v17  ;;  %10883 = vst [vmem:[#allocation77_spill] sm:$0xff] %v8219_v21  ;;  %v10898_v15 = vld [vmem:[#allocation17_spill] sm:$0xff] }
 0x345   :  { %2351 = vmatpush1.bf16.msra.mxu0 %v8207_v11  ;;  %2392 = vmatpush1.bf16.msra.mxu1 %v8210_v24  ;;  %v10897_v24 = vld [vmem:[#allocation18_spill] sm:$0xff] }
 0x346   :  { %2352 = vmatprep.subr.bf16.mxu0 %v8213_v25  ;;  %2393 = vmatprep.subr.bf16.mxu1 %v8216_v17 }
 0x349   :  { %2353 = vmatpush1.bf16.msra.mxu0 %v8219_v21  ;;  %2394 = vmatpush1.bf16.msra.mxu1 %v8222_v29  ;;  %v10895_v29 = vld [vmem:[#allocation16_spill] sm:$0xff]  ;;  %v10896_v21 = vld [vmem:[#allocation15_spill] sm:$0xff] }
 0x34a   :  { %2354 = vmatprep.subr.bf16.mxu0 %v8225_v19  ;;  %2395 = vmatprep.subr.bf16.mxu1 %v8228_v27  ;;  %v8246_v27 = vld [vmem:[#allocation4 + $0xe8] ss:$16 sps:$4 sm:$0xff]  }
 0x34b   :  { %10892 = vst [vmem:[#allocation87_spill] sm:$0xff] %v8246_v27 }
 0x34d   :  { %2355 = vmatpush1.bf16.msra.mxu0 %v8231_v30  ;;  %2396 = vmatpush1.bf16.msra.mxu1 %v8234_v47  ;;  %v8249_v30 = vld [vmem:[#allocation8 + $0x4] ss:$16 sps:$4 sm:$0xff]   ;;  %v8252_v47 = vld [vmem:[#allocation8 + $0xc] ss:$16 sps:$4 sm:$0xff]  }
 0x34e   :  { %2356 = vmatprep.subr.bf16.mxu0 %v8237_v55  ;;  %2397 = vmatprep.subr.bf16.mxu1 %v8240_v42  ;;  %10893 = vst [vmem:[#allocation88_spill] sm:$0xff] %v8249_v30  ;;  %10894 = vst [vmem:[#allocation89_spill] sm:$0xff] %v8252_v47 }
 0x351   :  { %2357 = vmatpush1.bf16.msra.mxu0 %v8243_v31  ;;  %2398 = vmatpush1.bf16.msra.mxu1 %v8246_v27 }
 0x352   :  { %2460 = vmatprep.subr.bf16.mxu0 %v8249_v30  ;;  %2501 = vmatprep.subr.bf16.mxu1 %v8252_v47 }
 0x365   :  { %v1514_v55 = vpop.f32.mrb[32].mxu0  ;;  %v1555_v19 = vpop.f32.mrb[32].mxu1 }
 0x366   :  { %v1562_v42 = vadd.f32 %v1514_v55, %v10895_v29  ;;  %v1564_v17 = vadd.f32 %v1555_v19, %v10896_v21  ;;  %v1516_v25 = vpop.f32.mrb[33].mxu0  ;;  %v1557_v31 = vpop.f32.mrb[33].mxu1 }
 0x367   :  { %v1563_v11 = vadd.f32 %v1516_v25, %v10897_v24  ;;  %v1565_v27 = vadd.f32 %v1557_v31, %v10898_v15  ;;  %v1518_v63 = vpop.f32.mrb[34].mxu0  ;;  %v1559_v10 = vpop.f32.mrb[34].mxu1  ;;  %v8281_v31 = vld [vmem:[#allocation8 + $0x20] ss:$16 sps:$4 sm:$0xff]  }
 0x368   :  { %v5701_v26 = vmul.f32 -1.442695, %v1562_v42  ;;  %v5703_v30 = vmul.f32 -1.442695, %v1564_v17  ;;  %v1519_v7 = vpop.f32.mrb[35].mxu0  ;;  %v1560_v44 = vpop.f32.mrb[35].mxu1 }
 0x369   :  { %v5702_v43 = vmul.f32 -1.442695, %v1563_v11  ;;  %v5704_v55 = vmul.f32 -1.442695, %v1565_v27  ;;  %v8276_v42 = vld [vmem:[#allocation8 + $0x2c] ss:$16 sps:$4 sm:$0xff]  }
 0x36a   :  { %6180 = vpow2.f32 %v5701_v26  ;;  %10903 = vst [vmem:[#allocation90_spill] sm:$0xff] %v8276_v42  ;;  %10904 = vst [vmem:[#allocation91_spill] sm:$0xff] %v8281_v31 }
 0x36b   :  { %6182 = vpow2.f32 %v5703_v30 }
 0x36c   :  { %6184 = vpow2.f32 %v5702_v43 }
 0x374   :  { %v6181_v47 = vpop.eup %6180 }
 0x375   :  { %v6183_v29 = vpop.eup %6182  ;;  %v1578_v38 = vadd.f32 1.0, %v6181_v47  ;;  %v8270_v47 = vld [vmem:[#allocation8 + $0x8] ss:$16 sps:$4 sm:$0xff]  }
 0x376   :  { %v6185_v21 = vpop.eup %6184  ;;  %v1580_v19 = vadd.f32 1.0, %v6183_v29  ;;  %10901 = vst [vmem:[#allocation18_spill] sm:$0xff] %v8270_v47  ;;  %v8284_v29 = vld [vmem:[#allocation8 + $0x28] ss:$16 sps:$4 sm:$0xff]  }
 0x377   :  { %v1579_v39 = vadd.f32 1.0, %v6185_v21  ;;  %10905 = vst [vmem:[#allocation92_spill] sm:$0xff] %v8284_v29  ;;  %v8290_v21 = vld [vmem:[#allocation8 + $0x4c] ss:$16 sps:$4 sm:$0xff]  }
 0x378   :  { %6186 = vrcp.f32 %v1580_v19  ;;  %10907 = vst [vmem:[#allocation94_spill] sm:$0xff] %v8290_v21  ;;  %v8293_v19 = vld [vmem:[#allocation8 + $0x40] ss:$16 sps:$4 sm:$0xff]  }
 0x379   :  { %6188 = vpow2.f32 %v5704_v55  ;;  %v8287_v55 = vld [vmem:[#allocation8 + $0x44] ss:$16 sps:$4 sm:$0xff]   ;;  %10908 = vst [vmem:[#allocation95_spill] sm:$0xff] %v8293_v19 }
 0x37a   :  { %6190 = vrcp.f32 %v1579_v39  ;;  %10906 = vst [vmem:[#allocation93_spill] sm:$0xff] %v8287_v55 }
 0x37b   :  { %6192 = vrcp.f32 %v1578_v38  ;;  %v8267_v38 = vld [vmem:[#allocation8] ss:$16 sps:$4 sm:$0xff]  }
 0x37c   :  { %10900 = vst [vmem:[#allocation15_spill] sm:$0xff] %v8267_v38 }
 0x382   :  { %v6187_v10 = vpop.eup %6186 }
 0x383   :  { %v6189_v63 = vpop.eup %6188  ;;  %v1590_v15 = vmul.f32 2.0, %v6187_v10  ;;  %v8296_v10 = vld [vmem:[#allocation8 + $0x48] ss:$16 sps:$4 sm:$0xff]  }
 0x384   :  { %v6191_v7 = vpop.eup %6190  ;;  %v1581_v26 = vadd.f32 1.0, %v6189_v63  ;;  %10909 = vst [vmem:[#allocation96_spill] sm:$0xff] %v8296_v10  ;;  %v8299_v63 = vld [vmem:[#allocation8 + $0x64] ss:$16 sps:$4 sm:$0xff]  }
 0x385   :  { %v5705_v44 = vadd.f32 -1.0, %v1590_v15  ;;  %v6193_v11 = vpop.eup %6192  ;;  %v1592_v43 = vmul.f32 %v6191_v7, %v7882_v53  ;;  %v8273_v53 = vld [vmem:[#allocation8 + $0x24] ss:$16 sps:$4 sm:$0xff]   ;;  %10910 = vst [vmem:[#allocation97_spill] sm:$0xff] %v8299_v63  ;;  %v8302_v15 = vld [vmem:[#allocation8 + $0x6c] ss:$16 sps:$4 sm:$0xff]  }
 0x386   :  { %6194 = vrcp.f32 %v1581_v26  ;;  %10902 = vst [vmem:[#allocation17_spill] sm:$0xff] %v8273_v53  ;;  %10911 = vst [vmem:[#allocation98_spill] sm:$0xff] %v8302_v15  ;;  %v8308_v26 = vld [vmem:[#allocation8 + $0x68] ss:$16 sps:$4 sm:$0xff]  }
 0x387   :  { %v1593_v24 = vmul.f32 %v6193_v11, %v5705_v44  ;;  %v8305_v11 = vld [vmem:[#allocation8 + $0x60] ss:$16 sps:$4 sm:$0xff]   ;;  %10913 = vst [vmem:[#allocation100_spill] sm:$0xff] %v8308_v26 }
 0x388   :  { %10912 = vst [vmem:[#allocation99_spill] sm:$0xff] %v8305_v11 }
 0x389   :  { %v8260_v25 = vadd.f32 %v1593_v24, %v1592_v43 }
 0x38b   :  { %10899 = vst [vmem:[#allocation16_spill] sm:$0xff] %v8260_v25  ;;  %6196 = vtanh.f32 %v8260_v25 }
 0x390   :  { %v6195_v17 = vpop.eup %6194 }
 0x395   :  { %v6197_v27 = vpop.eup %6196 }
 0x396   :  { %v1596_v30 = vmul.f32 %v6197_v27, %v6195_v17  ;;  %v8311_v17 = vld [vmem:[#allocation8 + $0x84] ss:$16 sps:$4 sm:$0xff]   ;;  %v8314_v27 = vld [vmem:[#allocation8 + $0x8c] ss:$16 sps:$4 sm:$0xff]  }
 0x397   :  { %10914 = vst [vmem:[#allocation101_spill] sm:$0xff] %v8311_v17  ;;  %10915 = vst [vmem:[#allocation102_spill] sm:$0xff] %v8314_v27 }
 0x398   :  { %v8263_v39 = vpack.c.bf16 %v1596_v30, %v1596_v30 }
 0x39a   :  { %2375 = vmatmul.mubr.bf16.vlgmr.msra.gmra.mrb[52].mxu0 %v8263_v39  ;;  %2416 = vmatmul.mubr.bf16.vlgmr.msra.gmra.mrb[52].mxu1 %v8263_v39 }
 0x39b   :  { %2461 = vmatpush1.bf16.msra.mxu0 %v8267_v38  ;;  %2502 = vmatpush1.bf16.msra.mxu1 %v8270_v47 }
 0x39c   :  { %2462 = vmatprep.subr.bf16.mxu0 %v8273_v53  ;;  %2503 = vmatprep.subr.bf16.mxu1 %v8276_v42 }
 0x39d   :  { %2492 = vmatprep.mubr.bf16.mxu0 %v10759_v4  ;;  %2533 = vmatprep.mubr.bf16.mxu1 %v10759_v4 }
 0x39f   :  { %2463 = vmatpush1.bf16.msra.mxu0 %v8281_v31  ;;  %2504 = vmatpush1.bf16.msra.mxu1 %v8284_v29 }
 0x3a0   :  { %2464 = vmatprep.subr.bf16.mxu0 %v8287_v55  ;;  %2505 = vmatprep.subr.bf16.mxu1 %v8290_v21 }
 0x3a3   :  { %2465 = vmatpush1.bf16.msra.mxu0 %v8293_v19  ;;  %2506 = vmatpush1.bf16.msra.mxu1 %v8296_v10  ;;  %v8317_v19 = vld [vmem:[#allocation8 + $0x80] ss:$16 sps:$4 sm:$0xff]  }
 0x3a4   :  { %2466 = vmatprep.subr.bf16.mxu0 %v8299_v63  ;;  %2507 = vmatprep.subr.bf16.mxu1 %v8302_v15  ;;  %10916 = vst [vmem:[#allocation103_spill] sm:$0xff] %v8317_v19 }
 0x3a7   :  { %v1632_v7 = vpop.f32.mrb[36].mxu0  ;;  %v1673_v44 = vpop.f32.mrb[36].mxu1  ;;  %2467 = vmatpush1.bf16.msra.mxu0 %v8305_v11  ;;  %2508 = vmatpush1.bf16.msra.mxu1 %v8308_v26  ;;  %v8320_v11 = vld [vmem:[#allocation8 + $0x88] ss:$16 sps:$4 sm:$0xff]   ;;  %v8323_v26 = vld [vmem:[#allocation8 + $0xa4] ss:$16 sps:$4 sm:$0xff]  }
 0x3a8   :  { %v1634_v24 = vpop.f32.mrb[37].mxu0  ;;  %v1675_v43 = vpop.f32.mrb[37].mxu1  ;;  %2468 = vmatprep.subr.bf16.mxu0 %v8311_v17  ;;  %2509 = vmatprep.subr.bf16.mxu1 %v8314_v27  ;;  %10917 = vst [vmem:[#allocation104_spill] sm:$0xff] %v8320_v11  ;;  %10918 = vst [vmem:[#allocation105_spill] sm:$0xff] %v8323_v26  ;;  %v8326_v17 = vld [vmem:[#allocation8 + $0xac] ss:$16 sps:$4 sm:$0xff]  }
 0x3a9   :  { %v1636_v30 = vpop.f32.mrb[38].mxu0  ;;  %v1677_v15 = vpop.f32.mrb[38].mxu1  ;;  %10919 = vst [vmem:[#allocation106_spill] sm:$0xff] %v8326_v17 }
 0x3aa   :  { %v1637_v63 = vpop.f32.mrb[39].mxu0  ;;  %v1678_v10 = vpop.f32.mrb[39].mxu1  ;;  %v8329_v30 = vld [vmem:[#allocation8 + $0xa0] ss:$16 sps:$4 sm:$0xff]   ;;  %v8338_v15 = vld [vmem:[#allocation8 + $0xcc] ss:$16 sps:$4 sm:$0xff]  }
 0x3ab   :  { %2469 = vmatpush1.bf16.msra.mxu0 %v8317_v19  ;;  %2510 = vmatpush1.bf16.msra.mxu1 %v8320_v11  ;;  %10920 = vst [vmem:[#allocation107_spill] sm:$0xff] %v8329_v30  ;;  %v8332_v10 = vld [vmem:[#allocation8 + $0xa8] ss:$16 sps:$4 sm:$0xff]   ;;  %v8335_v63 = vld [vmem:[#allocation8 + $0xc4] ss:$16 sps:$4 sm:$0xff]   ;;  %10923 = vst [vmem:[#allocation110_spill] sm:$0xff] %v8338_v15 }
 0x3ac   :  { %2470 = vmatprep.subr.bf16.mxu0 %v8323_v26  ;;  %2511 = vmatprep.subr.bf16.mxu1 %v8326_v17  ;;  %10921 = vst [vmem:[#allocation108_spill] sm:$0xff] %v8332_v10  ;;  %10922 = vst [vmem:[#allocation109_spill] sm:$0xff] %v8335_v63  ;;  %v8341_v26 = vld [vmem:[#allocation8 + $0xc0] ss:$16 sps:$4 sm:$0xff]   ;;  %v8344_v17 = vld [vmem:[#allocation8 + $0xc8] ss:$16 sps:$4 sm:$0xff]  }
 0x3ad   :  { %10924 = vst [vmem:[#allocation111_spill] sm:$0xff] %v8341_v26  ;;  %10925 = vst [vmem:[#allocation112_spill] sm:$0xff] %v8344_v17 }
 0x3af   :  { %2471 = vmatpush1.bf16.msra.mxu0 %v8329_v30  ;;  %2512 = vmatpush1.bf16.msra.mxu1 %v8332_v10  ;;  %v8347_v30 = vld [vmem:[#allocation8 + $0xe4] ss:$16 sps:$4 sm:$0xff]   ;;  %v8350_v10 = vld [vmem:[#allocation8 + $0xec] ss:$16 sps:$4 sm:$0xff]  }
 0x3b0   :  { %2472 = vmatprep.subr.bf16.mxu0 %v8335_v63  ;;  %2513 = vmatprep.subr.bf16.mxu1 %v8338_v15  ;;  %10926 = vst [vmem:[#allocation113_spill] sm:$0xff] %v8347_v30  ;;  %10927 = vst [vmem:[#allocation114_spill] sm:$0xff] %v8350_v10  ;;  %v8353_v63 = vld [vmem:[#allocation8 + $0xe0] ss:$16 sps:$4 sm:$0xff]   ;;  %v8356_v15 = vld [vmem:[#allocation8 + $0xe8] ss:$16 sps:$4 sm:$0xff]  }
 0x3b1   :  { %10928 = vst [vmem:[#allocation115_spill] sm:$0xff] %v8353_v63  ;;  %10929 = vst [vmem:[#allocation116_spill] sm:$0xff] %v8356_v15 }
 0x3b3   :  { %2473 = vmatpush1.bf16.msra.mxu0 %v8341_v26  ;;  %2514 = vmatpush1.bf16.msra.mxu1 %v8344_v17  ;;  %v8359_v26 = vld [vmem:[#allocation6 + $0x4] ss:$16 sps:$4 sm:$0xff]   ;;  %v8362_v17 = vld [vmem:[#allocation6 + $0xc] ss:$16 sps:$4 sm:$0xff]  }
 0x3b4   :  { %2474 = vmatprep.subr.bf16.mxu0 %v8347_v30  ;;  %2515 = vmatprep.subr.bf16.mxu1 %v8350_v10  ;;  %10930 = vst [vmem:[#allocation117_spill] sm:$0xff] %v8359_v26  ;;  %10931 = vst [vmem:[#allocation118_spill] sm:$0xff] %v8362_v17 }
 0x3b7   :  { %2475 = vmatpush1.bf16.msra.mxu0 %v8353_v63  ;;  %2516 = vmatpush1.bf16.msra.mxu1 %v8356_v15 }
 0x3b8   :  { %2542 = vmatprep.subr.bf16.mxu0 %v8359_v26  ;;  %2583 = vmatprep.subr.bf16.mxu1 %v8362_v17 }
 0x3c7   :  { %v1714_v30 = vpop.f32.mrb[40].mxu0  ;;  %v1755_v11 = vpop.f32.mrb[40].mxu1 }
 0x3c8   :  { %v1715_v19 = vadd.f32 %v1714_v30, %v1632_v7  ;;  %v1756_v10 = vadd.f32 %v1755_v11, %v1673_v44  ;;  %v1716_v27 = vpop.f32.mrb[41].mxu0  ;;  %v1757_v21 = vpop.f32.mrb[41].mxu1 }
 0x3c9   :  { %v1717_v55 = vadd.f32 %v1716_v27, %v1634_v24  ;;  %v1758_v63 = vadd.f32 %v1757_v21, %v1675_v43  ;;  %v1718_v29 = vpop.f32.mrb[42].mxu0  ;;  %v1759_v31 = vpop.f32.mrb[42].mxu1 }
 0x3ca   :  { %v1762_v15 = vadd.f32 %v1715_v19, %v7905_v59  ;;  %v1764_v42 = vadd.f32 %v1756_v10, %v7908_v14  ;;  %v1719_v53 = vpop.f32.mrb[43].mxu0  ;;  %v1760_v26 = vpop.f32.mrb[43].mxu1 }
 0x3cb   :  { %v1763_v47 = vadd.f32 %v1717_v55, %v7913_v61  ;;  %v1765_v7 = vadd.f32 %v1758_v63, %v7927_v23 }
 0x3cc   :  { %v5706_v38 = vmul.f32 -1.442695, %v1762_v15  ;;  %v5708_v17 = vmul.f32 -1.442695, %v1764_v42 }
 0x3cd   :  { %v5707_v25 = vmul.f32 -1.442695, %v1763_v47  ;;  %v5709_v29 = vmul.f32 -1.442695, %v1765_v7 }
 0x3ce   :  { %6198 = vpow2.f32 %v5706_v38 }
 0x3cf   :  { %6200 = vpow2.f32 %v5708_v17 }
 0x3d0   :  { %6202 = vpow2.f32 %v5707_v25 }
 0x3d8   :  { %v6199_v44 = vpop.eup %6198 }
 0x3d9   :  { %v6201_v21 = vpop.eup %6200  ;;  %v1778_v24 = vadd.f32 1.0, %v6199_v44 }
 0x3da   :  { %v6203_v31 = vpop.eup %6202  ;;  %v1780_v11 = vadd.f32 1.0, %v6201_v21 }
 0x3db   :  { %v1779_v19 = vadd.f32 1.0, %v6203_v31 }
 0x3dc   :  { %6204 = vrcp.f32 %v1780_v11 }
 0x3dd   :  { %6206 = vpow2.f32 %v5709_v29 }
 0x3de   :  { %6208 = vrcp.f32 %v1779_v19 }
 0x3df   :  { %6210 = vrcp.f32 %v1778_v24 }
 0x3e6   :  { %v6205_v53 = vpop.eup %6204 }
 0x3e7   :  { %v6207_v55 = vpop.eup %6206  ;;  %v1790_v42 = vmul.f32 2.0, %v6205_v53  ;;  %v2032_v47 = vpop.f32.mrb[44].mxu1  ;;  %v8377_v53 = vld [vmem:[#allocation6] ss:$16 sps:$4 sm:$0xff]  }
 0x3e8   :  { %v1991_v38 = vpop.f32.mrb[44].mxu0  ;;  %v6209_v26 = vpop.eup %6208  ;;  %v1781_v63 = vadd.f32 1.0, %v6207_v55  ;;  %v8380_v55 = vld [vmem:[#allocation6 + $0x8] ss:$16 sps:$4 sm:$0xff]  }
 0x3e9   :  { %v2034_v25 = vpop.f32.mrb[45].mxu1  ;;  %v1993_v43 = vpop.f32.mrb[45].mxu0  ;;  %v5710_v17 = vadd.f32 -1.0, %v1790_v42  ;;  %v1792_v21 = vmul.f32 %v6209_v26, %v7942_v32  ;;  %v8383_v32 = vld [vmem:[#allocation6 + $0x24] ss:$16 sps:$4 sm:$0xff]  }
 0x3ea   :  { %v2036_v27 = vpop.f32.mrb[46].mxu1  ;;  %v1995_v30 = vpop.f32.mrb[46].mxu0  ;;  %6212 = vrcp.f32 %v1781_v63  ;;  %10932 = vst [vmem:[#allocation119_spill] sm:$0xff] %v8383_v32  ;;  %v8386_v42 = vld [vmem:[#allocation6 + $0x2c] ss:$16 sps:$4 sm:$0xff]  }
 0x3eb   :  { %v6211_v10 = vpop.eup %6210  ;;  %v2037_v15 = vpop.f32.mrb[47].mxu1  ;;  %10933 = vst [vmem:[#allocation120_spill] sm:$0xff] %v8386_v42  ;;  %v8391_v26 = vld [vmem:[#allocation6 + $0x20] ss:$16 sps:$4 sm:$0xff]   ;;  %v8400_v30 = vld [vmem:[#allocation6 + $0x44] ss:$16 sps:$4 sm:$0xff]  }
 0x3ec   :  { %v1996_v7 = vpop.f32.mrb[47].mxu0  ;;  %v1793_v44 = vmul.f32 %v6211_v10, %v5710_v17  ;;  %10934 = vst [vmem:[#allocation121_spill] sm:$0xff] %v8391_v26  ;;  %v8394_v17 = vld [vmem:[#allocation6 + $0x28] ss:$16 sps:$4 sm:$0xff]   ;;  %v531_v27 = vld [vmem:[%s10385_s9] sm:$0xf] }
 0x3ed   :  { %10935 = vst [vmem:[#allocation122_spill] sm:$0xff] %v8394_v17  ;;  %10936 = vst [vmem:[#allocation123_spill] sm:$0xff] %v8400_v30  ;;  %v8403_v10 = vld [vmem:[#allocation6 + $0x4c] ss:$16 sps:$4 sm:$0xff]   ;;  %v8407_v63 = vrot.slane %v531_v27, %v7511_v56  ;;  %v8410_v15 = vrot.slane %v531_v27, %v7515_v58  ;;  %v8412_v7 = vld [vmem:[#allocation6 + $0x40] ss:$16 sps:$4 sm:$0xff]  }
 0x3ee   :  { %v8370_v29 = vadd.f32 %v1793_v44, %v1792_v21  ;;  %10937 = vst [vmem:[#allocation124_spill] sm:$0xff] %v8403_v10  ;;  %10938 = vst [vmem:[#allocation125_spill] sm:$0xff] %v8412_v7  ;;  %v8415_v44 = vld [vmem:[#allocation6 + $0x48] ss:$16 sps:$4 sm:$0xff]   ;;  %v8424_v58 = vld [vmem:[#allocation6 + $0x6c] ss:$16 sps:$4 sm:$0xff]  }
 0x3ef   :  { %10939 = vst [vmem:[#allocation126_spill] sm:$0xff] %v8415_v44 }
 0x3f0   :  { %6214 = vtanh.f32 %v8370_v29 }
 0x3f4   :  { %v6213_v31 = vpop.eup %6212 }
 0x3fa   :  { %v6215_v11 = vpop.eup %6214 }
 0x3fb   :  { %v1796_v19 = vmul.f32 %v6215_v11, %v6213_v31  ;;  %v8419_v11 = vrot.slane %v531_v27, %v7513_v57 }
 0x3fd   :  { %v8373_v24 = vpack.c.bf16 %v1796_v19, %v1796_v19 }
 0x3ff   :  { %2493 = vmatmul.mubr.bf16.vlgmr.msra.gmra.mrb[56].mxu0 %v8373_v24  ;;  %2534 = vmatmul.mubr.bf16.vlgmr.msra.gmra.mrb[56].mxu1 %v8373_v24 }
 0x400   :  { %2543 = vmatpush1.bf16.msra.mxu0 %v8377_v53  ;;  %2584 = vmatpush1.bf16.msra.mxu1 %v8380_v55 }
 0x401   :  { %2544 = vmatprep.subr.bf16.mxu0 %v8383_v32  ;;  %2585 = vmatprep.subr.bf16.mxu1 %v8386_v42 }
 0x402   :  { %2574 = vmatprep.mubr.bf16.mxu0 %v10759_v4  ;;  %2615 = vmatprep.mubr.bf16.mxu1 %v10759_v4 }
 0x404   :  { %2545 = vmatpush1.bf16.msra.mxu0 %v8391_v26  ;;  %2586 = vmatpush1.bf16.msra.mxu1 %v8394_v17  ;;  %v8421_v17 = vld [vmem:[#allocation6 + $0x64] ss:$16 sps:$4 sm:$0xff]  }
 0x405   :  { %2546 = vmatprep.subr.bf16.mxu0 %v8400_v30  ;;  %2587 = vmatprep.subr.bf16.mxu1 %v8403_v10  ;;  %10940 = vst [vmem:[#allocation127_spill] sm:$0xff] %v8421_v17 }
 0x407   :  { %v2233_v21 = vpop.f32.mrb[48].mxu0  ;;  %v2274_v31 = vpop.f32.mrb[48].mxu1 }
 0x408   :  { %2547 = vmatpush1.bf16.msra.mxu0 %v8412_v7  ;;  %2588 = vmatpush1.bf16.msra.mxu1 %v8415_v44  ;;  %v2234_v19 = vadd.f32 %v2233_v21, %v1991_v38  ;;  %v2275_v10 = vadd.f32 %v2274_v31, %v2032_v47  ;;  %v2235_v56 = vpop.f32.mrb[49].mxu0  ;;  %v2276_v30 = vpop.f32.mrb[49].mxu1  ;;  %v8430_v31 = vld [vmem:[#allocation6 + $0x60] ss:$16 sps:$4 sm:$0xff]  }
 0x409   :  { %2548 = vmatprep.subr.bf16.mxu0 %v8421_v17  ;;  %2589 = vmatprep.subr.bf16.mxu1 %v8424_v58  ;;  %v2236_v7 = vadd.f32 %v2235_v56, %v1993_v43  ;;  %v2277_v26 = vadd.f32 %v2276_v30, %v2034_v25  ;;  %v2237_v44 = vpop.f32.mrb[50].mxu0  ;;  %v2278_v42 = vpop.f32.mrb[50].mxu1  ;;  %v8433_v17 = vld [vmem:[#allocation6 + $0x68] ss:$16 sps:$4 sm:$0xff]   ;;  %v8436_v30 = vld [vmem:[#allocation6 + $0x84] ss:$16 sps:$4 sm:$0xff]   ;;  %v8455_v56 = vrot.slane %v531_v27, %v7520_v60 }
 0x40a   :  { %v2302_v32 = vadd.f32 %v8407_v63, %v2234_v19  ;;  %v2304_v57 = vadd.f32 %v8410_v15, %v2275_v10  ;;  %v2238_v38 = vpop.f32.mrb[51].mxu0  ;;  %v2279_v47 = vpop.f32.mrb[51].mxu1  ;;  %v8439_v42 = vld [vmem:[#allocation6 + $0x8c] ss:$16 sps:$4 sm:$0xff]   ;;  %v8445_v44 = vld [vmem:[#allocation6 + $0x88] ss:$16 sps:$4 sm:$0xff]  }
 0x40b   :  { %v2303_v21 = vadd.f32 %v8419_v11, %v2236_v7  ;;  %v8442_v7 = vld [vmem:[#allocation6 + $0x80] ss:$16 sps:$4 sm:$0xff]   ;;  %v8451_v19 = vld [vmem:[#allocation6 + $0xac] ss:$16 sps:$4 sm:$0xff]   ;;  %10942 = vst [vmem:[#allocation129_spill] sm:$0xff] %v8455_v56 }
 0x40c   :  { %2549 = vmatpush1.bf16.msra.mxu0 %v8430_v31  ;;  %2590 = vmatpush1.bf16.msra.mxu1 %v8433_v17  ;;  %v5775_v43 = vmul.f32 -1.442695, %v2302_v32  ;;  %v5777_v25 = vmul.f32 -1.442695, %v2304_v57  ;;  %v8448_v32 = vld [vmem:[#allocation6 + $0xa4] ss:$16 sps:$4 sm:$0xff]  }
 0x40d   :  { %2550 = vmatprep.subr.bf16.mxu0 %v8436_v30  ;;  %2591 = vmatprep.subr.bf16.mxu1 %v8439_v42  ;;  %v5776_v10 = vmul.f32 -1.442695, %v2303_v21  ;;  %10941 = vst [vmem:[#allocation128_spill] sm:$0xff] %v8451_v19  ;;  %v8457_v57 = vld [vmem:[#allocation6 + $0xa0] ss:$16 sps:$4 sm:$0xff]  }
 0x40e   :  { %6216 = vpow2.f32 %v5775_v43  ;;  %10943 = vst [vmem:[#allocation130_spill] sm:$0xff] %v8457_v57  ;;  %v8460_v38 = vld [vmem:[#allocation6 + $0xa8] ss:$16 sps:$4 sm:$0xff]   ;;  %v8463_v47 = vld [vmem:[#allocation6 + $0xc4] ss:$16 sps:$4 sm:$0xff]   ;;  %v2305_v43 = vadd.f32 %v8455_v56, %v2277_v26 }
 0x40f   :  { %6218 = vpow2.f32 %v5777_v25  ;;  %10944 = vst [vmem:[#allocation131_spill] sm:$0xff] %v8460_v38  ;;  %10945 = vst [vmem:[#allocation132_spill] sm:$0xff] %v8463_v47  ;;  %v8466_v21 = vld [vmem:[#allocation6 + $0xcc] ss:$16 sps:$4 sm:$0xff]   ;;  %v8470_v60 = vld [vmem:[#allocation6 + $0xc0] ss:$16 sps:$4 sm:$0xff]  }
 0x410   :  { %2551 = vmatpush1.bf16.msra.mxu0 %v8442_v7  ;;  %2592 = vmatpush1.bf16.msra.mxu1 %v8445_v44  ;;  %6220 = vpow2.f32 %v5776_v10  ;;  %10946 = vst [vmem:[#allocation133_spill] sm:$0xff] %v8466_v21  ;;  %10947 = vst [vmem:[#allocation134_spill] sm:$0xff] %v8470_v60  ;;  %v8473_v27 = vld [vmem:[#allocation6 + $0xc8] ss:$16 sps:$4 sm:$0xff]   ;;  %v8476_v10 = vld [vmem:[#allocation6 + $0xe4] ss:$16 sps:$4 sm:$0xff]  }
 0x411   :  { %2552 = vmatprep.subr.bf16.mxu0 %v8448_v32  ;;  %2593 = vmatprep.subr.bf16.mxu1 %v8451_v19  ;;  %10948 = vst [vmem:[#allocation135_spill] sm:$0xff] %v8473_v27  ;;  %v8482_v19 = vld [vmem:[#allocation6 + $0xe0] ss:$16 sps:$4 sm:$0xff]  }
 0x414   :  { %2553 = vmatpush1.bf16.msra.mxu0 %v8457_v57  ;;  %2594 = vmatpush1.bf16.msra.mxu1 %v8460_v38  ;;  %v5778_v38 = vmul.f32 -1.442695, %v2305_v43  ;;  %v10971_v43 = vld [vmem:[#allocation61_spill] sm:$0xff] }
 0x415   :  { %2554 = vmatprep.subr.bf16.mxu0 %v8463_v47  ;;  %2595 = vmatprep.subr.bf16.mxu1 %v8466_v21  ;;  %v8479_v47 = vld [vmem:[#allocation6 + $0xec] ss:$16 sps:$4 sm:$0xff]  }
 0x418   :  { %2555 = vmatpush1.bf16.msra.mxu0 %v8470_v60  ;;  %2596 = vmatpush1.bf16.msra.mxu1 %v8473_v27  ;;  %v6217_v25 = vpop.eup %6216  ;;  %v8485_v60 = vld [vmem:[#allocation6 + $0xe8] ss:$16 sps:$4 sm:$0xff]  }
 0x419   :  { %2556 = vmatprep.subr.bf16.mxu0 %v8476_v10  ;;  %2597 = vmatprep.subr.bf16.mxu1 %v8479_v47  ;;  %v6219_v21 = vpop.eup %6218  ;;  %v2318_v27 = vadd.f32 1.0, %v6217_v25  ;;  %v10973_v25 = vld [vmem:[#allocation63_spill] sm:$0xff] }
 0x41a   :  { %v6221_v26 = vpop.eup %6220  ;;  %v2320_v56 = vadd.f32 1.0, %v6219_v21  ;;  %v10970_v21 = vld [vmem:[#allocation60_spill] sm:$0xff] }
 0x41b   :  { %v2319_v57 = vadd.f32 1.0, %v6221_v26  ;;  %v10974_v26 = vld [vmem:[#allocation64_spill] sm:$0xff] }
 0x41c   :  { %2557 = vmatpush1.bf16.msra.mxu0 %v8482_v19  ;;  %2598 = vmatpush1.bf16.msra.mxu1 %v8485_v60  ;;  %6222 = vrcp.f32 %v2320_v56  ;;  %v10967_v56 = vld [vmem:[#allocation57_spill] sm:$0xff] }
 0x41d   :  { %2660 = vmatprep.subr.bf16.mxu0 %v7979_v54  ;;  %2701 = vmatprep.subr.bf16.mxu1 %v7981_v45  ;;  %6224 = vpow2.f32 %v5778_v38  ;;  %v10969_v38 = vld [vmem:[#allocation59_spill] sm:$0xff] }
 0x41e   :  { %6226 = vrcp.f32 %v2319_v57  ;;  %v10968_v57 = vld [vmem:[#allocation58_spill] sm:$0xff] }
 0x41f   :  { %2575 = vmatmul.mubr.bf16.vlgmr.msra.gmra.mrb[60].mxu0 %v8263_v39  ;;  %2616 = vmatmul.mubr.bf16.vlgmr.msra.gmra.mrb[60].mxu1 %v8263_v39  ;;  %6228 = vrcp.f32 %v2318_v27  ;;  %v10972_v27 = vld [vmem:[#allocation62_spill] sm:$0xff] }
 0x420   :  { %2661 = vmatpush1.bf16.msra.mxu0 %v7985_v28  ;;  %2702 = vmatpush1.bf16.msra.mxu1 %v7987_v46 }
 0x421   :  { %2662 = vmatprep.subr.bf16.mxu0 %v7991_v20  ;;  %2703 = vmatprep.subr.bf16.mxu1 %v7993_v16 }
 0x422   :  { %2692 = vmatprep.mubr.bf16.mxu0 %v10759_v4  ;;  %2733 = vmatprep.mubr.bf16.mxu1 %v10759_v4 }
 0x424   :  { %2663 = vmatpush1.bf16.msra.mxu0 %v7999_v41  ;;  %2704 = vmatpush1.bf16.msra.mxu1 %v8001_v34 }
 0x425   :  { %2664 = vmatprep.subr.bf16.mxu0 %v8005_v40  ;;  %2705 = vmatprep.subr.bf16.mxu1 %v8007_v48 }
 0x426   :  { %v6223_v54 = vpop.eup %6222 }
 0x427   :  { %v6225_v45 = vpop.eup %6224  ;;  %v2330_v28 = vmul.f32 2.0, %v6223_v54  ;;  %v10975_v54 = vld [vmem:[#allocation65_spill] sm:$0xff] }
 0x428   :  { %2665 = vmatpush1.bf16.msra.mxu0 %v8013_v33  ;;  %2706 = vmatpush1.bf16.msra.mxu1 %v8015_v49  ;;  %v6227_v46 = vpop.eup %6226  ;;  %v2321_v41 = vadd.f32 1.0, %v6225_v45  ;;  %v10976_v45 = vld [vmem:[#allocation66_spill] sm:$0xff] }
 0x429   :  { %2666 = vmatprep.subr.bf16.mxu0 %v8019_v50  ;;  %2707 = vmatprep.subr.bf16.mxu1 %v8021_v51  ;;  %v5779_v20 = vadd.f32 -1.0, %v2330_v28  ;;  %v6229_v16 = vpop.eup %6228  ;;  %v2332_v39 = vmul.f32 0.0, %v6227_v46  ;;  %v10949_v50 = vld [vmem:[#allocation39_spill] sm:$0xff]  ;;  %v10950_v51 = vld [vmem:[#allocation40_spill] sm:$0xff] }
 0x42a   :  { %6230 = vrcp.f32 %v2321_v41  ;;  %v10977_v28 = vld [vmem:[#allocation67_spill] sm:$0xff]  ;;  %v10978_v46 = vld [vmem:[#allocation68_spill] sm:$0xff]  ;;  %v10981_v41 = vld [vmem:[#allocation81_spill] sm:$0xff] }
 0x42b   :  { %v2333_v34 = vmul.f32 %v6229_v16, %v5779_v20  ;;  %v10979_v20 = vld [vmem:[#allocation69_spill] sm:$0xff]  ;;  %v10980_v16 = vld [vmem:[#allocation70_spill] sm:$0xff] }
 0x42c   :  { %2667 = vmatpush1.bf16.msra.mxu0 %v8025_v52  ;;  %2708 = vmatpush1.bf16.msra.mxu1 %v8027_v8  ;;  %v10951_v52 = vld [vmem:[#allocation41_spill] sm:$0xff] }
 0x42d   :  { %2668 = vmatprep.subr.bf16.mxu0 %v8031_v9  ;;  %2709 = vmatprep.subr.bf16.mxu1 %v8033_v22  ;;  %v8510_v40 = vadd.f32 %v2333_v34, %v2332_v39  ;;  %v10952_v9 = vld [vmem:[#allocation42_spill] sm:$0xff]  ;;  %v10953_v22 = vld [vmem:[#allocation43_spill] sm:$0xff] }
 0x42e   :  { %v8561_v34 = vld [vmem:[#allocation4 + $0x4] ss:$16 sps:$4 sm:$0xff]   ;;  %v8564_v39 = vld [vmem:[#allocation4 + $0xc] ss:$16 sps:$4 sm:$0xff]  }
 0x42f   :  { %6232 = vtanh.f32 %v8510_v40 }
 0x430   :  { %2669 = vmatpush1.bf16.msra.mxu0 %v8037_v62  ;;  %2710 = vmatpush1.bf16.msra.mxu1 %v8039_v2  ;;  %v10954_v62 = vld [vmem:[#allocation44_spill] sm:$0xff]  ;;  %v10955_v2 = vld [vmem:[#allocation45_spill] sm:$0xff] }
 0x431   :  { %2670 = vmatprep.subr.bf16.mxu0 %v8043_v0  ;;  %2711 = vmatprep.subr.bf16.mxu1 %v8045_v3  ;;  %v10956_v0 = vld [vmem:[#allocation46_spill] sm:$0xff]  ;;  %v10957_v3 = vld [vmem:[#allocation47_spill] sm:$0xff] }
 0x434   :  { %2671 = vmatpush1.bf16.msra.mxu0 %v8049_v5  ;;  %2712 = vmatpush1.bf16.msra.mxu1 %v8051_v6  ;;  %v6231_v48 = vpop.eup %6230  ;;  %v10958_v5 = vld [vmem:[#allocation48_spill] sm:$0xff]  ;;  %v10959_v6 = vld [vmem:[#allocation49_spill] sm:$0xff] }
 0x435   :  { %2672 = vmatprep.subr.bf16.mxu0 %v8055_v12  ;;  %2713 = vmatprep.subr.bf16.mxu1 %v8057_v13  ;;  %v10960_v12 = vld [vmem:[#allocation50_spill] sm:$0xff]  ;;  %v10961_v13 = vld [vmem:[#allocation51_spill] sm:$0xff] }
 0x438   :  { %2673 = vmatpush1.bf16.msra.mxu0 %v8061_v35  ;;  %2714 = vmatpush1.bf16.msra.mxu1 %v8063_v1  ;;  %v10962_v35 = vld [vmem:[#allocation52_spill] sm:$0xff]  ;;  %v10963_v1 = vld [vmem:[#allocation53_spill] sm:$0xff] }
 0x439   :  { %2674 = vmatprep.subr.bf16.mxu0 %v8067_v18  ;;  %2715 = vmatprep.subr.bf16.mxu1 %v8069_v36  ;;  %v6233_v33 = vpop.eup %6232  ;;  %v10964_v18 = vld [vmem:[#allocation54_spill] sm:$0xff]  ;;  %v10965_v36 = vld [vmem:[#allocation55_spill] sm:$0xff] }
 0x43a   :  { %v2336_v49 = vmul.f32 %v6233_v33, %v6231_v48  ;;  %v8569_v48 = vld [vmem:[#allocation4] ss:$16 sps:$4 sm:$0xff]   ;;  %v8572_v33 = vld [vmem:[#allocation4 + $0x8] ss:$16 sps:$4 sm:$0xff]  }
 0x43c   :  { %2675 = vmatpush1.bf16.msra.mxu0 %v8073_v37  ;;  %2716 = vmatpush1.bf16.msra.mxu1 %v10949_v50  ;;  %v2659_v8 = vpack.c.bf16 %v2336_v49, %v2336_v49  ;;  %v10966_v37 = vld [vmem:[#allocation56_spill] sm:$0xff]  ;;  %v8575_v49 = vld [vmem:[#allocation4 + $0x24] ss:$16 sps:$4 sm:$0xff]  }
 0x43d   :  { %2742 = vmatprep.subr.bf16.mxu0 %v10950_v51  ;;  %2783 = vmatprep.subr.bf16.mxu1 %v10951_v52  ;;  %v8578_v50 = vld [vmem:[#allocation4 + $0x2c] ss:$16 sps:$4 sm:$0xff]   ;;  %v8586_v51 = vld [vmem:[#allocation4 + $0x28] ss:$16 sps:$4 sm:$0xff]   ;;  %v8589_v52 = vld [vmem:[#allocation4 + $0x44] ss:$16 sps:$4 sm:$0xff]  }
 0x43f   :  { %2693 = vmatmul.mubr.bf16.vlgmr.msra.gmra.mrb[64].mxu0 %v2659_v8  ;;  %2734 = vmatmul.mubr.bf16.vlgmr.msra.gmra.mrb[64].mxu1 %v2659_v8  ;;  %v8592_v8 = vld [vmem:[#allocation4 + $0x4c] ss:$16 sps:$4 sm:$0xff]  }
 0x440   :  { %2743 = vmatpush1.bf16.msra.mxu0 %v10952_v9  ;;  %2784 = vmatpush1.bf16.msra.mxu1 %v10953_v22  ;;  %v8595_v9 = vld [vmem:[#allocation4 + $0x40] ss:$16 sps:$4 sm:$0xff]   ;;  %v8598_v22 = vld [vmem:[#allocation4 + $0x48] ss:$16 sps:$4 sm:$0xff]  }
 0x441   :  { %2744 = vmatprep.subr.bf16.mxu0 %v10954_v62  ;;  %2785 = vmatprep.subr.bf16.mxu1 %v10955_v2  ;;  %v8601_v62 = vld [vmem:[#allocation4 + $0x64] ss:$16 sps:$4 sm:$0xff]   ;;  %v8604_v2 = vld [vmem:[#allocation4 + $0x6c] ss:$16 sps:$4 sm:$0xff]  }
 0x442   :  { %2774 = vmatprep.mubr.bf16.mxu0 %v10759_v4  ;;  %2815 = vmatprep.mubr.bf16.mxu1 %v10759_v4 }
 0x444   :  { %2745 = vmatpush1.bf16.msra.mxu0 %v10956_v0  ;;  %2786 = vmatpush1.bf16.msra.mxu1 %v10957_v3  ;;  %v8607_v0 = vld [vmem:[#allocation4 + $0x60] ss:$16 sps:$4 sm:$0xff]   ;;  %v8610_v3 = vld [vmem:[#allocation4 + $0x68] ss:$16 sps:$4 sm:$0xff]  }
 0x445   :  { %2746 = vmatprep.subr.bf16.mxu0 %v10958_v5  ;;  %2787 = vmatprep.subr.bf16.mxu1 %v10959_v6  ;;  %v10982_v5 = vld [vmem:[#allocation71_spill] sm:$0xff]  ;;  %v10983_v6 = vld [vmem:[#allocation72_spill] sm:$0xff] }
 0x448   :  { %2747 = vmatpush1.bf16.msra.mxu0 %v10960_v12  ;;  %2788 = vmatpush1.bf16.msra.mxu1 %v10961_v13 }
 0x449   :  { %2748 = vmatprep.subr.bf16.mxu0 %v10962_v35  ;;  %2789 = vmatprep.subr.bf16.mxu1 %v10963_v1  ;;  %v10984_v35 = vld [vmem:[#allocation20_spill] sm:$0xff] }
 0x44c   :  { %2749 = vmatpush1.bf16.msra.mxu0 %v10964_v18  ;;  %2790 = vmatpush1.bf16.msra.mxu1 %v10965_v36  ;;  %v10985_v18 = vld [vmem:[#allocation19_spill] sm:$0xff] }
 0x44d   :  { %2750 = vmatprep.subr.bf16.mxu0 %v10966_v37  ;;  %2791 = vmatprep.subr.bf16.mxu1 %v10967_v56 }
 0x450   :  { %2751 = vmatpush1.bf16.msra.mxu0 %v10968_v57  ;;  %2792 = vmatpush1.bf16.msra.mxu1 %v10969_v38  ;;  %v10986_v57 = vld [vmem:[#allocation22_spill] sm:$0xff] }
 0x451   :  { %2752 = vmatprep.subr.bf16.mxu0 %v10970_v21  ;;  %2793 = vmatprep.subr.bf16.mxu1 %v10971_v43  ;;  %v10987_v21 = vld [vmem:[#allocation21_spill] sm:$0xff] }
 0x454   :  { %2753 = vmatpush1.bf16.msra.mxu0 %v10972_v27  ;;  %2794 = vmatpush1.bf16.msra.mxu1 %v10973_v25 }
 0x455   :  { %2754 = vmatprep.subr.bf16.mxu0 %v10974_v26  ;;  %2795 = vmatprep.subr.bf16.mxu1 %v10975_v54  ;;  %v10988_v26 = vld [vmem:[#allocation73_spill] sm:$0xff]  ;;  %v10989_v54 = vld [vmem:[#allocation74_spill] sm:$0xff] }
 0x458   :  { %2755 = vmatpush1.bf16.msra.mxu0 %v10976_v45  ;;  %2796 = vmatpush1.bf16.msra.mxu1 %v10977_v28 }
 0x459   :  { %2756 = vmatprep.subr.bf16.mxu0 %v10978_v46  ;;  %2797 = vmatprep.subr.bf16.mxu1 %v10979_v20 }
 0x45c   :  { %2757 = vmatpush1.bf16.msra.mxu0 %v10980_v16  ;;  %2798 = vmatpush1.bf16.msra.mxu1 %v10981_v41  ;;  %v10990_v16 = vld [vmem:[#allocation75_spill] sm:$0xff]  ;;  %v10991_v41 = vld [vmem:[#allocation76_spill] sm:$0xff] }
 0x45d   :  { %2864 = vmatprep.subr.bf16.mxu0 %v8561_v34  ;;  %2905 = vmatprep.subr.bf16.mxu1 %v8564_v39 }
 0x45f   :  { %2775 = vmatmul.mubr.bf16.vlgmr.msra.gmra.mrb[68].mxu0 %v8373_v24  ;;  %2816 = vmatmul.mubr.bf16.vlgmr.msra.gmra.mrb[68].mxu1 %v8373_v24  ;;  %v8583_v24 = vld [vmem:[#allocation4 + $0x20] ss:$16 sps:$4 sm:$0xff]  }
 0x460   :  { %2865 = vmatpush1.bf16.msra.mxu0 %v8569_v48  ;;  %2906 = vmatpush1.bf16.msra.mxu1 %v8572_v33 }
 0x461   :  { %2866 = vmatprep.subr.bf16.mxu0 %v8575_v49  ;;  %2907 = vmatprep.subr.bf16.mxu1 %v8578_v50 }
 0x462   :  { %2896 = vmatprep.mubr.bf16.mxu0 %v10759_v4  ;;  %2937 = vmatprep.mubr.bf16.mxu1 %v10759_v4 }
 0x464   :  { %2867 = vmatpush1.bf16.msra.mxu0 %v8583_v24  ;;  %2908 = vmatpush1.bf16.msra.mxu1 %v8586_v51 }
 0x465   :  { %2868 = vmatprep.subr.bf16.mxu0 %v8589_v52  ;;  %2909 = vmatprep.subr.bf16.mxu1 %v8592_v8 }
 0x468   :  { %2869 = vmatpush1.bf16.msra.mxu0 %v8595_v9  ;;  %2910 = vmatpush1.bf16.msra.mxu1 %v8598_v22 }
 0x469   :  { %2870 = vmatprep.subr.bf16.mxu0 %v8601_v62  ;;  %2911 = vmatprep.subr.bf16.mxu1 %v8604_v2 }
 0x46c   :  { %2871 = vmatpush1.bf16.msra.mxu0 %v8607_v0  ;;  %2912 = vmatpush1.bf16.msra.mxu1 %v8610_v3 }
 0x46d   :  { %2872 = vmatprep.subr.bf16.mxu0 %v10982_v5  ;;  %2913 = vmatprep.subr.bf16.mxu1 %v10983_v6  ;;  %v2376_v12 = vpop.f32.mrb[52].mxu0  ;;  %v2417_v13 = vpop.f32.mrb[52].mxu1  ;;  %v10992_v6 = vld [vmem:[#allocation77_spill] sm:$0xff] }
 0x46e   :  { %v2424_v1 = vadd.f32 %v2376_v12, %v10984_v35  ;;  %v2426_v36 = vadd.f32 %v2417_v13, %v10985_v18  ;;  %v2378_v37 = vpop.f32.mrb[53].mxu0  ;;  %v2419_v56 = vpop.f32.mrb[53].mxu1  ;;  %v10993_v12 = vld [vmem:[#allocation78_spill] sm:$0xff]  ;;  %v10994_v13 = vld [vmem:[#allocation79_spill] sm:$0xff]  ;;  %v10995_v35 = vld [vmem:[#allocation80_spill] sm:$0xff] }
 0x46f   :  { %v2425_v38 = vadd.f32 %v2378_v37, %v10986_v57  ;;  %v2427_v43 = vadd.f32 %v2419_v56, %v10987_v21  ;;  %v2380_v27 = vpop.f32.mrb[54].mxu0  ;;  %v2421_v25 = vpop.f32.mrb[54].mxu1  ;;  %v10997_v18 = vld [vmem:[#allocation83_spill] sm:$0xff]  ;;  %v10999_v37 = vld [vmem:[#allocation85_spill] sm:$0xff]  ;;  %v11000_v56 = vld [vmem:[#allocation86_spill] sm:$0xff] }
 0x470   :  { %2873 = vmatpush1.bf16.msra.mxu0 %v10988_v26  ;;  %2914 = vmatpush1.bf16.msra.mxu1 %v10989_v54  ;;  %v5780_v45 = vmul.f32 -1.442695, %v2424_v1  ;;  %v5782_v28 = vmul.f32 -1.442695, %v2426_v36  ;;  %v2381_v46 = vpop.f32.mrb[55].mxu0  ;;  %v2422_v20 = vpop.f32.mrb[55].mxu1 }
 0x471   :  { %2874 = vmatprep.subr.bf16.mxu0 %v10990_v16  ;;  %2915 = vmatprep.subr.bf16.mxu1 %v10991_v41  ;;  %v5781_v5 = vmul.f32 -1.442695, %v2425_v38  ;;  %v10996_v1 = vld [vmem:[#allocation82_spill] sm:$0xff]  ;;  %v10998_v36 = vld [vmem:[#allocation84_spill] sm:$0xff]  ;;  %v11001_v57 = vld [vmem:[#allocation87_spill] sm:$0xff] }
 0x472   :  { %6234 = vpow2.f32 %v5780_v45  ;;  %v11002_v21 = vld [vmem:[#allocation88_spill] sm:$0xff]  ;;  %v11003_v27 = vld [vmem:[#allocation89_spill] sm:$0xff]  ;;  %v5783_v26 = vmul.f32 -1.442695, %v2427_v43 }
 0x473   :  { %6236 = vpow2.f32 %v5782_v28 }
 0x474   :  { %2875 = vmatpush1.bf16.msra.mxu0 %v10992_v6  ;;  %2916 = vmatpush1.bf16.msra.mxu1 %v10993_v12  ;;  %6238 = vpow2.f32 %v5781_v5 }
 0x475   :  { %2876 = vmatprep.subr.bf16.mxu0 %v10994_v13  ;;  %2917 = vmatprep.subr.bf16.mxu1 %v10995_v35 }
 0x478   :  { %2877 = vmatpush1.bf16.msra.mxu0 %v10996_v1  ;;  %2918 = vmatpush1.bf16.msra.mxu1 %v10997_v18  ;;  %v11004_v1 = vld [vmem:[#allocation16_spill] sm:$0xff] }
 0x479   :  { %2878 = vmatprep.subr.bf16.mxu0 %v10998_v36  ;;  %2919 = vmatprep.subr.bf16.mxu1 %v10999_v37 }
 0x47c   :  { %2879 = vmatpush1.bf16.msra.mxu0 %v11000_v56  ;;  %2920 = vmatpush1.bf16.msra.mxu1 %v11001_v57  ;;  %v6235_v38 = vpop.eup %6234 }
 0x47d   :  { %2982 = vmatprep.subr.bf16.mxu0 %v11002_v21  ;;  %3023 = vmatprep.subr.bf16.mxu1 %v11003_v27  ;;  %v6237_v25 = vpop.eup %6236  ;;  %v2440_v46 = vadd.f32 1.0, %v6235_v38  ;;  %v11005_v38 = vld [vmem:[#allocation15_spill] sm:$0xff]  ;;  %v11006_v21 = vld [vmem:[#allocation18_spill] sm:$0xff]  ;;  %v11007_v27 = vld [vmem:[#allocation17_spill] sm:$0xff] }
 0x47e   :  { %v6239_v54 = vpop.eup %6238  ;;  %v2442_v45 = vadd.f32 1.0, %v6237_v25  ;;  %v11008_v25 = vld [vmem:[#allocation90_spill] sm:$0xff] }
 0x47f   :  { %v2441_v28 = vadd.f32 1.0, %v6239_v54  ;;  %v11010_v54 = vld [vmem:[#allocation92_spill] sm:$0xff] }
 0x480   :  { %6240 = vrcp.f32 %v2442_v45  ;;  %v11011_v45 = vld [vmem:[#allocation93_spill] sm:$0xff] }
 0x481   :  { %6242 = vpow2.f32 %v5783_v26  ;;  %v11009_v26 = vld [vmem:[#allocation91_spill] sm:$0xff] }
 0x482   :  { %6244 = vrcp.f32 %v2441_v28  ;;  %v11012_v28 = vld [vmem:[#allocation94_spill] sm:$0xff] }
 0x483   :  { %6246 = vrcp.f32 %v2440_v46  ;;  %v11013_v46 = vld [vmem:[#allocation95_spill] sm:$0xff] }
 0x48a   :  { %v6241_v20 = vpop.eup %6240 }
 0x48b   :  { %v6243_v16 = vpop.eup %6242  ;;  %v2452_v41 = vmul.f32 2.0, %v6241_v20  ;;  %v11014_v20 = vld [vmem:[#allocation96_spill] sm:$0xff] }
 0x48c   :  { %v6245_v5 = vpop.eup %6244  ;;  %v2443_v13 = vadd.f32 1.0, %v6243_v16  ;;  %v11015_v16 = vld [vmem:[#allocation97_spill] sm:$0xff] }
 0x48d   :  { %v5784_v6 = vadd.f32 -1.0, %v2452_v41  ;;  %v6247_v12 = vpop.eup %6246  ;;  %v2454_v18 = vmul.f32 %v6245_v5, %v11004_v1  ;;  %v11016_v41 = vld [vmem:[#allocation98_spill] sm:$0xff]  ;;  %v11017_v5 = vld [vmem:[#allocation99_spill] sm:$0xff]  ;;  %v11022_v1 = vld [vmem:[#allocation104_spill] sm:$0xff] }
 0x48e   :  { %6248 = vrcp.f32 %v2443_v13  ;;  %v11020_v13 = vld [vmem:[#allocation102_spill] sm:$0xff] }
 0x48f   :  { %v2455_v35 = vmul.f32 %v6247_v12, %v5784_v6  ;;  %v11018_v6 = vld [vmem:[#allocation100_spill] sm:$0xff]  ;;  %v11019_v12 = vld [vmem:[#allocation101_spill] sm:$0xff] }
 0x491   :  { %v8636_v36 = vadd.f32 %v2455_v35, %v2454_v18  ;;  %v11021_v35 = vld [vmem:[#allocation103_spill] sm:$0xff]  ;;  %v11023_v18 = vld [vmem:[#allocation105_spill] sm:$0xff] }
 0x493   :  { %6250 = vtanh.f32 %v8636_v36 }
 0x498   :  { %v6249_v43 = vpop.eup %6248 }
 0x49d   :  { %v6251_v37 = vpop.eup %6250 }
 0x49e   :  { %v2458_v56 = vmul.f32 %v6251_v37, %v6249_v43  ;;  %v11024_v43 = vld [vmem:[#allocation106_spill] sm:$0xff]  ;;  %v11025_v37 = vld [vmem:[#allocation107_spill] sm:$0xff] }
 0x4a0   :  { %v8639_v57 = vpack.c.bf16 %v2458_v56, %v2458_v56  ;;  %v11026_v56 = vld [vmem:[#allocation108_spill] sm:$0xff] }
 0x4a2   :  { %2897 = vmatmul.mubr.bf16.vlgmr.msra.gmra.mrb[72].mxu0 %v8639_v57  ;;  %2938 = vmatmul.mubr.bf16.vlgmr.msra.gmra.mrb[72].mxu1 %v8639_v57 }
 0x4a3   :  { %2983 = vmatpush1.bf16.msra.mxu0 %v11005_v38  ;;  %3024 = vmatpush1.bf16.msra.mxu1 %v11006_v21  ;;  %v11027_v38 = vld [vmem:[#allocation109_spill] sm:$0xff]  ;;  %v11028_v21 = vld [vmem:[#allocation110_spill] sm:$0xff] }
 0x4a4   :  { %2984 = vmatprep.subr.bf16.mxu0 %v11007_v27  ;;  %3025 = vmatprep.subr.bf16.mxu1 %v11008_v25  ;;  %v11029_v27 = vld [vmem:[#allocation111_spill] sm:$0xff]  ;;  %v11030_v25 = vld [vmem:[#allocation112_spill] sm:$0xff] }
 0x4a5   :  { %3014 = vmatprep.mubr.bf16.mxu0 %v10759_v4  ;;  %3055 = vmatprep.mubr.bf16.mxu1 %v10759_v4 }
 0x4a7   :  { %2985 = vmatpush1.bf16.msra.mxu0 %v11009_v26  ;;  %3026 = vmatpush1.bf16.msra.mxu1 %v11010_v54  ;;  %v11031_v26 = vld [vmem:[#allocation113_spill] sm:$0xff]  ;;  %v11032_v54 = vld [vmem:[#allocation114_spill] sm:$0xff] }
 0x4a8   :  { %2986 = vmatprep.subr.bf16.mxu0 %v11011_v45  ;;  %3027 = vmatprep.subr.bf16.mxu1 %v11012_v28  ;;  %v11033_v45 = vld [vmem:[#allocation115_spill] sm:$0xff]  ;;  %v11034_v28 = vld [vmem:[#allocation116_spill] sm:$0xff] }
 0x4ab   :  { %2987 = vmatpush1.bf16.msra.mxu0 %v11013_v46  ;;  %3028 = vmatpush1.bf16.msra.mxu1 %v11014_v20  ;;  %v11035_v46 = vld [vmem:[#allocation117_spill] sm:$0xff]  ;;  %v11036_v20 = vld [vmem:[#allocation118_spill] sm:$0xff] }
 0x4ac   :  { %2988 = vmatprep.subr.bf16.mxu0 %v11015_v16  ;;  %3029 = vmatprep.subr.bf16.mxu1 %v11016_v41 }
 0x4af   :  { %2989 = vmatpush1.bf16.msra.mxu0 %v11017_v5  ;;  %3030 = vmatpush1.bf16.msra.mxu1 %v11018_v6 }
 0x4b0   :  { %2990 = vmatprep.subr.bf16.mxu0 %v11019_v12  ;;  %3031 = vmatprep.subr.bf16.mxu1 %v11020_v13 }
 0x4b3   :  { %2991 = vmatpush1.bf16.msra.mxu0 %v11021_v35  ;;  %3032 = vmatpush1.bf16.msra.mxu1 %v11022_v1 }
 0x4b4   :  { %2992 = vmatprep.subr.bf16.mxu0 %v11023_v18  ;;  %3033 = vmatprep.subr.bf16.mxu1 %v11024_v43 }
 0x4b7   :  { %2993 = vmatpush1.bf16.msra.mxu0 %v11025_v37  ;;  %3034 = vmatpush1.bf16.msra.mxu1 %v11026_v56 }
 0x4b8   :  { %2994 = vmatprep.subr.bf16.mxu0 %v11027_v38  ;;  %3035 = vmatprep.subr.bf16.mxu1 %v11028_v21 }
 0x4bb   :  { %2995 = vmatpush1.bf16.msra.mxu0 %v11029_v27  ;;  %3036 = vmatpush1.bf16.msra.mxu1 %v11030_v25 }
 0x4bc   :  { %2996 = vmatprep.subr.bf16.mxu0 %v11031_v26  ;;  %3037 = vmatprep.subr.bf16.mxu1 %v11032_v54 }
 0x4bf   :  { %2997 = vmatpush1.bf16.msra.mxu0 %v11033_v45  ;;  %3038 = vmatpush1.bf16.msra.mxu1 %v11034_v28 }
 0x4c0   :  { %3064 = vmatprep.subr.bf16.mxu0 %v11035_v46  ;;  %3105 = vmatprep.subr.bf16.mxu1 %v11036_v20 }
 0x4d2   :  { %v2494_v16 = vpop.f32.mrb[56].mxu0  ;;  %v2535_v41 = vpop.f32.mrb[56].mxu1 }
 0x4d3   :  { %v2496_v5 = vpop.f32.mrb[57].mxu0  ;;  %v2537_v6 = vpop.f32.mrb[57].mxu1 }
 0x4d4   :  { %v2498_v12 = vpop.f32.mrb[58].mxu0  ;;  %v2539_v13 = vpop.f32.mrb[58].mxu1 }
 0x4d5   :  { %v2499_v35 = vpop.f32.mrb[59].mxu0  ;;  %v2540_v1 = vpop.f32.mrb[59].mxu1 }
 0x4f2   :  { %v2576_v18 = vpop.f32.mrb[60].mxu0  ;;  %v2617_v43 = vpop.f32.mrb[60].mxu1 }
 0x4f3   :  { %v2577_v37 = vadd.f32 %v2576_v18, %v2494_v16  ;;  %v2618_v56 = vadd.f32 %v2617_v43, %v2535_v41  ;;  %v2578_v38 = vpop.f32.mrb[61].mxu0  ;;  %v2619_v21 = vpop.f32.mrb[61].mxu1 }
 0x4f4   :  { %v2579_v27 = vadd.f32 %v2578_v38, %v2496_v5  ;;  %v2620_v25 = vadd.f32 %v2619_v21, %v2537_v6  ;;  %v2580_v26 = vpop.f32.mrb[62].mxu0  ;;  %v2621_v54 = vpop.f32.mrb[62].mxu1 }
 0x4f5   :  { %v2624_v45 = vadd.f32 %v2577_v37, %v7905_v59  ;;  %v2626_v28 = vadd.f32 %v2618_v56, %v7908_v14  ;;  %v2581_v46 = vpop.f32.mrb[63].mxu0  ;;  %v2622_v20 = vpop.f32.mrb[63].mxu1 }
 0x4f6   :  { %v2625_v12 = vadd.f32 %v2579_v27, %v7913_v61  ;;  %v2627_v16 = vadd.f32 %v2620_v25, %v7927_v23 }
 0x4f7   :  { %v5785_v13 = vmul.f32 -1.442695, %v2624_v45  ;;  %v5787_v35 = vmul.f32 -1.442695, %v2626_v28 }
 0x4f8   :  { %v5786_v1 = vmul.f32 -1.442695, %v2625_v12  ;;  %v5788_v6 = vmul.f32 -1.442695, %v2627_v16 }
 0x4f9   :  { %6252 = vpow2.f32 %v5785_v13 }
 0x4fa   :  { %6254 = vpow2.f32 %v5787_v35 }
 0x4fb   :  { %6256 = vpow2.f32 %v5786_v1 }
 0x503   :  { %v6253_v41 = vpop.eup %6252 }
 0x504   :  { %v6255_v5 = vpop.eup %6254  ;;  %v2640_v38 = vadd.f32 1.0, %v6253_v41 }
 0x505   :  { %v6257_v18 = vpop.eup %6256  ;;  %v2642_v43 = vadd.f32 1.0, %v6255_v5 }
 0x506   :  { %v2641_v37 = vadd.f32 1.0, %v6257_v18 }
 0x507   :  { %6258 = vrcp.f32 %v2642_v43 }
 0x508   :  { %6260 = vpow2.f32 %v5788_v6 }
 0x509   :  { %6262 = vrcp.f32 %v2641_v37 }
 0x50a   :  { %6264 = vrcp.f32 %v2640_v38 }
 0x511   :  { %v6259_v56 = vpop.eup %6258 }
 0x512   :  { %v6261_v21 = vpop.eup %6260  ;;  %v2652_v27 = vmul.f32 2.0, %v6259_v56  ;;  %v2694_v26 = vpop.f32.mrb[64].mxu0  ;;  %v11037_v56 = vld [vmem:[#allocation119_spill] sm:$0xff] }
 0x513   :  { %v2735_v54 = vpop.f32.mrb[64].mxu1  ;;  %v6263_v45 = vpop.eup %6262  ;;  %v2643_v35 = vadd.f32 1.0, %v6261_v21  ;;  %v11039_v21 = vld [vmem:[#allocation121_spill] sm:$0xff] }
 0x514   :  { %v2696_v28 = vpop.f32.mrb[65].mxu0  ;;  %v2737_v46 = vpop.f32.mrb[65].mxu1  ;;  %v5789_v25 = vadd.f32 -1.0, %v2652_v27  ;;  %v2654_v5 = vmul.f32 %v6263_v45, %v8370_v29  ;;  %v11038_v29 = vld [vmem:[#allocation120_spill] sm:$0xff]  ;;  %v11040_v27 = vld [vmem:[#allocation122_spill] sm:$0xff]  ;;  %v11041_v45 = vld [vmem:[#allocation123_spill] sm:$0xff] }
 0x515   :  { %v2698_v20 = vpop.f32.mrb[66].mxu0  ;;  %v2739_v12 = vpop.f32.mrb[66].mxu1  ;;  %6266 = vrcp.f32 %v2643_v35 }
 0x516   :  { %v6265_v13 = vpop.eup %6264  ;;  %v2699_v1 = vpop.f32.mrb[67].mxu0  ;;  %v11043_v20 = vld [vmem:[#allocation125_spill] sm:$0xff] }
 0x517   :  { %v2740_v16 = vpop.f32.mrb[67].mxu1  ;;  %v2655_v41 = vmul.f32 %v6265_v13, %v5789_v25  ;;  %v11042_v25 = vld [vmem:[#allocation124_spill] sm:$0xff] }
 0x519   :  { %v8682_v6 = vadd.f32 %v2655_v41, %v2654_v5  ;;  %v11045_v41 = vld [vmem:[#allocation127_spill] sm:$0xff] }
 0x51b   :  { %6268 = vtanh.f32 %v8682_v6 }
 0x51f   :  { %v6267_v18 = vpop.eup %6266 }
 0x525   :  { %v6269_v43 = vpop.eup %6268 }
 0x526   :  { %v2658_v37 = vmul.f32 %v6269_v43, %v6267_v18 }
 0x528   :  { %v8685_v38 = vpack.c.bf16 %v2658_v37, %v2658_v37 }
 0x52a   :  { %3015 = vmatmul.mubr.bf16.vlgmr.msra.gmra.mrb[76].mxu0 %v8685_v38  ;;  %3056 = vmatmul.mubr.bf16.vlgmr.msra.gmra.mrb[76].mxu1 %v8685_v38 }
 0x52b   :  { %3065 = vmatpush1.bf16.msra.mxu0 %v8377_v53  ;;  %3106 = vmatpush1.bf16.msra.mxu1 %v8380_v55  ;;  %v11044_v53 = vld [vmem:[#allocation126_spill] sm:$0xff] }
 0x52c   :  { %3066 = vmatprep.subr.bf16.mxu0 %v11037_v56  ;;  %3107 = vmatprep.subr.bf16.mxu1 %v11038_v29 }
 0x52d   :  { %3096 = vmatprep.mubr.bf16.mxu0 %v10759_v4  ;;  %3137 = vmatprep.mubr.bf16.mxu1 %v10759_v4 }
 0x52f   :  { %3067 = vmatpush1.bf16.msra.mxu0 %v11039_v21  ;;  %3108 = vmatpush1.bf16.msra.mxu1 %v11040_v27 }
 0x530   :  { %3068 = vmatprep.subr.bf16.mxu0 %v11041_v45  ;;  %3109 = vmatprep.subr.bf16.mxu1 %v11042_v25 }
 0x532   :  { %v2776_v55 = vpop.f32.mrb[68].mxu0  ;;  %v2817_v12 = vpop.f32.mrb[68].mxu1 }
 0x533   :  { %3069 = vmatpush1.bf16.msra.mxu0 %v11043_v20  ;;  %3110 = vmatpush1.bf16.msra.mxu1 %v11044_v53  ;;  %v2777_v13 = vadd.f32 %v2776_v55, %v2694_v26  ;;  %v2818_v35 = vadd.f32 %v2817_v12, %v2735_v54  ;;  %v2778_v1 = vpop.f32.mrb[69].mxu0  ;;  %v2819_v16 = vpop.f32.mrb[69].mxu1  ;;  %v11052_v20 = vld [vmem:[#allocation134_spill] sm:$0xff] }
 0x534   :  { %3070 = vmatprep.subr.bf16.mxu0 %v11045_v41  ;;  %3111 = vmatprep.subr.bf16.mxu1 %v8424_v58  ;;  %v2779_v5 = vadd.f32 %v2778_v1, %v2696_v28  ;;  %v2820_v18 = vadd.f32 %v2819_v16, %v2737_v46  ;;  %v2780_v43 = vpop.f32.mrb[70].mxu0  ;;  %v2821_v37 = vpop.f32.mrb[70].mxu1  ;;  %v11046_v28 = vld [vmem:[#allocation128_spill] sm:$0xff]  ;;  %v8725_v1 = vld [vmem:[#allocation11 + $0x4] ss:$16 sps:$4 sm:$0xff]  }
 0x535   :  { %v2824_v56 = vadd.f32 %v2777_v13, %v8407_v63  ;;  %v2826_v29 = vadd.f32 %v2818_v35, %v8410_v15  ;;  %v2781_v21 = vpop.f32.mrb[71].mxu0  ;;  %v2822_v27 = vpop.f32.mrb[71].mxu1  ;;  %v11049_v46 = vld [vmem:[#allocation132_spill] sm:$0xff] }
 0x536   :  { %v2825_v45 = vadd.f32 %v2779_v5, %v8419_v11  ;;  %v8728_v16 = vld [vmem:[#allocation11 + $0xc] ss:$16 sps:$4 sm:$0xff]   ;;  %v8750_v41 = vld [vmem:[#allocation11 + $0x28] ss:$16 sps:$4 sm:$0xff]   ;;  %v8753_v5 = vld [vmem:[#allocation11 + $0x44] ss:$16 sps:$4 sm:$0xff]  }
 0x537   :  { %3071 = vmatpush1.bf16.msra.mxu0 %v8430_v31  ;;  %3112 = vmatpush1.bf16.msra.mxu1 %v8433_v17  ;;  %v5790_v26 = vmul.f32 -1.442695, %v2824_v56  ;;  %v5792_v54 = vmul.f32 -1.442695, %v2826_v29  ;;  %v11047_v31 = vld [vmem:[#allocation130_spill] sm:$0xff]  ;;  %v11048_v17 = vld [vmem:[#allocation131_spill] sm:$0xff] }
 0x538   :  { %3072 = vmatprep.subr.bf16.mxu0 %v8436_v30  ;;  %3113 = vmatprep.subr.bf16.mxu1 %v8439_v42  ;;  %v5791_v58 = vmul.f32 -1.442695, %v2825_v45  ;;  %v11050_v30 = vld [vmem:[#allocation133_spill] sm:$0xff]  ;;  %v8762_v21 = vld [vmem:[#allocation11 + $0x48] ss:$16 sps:$4 sm:$0xff]  }
 0x539   :  { %6270 = vpow2.f32 %v5790_v26  ;;  %v11051_v42 = vld [vmem:[#allocation129_spill] sm:$0xff]  ;;  %v8768_v26 = vld [vmem:[#allocation11 + $0x6c] ss:$16 sps:$4 sm:$0xff]  }
 0x53a   :  { %6272 = vpow2.f32 %v5792_v54  ;;  %v2827_v25 = vadd.f32 %v2820_v18, %v11051_v42  ;;  %v8756_v18 = vld [vmem:[#allocation11 + $0x4c] ss:$16 sps:$4 sm:$0xff]   ;;  %v8759_v29 = vld [vmem:[#allocation11 + $0x40] ss:$16 sps:$4 sm:$0xff]   ;;  %v8765_v45 = vld [vmem:[#allocation11 + $0x64] ss:$16 sps:$4 sm:$0xff]  }
 0x53b   :  { %3073 = vmatpush1.bf16.msra.mxu0 %v8442_v7  ;;  %3114 = vmatpush1.bf16.msra.mxu1 %v8445_v44  ;;  %6274 = vpow2.f32 %v5791_v58  ;;  %v11053_v7 = vld [vmem:[#allocation135_spill] sm:$0xff] }
 0x53c   :  { %3074 = vmatprep.subr.bf16.mxu0 %v8448_v32  ;;  %3115 = vmatprep.subr.bf16.mxu1 %v11046_v28  ;;  %v5793_v53 = vmul.f32 -1.442695, %v2827_v25  ;;  %v8778_v25 = vld [vmem:[#allocation11 + $0x84] ss:$16 sps:$4 sm:$0xff]  }
 0x53d   :  { %11055 = vst [vmem:[#allocation40_spill] sm:$0xff] %v8778_v25 }
 0x53f   :  { %3075 = vmatpush1.bf16.msra.mxu0 %v11047_v31  ;;  %3116 = vmatpush1.bf16.msra.mxu1 %v11048_v17 }
 0x540   :  { %3076 = vmatprep.subr.bf16.mxu0 %v11049_v46  ;;  %3117 = vmatprep.subr.bf16.mxu1 %v11050_v30  ;;  %v8772_v46 = vld [vmem:[#allocation11 + $0x60] ss:$16 sps:$4 sm:$0xff]   ;;  %v8775_v30 = vld [vmem:[#allocation11 + $0x68] ss:$16 sps:$4 sm:$0xff]  }
 0x541   :  { %11054 = vst [vmem:[#allocation39_spill] sm:$0xff] %v8775_v30 }
 0x543   :  { %3077 = vmatpush1.bf16.msra.mxu0 %v11052_v20  ;;  %3118 = vmatpush1.bf16.msra.mxu1 %v11053_v7  ;;  %v6271_v44 = vpop.eup %6270  ;;  %v8781_v20 = vld [vmem:[#allocation11 + $0x8c] ss:$16 sps:$4 sm:$0xff]  }
 0x544   :  { %3078 = vmatprep.subr.bf16.mxu0 %v8476_v10  ;;  %3119 = vmatprep.subr.bf16.mxu1 %v8479_v47  ;;  %v6273_v32 = vpop.eup %6272  ;;  %v2840_v35 = vadd.f32 1.0, %v6271_v44  ;;  %v8733_v47 = vld [vmem:[#allocation11] ss:$16 sps:$4 sm:$0xff]   ;;  %v8742_v10 = vld [vmem:[#allocation11 + $0x2c] ss:$16 sps:$4 sm:$0xff]   ;;  %11056 = vst [vmem:[#allocation41_spill] sm:$0xff] %v8781_v20 }
 0x545   :  { %v6275_v55 = vpop.eup %6274  ;;  %v2842_v12 = vadd.f32 1.0, %v6273_v32  ;;  %v8789_v44 = vld [vmem:[#allocation11 + $0x88] ss:$16 sps:$4 sm:$0xff]   ;;  %v8793_v32 = vld [vmem:[#allocation11 + $0xa4] ss:$16 sps:$4 sm:$0xff]  }
 0x546   :  { %v2841_v13 = vadd.f32 1.0, %v6275_v55  ;;  %11058 = vst [vmem:[#allocation43_spill] sm:$0xff] %v8789_v44  ;;  %11059 = vst [vmem:[#allocation44_spill] sm:$0xff] %v8793_v32  ;;  %v8799_v55 = vld [vmem:[#allocation11 + $0xa0] ss:$16 sps:$4 sm:$0xff]  }
 0x547   :  { %3079 = vmatpush1.bf16.msra.mxu0 %v8482_v19  ;;  %3120 = vmatpush1.bf16.msra.mxu1 %v8485_v60  ;;  %6276 = vrcp.f32 %v2842_v12  ;;  %v8736_v19 = vld [vmem:[#allocation11 + $0x8] ss:$16 sps:$4 sm:$0xff]   ;;  %v8739_v60 = vld [vmem:[#allocation11 + $0x24] ss:$16 sps:$4 sm:$0xff]   ;;  %11061 = vst [vmem:[#allocation46_spill] sm:$0xff] %v8799_v55 }
 0x548   :  { %3182 = vmatprep.subr.bf16.mxu0 %v8725_v1  ;;  %3223 = vmatprep.subr.bf16.mxu1 %v8728_v16  ;;  %6278 = vpow2.f32 %v5793_v53  ;;  %v8796_v53 = vld [vmem:[#allocation11 + $0xac] ss:$16 sps:$4 sm:$0xff]   ;;  %v8802_v12 = vld [vmem:[#allocation11 + $0xa8] ss:$16 sps:$4 sm:$0xff]  }
 0x549   :  { %6280 = vrcp.f32 %v2841_v13  ;;  %11060 = vst [vmem:[#allocation45_spill] sm:$0xff] %v8796_v53  ;;  %11062 = vst [vmem:[#allocation47_spill] sm:$0xff] %v8802_v12  ;;  %v8805_v13 = vld [vmem:[#allocation11 + $0xc4] ss:$16 sps:$4 sm:$0xff]  }
 0x54a   :  { %3097 = vmatmul.mubr.bf16.vlgmr.msra.gmra.mrb[80].mxu0 %v8639_v57  ;;  %3138 = vmatmul.mubr.bf16.vlgmr.msra.gmra.mrb[80].mxu1 %v8639_v57  ;;  %6282 = vrcp.f32 %v2840_v35  ;;  %v8747_v57 = vld [vmem:[#allocation11 + $0x20] ss:$16 sps:$4 sm:$0xff]   ;;  %11063 = vst [vmem:[#allocation48_spill] sm:$0xff] %v8805_v13  ;;  %v8808_v35 = vld [vmem:[#allocation11 + $0xcc] ss:$16 sps:$4 sm:$0xff]  }
 0x54b   :  { %3183 = vmatpush1.bf16.msra.mxu0 %v8733_v47  ;;  %3224 = vmatpush1.bf16.msra.mxu1 %v8736_v19  ;;  %11064 = vst [vmem:[#allocation49_spill] sm:$0xff] %v8808_v35 }
 0x54c   :  { %3184 = vmatprep.subr.bf16.mxu0 %v8739_v60  ;;  %3225 = vmatprep.subr.bf16.mxu1 %v8742_v10 }
 0x54d   :  { %3214 = vmatprep.mubr.bf16.mxu0 %v10759_v4  ;;  %3255 = vmatprep.mubr.bf16.mxu1 %v10759_v4 }
 0x54f   :  { %3185 = vmatpush1.bf16.msra.mxu0 %v8747_v57  ;;  %3226 = vmatpush1.bf16.msra.mxu1 %v8750_v41 }
 0x550   :  { %3186 = vmatprep.subr.bf16.mxu0 %v8753_v5  ;;  %3227 = vmatprep.subr.bf16.mxu1 %v8756_v18 }
 0x551   :  { %v6277_v43 = vpop.eup %6276 }
 0x552   :  { %v6279_v37 = vpop.eup %6278  ;;  %v2852_v56 = vmul.f32 2.0, %v6277_v43  ;;  %v8811_v43 = vld [vmem:[#allocation11 + $0xc0] ss:$16 sps:$4 sm:$0xff]  }
 0x553   :  { %3187 = vmatpush1.bf16.msra.mxu0 %v8759_v29  ;;  %3228 = vmatpush1.bf16.msra.mxu1 %v8762_v21  ;;  %v6281_v27 = vpop.eup %6280  ;;  %v2843_v28 = vadd.f32 1.0, %v6279_v37  ;;  %11065 = vst [vmem:[#allocation50_spill] sm:$0xff] %v8811_v43  ;;  %v8814_v37 = vld [vmem:[#allocation11 + $0xc8] ss:$16 sps:$4 sm:$0xff]  }
 0x554   :  { %3188 = vmatprep.subr.bf16.mxu0 %v8765_v45  ;;  %3229 = vmatprep.subr.bf16.mxu1 %v8768_v26  ;;  %v5794_v54 = vadd.f32 -1.0, %v2852_v56  ;;  %v6283_v58 = vpop.eup %6282  ;;  %v2854_v17 = vmul.f32 %v6281_v27, %v8510_v40  ;;  %v8786_v40 = vld [vmem:[#allocation11 + $0x80] ss:$16 sps:$4 sm:$0xff]   ;;  %11066 = vst [vmem:[#allocation51_spill] sm:$0xff] %v8814_v37  ;;  %v8817_v27 = vld [vmem:[#allocation11 + $0xe4] ss:$16 sps:$4 sm:$0xff]  }
 0x555   :  { %6284 = vrcp.f32 %v2843_v28  ;;  %11057 = vst [vmem:[#allocation42_spill] sm:$0xff] %v8786_v40  ;;  %11067 = vst [vmem:[#allocation52_spill] sm:$0xff] %v8817_v27 }
 0x556   :  { %v2855_v31 = vmul.f32 %v6283_v58, %v5794_v54  ;;  %v8820_v54 = vld [vmem:[#allocation11 + $0xec] ss:$16 sps:$4 sm:$0xff]  }
 0x557   :  { %3189 = vmatpush1.bf16.msra.mxu0 %v8772_v46  ;;  %3230 = vmatpush1.bf16.msra.mxu1 %v8775_v30  ;;  %11068 = vst [vmem:[#allocation53_spill] sm:$0xff] %v8820_v54  ;;  %v8889_v30 = vld [vmem:[#allocation9 + $0x80] ss:$16 sps:$4 sm:$0xff]  }
 0x558   :  { %3190 = vmatprep.subr.bf16.mxu0 %v8778_v25  ;;  %3231 = vmatprep.subr.bf16.mxu1 %v8781_v20  ;;  %v8784_v7 = vadd.f32 %v2855_v31, %v2854_v17  ;;  %v8823_v31 = vld [vmem:[#allocation11 + $0xe0] ss:$16 sps:$4 sm:$0xff]   ;;  %v8826_v17 = vld [vmem:[#allocation11 + $0xe8] ss:$16 sps:$4 sm:$0xff]  }
 0x559   :  { %11069 = vst [vmem:[#allocation54_spill] sm:$0xff] %v8823_v31  ;;  %11070 = vst [vmem:[#allocation55_spill] sm:$0xff] %v8826_v17 }
 0x55a   :  { %6286 = vtanh.f32 %v8784_v7 }
 0x55b   :  { %3191 = vmatpush1.bf16.msra.mxu0 %v8786_v40  ;;  %3232 = vmatpush1.bf16.msra.mxu1 %v8789_v44 }
 0x55c   :  { %3192 = vmatprep.subr.bf16.mxu0 %v8793_v32  ;;  %3233 = vmatprep.subr.bf16.mxu1 %v8796_v53  ;;  %v11092_v53 = vld [vmem:[#allocation25_spill] sm:$0xff] }
 0x55f   :  { %3193 = vmatpush1.bf16.msra.mxu0 %v8799_v55  ;;  %3234 = vmatpush1.bf16.msra.mxu1 %v8802_v12  ;;  %v6285_v56 = vpop.eup %6284  ;;  %v11091_v12 = vld [vmem:[#allocation26_spill] sm:$0xff] }
 0x560   :  { %3194 = vmatprep.subr.bf16.mxu0 %v8805_v13  ;;  %3235 = vmatprep.subr.bf16.mxu1 %v8808_v35 }
 0x563   :  { %3195 = vmatpush1.bf16.msra.mxu0 %v8811_v43  ;;  %3236 = vmatpush1.bf16.msra.mxu1 %v8814_v37  ;;  %v8829_v37 = vld [vmem:[#allocation9 + $0x4] ss:$16 sps:$4 sm:$0xff]   ;;  %v8832_v43 = vld [vmem:[#allocation9 + $0xc] ss:$16 sps:$4 sm:$0xff]  }
 0x564   :  { %3196 = vmatprep.subr.bf16.mxu0 %v8817_v27  ;;  %3237 = vmatprep.subr.bf16.mxu1 %v8820_v54  ;;  %v6287_v58 = vpop.eup %6286  ;;  %11071 = vst [vmem:[#allocation56_spill] sm:$0xff] %v8829_v37  ;;  %11072 = vst [vmem:[#allocation57_spill] sm:$0xff] %v8832_v43  ;;  %v11090_v54 = vld [vmem:[#allocation23_spill] sm:$0xff] }
 0x565   :  { %v2858_v28 = vmul.f32 %v6287_v58, %v6285_v56  ;;  %v8835_v56 = vld [vmem:[#allocation9] ss:$16 sps:$4 sm:$0xff]   ;;  %v8838_v58 = vld [vmem:[#allocation9 + $0x8] ss:$16 sps:$4 sm:$0xff]  }
 0x566   :  { %11073 = vst [vmem:[#allocation58_spill] sm:$0xff] %v8835_v56  ;;  %11074 = vst [vmem:[#allocation59_spill] sm:$0xff] %v8838_v58 }
 0x567   :  { %3197 = vmatpush1.bf16.msra.mxu0 %v8823_v31  ;;  %3238 = vmatpush1.bf16.msra.mxu1 %v8826_v17  ;;  %v3181_v27 = vpack.c.bf16 %v2858_v28, %v2858_v28  ;;  %v8841_v17 = vld [vmem:[#allocation9 + $0x24] ss:$16 sps:$4 sm:$0xff]   ;;  %v8852_v28 = vld [vmem:[#allocation9 + $0x28] ss:$16 sps:$4 sm:$0xff]  }
 0x568   :  { %3264 = vmatprep.subr.bf16.mxu0 %v8829_v37  ;;  %3305 = vmatprep.subr.bf16.mxu1 %v8832_v43  ;;  %11075 = vst [vmem:[#allocation60_spill] sm:$0xff] %v8841_v17  ;;  %v8844_v37 = vld [vmem:[#allocation9 + $0x2c] ss:$16 sps:$4 sm:$0xff]   ;;  %11078 = vst [vmem:[#allocation63_spill] sm:$0xff] %v8852_v28  ;;  %v8879_v31 = vld [vmem:[#allocation9 + $0x84] ss:$16 sps:$4 sm:$0xff]  }
 0x569   :  { %11076 = vst [vmem:[#allocation61_spill] sm:$0xff] %v8844_v37  ;;  %11087 = vst [vmem:[#allocation71_spill] sm:$0xff] %v8879_v31 }
 0x56a   :  { %3215 = vmatmul.mubr.bf16.vlgmr.msra.gmra.mrb[84].mxu0 %v3181_v27  ;;  %3256 = vmatmul.mubr.bf16.vlgmr.msra.gmra.mrb[84].mxu1 %v3181_v27  ;;  %v8849_v27 = vld [vmem:[#allocation9 + $0x20] ss:$16 sps:$4 sm:$0xff]  }
 0x56b   :  { %3265 = vmatpush1.bf16.msra.mxu0 %v8835_v56  ;;  %3306 = vmatpush1.bf16.msra.mxu1 %v8838_v58  ;;  %11077 = vst [vmem:[#allocation62_spill] sm:$0xff] %v8849_v27  ;;  %v8855_v58 = vld [vmem:[#allocation9 + $0x44] ss:$16 sps:$4 sm:$0xff]   ;;  %v8864_v56 = vld [vmem:[#allocation9 + $0x48] ss:$16 sps:$4 sm:$0xff]  }
 0x56c   :  { %3266 = vmatprep.subr.bf16.mxu0 %v8841_v17  ;;  %3307 = vmatprep.subr.bf16.mxu1 %v8844_v37  ;;  %11079 = vst [vmem:[#allocation64_spill] sm:$0xff] %v8855_v58  ;;  %v8858_v17 = vld [vmem:[#allocation9 + $0x4c] ss:$16 sps:$4 sm:$0xff]   ;;  %v8861_v37 = vld [vmem:[#allocation9 + $0x40] ss:$16 sps:$4 sm:$0xff]   ;;  %11082 = vst [vmem:[#allocation67_spill] sm:$0xff] %v8864_v56 }
 0x56d   :  { %3296 = vmatprep.mubr.bf16.mxu0 %v10759_v4  ;;  %3337 = vmatprep.mubr.bf16.mxu1 %v10759_v4  ;;  %11080 = vst [vmem:[#allocation65_spill] sm:$0xff] %v8858_v17  ;;  %11081 = vst [vmem:[#allocation66_spill] sm:$0xff] %v8861_v37 }
 0x56f   :  { %3267 = vmatpush1.bf16.msra.mxu0 %v8849_v27  ;;  %3308 = vmatpush1.bf16.msra.mxu1 %v8852_v28  ;;  %v8867_v27 = vld [vmem:[#allocation9 + $0x64] ss:$16 sps:$4 sm:$0xff]   ;;  %v8870_v28 = vld [vmem:[#allocation9 + $0x6c] ss:$16 sps:$4 sm:$0xff]  }
 0x570   :  { %3268 = vmatprep.subr.bf16.mxu0 %v8855_v58  ;;  %3309 = vmatprep.subr.bf16.mxu1 %v8858_v17  ;;  %11083 = vst [vmem:[#allocation68_spill] sm:$0xff] %v8867_v27  ;;  %11084 = vst [vmem:[#allocation69_spill] sm:$0xff] %v8870_v28  ;;  %v8873_v58 = vld [vmem:[#allocation9 + $0x60] ss:$16 sps:$4 sm:$0xff]   ;;  %v8876_v17 = vld [vmem:[#allocation9 + $0x68] ss:$16 sps:$4 sm:$0xff]  }
 0x571   :  { %11085 = vst [vmem:[#allocation70_spill] sm:$0xff] %v8873_v58  ;;  %11086 = vst [vmem:[#allocation81_spill] sm:$0xff] %v8876_v17 }
 0x573   :  { %3269 = vmatpush1.bf16.msra.mxu0 %v8861_v37  ;;  %3310 = vmatpush1.bf16.msra.mxu1 %v8864_v56  ;;  %v8882_v56 = vld [vmem:[#allocation9 + $0x8c] ss:$16 sps:$4 sm:$0xff]  }
 0x574   :  { %3270 = vmatprep.subr.bf16.mxu0 %v8867_v27  ;;  %3311 = vmatprep.subr.bf16.mxu1 %v8870_v28  ;;  %11088 = vst [vmem:[#allocation72_spill] sm:$0xff] %v8882_v56  ;;  %v11089_v27 = vld [vmem:[#allocation24_spill] sm:$0xff] }
 0x575   :  { %v2898_v37 = vpop.f32.mrb[72].mxu0  ;;  %v2939_v43 = vpop.f32.mrb[72].mxu1 }
 0x576   :  { %v2946_v28 = vadd.f32 %v2898_v37, %v11089_v27  ;;  %v2948_v35 = vadd.f32 %v2939_v43, %v11090_v54  ;;  %v2900_v13 = vpop.f32.mrb[73].mxu0  ;;  %v8895_v37 = vld [vmem:[#allocation9 + $0xa4] ss:$16 sps:$4 sm:$0xff]   ;;  %v8928_v27 = vld [vmem:[#allocation9 + $0xe8] ss:$16 sps:$4 sm:$0xff]  }
 0x577   :  { %3271 = vmatpush1.bf16.msra.mxu0 %v8873_v58  ;;  %3312 = vmatpush1.bf16.msra.mxu1 %v8876_v17  ;;  %v2941_v58 = vpop.f32.mrb[73].mxu1  ;;  %v2947_v55 = vadd.f32 %v2900_v13, %v11091_v12  ;;  %v2902_v32 = vpop.f32.mrb[74].mxu0  ;;  %v8919_v12 = vld [vmem:[#allocation9 + $0xe4] ss:$16 sps:$4 sm:$0xff]   ;;  %v8922_v13 = vld [vmem:[#allocation9 + $0xec] ss:$16 sps:$4 sm:$0xff]  }
 0x578   :  { %3272 = vmatprep.subr.bf16.mxu0 %v8879_v31  ;;  %3313 = vmatprep.subr.bf16.mxu1 %v8882_v56  ;;  %v2949_v17 = vadd.f32 %v2941_v58, %v11092_v53  ;;  %v2943_v44 = vpop.f32.mrb[74].mxu1  ;;  %v5795_v40 = vmul.f32 -1.442695, %v2946_v28  ;;  %v5797_v20 = vmul.f32 -1.442695, %v2948_v35  ;;  %v2903_v25 = vpop.f32.mrb[75].mxu0 }
 0x579   :  { %v2944_v31 = vpop.f32.mrb[75].mxu1  ;;  %v8892_v56 = vld [vmem:[#allocation9 + $0x88] ss:$16 sps:$4 sm:$0xff]   ;;  %v5796_v43 = vmul.f32 -1.442695, %v2947_v55  ;;  %11094 = vst [vmem:[#allocation19_spill] sm:$0xff] %v8919_v12 }
 0x57a   :  { %6288 = vpow2.f32 %v5795_v40  ;;  %v8898_v32 = vld [vmem:[#allocation9 + $0xac] ss:$16 sps:$4 sm:$0xff]   ;;  %v8901_v25 = vld [vmem:[#allocation9 + $0xa0] ss:$16 sps:$4 sm:$0xff]   ;;  %v8904_v44 = vld [vmem:[#allocation9 + $0xa8] ss:$16 sps:$4 sm:$0xff]  }
 0x57b   :  { %3273 = vmatpush1.bf16.msra.mxu0 %v8889_v30  ;;  %3314 = vmatpush1.bf16.msra.mxu1 %v8892_v56  ;;  %6290 = vpow2.f32 %v5797_v20  ;;  %v8907_v53 = vld [vmem:[#allocation9 + $0xc4] ss:$16 sps:$4 sm:$0xff]   ;;  %v8910_v40 = vld [vmem:[#allocation9 + $0xcc] ss:$16 sps:$4 sm:$0xff]   ;;  %v8913_v55 = vld [vmem:[#allocation9 + $0xc0] ss:$16 sps:$4 sm:$0xff]  }
 0x57c   :  { %3274 = vmatprep.subr.bf16.mxu0 %v8895_v37  ;;  %3315 = vmatprep.subr.bf16.mxu1 %v8898_v32  ;;  %6292 = vpow2.f32 %v5796_v43  ;;  %v8916_v20 = vld [vmem:[#allocation9 + $0xc8] ss:$16 sps:$4 sm:$0xff]   ;;  %v5798_v31 = vmul.f32 -1.442695, %v2949_v17  ;;  %v8925_v58 = vld [vmem:[#allocation9 + $0xe0] ss:$16 sps:$4 sm:$0xff]  }
 0x57d   :  { %11093 = vst [vmem:[#allocation20_spill] sm:$0xff] %v8916_v20  ;;  %v8979_v17 = vld [vmem:[#allocation4 + $0xc4] ss:$16 sps:$4 sm:$0xff]  }
 0x57e   :  { %11101 = vst [vmem:[#allocation77_spill] sm:$0xff] %v8979_v17 }
 0x57f   :  { %3275 = vmatpush1.bf16.msra.mxu0 %v8901_v25  ;;  %3316 = vmatpush1.bf16.msra.mxu1 %v8904_v44 }
 0x580   :  { %3276 = vmatprep.subr.bf16.mxu0 %v8907_v53  ;;  %3317 = vmatprep.subr.bf16.mxu1 %v8910_v40 }
 0x583   :  { %3277 = vmatpush1.bf16.msra.mxu0 %v8913_v55  ;;  %3318 = vmatpush1.bf16.msra.mxu1 %v8916_v20 }
 0x584   :  { %3278 = vmatprep.subr.bf16.mxu0 %v8919_v12  ;;  %3319 = vmatprep.subr.bf16.mxu1 %v8922_v13  ;;  %v6289_v35 = vpop.eup %6288 }
 0x585   :  { %v6291_v54 = vpop.eup %6290  ;;  %v2962_v20 = vadd.f32 1.0, %v6289_v35  ;;  %v8988_v35 = vld [vmem:[#allocation4 + $0xc8] ss:$16 sps:$4 sm:$0xff]  }
 0x586   :  { %v6293_v28 = vpop.eup %6292  ;;  %v2964_v43 = vadd.f32 1.0, %v6291_v54  ;;  %11104 = vst [vmem:[#allocation80_spill] sm:$0xff] %v8988_v35  ;;  %v8991_v54 = vld [vmem:[#allocation4 + $0xe4] ss:$16 sps:$4 sm:$0xff]  }
 0x587   :  { %3279 = vmatpush1.bf16.msra.mxu0 %v8925_v58  ;;  %3320 = vmatpush1.bf16.msra.mxu1 %v8928_v27  ;;  %v2963_v12 = vadd.f32 1.0, %v6293_v28  ;;  %11105 = vst [vmem:[#allocation82_spill] sm:$0xff] %v8991_v54 }
 0x588   :  { %3386 = vmatprep.subr.bf16.mxu0 %v8561_v34  ;;  %3427 = vmatprep.subr.bf16.mxu1 %v8564_v39  ;;  %6294 = vrcp.f32 %v2964_v43 }
 0x589   :  { %6296 = vpow2.f32 %v5798_v31  ;;  %v8994_v31 = vld [vmem:[#allocation4 + $0xec] ss:$16 sps:$4 sm:$0xff]  }
 0x58a   :  { %3297 = vmatmul.mubr.bf16.vlgmr.msra.gmra.mrb[88].mxu0 %v8685_v38  ;;  %3338 = vmatmul.mubr.bf16.vlgmr.msra.gmra.mrb[88].mxu1 %v8685_v38  ;;  %6298 = vrcp.f32 %v2963_v12  ;;  %v8976_v38 = vld [vmem:[#allocation4 + $0xa8] ss:$16 sps:$4 sm:$0xff]   ;;  %v8985_v12 = vld [vmem:[#allocation4 + $0xc0] ss:$16 sps:$4 sm:$0xff]   ;;  %11106 = vst [vmem:[#allocation83_spill] sm:$0xff] %v8994_v31 }
 0x58b   :  { %3387 = vmatpush1.bf16.msra.mxu0 %v8569_v48  ;;  %3428 = vmatpush1.bf16.msra.mxu1 %v8572_v33  ;;  %6300 = vrcp.f32 %v2962_v20  ;;  %11100 = vst [vmem:[#allocation76_spill] sm:$0xff] %v8976_v38  ;;  %v8982_v20 = vld [vmem:[#allocation4 + $0xcc] ss:$16 sps:$4 sm:$0xff]   ;;  %11103 = vst [vmem:[#allocation79_spill] sm:$0xff] %v8985_v12 }
 0x58c   :  { %3388 = vmatprep.subr.bf16.mxu0 %v8575_v49  ;;  %3429 = vmatprep.subr.bf16.mxu1 %v8578_v50  ;;  %11102 = vst [vmem:[#allocation78_spill] sm:$0xff] %v8982_v20 }
 0x58d   :  { %3418 = vmatprep.mubr.bf16.mxu0 %v10759_v4  ;;  %3459 = vmatprep.mubr.bf16.mxu1 %v10759_v4 }
 0x58f   :  { %3389 = vmatpush1.bf16.msra.mxu0 %v8583_v24  ;;  %3430 = vmatpush1.bf16.msra.mxu1 %v8586_v51  ;;  %v8951_v51 = vld [vmem:[#allocation4 + $0x84] ss:$16 sps:$4 sm:$0xff]  }
 0x590   :  { %3390 = vmatprep.subr.bf16.mxu0 %v8589_v52  ;;  %3431 = vmatprep.subr.bf16.mxu1 %v8592_v8  ;;  %v8954_v52 = vld [vmem:[#allocation4 + $0x8c] ss:$16 sps:$4 sm:$0xff]  }
 0x592   :  { %v6295_v34 = vpop.eup %6294 }
 0x593   :  { %3391 = vmatpush1.bf16.msra.mxu0 %v8595_v9  ;;  %3432 = vmatpush1.bf16.msra.mxu1 %v8598_v22  ;;  %v6297_v39 = vpop.eup %6296  ;;  %v2974_v48 = vmul.f32 2.0, %v6295_v34  ;;  %v8997_v34 = vld [vmem:[#allocation4 + $0xe0] ss:$16 sps:$4 sm:$0xff]  }
 0x594   :  { %3392 = vmatprep.subr.bf16.mxu0 %v8601_v62  ;;  %3433 = vmatprep.subr.bf16.mxu1 %v8604_v2  ;;  %v6299_v33 = vpop.eup %6298  ;;  %v2965_v24 = vadd.f32 1.0, %v6297_v39  ;;  %v8960_v62 = vld [vmem:[#allocation4 + $0x80] ss:$16 sps:$4 sm:$0xff]   ;;  %v8963_v2 = vld [vmem:[#allocation4 + $0x88] ss:$16 sps:$4 sm:$0xff]   ;;  %11107 = vst [vmem:[#allocation84_spill] sm:$0xff] %v8997_v34 }
 0x595   :  { %v5799_v49 = vadd.f32 -1.0, %v2974_v48  ;;  %v6301_v50 = vpop.eup %6300  ;;  %v2976_v9 = vmul.f32 %v6299_v33, %v8636_v36  ;;  %11095 = vst [vmem:[#allocation22_spill] sm:$0xff] %v8960_v62  ;;  %11096 = vst [vmem:[#allocation21_spill] sm:$0xff] %v8963_v2  ;;  %v8973_v36 = vld [vmem:[#allocation4 + $0xa0] ss:$16 sps:$4 sm:$0xff]  }
 0x596   :  { %6302 = vrcp.f32 %v2965_v24  ;;  %11099 = vst [vmem:[#allocation75_spill] sm:$0xff] %v8973_v36  ;;  %v9000_v39 = vld [vmem:[#allocation4 + $0xe8] ss:$16 sps:$4 sm:$0xff]   ;;  %v9003_v33 = vld [vmem:[#allocation8 + $0x4] ss:$16 sps:$4 sm:$0xff]  }
 0x597   :  { %3393 = vmatpush1.bf16.msra.mxu0 %v8607_v0  ;;  %3434 = vmatpush1.bf16.msra.mxu1 %v8610_v3  ;;  %v2977_v8 = vmul.f32 %v6301_v50, %v5799_v49  ;;  %v8966_v0 = vld [vmem:[#allocation4 + $0xa4] ss:$16 sps:$4 sm:$0xff]   ;;  %v8969_v3 = vld [vmem:[#allocation4 + $0xac] ss:$16 sps:$4 sm:$0xff]   ;;  %11108 = vst [vmem:[#allocation85_spill] sm:$0xff] %v9000_v39  ;;  %11109 = vst [vmem:[#allocation86_spill] sm:$0xff] %v9003_v33 }
 0x598   :  { %3394 = vmatprep.subr.bf16.mxu0 %v8951_v51  ;;  %3435 = vmatprep.subr.bf16.mxu1 %v8954_v52  ;;  %11097 = vst [vmem:[#allocation73_spill] sm:$0xff] %v8966_v0  ;;  %11098 = vst [vmem:[#allocation74_spill] sm:$0xff] %v8969_v3  ;;  %v9006_v49 = vld [vmem:[#allocation8 + $0xc] ss:$16 sps:$4 sm:$0xff]   ;;  %v9013_v24 = vld [vmem:[#allocation8] ss:$16 sps:$4 sm:$0xff]  }
 0x599   :  { %v8958_v22 = vadd.f32 %v2977_v8, %v2976_v9  ;;  %11110 = vst [vmem:[#allocation87_spill] sm:$0xff] %v9006_v49  ;;  %11111 = vst [vmem:[#allocation88_spill] sm:$0xff] %v9013_v24  ;;  %v9016_v8 = vld [vmem:[#allocation8 + $0x8] ss:$16 sps:$4 sm:$0xff]   ;;  %v9019_v9 = vld [vmem:[#allocation8 + $0x24] ss:$16 sps:$4 sm:$0xff]  }
 0x59a   :  { %11112 = vst [vmem:[#allocation89_spill] sm:$0xff] %v9016_v8  ;;  %11113 = vst [vmem:[#allocation16_spill] sm:$0xff] %v9019_v9 }
 0x59b   :  { %3395 = vmatpush1.bf16.msra.mxu0 %v8960_v62  ;;  %3436 = vmatpush1.bf16.msra.mxu1 %v8963_v2  ;;  %6304 = vtanh.f32 %v8958_v22 }
 0x59c   :  { %3396 = vmatprep.subr.bf16.mxu0 %v8966_v0  ;;  %3437 = vmatprep.subr.bf16.mxu1 %v8969_v3 }
 0x59f   :  { %3397 = vmatpush1.bf16.msra.mxu0 %v8973_v36  ;;  %3438 = vmatpush1.bf16.msra.mxu1 %v8976_v38 }
 0x5a0   :  { %3398 = vmatprep.subr.bf16.mxu0 %v8979_v17  ;;  %3439 = vmatprep.subr.bf16.mxu1 %v8982_v20  ;;  %v6303_v28 = vpop.eup %6302 }
 0x5a3   :  { %3399 = vmatpush1.bf16.msra.mxu0 %v8985_v12  ;;  %3440 = vmatpush1.bf16.msra.mxu1 %v8988_v35 }
 0x5a4   :  { %3400 = vmatprep.subr.bf16.mxu0 %v8991_v54  ;;  %3441 = vmatprep.subr.bf16.mxu1 %v8994_v31 }
 0x5a5   :  { %v6305_v43 = vpop.eup %6304 }
 0x5a6   :  { %v2980_v48 = vmul.f32 %v6305_v43, %v6303_v28  ;;  %v9022_v28 = vld [vmem:[#allocation8 + $0x2c] ss:$16 sps:$4 sm:$0xff]   ;;  %v9027_v43 = vld [vmem:[#allocation8 + $0x20] ss:$16 sps:$4 sm:$0xff]  }
 0x5a7   :  { %3401 = vmatpush1.bf16.msra.mxu0 %v8997_v34  ;;  %3442 = vmatpush1.bf16.msra.mxu1 %v9000_v39  ;;  %11114 = vst [vmem:[#allocation15_spill] sm:$0xff] %v9022_v28  ;;  %11115 = vst [vmem:[#allocation18_spill] sm:$0xff] %v9027_v43 }
 0x5a8   :  { %3504 = vmatprep.subr.bf16.mxu0 %v9003_v33  ;;  %3545 = vmatprep.subr.bf16.mxu1 %v9006_v49  ;;  %v9009_v50 = vpack.c.bf16 %v2980_v48, %v2980_v48  ;;  %v9030_v48 = vld [vmem:[#allocation8 + $0x28] ss:$16 sps:$4 sm:$0xff]  }
 0x5a9   :  { %11116 = vst [vmem:[#allocation17_spill] sm:$0xff] %v9030_v48 }
 0x5aa   :  { %3419 = vmatmul.mubr.bf16.vlgmr.msra.gmra.mrb[92].mxu0 %v9009_v50  ;;  %3460 = vmatmul.mubr.bf16.vlgmr.msra.gmra.mrb[92].mxu1 %v9009_v50 }
 0x5ab   :  { %3505 = vmatpush1.bf16.msra.mxu0 %v9013_v24  ;;  %3546 = vmatpush1.bf16.msra.mxu1 %v9016_v8  ;;  %v9033_v8 = vld [vmem:[#allocation8 + $0x44] ss:$16 sps:$4 sm:$0xff]   ;;  %v9042_v24 = vld [vmem:[#allocation8 + $0x48] ss:$16 sps:$4 sm:$0xff]  }
 0x5ac   :  { %3506 = vmatprep.subr.bf16.mxu0 %v9019_v9  ;;  %3547 = vmatprep.subr.bf16.mxu1 %v9022_v28  ;;  %11117 = vst [vmem:[#allocation90_spill] sm:$0xff] %v9033_v8  ;;  %v9036_v9 = vld [vmem:[#allocation8 + $0x4c] ss:$16 sps:$4 sm:$0xff]   ;;  %v9039_v28 = vld [vmem:[#allocation8 + $0x40] ss:$16 sps:$4 sm:$0xff]   ;;  %11120 = vst [vmem:[#allocation93_spill] sm:$0xff] %v9042_v24 }
 0x5ad   :  { %3536 = vmatprep.mubr.bf16.mxu0 %v10759_v4  ;;  %3577 = vmatprep.mubr.bf16.mxu1 %v10759_v4  ;;  %11118 = vst [vmem:[#allocation91_spill] sm:$0xff] %v9036_v9  ;;  %11119 = vst [vmem:[#allocation92_spill] sm:$0xff] %v9039_v28 }
 0x5af   :  { %3507 = vmatpush1.bf16.msra.mxu0 %v9027_v43  ;;  %3548 = vmatpush1.bf16.msra.mxu1 %v9030_v48  ;;  %v9045_v43 = vld [vmem:[#allocation8 + $0x64] ss:$16 sps:$4 sm:$0xff]   ;;  %v9048_v48 = vld [vmem:[#allocation8 + $0x6c] ss:$16 sps:$4 sm:$0xff]  }
 0x5b0   :  { %3508 = vmatprep.subr.bf16.mxu0 %v9033_v8  ;;  %3549 = vmatprep.subr.bf16.mxu1 %v9036_v9  ;;  %11121 = vst [vmem:[#allocation94_spill] sm:$0xff] %v9045_v43  ;;  %11122 = vst [vmem:[#allocation95_spill] sm:$0xff] %v9048_v48  ;;  %v9051_v8 = vld [vmem:[#allocation8 + $0x60] ss:$16 sps:$4 sm:$0xff]   ;;  %v9054_v9 = vld [vmem:[#allocation8 + $0x68] ss:$16 sps:$4 sm:$0xff]  }
 0x5b1   :  { %11123 = vst [vmem:[#allocation96_spill] sm:$0xff] %v9051_v8  ;;  %11124 = vst [vmem:[#allocation97_spill] sm:$0xff] %v9054_v9 }
 0x5b3   :  { %3509 = vmatpush1.bf16.msra.mxu0 %v9039_v28  ;;  %3550 = vmatpush1.bf16.msra.mxu1 %v9042_v24  ;;  %v9057_v28 = vld [vmem:[#allocation8 + $0x84] ss:$16 sps:$4 sm:$0xff]   ;;  %v9060_v24 = vld [vmem:[#allocation8 + $0x8c] ss:$16 sps:$4 sm:$0xff]  }
 0x5b4   :  { %3510 = vmatprep.subr.bf16.mxu0 %v9045_v43  ;;  %3551 = vmatprep.subr.bf16.mxu1 %v9048_v48  ;;  %11125 = vst [vmem:[#allocation98_spill] sm:$0xff] %v9057_v28  ;;  %11126 = vst [vmem:[#allocation99_spill] sm:$0xff] %v9060_v24  ;;  %v9063_v43 = vld [vmem:[#allocation8 + $0x80] ss:$16 sps:$4 sm:$0xff]   ;;  %v9066_v48 = vld [vmem:[#allocation8 + $0x88] ss:$16 sps:$4 sm:$0xff]  }
 0x5b5   :  { %11127 = vst [vmem:[#allocation100_spill] sm:$0xff] %v9063_v43  ;;  %11128 = vst [vmem:[#allocation101_spill] sm:$0xff] %v9066_v48 }
 0x5b7   :  { %3511 = vmatpush1.bf16.msra.mxu0 %v9051_v8  ;;  %3552 = vmatpush1.bf16.msra.mxu1 %v9054_v9  ;;  %v9069_v8 = vld [vmem:[#allocation8 + $0xa4] ss:$16 sps:$4 sm:$0xff]   ;;  %v9072_v9 = vld [vmem:[#allocation8 + $0xac] ss:$16 sps:$4 sm:$0xff]  }
 0x5b8   :  { %3512 = vmatprep.subr.bf16.mxu0 %v9057_v28  ;;  %3553 = vmatprep.subr.bf16.mxu1 %v9060_v24  ;;  %11129 = vst [vmem:[#allocation102_spill] sm:$0xff] %v9069_v8  ;;  %11130 = vst [vmem:[#allocation103_spill] sm:$0xff] %v9072_v9  ;;  %v9075_v28 = vld [vmem:[#allocation8 + $0xa0] ss:$16 sps:$4 sm:$0xff]   ;;  %v9078_v24 = vld [vmem:[#allocation8 + $0xa8] ss:$16 sps:$4 sm:$0xff]  }
 0x5b9   :  { %11131 = vst [vmem:[#allocation104_spill] sm:$0xff] %v9075_v28  ;;  %11132 = vst [vmem:[#allocation105_spill] sm:$0xff] %v9078_v24 }
 0x5bb   :  { %3513 = vmatpush1.bf16.msra.mxu0 %v9063_v43  ;;  %3554 = vmatpush1.bf16.msra.mxu1 %v9066_v48  ;;  %v9081_v43 = vld [vmem:[#allocation8 + $0xc4] ss:$16 sps:$4 sm:$0xff]   ;;  %v9084_v48 = vld [vmem:[#allocation8 + $0xcc] ss:$16 sps:$4 sm:$0xff]  }
 0x5bc   :  { %3514 = vmatprep.subr.bf16.mxu0 %v9069_v8  ;;  %3555 = vmatprep.subr.bf16.mxu1 %v9072_v9  ;;  %11133 = vst [vmem:[#allocation106_spill] sm:$0xff] %v9081_v43  ;;  %11134 = vst [vmem:[#allocation107_spill] sm:$0xff] %v9084_v48  ;;  %v9087_v8 = vld [vmem:[#allocation8 + $0xc0] ss:$16 sps:$4 sm:$0xff]   ;;  %v9090_v9 = vld [vmem:[#allocation8 + $0xc8] ss:$16 sps:$4 sm:$0xff]  }
 0x5bd   :  { %11135 = vst [vmem:[#allocation108_spill] sm:$0xff] %v9087_v8  ;;  %11136 = vst [vmem:[#allocation109_spill] sm:$0xff] %v9090_v9 }
 0x5bf   :  { %3515 = vmatpush1.bf16.msra.mxu0 %v9075_v28  ;;  %3556 = vmatpush1.bf16.msra.mxu1 %v9078_v24  ;;  %v9093_v28 = vld [vmem:[#allocation8 + $0xe4] ss:$16 sps:$4 sm:$0xff]   ;;  %v9096_v24 = vld [vmem:[#allocation8 + $0xec] ss:$16 sps:$4 sm:$0xff]  }
 0x5c0   :  { %3516 = vmatprep.subr.bf16.mxu0 %v9081_v43  ;;  %3557 = vmatprep.subr.bf16.mxu1 %v9084_v48  ;;  %11137 = vst [vmem:[#allocation110_spill] sm:$0xff] %v9093_v28  ;;  %11138 = vst [vmem:[#allocation111_spill] sm:$0xff] %v9096_v24  ;;  %v9099_v43 = vld [vmem:[#allocation8 + $0xe0] ss:$16 sps:$4 sm:$0xff]   ;;  %v9102_v48 = vld [vmem:[#allocation8 + $0xe8] ss:$16 sps:$4 sm:$0xff]  }
 0x5c1   :  { %11139 = vst [vmem:[#allocation112_spill] sm:$0xff] %v9099_v43  ;;  %11140 = vst [vmem:[#allocation113_spill] sm:$0xff] %v9102_v48 }
 0x5c3   :  { %3517 = vmatpush1.bf16.msra.mxu0 %v9087_v8  ;;  %3558 = vmatpush1.bf16.msra.mxu1 %v9090_v9  ;;  %v9105_v8 = vld [vmem:[#allocation6 + $0x4] ss:$16 sps:$4 sm:$0xff]   ;;  %v9108_v9 = vld [vmem:[#allocation6 + $0xc] ss:$16 sps:$4 sm:$0xff]  }
 0x5c4   :  { %3518 = vmatprep.subr.bf16.mxu0 %v9093_v28  ;;  %3559 = vmatprep.subr.bf16.mxu1 %v9096_v24  ;;  %11141 = vst [vmem:[#allocation114_spill] sm:$0xff] %v9105_v8  ;;  %11142 = vst [vmem:[#allocation115_spill] sm:$0xff] %v9108_v9 }
 0x5c7   :  { %3519 = vmatpush1.bf16.msra.mxu0 %v9099_v43  ;;  %3560 = vmatpush1.bf16.msra.mxu1 %v9102_v48 }
 0x5c8   :  { %3586 = vmatprep.subr.bf16.mxu0 %v9105_v8  ;;  %3627 = vmatprep.subr.bf16.mxu1 %v9108_v9 }
 0x5fd   :  { %v3016_v28 = vpop.f32.mrb[76].mxu0  ;;  %v3057_v49 = vpop.f32.mrb[76].mxu1 }
 0x5fe   :  { %v3018_v33 = vpop.f32.mrb[77].mxu0  ;;  %v3059_v24 = vpop.f32.mrb[77].mxu1 }
 0x5ff   :  { %v3020_v39 = vpop.f32.mrb[78].mxu0  ;;  %v3061_v34 = vpop.f32.mrb[78].mxu1 }
 0x600   :  { %v3021_v31 = vpop.f32.mrb[79].mxu0  ;;  %v3062_v43 = vpop.f32.mrb[79].mxu1 }
 0x61d   :  { %v3098_v54 = vpop.f32.mrb[80].mxu0  ;;  %v3139_v35 = vpop.f32.mrb[80].mxu1 }
 0x61e   :  { %v3099_v12 = vadd.f32 %v3098_v54, %v3016_v28  ;;  %v3140_v48 = vadd.f32 %v3139_v35, %v3057_v49  ;;  %v3100_v20 = vpop.f32.mrb[81].mxu0  ;;  %v3141_v17 = vpop.f32.mrb[81].mxu1 }
 0x61f   :  { %v3101_v38 = vadd.f32 %v3100_v20, %v3018_v33  ;;  %v3142_v8 = vadd.f32 %v3141_v17, %v3059_v24  ;;  %v3102_v36 = vpop.f32.mrb[82].mxu0  ;;  %v3143_v3 = vpop.f32.mrb[82].mxu1 }
 0x620   :  { %v3146_v9 = vadd.f32 %v3099_v12, %v7905_v59  ;;  %v3148_v0 = vadd.f32 %v3140_v48, %v7908_v14  ;;  %v3103_v2 = vpop.f32.mrb[83].mxu0  ;;  %v3144_v62 = vpop.f32.mrb[83].mxu1 }
 0x621   :  { %v3147_v34 = vadd.f32 %v3101_v38, %v7913_v61  ;;  %v3149_v35 = vadd.f32 %v3142_v8, %v7927_v23 }
 0x622   :  { %v5800_v31 = vmul.f32 -1.442695, %v3146_v9  ;;  %v5802_v39 = vmul.f32 -1.442695, %v3148_v0 }
 0x623   :  { %v5801_v43 = vmul.f32 -1.442695, %v3147_v34  ;;  %v5803_v36 = vmul.f32 -1.442695, %v3149_v35 }
 0x624   :  { %6306 = vpow2.f32 %v5800_v31 }
 0x625   :  { %6308 = vpow2.f32 %v5802_v39 }
 0x626   :  { %6310 = vpow2.f32 %v5801_v43 }
 0x62e   :  { %v6307_v20 = vpop.eup %6306 }
 0x62f   :  { %v6309_v17 = vpop.eup %6308  ;;  %v3162_v33 = vadd.f32 1.0, %v6307_v20 }
 0x630   :  { %v6311_v3 = vpop.eup %6310  ;;  %v3164_v54 = vadd.f32 1.0, %v6309_v17 }
 0x631   :  { %v3163_v12 = vadd.f32 1.0, %v6311_v3 }
 0x632   :  { %6312 = vrcp.f32 %v3164_v54 }
 0x633   :  { %6314 = vpow2.f32 %v5803_v36 }
 0x634   :  { %6316 = vrcp.f32 %v3163_v12 }
 0x635   :  { %6318 = vrcp.f32 %v3162_v33 }
 0x63c   :  { %v6313_v62 = vpop.eup %6312 }
 0x63d   :  { %v6315_v2 = vpop.eup %6314  ;;  %v3174_v0 = vmul.f32 2.0, %v6313_v62  ;;  %v3216_v38 = vpop.f32.mrb[84].mxu0  ;;  %v9123_v62 = vld [vmem:[#allocation6] ss:$16 sps:$4 sm:$0xff]  }
 0x63e   :  { %v3257_v49 = vpop.f32.mrb[84].mxu1  ;;  %v6317_v24 = vpop.eup %6316  ;;  %v3165_v39 = vadd.f32 1.0, %v6315_v2  ;;  %v9126_v2 = vld [vmem:[#allocation6 + $0x8] ss:$16 sps:$4 sm:$0xff]  }
 0x63f   :  { %v3218_v9 = vpop.f32.mrb[85].mxu0  ;;  %v3259_v28 = vpop.f32.mrb[85].mxu1  ;;  %v5804_v8 = vadd.f32 -1.0, %v3174_v0  ;;  %v3176_v17 = vmul.f32 %v6317_v24, %v8682_v6  ;;  %v9129_v6 = vld [vmem:[#allocation6 + $0x24] ss:$16 sps:$4 sm:$0xff]  }
 0x640   :  { %v3220_v48 = vpop.f32.mrb[86].mxu0  ;;  %v3261_v34 = vpop.f32.mrb[86].mxu1  ;;  %6320 = vrcp.f32 %v3165_v39  ;;  %v9132_v0 = vld [vmem:[#allocation6 + $0x2c] ss:$16 sps:$4 sm:$0xff]   ;;  %v9137_v24 = vld [vmem:[#allocation6 + $0x20] ss:$16 sps:$4 sm:$0xff]  }
 0x641   :  { %v6319_v31 = vpop.eup %6318  ;;  %v3221_v43 = vpop.f32.mrb[87].mxu0  ;;  %11143 = vst [vmem:[#allocation116_spill] sm:$0xff] %v9132_v0  ;;  %11144 = vst [vmem:[#allocation117_spill] sm:$0xff] %v9137_v24  ;;  %v9143_v48 = vld [vmem:[#allocation6 + $0x44] ss:$16 sps:$4 sm:$0xff]  }
 0x642   :  { %v3262_v35 = vpop.f32.mrb[87].mxu1  ;;  %v3177_v20 = vmul.f32 %v6319_v31, %v5804_v8  ;;  %v9140_v8 = vld [vmem:[#allocation6 + $0x28] ss:$16 sps:$4 sm:$0xff]   ;;  %11146 = vst [vmem:[#allocation119_spill] sm:$0xff] %v9143_v48  ;;  %v9146_v34 = vld [vmem:[#allocation6 + $0x4c] ss:$16 sps:$4 sm:$0xff]  }
 0x643   :  { %11145 = vst [vmem:[#allocation118_spill] sm:$0xff] %v9140_v8  ;;  %11147 = vst [vmem:[#allocation120_spill] sm:$0xff] %v9146_v34  ;;  %v9149_v31 = vld [vmem:[#allocation6 + $0x40] ss:$16 sps:$4 sm:$0xff]   ;;  %v9152_v39 = vld [vmem:[#allocation6 + $0x48] ss:$16 sps:$4 sm:$0xff]  }
 0x644   :  { %v9116_v36 = vadd.f32 %v3177_v20, %v3176_v17  ;;  %11148 = vst [vmem:[#allocation121_spill] sm:$0xff] %v9149_v31  ;;  %11149 = vst [vmem:[#allocation122_spill] sm:$0xff] %v9152_v39 }
 0x646   :  { %6322 = vtanh.f32 %v9116_v36 }
 0x64a   :  { %v6321_v3 = vpop.eup %6320 }
 0x650   :  { %v6323_v54 = vpop.eup %6322 }
 0x651   :  { %v3180_v12 = vmul.f32 %v6323_v54, %v6321_v3 }
 0x653   :  { %v9119_v33 = vpack.c.bf16 %v3180_v12, %v3180_v12  ;;  %v9155_v12 = vld [vmem:[#allocation6 + $0x64] ss:$16 sps:$4 sm:$0xff]  }
 0x654   :  { %11150 = vst [vmem:[#allocation123_spill] sm:$0xff] %v9155_v12 }
 0x655   :  { %3537 = vmatmul.mubr.bf16.vlgmr.msra.gmra.mrb[96].mxu0 %v9119_v33  ;;  %3578 = vmatmul.mubr.bf16.vlgmr.msra.gmra.mrb[96].mxu1 %v9119_v33 }
 0x656   :  { %3587 = vmatpush1.bf16.msra.mxu0 %v9123_v62  ;;  %3628 = vmatpush1.bf16.msra.mxu1 %v9126_v2 }
 0x657   :  { %3588 = vmatprep.subr.bf16.mxu0 %v9129_v6  ;;  %3629 = vmatprep.subr.bf16.mxu1 %v9132_v0 }
 0x658   :  { %3618 = vmatprep.mubr.bf16.mxu0 %v10759_v4  ;;  %3659 = vmatprep.mubr.bf16.mxu1 %v10759_v4 }
 0x65a   :  { %3589 = vmatpush1.bf16.msra.mxu0 %v9137_v24  ;;  %3630 = vmatpush1.bf16.msra.mxu1 %v9140_v8 }
 0x65b   :  { %3590 = vmatprep.subr.bf16.mxu0 %v9143_v48  ;;  %3631 = vmatprep.subr.bf16.mxu1 %v9146_v34  ;;  %v9158_v48 = vld [vmem:[#allocation6 + $0x6c] ss:$16 sps:$4 sm:$0xff]  }
 0x65d   :  { %v3298_v43 = vpop.f32.mrb[88].mxu0  ;;  %v3339_v35 = vpop.f32.mrb[88].mxu1 }
 0x65e   :  { %3591 = vmatpush1.bf16.msra.mxu0 %v9149_v31  ;;  %3632 = vmatpush1.bf16.msra.mxu1 %v9152_v39  ;;  %v3299_v20 = vadd.f32 %v3298_v43, %v3216_v38  ;;  %v3340_v17 = vadd.f32 %v3339_v35, %v3257_v49  ;;  %v3300_v3 = vpop.f32.mrb[89].mxu0  ;;  %v3341_v54 = vpop.f32.mrb[89].mxu1  ;;  %v9164_v35 = vld [vmem:[#allocation6 + $0x60] ss:$16 sps:$4 sm:$0xff]  }
 0x65f   :  { %3592 = vmatprep.subr.bf16.mxu0 %v9155_v12  ;;  %3633 = vmatprep.subr.bf16.mxu1 %v9158_v48  ;;  %v3301_v34 = vadd.f32 %v3300_v3, %v3218_v9  ;;  %v3342_v31 = vadd.f32 %v3341_v54, %v3259_v28  ;;  %v3302_v8 = vpop.f32.mrb[90].mxu0  ;;  %v3343_v24 = vpop.f32.mrb[90].mxu1  ;;  %v9167_v12 = vld [vmem:[#allocation6 + $0x68] ss:$16 sps:$4 sm:$0xff]   ;;  %v9188_v3 = vld [vmem:[#allocation6 + $0xa0] ss:$16 sps:$4 sm:$0xff]  }
 0x660   :  { %v3346_v39 = vadd.f32 %v3299_v20, %v8407_v63  ;;  %v3348_v0 = vadd.f32 %v3340_v17, %v8410_v15  ;;  %v3303_v38 = vpop.f32.mrb[91].mxu0  ;;  %v3344_v49 = vpop.f32.mrb[91].mxu1  ;;  %v9170_v8 = vld [vmem:[#allocation6 + $0x84] ss:$16 sps:$4 sm:$0xff]   ;;  %v9173_v24 = vld [vmem:[#allocation6 + $0x8c] ss:$16 sps:$4 sm:$0xff]  }
 0x661   :  { %v3347_v43 = vadd.f32 %v3301_v34, %v8419_v11  ;;  %v9176_v34 = vld [vmem:[#allocation6 + $0x80] ss:$16 sps:$4 sm:$0xff]   ;;  %v9179_v17 = vld [vmem:[#allocation6 + $0x88] ss:$16 sps:$4 sm:$0xff]   ;;  %11153 = vst [vmem:[#allocation126_spill] sm:$0xff] %v9188_v3 }
 0x662   :  { %3593 = vmatpush1.bf16.msra.mxu0 %v9164_v35  ;;  %3634 = vmatpush1.bf16.msra.mxu1 %v9167_v12  ;;  %v5805_v9 = vmul.f32 -1.442695, %v3346_v39  ;;  %v5807_v28 = vmul.f32 -1.442695, %v3348_v0  ;;  %v9182_v0 = vld [vmem:[#allocation6 + $0xa4] ss:$16 sps:$4 sm:$0xff]  }
 0x663   :  { %3594 = vmatprep.subr.bf16.mxu0 %v9170_v8  ;;  %3635 = vmatprep.subr.bf16.mxu1 %v9173_v24  ;;  %v5806_v20 = vmul.f32 -1.442695, %v3347_v43  ;;  %11151 = vst [vmem:[#allocation124_spill] sm:$0xff] %v9182_v0  ;;  %v9185_v39 = vld [vmem:[#allocation6 + $0xac] ss:$16 sps:$4 sm:$0xff]   ;;  %v3349_v43 = vadd.f32 %v3342_v31, %v11051_v42 }
 0x664   :  { %6324 = vpow2.f32 %v5805_v9  ;;  %11152 = vst [vmem:[#allocation125_spill] sm:$0xff] %v9185_v39  ;;  %v9191_v54 = vld [vmem:[#allocation6 + $0xa8] ss:$16 sps:$4 sm:$0xff]   ;;  %v9194_v38 = vld [vmem:[#allocation6 + $0xc4] ss:$16 sps:$4 sm:$0xff]  }
 0x665   :  { %6326 = vpow2.f32 %v5807_v28  ;;  %11154 = vst [vmem:[#allocation127_spill] sm:$0xff] %v9191_v54  ;;  %11155 = vst [vmem:[#allocation128_spill] sm:$0xff] %v9194_v38  ;;  %v9197_v49 = vld [vmem:[#allocation6 + $0xcc] ss:$16 sps:$4 sm:$0xff]   ;;  %v9201_v9 = vld [vmem:[#allocation6 + $0xc0] ss:$16 sps:$4 sm:$0xff]  }
 0x666   :  { %3595 = vmatpush1.bf16.msra.mxu0 %v9176_v34  ;;  %3636 = vmatpush1.bf16.msra.mxu1 %v9179_v17  ;;  %6328 = vpow2.f32 %v5806_v20  ;;  %11156 = vst [vmem:[#allocation130_spill] sm:$0xff] %v9197_v49  ;;  %11157 = vst [vmem:[#allocation131_spill] sm:$0xff] %v9201_v9  ;;  %v9204_v28 = vld [vmem:[#allocation6 + $0xc8] ss:$16 sps:$4 sm:$0xff]  }
 0x667   :  { %3596 = vmatprep.subr.bf16.mxu0 %v9182_v0  ;;  %3637 = vmatprep.subr.bf16.mxu1 %v9185_v39  ;;  %11158 = vst [vmem:[#allocation132_spill] sm:$0xff] %v9204_v28  ;;  %v5808_v39 = vmul.f32 -1.442695, %v3349_v43  ;;  %v9213_v0 = vld [vmem:[#allocation6 + $0xe0] ss:$16 sps:$4 sm:$0xff]  }
 0x668   :  { %v11163_v43 = vld [vmem:[#allocation29_spill] sm:$0xff] }
 0x66a   :  { %3597 = vmatpush1.bf16.msra.mxu0 %v9188_v3  ;;  %3638 = vmatpush1.bf16.msra.mxu1 %v9191_v54  ;;  %v9207_v54 = vld [vmem:[#allocation6 + $0xe4] ss:$16 sps:$4 sm:$0xff]  }
 0x66b   :  { %3598 = vmatprep.subr.bf16.mxu0 %v9194_v38  ;;  %3639 = vmatprep.subr.bf16.mxu1 %v9197_v49  ;;  %v9210_v38 = vld [vmem:[#allocation6 + $0xec] ss:$16 sps:$4 sm:$0xff]  }
 0x66e   :  { %3599 = vmatpush1.bf16.msra.mxu0 %v9201_v9  ;;  %3640 = vmatpush1.bf16.msra.mxu1 %v9204_v28  ;;  %v6325_v20 = vpop.eup %6324  ;;  %v9216_v9 = vld [vmem:[#allocation6 + $0xe8] ss:$16 sps:$4 sm:$0xff]  }
 0x66f   :  { %3600 = vmatprep.subr.bf16.mxu0 %v9207_v54  ;;  %3641 = vmatprep.subr.bf16.mxu1 %v9210_v38  ;;  %v6327_v49 = vpop.eup %6326  ;;  %v3362_v28 = vadd.f32 1.0, %v6325_v20 }
 0x670   :  { %v6329_v3 = vpop.eup %6328  ;;  %v3364_v31 = vadd.f32 1.0, %v6327_v49 }
 0x671   :  { %v3363_v42 = vadd.f32 1.0, %v6329_v3 }
 0x672   :  { %3601 = vmatpush1.bf16.msra.mxu0 %v9213_v0  ;;  %3642 = vmatpush1.bf16.msra.mxu1 %v9216_v9  ;;  %6330 = vrcp.f32 %v3364_v31 }
 0x673   :  { %3704 = vmatprep.subr.bf16.mxu0 %v8725_v1  ;;  %3745 = vmatprep.subr.bf16.mxu1 %v8728_v16  ;;  %6332 = vrcp.f32 %v3363_v42 }
 0x674   :  { %6334 = vpow2.f32 %v5808_v39 }
 0x675   :  { %3619 = vmatmul.mubr.bf16.vlgmr.msra.gmra.mrb[100].mxu0 %v9009_v50  ;;  %3660 = vmatmul.mubr.bf16.vlgmr.msra.gmra.mrb[100].mxu1 %v9009_v50  ;;  %6336 = vrcp.f32 %v3362_v28  ;;  %v11160_v50 = vld [vmem:[#allocation27_spill] sm:$0xff] }
 0x676   :  { %3705 = vmatpush1.bf16.msra.mxu0 %v8733_v47  ;;  %3746 = vmatpush1.bf16.msra.mxu1 %v8736_v19 }
 0x677   :  { %3706 = vmatprep.subr.bf16.mxu0 %v8739_v60  ;;  %3747 = vmatprep.subr.bf16.mxu1 %v8742_v10 }
 0x678   :  { %3736 = vmatprep.mubr.bf16.mxu0 %v10759_v4  ;;  %3777 = vmatprep.mubr.bf16.mxu1 %v10759_v4 }
 0x67a   :  { %3707 = vmatpush1.bf16.msra.mxu0 %v8747_v57  ;;  %3748 = vmatpush1.bf16.msra.mxu1 %v8750_v41 }
 0x67b   :  { %3708 = vmatprep.subr.bf16.mxu0 %v8753_v5  ;;  %3749 = vmatprep.subr.bf16.mxu1 %v8756_v18  ;;  %v11159_v5 = vld [vmem:[#allocation28_spill] sm:$0xff] }
 0x67c   :  { %v6331_v42 = vpop.eup %6330 }
 0x67d   :  { %v6333_v1 = vpop.eup %6332  ;;  %v3374_v16 = vmul.f32 2.0, %v6331_v42  ;;  %v3420_v60 = vpop.f32.mrb[92].mxu0 }
 0x67e   :  { %3709 = vmatpush1.bf16.msra.mxu0 %v8759_v29  ;;  %3750 = vmatpush1.bf16.msra.mxu1 %v8762_v21  ;;  %v6335_v47 = vpop.eup %6334  ;;  %v3461_v10 = vpop.f32.mrb[92].mxu1  ;;  %v3376_v41 = vmul.f32 %v6333_v1, %v8784_v7  ;;  %v3468_v18 = vadd.f32 %v3420_v60, %v11159_v5  ;;  %v11161_v21 = vld [vmem:[#allocation39_spill] sm:$0xff]  ;;  %v11164_v1 = vld [vmem:[#allocation40_spill] sm:$0xff]  ;;  %v11166_v5 = vld [vmem:[#allocation42_spill] sm:$0xff] }
 0x67f   :  { %3710 = vmatprep.subr.bf16.mxu0 %v8765_v45  ;;  %3751 = vmatprep.subr.bf16.mxu1 %v8768_v26  ;;  %v5809_v19 = vadd.f32 -1.0, %v3374_v16  ;;  %v6337_v57 = vpop.eup %6336  ;;  %v3470_v39 = vadd.f32 %v3461_v10, %v11160_v50  ;;  %v3422_v3 = vpop.f32.mrb[93].mxu0  ;;  %v11162_v45 = vld [vmem:[#allocation30_spill] sm:$0xff]  ;;  %v11165_v16 = vld [vmem:[#allocation41_spill] sm:$0xff]  ;;  %v11167_v50 = vld [vmem:[#allocation43_spill] sm:$0xff] }
 0x680   :  { %v3463_v49 = vpop.f32.mrb[93].mxu1  ;;  %v3469_v26 = vadd.f32 %v3422_v3, %v11162_v45  ;;  %v3424_v20 = vpop.f32.mrb[94].mxu0  ;;  %v5810_v42 = vmul.f32 -1.442695, %v3468_v18  ;;  %v11168_v3 = vld [vmem:[#allocation44_spill] sm:$0xff]  ;;  %v11169_v18 = vld [vmem:[#allocation45_spill] sm:$0xff] }
 0x681   :  { %v3377_v29 = vmul.f32 %v6337_v57, %v5809_v19  ;;  %v9244_v28 = vadd.f32 %v3463_v49, %v11163_v43  ;;  %v3465_v31 = vpop.f32.mrb[94].mxu1  ;;  %v5812_v7 = vmul.f32 -1.442695, %v3470_v39  ;;  %v3425_v60 = vpop.f32.mrb[95].mxu0  ;;  %v11170_v39 = vld [vmem:[#allocation46_spill] sm:$0xff]  ;;  %v11173_v49 = vld [vmem:[#allocation49_spill] sm:$0xff] }
 0x682   :  { %3711 = vmatpush1.bf16.msra.mxu0 %v8772_v46  ;;  %3752 = vmatpush1.bf16.msra.mxu1 %v11161_v21  ;;  %v3466_v10 = vpop.f32.mrb[95].mxu1  ;;  %v3365_v46 = vadd.f32 1.0, %v6335_v47  ;;  %v5811_v57 = vmul.f32 -1.442695, %v3469_v26  ;;  %6338 = vpow2.f32 %v5810_v42  ;;  %v11172_v47 = vld [vmem:[#allocation48_spill] sm:$0xff]  ;;  %v11175_v21 = vld [vmem:[#allocation51_spill] sm:$0xff] }
 0x683   :  { %3712 = vmatprep.subr.bf16.mxu0 %v11164_v1  ;;  %3753 = vmatprep.subr.bf16.mxu1 %v11165_v16  ;;  %v9248_v19 = vadd.f32 %v3377_v29, %v3376_v41  ;;  %6340 = vpow2.f32 %v5812_v7  ;;  %v11171_v41 = vld [vmem:[#allocation47_spill] sm:$0xff]  ;;  %v11174_v29 = vld [vmem:[#allocation50_spill] sm:$0xff]  ;;  %v11176_v26 = vld [vmem:[#allocation52_spill] sm:$0xff] }
 0x684   :  { %6342 = vpow2.f32 %v5811_v57  ;;  %v11177_v43 = vld [vmem:[#allocation53_spill] sm:$0xff]  ;;  %v11178_v16 = vld [vmem:[#allocation54_spill] sm:$0xff]  ;;  %v11179_v60 = vld [vmem:[#allocation55_spill] sm:$0xff] }
 0x685   :  { %6344 = vrcp.f32 %v3365_v46  ;;  %v11180_v57 = vld [vmem:[#allocation56_spill] sm:$0xff] }
 0x686   :  { %3713 = vmatpush1.bf16.msra.mxu0 %v11166_v5  ;;  %3754 = vmatpush1.bf16.msra.mxu1 %v11167_v50  ;;  %6346 = vtanh.f32 %v9248_v19  ;;  %v11181_v5 = vld [vmem:[#allocation57_spill] sm:$0xff] }
 0x687   :  { %3714 = vmatprep.subr.bf16.mxu0 %v11168_v3  ;;  %3755 = vmatprep.subr.bf16.mxu1 %v11169_v18  ;;  %v11182_v18 = vld [vmem:[#allocation58_spill] sm:$0xff] }
 0x68a   :  { %3715 = vmatpush1.bf16.msra.mxu0 %v11170_v39  ;;  %3756 = vmatpush1.bf16.msra.mxu1 %v11171_v41  ;;  %v11183_v39 = vld [vmem:[#allocation59_spill] sm:$0xff]  ;;  %v11184_v41 = vld [vmem:[#allocation60_spill] sm:$0xff] }
 0x68b   :  { %3716 = vmatprep.subr.bf16.mxu0 %v11172_v47  ;;  %3757 = vmatprep.subr.bf16.mxu1 %v11173_v49  ;;  %v11185_v47 = vld [vmem:[#allocation61_spill] sm:$0xff] }
 0x68c   :  { %v6339_v45 = vpop.eup %6338 }
 0x68d   :  { %v6341_v20 = vpop.eup %6340  ;;  %v3484_v46 = vadd.f32 1.0, %v6339_v45 }
 0x68e   :  { %3717 = vmatpush1.bf16.msra.mxu0 %v11174_v29  ;;  %3758 = vmatpush1.bf16.msra.mxu1 %v11175_v21  ;;  %v6343_v31 = vpop.eup %6342  ;;  %v3486_v42 = vadd.f32 1.0, %v6341_v20  ;;  %v11186_v29 = vld [vmem:[#allocation62_spill] sm:$0xff]  ;;  %v11187_v21 = vld [vmem:[#allocation63_spill] sm:$0xff] }
 0x68f   :  { %3718 = vmatprep.subr.bf16.mxu0 %v11176_v26  ;;  %3759 = vmatprep.subr.bf16.mxu1 %v11177_v43  ;;  %v6345_v7 = vpop.eup %6344  ;;  %v3485_v1 = vadd.f32 1.0, %v6343_v31  ;;  %v11188_v26 = vld [vmem:[#allocation64_spill] sm:$0xff]  ;;  %v11189_v43 = vld [vmem:[#allocation65_spill] sm:$0xff] }
 0x690   :  { %v6347_v10 = vpop.eup %6346  ;;  %6348 = vrcp.f32 %v3486_v42 }
 0x691   :  { %v3380_v50 = vmul.f32 %v6347_v10, %v6345_v7  ;;  %6350 = vrcp.f32 %v3485_v1  ;;  %v11190_v7 = vld [vmem:[#allocation66_spill] sm:$0xff]  ;;  %v11191_v1 = vld [vmem:[#allocation67_spill] sm:$0xff]  ;;  %v11192_v10 = vld [vmem:[#allocation68_spill] sm:$0xff] }
 0x692   :  { %3719 = vmatpush1.bf16.msra.mxu0 %v11178_v16  ;;  %3760 = vmatpush1.bf16.msra.mxu1 %v11179_v60  ;;  %6352 = vrcp.f32 %v3484_v46  ;;  %v11193_v46 = vld [vmem:[#allocation69_spill] sm:$0xff] }
 0x693   :  { %3786 = vmatprep.subr.bf16.mxu0 %v11180_v57  ;;  %3827 = vmatprep.subr.bf16.mxu1 %v11181_v5  ;;  %v3703_v3 = vpack.c.bf16 %v3380_v50, %v3380_v50  ;;  %v11194_v5 = vld [vmem:[#allocation70_spill] sm:$0xff]  ;;  %v11195_v50 = vld [vmem:[#allocation81_spill] sm:$0xff] }
 0x695   :  { %3737 = vmatmul.mubr.bf16.vlgmr.msra.gmra.mrb[104].mxu0 %v3703_v3  ;;  %3778 = vmatmul.mubr.bf16.vlgmr.msra.gmra.mrb[104].mxu1 %v3703_v3  ;;  %v11196_v3 = vld [vmem:[#allocation71_spill] sm:$0xff] }
 0x696   :  { %3787 = vmatpush1.bf16.msra.mxu0 %v11182_v18  ;;  %3828 = vmatpush1.bf16.msra.mxu1 %v11183_v39  ;;  %v11197_v18 = vld [vmem:[#allocation72_spill] sm:$0xff]  ;;  %v11199_v39 = vld [vmem:[#allocation19_spill] sm:$0xff] }
 0x697   :  { %3788 = vmatprep.subr.bf16.mxu0 %v11184_v41  ;;  %3829 = vmatprep.subr.bf16.mxu1 %v11185_v47  ;;  %v9343_v41 = vld [vmem:[#allocation4 + $0x64] ss:$16 sps:$4 sm:$0xff]   ;;  %v9346_v47 = vld [vmem:[#allocation4 + $0x6c] ss:$16 sps:$4 sm:$0xff]  }
 0x698   :  { %3818 = vmatprep.mubr.bf16.mxu0 %v10759_v4  ;;  %3859 = vmatprep.mubr.bf16.mxu1 %v10759_v4 }
 0x69a   :  { %v6349_v49 = vpop.eup %6348  ;;  %3789 = vmatpush1.bf16.msra.mxu0 %v11186_v29  ;;  %3830 = vmatpush1.bf16.msra.mxu1 %v11187_v21  ;;  %v9349_v29 = vld [vmem:[#allocation4 + $0x60] ss:$16 sps:$4 sm:$0xff]   ;;  %v9352_v21 = vld [vmem:[#allocation4 + $0x68] ss:$16 sps:$4 sm:$0xff]  }
 0x69b   :  { %v3496_v45 = vmul.f32 2.0, %v6349_v49  ;;  %3790 = vmatprep.subr.bf16.mxu0 %v11188_v26  ;;  %3831 = vmatprep.subr.bf16.mxu1 %v11189_v43  ;;  %v6351_v20 = vpop.eup %6350  ;;  %v11201_v26 = vld [vmem:[#allocation21_spill] sm:$0xff] }
 0x69c   :  { %v6353_v42 = vpop.eup %6352  ;;  %v3498_v60 = vmul.f32 %v6351_v20, %v8958_v22  ;;  %v11198_v22 = vld [vmem:[#allocation20_spill] sm:$0xff]  ;;  %v11202_v43 = vld [vmem:[#allocation73_spill] sm:$0xff]  ;;  %v11203_v20 = vld [vmem:[#allocation74_spill] sm:$0xff] }
 0x69d   :  { %v5814_v31 = vadd.f32 -1.0, %v3496_v45  ;;  %v11200_v45 = vld [vmem:[#allocation22_spill] sm:$0xff] }
 0x69e   :  { %3791 = vmatpush1.bf16.msra.mxu0 %v11190_v7  ;;  %3832 = vmatpush1.bf16.msra.mxu1 %v11191_v1  ;;  %v11206_v7 = vld [vmem:[#allocation77_spill] sm:$0xff]  ;;  %v11207_v1 = vld [vmem:[#allocation78_spill] sm:$0xff] }
 0x69f   :  { %v3499_v16 = vmul.f32 %v6353_v42, %v5814_v31  ;;  %3792 = vmatprep.subr.bf16.mxu0 %v11192_v10  ;;  %3833 = vmatprep.subr.bf16.mxu1 %v11193_v46  ;;  %v11204_v31 = vld [vmem:[#allocation75_spill] sm:$0xff]  ;;  %v11205_v42 = vld [vmem:[#allocation76_spill] sm:$0xff]  ;;  %v11210_v10 = vld [vmem:[#allocation82_spill] sm:$0xff] }
 0x6a0   :  { %v11211_v46 = vld [vmem:[#allocation83_spill] sm:$0xff] }
 0x6a1   :  { %v9282_v57 = vadd.f32 %v3499_v16, %v3498_v60  ;;  %v11209_v60 = vld [vmem:[#allocation80_spill] sm:$0xff] }
 0x6a2   :  { %3793 = vmatpush1.bf16.msra.mxu0 %v11194_v5  ;;  %3834 = vmatpush1.bf16.msra.mxu1 %v11195_v50  ;;  %v11212_v50 = vld [vmem:[#allocation84_spill] sm:$0xff] }
 0x6a3   :  { %3794 = vmatprep.subr.bf16.mxu0 %v11196_v3  ;;  %3835 = vmatprep.subr.bf16.mxu1 %v11197_v18  ;;  %v11213_v3 = vld [vmem:[#allocation85_spill] sm:$0xff] }
 0x6a6   :  { %3795 = vmatpush1.bf16.msra.mxu0 %v8889_v30  ;;  %3836 = vmatpush1.bf16.msra.mxu1 %v8892_v56  ;;  %v5813_v30 = vmul.f32 -1.442695, %v9244_v28  ;;  %v9303_v56 = vld [vmem:[#allocation4 + $0x4] ss:$16 sps:$4 sm:$0xff]   ;;  %v9340_v28 = vld [vmem:[#allocation4 + $0x48] ss:$16 sps:$4 sm:$0xff]  }
 0x6a7   :  { %3796 = vmatprep.subr.bf16.mxu0 %v8895_v37  ;;  %3837 = vmatprep.subr.bf16.mxu1 %v8898_v32  ;;  %v9306_v37 = vld [vmem:[#allocation4 + $0xc] ss:$16 sps:$4 sm:$0xff]   ;;  %v9311_v32 = vld [vmem:[#allocation4] ss:$16 sps:$4 sm:$0xff]  }
 0x6a8   :  { %6354 = vpow2.f32 %v5813_v30  ;;  %v11215_v30 = vld [vmem:[#allocation87_spill] sm:$0xff] }
 0x6a9   :  { %6356 = vtanh.f32 %v9282_v57 }
 0x6aa   :  { %3797 = vmatpush1.bf16.msra.mxu0 %v8901_v25  ;;  %3838 = vmatpush1.bf16.msra.mxu1 %v8904_v44  ;;  %v9314_v25 = vld [vmem:[#allocation4 + $0x8] ss:$16 sps:$4 sm:$0xff]   ;;  %v9317_v44 = vld [vmem:[#allocation4 + $0x24] ss:$16 sps:$4 sm:$0xff]  }
 0x6ab   :  { %3798 = vmatprep.subr.bf16.mxu0 %v8907_v53  ;;  %3839 = vmatprep.subr.bf16.mxu1 %v8910_v40  ;;  %v9320_v53 = vld [vmem:[#allocation4 + $0x2c] ss:$16 sps:$4 sm:$0xff]   ;;  %v9325_v40 = vld [vmem:[#allocation4 + $0x20] ss:$16 sps:$4 sm:$0xff]  }
 0x6ae   :  { %3799 = vmatpush1.bf16.msra.mxu0 %v8913_v55  ;;  %3840 = vmatpush1.bf16.msra.mxu1 %v11198_v22  ;;  %v9328_v55 = vld [vmem:[#allocation4 + $0x28] ss:$16 sps:$4 sm:$0xff]  }
 0x6af   :  { %3800 = vmatprep.subr.bf16.mxu0 %v11199_v39  ;;  %3841 = vmatprep.subr.bf16.mxu1 %v8922_v13  ;;  %v9331_v13 = vld [vmem:[#allocation4 + $0x44] ss:$16 sps:$4 sm:$0xff]   ;;  %v11214_v22 = vld [vmem:[#allocation86_spill] sm:$0xff]  ;;  %v11216_v39 = vld [vmem:[#allocation88_spill] sm:$0xff] }
 0x6b2   :  { %3801 = vmatpush1.bf16.msra.mxu0 %v8925_v58  ;;  %3842 = vmatpush1.bf16.msra.mxu1 %v8928_v27  ;;  %v9334_v58 = vld [vmem:[#allocation4 + $0x4c] ss:$16 sps:$4 sm:$0xff]   ;;  %v6355_v27 = vpop.eup %6354 }
 0x6b3   :  { %3908 = vmatprep.subr.bf16.mxu0 %v9303_v56  ;;  %3949 = vmatprep.subr.bf16.mxu1 %v9306_v37  ;;  %v3487_v49 = vadd.f32 1.0, %v6355_v27  ;;  %v11217_v27 = vld [vmem:[#allocation89_spill] sm:$0xff] }
 0x6b5   :  { %3819 = vmatmul.mubr.bf16.vlgmr.msra.gmra.mrb[108].mxu0 %v9119_v33  ;;  %3860 = vmatmul.mubr.bf16.vlgmr.msra.gmra.mrb[108].mxu1 %v9119_v33  ;;  %v9337_v33 = vld [vmem:[#allocation4 + $0x40] ss:$16 sps:$4 sm:$0xff]   ;;  %6358 = vrcp.f32 %v3487_v49  ;;  %v11218_v49 = vld [vmem:[#allocation16_spill] sm:$0xff] }
 0x6b6   :  { %3909 = vmatpush1.bf16.msra.mxu0 %v9311_v32  ;;  %3950 = vmatpush1.bf16.msra.mxu1 %v9314_v25 }
 0x6b7   :  { %3910 = vmatprep.subr.bf16.mxu0 %v9317_v44  ;;  %3951 = vmatprep.subr.bf16.mxu1 %v9320_v53 }
 0x6b8   :  { %3940 = vmatprep.mubr.bf16.mxu0 %v10759_v4  ;;  %3981 = vmatprep.mubr.bf16.mxu1 %v10759_v4 }
 0x6ba   :  { %3911 = vmatpush1.bf16.msra.mxu0 %v9325_v40  ;;  %3952 = vmatpush1.bf16.msra.mxu1 %v9328_v55 }
 0x6bb   :  { %3912 = vmatprep.subr.bf16.mxu0 %v9331_v13  ;;  %3953 = vmatprep.subr.bf16.mxu1 %v9334_v58 }
 0x6be   :  { %3913 = vmatpush1.bf16.msra.mxu0 %v9337_v33  ;;  %3954 = vmatpush1.bf16.msra.mxu1 %v9340_v28 }
 0x6bf   :  { %3914 = vmatprep.subr.bf16.mxu0 %v9343_v41  ;;  %3955 = vmatprep.subr.bf16.mxu1 %v9346_v47 }
 0x6c2   :  { %3915 = vmatpush1.bf16.msra.mxu0 %v9349_v29  ;;  %3956 = vmatpush1.bf16.msra.mxu1 %v9352_v21 }
 0x6c3   :  { %3916 = vmatprep.subr.bf16.mxu0 %v8951_v51  ;;  %3957 = vmatprep.subr.bf16.mxu1 %v8954_v52  ;;  %v6357_v51 = vpop.eup %6356  ;;  %v11208_v52 = vld [vmem:[#allocation79_spill] sm:$0xff] }
 0x6c4   :  { %v6359_v16 = vpop.eup %6358 }
 0x6c5   :  { %v3502_v5 = vmul.f32 %v6359_v16, %v6357_v51  ;;  %v11227_v51 = vld [vmem:[#allocation95_spill] sm:$0xff]  ;;  %v11228_v16 = vld [vmem:[#allocation96_spill] sm:$0xff] }
 0x6c6   :  { %3917 = vmatpush1.bf16.msra.mxu0 %v11200_v45  ;;  %3958 = vmatpush1.bf16.msra.mxu1 %v11201_v26  ;;  %v11219_v45 = vld [vmem:[#allocation15_spill] sm:$0xff]  ;;  %v11220_v26 = vld [vmem:[#allocation18_spill] sm:$0xff] }
 0x6c7   :  { %3918 = vmatprep.subr.bf16.mxu0 %v11202_v43  ;;  %3959 = vmatprep.subr.bf16.mxu1 %v11203_v20  ;;  %v9372_v18 = vpack.c.bf16 %v3502_v5, %v3502_v5  ;;  %v11221_v43 = vld [vmem:[#allocation17_spill] sm:$0xff]  ;;  %v11222_v20 = vld [vmem:[#allocation90_spill] sm:$0xff] }
 0x6c8   :  { %v11233_v5 = vld [vmem:[#allocation101_spill] sm:$0xff] }
 0x6ca   :  { %3919 = vmatpush1.bf16.msra.mxu0 %v11204_v31  ;;  %3960 = vmatpush1.bf16.msra.mxu1 %v11205_v42  ;;  %v11223_v31 = vld [vmem:[#allocation91_spill] sm:$0xff]  ;;  %v11224_v42 = vld [vmem:[#allocation92_spill] sm:$0xff] }
 0x6cb   :  { %3920 = vmatprep.subr.bf16.mxu0 %v11206_v7  ;;  %3961 = vmatprep.subr.bf16.mxu1 %v11207_v1  ;;  %v11225_v7 = vld [vmem:[#allocation93_spill] sm:$0xff]  ;;  %v11226_v1 = vld [vmem:[#allocation94_spill] sm:$0xff] }
 0x6ce   :  { %3921 = vmatpush1.bf16.msra.mxu0 %v11208_v52  ;;  %3962 = vmatpush1.bf16.msra.mxu1 %v11209_v60  ;;  %v11229_v52 = vld [vmem:[#allocation97_spill] sm:$0xff]  ;;  %v11230_v60 = vld [vmem:[#allocation98_spill] sm:$0xff] }
 0x6cf   :  { %3922 = vmatprep.subr.bf16.mxu0 %v11210_v10  ;;  %3963 = vmatprep.subr.bf16.mxu1 %v11211_v46  ;;  %v11231_v10 = vld [vmem:[#allocation99_spill] sm:$0xff]  ;;  %v11232_v46 = vld [vmem:[#allocation100_spill] sm:$0xff] }
 0x6d2   :  { %3923 = vmatpush1.bf16.msra.mxu0 %v11212_v50  ;;  %3964 = vmatpush1.bf16.msra.mxu1 %v11213_v3  ;;  %v11234_v50 = vld [vmem:[#allocation102_spill] sm:$0xff]  ;;  %v11235_v3 = vld [vmem:[#allocation103_spill] sm:$0xff] }
 0x6d3   :  { %4026 = vmatprep.subr.bf16.mxu0 %v11214_v22  ;;  %4067 = vmatprep.subr.bf16.mxu1 %v11215_v30  ;;  %v11236_v22 = vld [vmem:[#allocation104_spill] sm:$0xff]  ;;  %v11237_v30 = vld [vmem:[#allocation105_spill] sm:$0xff] }
 0x6d5   :  { %3941 = vmatmul.mubr.bf16.vlgmr.msra.gmra.mrb[112].mxu0 %v9372_v18  ;;  %3982 = vmatmul.mubr.bf16.vlgmr.msra.gmra.mrb[112].mxu1 %v9372_v18 }
 0x6d6   :  { %4027 = vmatpush1.bf16.msra.mxu0 %v11216_v39  ;;  %4068 = vmatpush1.bf16.msra.mxu1 %v11217_v27  ;;  %v11238_v39 = vld [vmem:[#allocation106_spill] sm:$0xff]  ;;  %v11239_v27 = vld [vmem:[#allocation107_spill] sm:$0xff] }
 0x6d7   :  { %4028 = vmatprep.subr.bf16.mxu0 %v11218_v49  ;;  %4069 = vmatprep.subr.bf16.mxu1 %v11219_v45  ;;  %v11240_v49 = vld [vmem:[#allocation108_spill] sm:$0xff]  ;;  %v11241_v45 = vld [vmem:[#allocation109_spill] sm:$0xff] }
 0x6d8   :  { %4058 = vmatprep.mubr.bf16.mxu0 %v10759_v4  ;;  %4099 = vmatprep.mubr.bf16.mxu1 %v10759_v4 }
 0x6da   :  { %4029 = vmatpush1.bf16.msra.mxu0 %v11220_v26  ;;  %4070 = vmatpush1.bf16.msra.mxu1 %v11221_v43  ;;  %v11242_v26 = vld [vmem:[#allocation110_spill] sm:$0xff]  ;;  %v11243_v43 = vld [vmem:[#allocation111_spill] sm:$0xff] }
 0x6db   :  { %4030 = vmatprep.subr.bf16.mxu0 %v11222_v20  ;;  %4071 = vmatprep.subr.bf16.mxu1 %v11223_v31  ;;  %v11244_v20 = vld [vmem:[#allocation112_spill] sm:$0xff]  ;;  %v11245_v31 = vld [vmem:[#allocation113_spill] sm:$0xff] }
 0x6de   :  { %4031 = vmatpush1.bf16.msra.mxu0 %v11224_v42  ;;  %4072 = vmatpush1.bf16.msra.mxu1 %v11225_v7  ;;  %v11246_v42 = vld [vmem:[#allocation114_spill] sm:$0xff]  ;;  %v11247_v7 = vld [vmem:[#allocation115_spill] sm:$0xff] }
 0x6df   :  { %4032 = vmatprep.subr.bf16.mxu0 %v11226_v1  ;;  %4073 = vmatprep.subr.bf16.mxu1 %v11227_v51 }
 0x6e2   :  { %4033 = vmatpush1.bf16.msra.mxu0 %v11228_v16  ;;  %4074 = vmatpush1.bf16.msra.mxu1 %v11229_v52 }
 0x6e3   :  { %4034 = vmatprep.subr.bf16.mxu0 %v11230_v60  ;;  %4075 = vmatprep.subr.bf16.mxu1 %v11231_v10 }
 0x6e6   :  { %4035 = vmatpush1.bf16.msra.mxu0 %v11232_v46  ;;  %4076 = vmatpush1.bf16.msra.mxu1 %v11233_v5 }
 0x6e7   :  { %4036 = vmatprep.subr.bf16.mxu0 %v11234_v50  ;;  %4077 = vmatprep.subr.bf16.mxu1 %v11235_v3 }
 0x6ea   :  { %4037 = vmatpush1.bf16.msra.mxu0 %v11236_v22  ;;  %4078 = vmatpush1.bf16.msra.mxu1 %v11237_v30 }
 0x6eb   :  { %4038 = vmatprep.subr.bf16.mxu0 %v11238_v39  ;;  %4079 = vmatprep.subr.bf16.mxu1 %v11239_v27 }
 0x6ee   :  { %4039 = vmatpush1.bf16.msra.mxu0 %v11240_v49  ;;  %4080 = vmatpush1.bf16.msra.mxu1 %v11241_v45 }
 0x6ef   :  { %4040 = vmatprep.subr.bf16.mxu0 %v11242_v26  ;;  %4081 = vmatprep.subr.bf16.mxu1 %v11243_v43 }
 0x6f2   :  { %4041 = vmatpush1.bf16.msra.mxu0 %v11244_v20  ;;  %4082 = vmatpush1.bf16.msra.mxu1 %v11245_v31 }
 0x6f3   :  { %4108 = vmatprep.subr.bf16.mxu0 %v11246_v42  ;;  %4149 = vmatprep.subr.bf16.mxu1 %v11247_v7 }
 0x728   :  { %v3538_v1 = vpop.f32.mrb[96].mxu0  ;;  %v3579_v51 = vpop.f32.mrb[96].mxu1 }
 0x729   :  { %v3540_v16 = vpop.f32.mrb[97].mxu0  ;;  %v3581_v52 = vpop.f32.mrb[97].mxu1 }
 0x72a   :  { %v3542_v60 = vpop.f32.mrb[98].mxu0  ;;  %v3583_v10 = vpop.f32.mrb[98].mxu1 }
 0x72b   :  { %v3543_v46 = vpop.f32.mrb[99].mxu0  ;;  %v3584_v5 = vpop.f32.mrb[99].mxu1 }
 0x748   :  { %v3620_v50 = vpop.f32.mrb[100].mxu0  ;;  %v3661_v3 = vpop.f32.mrb[100].mxu1 }
 0x749   :  { %v3621_v22 = vadd.f32 %v3620_v50, %v3538_v1  ;;  %v3662_v30 = vadd.f32 %v3661_v3, %v3579_v51  ;;  %v3622_v39 = vpop.f32.mrb[101].mxu0  ;;  %v3663_v27 = vpop.f32.mrb[101].mxu1 }
 0x74a   :  { %v3623_v49 = vadd.f32 %v3622_v39, %v3540_v16  ;;  %v3664_v45 = vadd.f32 %v3663_v27, %v3581_v52  ;;  %v3624_v26 = vpop.f32.mrb[102].mxu0  ;;  %v3665_v43 = vpop.f32.mrb[102].mxu1 }
 0x74b   :  { %v3668_v20 = vadd.f32 %v3621_v22, %v7905_v59  ;;  %v3670_v31 = vadd.f32 %v3662_v30, %v7908_v14  ;;  %v3625_v42 = vpop.f32.mrb[103].mxu0  ;;  %v3666_v7 = vpop.f32.mrb[103].mxu1 }
 0x74c   :  { %v3669_v60 = vadd.f32 %v3623_v49, %v7913_v61  ;;  %v3671_v1 = vadd.f32 %v3664_v45, %v7927_v23 }
 0x74d   :  { %v5815_v10 = vmul.f32 -1.442695, %v3668_v20  ;;  %v5817_v46 = vmul.f32 -1.442695, %v3670_v31 }
 0x74e   :  { %v5816_v5 = vmul.f32 -1.442695, %v3669_v60  ;;  %v5818_v52 = vmul.f32 -1.442695, %v3671_v1 }
 0x74f   :  { %6360 = vpow2.f32 %v5815_v10 }
 0x750   :  { %6362 = vpow2.f32 %v5817_v46 }
 0x751   :  { %6364 = vpow2.f32 %v5816_v5 }
 0x759   :  { %v6361_v51 = vpop.eup %6360 }
 0x75a   :  { %v6363_v16 = vpop.eup %6362  ;;  %v3684_v39 = vadd.f32 1.0, %v6361_v51 }
 0x75b   :  { %v6365_v50 = vpop.eup %6364  ;;  %v3686_v3 = vadd.f32 1.0, %v6363_v16 }
 0x75c   :  { %v3685_v22 = vadd.f32 1.0, %v6365_v50 }
 0x75d   :  { %6366 = vrcp.f32 %v3686_v3 }
 0x75e   :  { %6368 = vpow2.f32 %v5818_v52 }
 0x75f   :  { %6370 = vrcp.f32 %v3685_v22 }
 0x760   :  { %6372 = vrcp.f32 %v3684_v39 }
 0x767   :  { %v6367_v30 = vpop.eup %6366 }
 0x768   :  { %v6369_v27 = vpop.eup %6368  ;;  %v3696_v49 = vmul.f32 2.0, %v6367_v30  ;;  %v3738_v42 = vpop.f32.mrb[104].mxu0  ;;  %v11249_v30 = vld [vmem:[#allocation117_spill] sm:$0xff] }
 0x769   :  { %v6371_v26 = vpop.eup %6370  ;;  %v3687_v31 = vadd.f32 1.0, %v6369_v27  ;;  %v3779_v45 = vpop.f32.mrb[104].mxu1  ;;  %v11250_v27 = vld [vmem:[#allocation118_spill] sm:$0xff] }
 0x76a   :  { %v5819_v43 = vadd.f32 -1.0, %v3696_v49  ;;  %v6373_v20 = vpop.eup %6372  ;;  %v3698_v60 = vmul.f32 %v6371_v26, %v9116_v36  ;;  %v3740_v10 = vpop.f32.mrb[105].mxu0  ;;  %v11248_v36 = vld [vmem:[#allocation116_spill] sm:$0xff]  ;;  %v11251_v49 = vld [vmem:[#allocation119_spill] sm:$0xff] }
 0x76b   :  { %v3781_v46 = vpop.f32.mrb[105].mxu1  ;;  %v3742_v5 = vpop.f32.mrb[106].mxu0  ;;  %6374 = vrcp.f32 %v3687_v31  ;;  %v11252_v26 = vld [vmem:[#allocation120_spill] sm:$0xff] }
 0x76c   :  { %v3699_v7 = vmul.f32 %v6373_v20, %v5819_v43  ;;  %v3783_v1 = vpop.f32.mrb[106].mxu1  ;;  %v3743_v16 = vpop.f32.mrb[107].mxu0  ;;  %v11253_v43 = vld [vmem:[#allocation121_spill] sm:$0xff] }
 0x76d   :  { %v3784_v52 = vpop.f32.mrb[107].mxu1 }
 0x76e   :  { %v9417_v51 = vadd.f32 %v3699_v7, %v3698_v60 }
 0x770   :  { %6376 = vtanh.f32 %v9417_v51 }
 0x775   :  { %v6375_v50 = vpop.eup %6374 }
 0x77a   :  { %v6377_v3 = vpop.eup %6376 }
 0x77b   :  { %v3702_v22 = vmul.f32 %v6377_v3, %v6375_v50 }
 0x77d   :  { %v9420_v39 = vpack.c.bf16 %v3702_v22, %v3702_v22 }
 0x77f   :  { %4059 = vmatmul.mubr.bf16.vlgmr.msra.gmra.mrb[116].mxu0 %v9420_v39  ;;  %4100 = vmatmul.mubr.bf16.vlgmr.msra.gmra.mrb[116].mxu1 %v9420_v39 }
 0x780   :  { %4109 = vmatpush1.bf16.msra.mxu0 %v9123_v62  ;;  %4150 = vmatpush1.bf16.msra.mxu1 %v9126_v2  ;;  %v11254_v62 = vld [vmem:[#allocation122_spill] sm:$0xff]  ;;  %v11255_v2 = vld [vmem:[#allocation123_spill] sm:$0xff] }
 0x781   :  { %4110 = vmatprep.subr.bf16.mxu0 %v9129_v6  ;;  %4151 = vmatprep.subr.bf16.mxu1 %v11248_v36 }
 0x782   :  { %4140 = vmatprep.mubr.bf16.mxu0 %v10759_v4  ;;  %4181 = vmatprep.mubr.bf16.mxu1 %v10759_v4 }
 0x784   :  { %4111 = vmatpush1.bf16.msra.mxu0 %v11249_v30  ;;  %4152 = vmatpush1.bf16.msra.mxu1 %v11250_v27  ;;  %v11260_v30 = vld [vmem:[#allocation128_spill] sm:$0xff]  ;;  %v11261_v27 = vld [vmem:[#allocation130_spill] sm:$0xff] }
 0x785   :  { %4112 = vmatprep.subr.bf16.mxu0 %v11251_v49  ;;  %4153 = vmatprep.subr.bf16.mxu1 %v11252_v26  ;;  %v11262_v49 = vld [vmem:[#allocation131_spill] sm:$0xff] }
 0x788   :  { %4113 = vmatpush1.bf16.msra.mxu0 %v11253_v43  ;;  %4154 = vmatpush1.bf16.msra.mxu1 %v11254_v62  ;;  %v3820_v6 = vpop.f32.mrb[108].mxu0  ;;  %v3861_v20 = vpop.f32.mrb[108].mxu1 }
 0x789   :  { %4114 = vmatprep.subr.bf16.mxu0 %v11255_v2  ;;  %4155 = vmatprep.subr.bf16.mxu1 %v9158_v48  ;;  %v3821_v31 = vadd.f32 %v3820_v6, %v3738_v42  ;;  %v3862_v7 = vadd.f32 %v3861_v20, %v3779_v45  ;;  %v3822_v60 = vpop.f32.mrb[109].mxu0  ;;  %v3863_v5 = vpop.f32.mrb[109].mxu1  ;;  %v9460_v6 = vld [vmem:[#allocation11 + $0x4] ss:$16 sps:$4 sm:$0xff]   ;;  %v9463_v20 = vld [vmem:[#allocation11 + $0xc] ss:$16 sps:$4 sm:$0xff]  }
 0x78a   :  { %v3823_v1 = vadd.f32 %v3822_v60, %v3740_v10  ;;  %v3864_v16 = vadd.f32 %v3863_v5, %v3781_v46  ;;  %v3824_v52 = vpop.f32.mrb[110].mxu0  ;;  %v3865_v50 = vpop.f32.mrb[110].mxu1  ;;  %v11256_v10 = vld [vmem:[#allocation124_spill] sm:$0xff]  ;;  %v11259_v46 = vld [vmem:[#allocation127_spill] sm:$0xff] }
 0x78b   :  { %v3868_v48 = vadd.f32 %v3821_v31, %v8407_v63  ;;  %v3870_v3 = vadd.f32 %v3862_v7, %v8410_v15  ;;  %v3825_v42 = vpop.f32.mrb[111].mxu0  ;;  %v3866_v45 = vpop.f32.mrb[111].mxu1  ;;  %v9474_v60 = vld [vmem:[#allocation11 + $0x24] ss:$16 sps:$4 sm:$0xff]   ;;  %v9477_v5 = vld [vmem:[#allocation11 + $0x2c] ss:$16 sps:$4 sm:$0xff]  }
 0x78c   :  { %4115 = vmatpush1.bf16.msra.mxu0 %v9164_v35  ;;  %4156 = vmatpush1.bf16.msra.mxu1 %v9167_v12  ;;  %v3869_v22 = vadd.f32 %v3823_v1, %v8419_v11  ;;  %v9485_v1 = vld [vmem:[#allocation11 + $0x28] ss:$16 sps:$4 sm:$0xff]   ;;  %v9491_v52 = vld [vmem:[#allocation11 + $0x4c] ss:$16 sps:$4 sm:$0xff]   ;;  %v9494_v50 = vld [vmem:[#allocation11 + $0x40] ss:$16 sps:$4 sm:$0xff]  }
 0x78d   :  { %4116 = vmatprep.subr.bf16.mxu0 %v9170_v8  ;;  %4157 = vmatprep.subr.bf16.mxu1 %v9173_v24  ;;  %v5820_v36 = vmul.f32 -1.442695, %v3868_v48  ;;  %v5822_v35 = vmul.f32 -1.442695, %v3870_v3  ;;  %v11257_v8 = vld [vmem:[#allocation125_spill] sm:$0xff]  ;;  %v11258_v24 = vld [vmem:[#allocation126_spill] sm:$0xff] }
 0x78e   :  { %v5821_v12 = vmul.f32 -1.442695, %v3869_v22  ;;  %v9497_v48 = vld [vmem:[#allocation11 + $0x48] ss:$16 sps:$4 sm:$0xff]   ;;  %v9500_v3 = vld [vmem:[#allocation11 + $0x64] ss:$16 sps:$4 sm:$0xff]  }
 0x78f   :  { %6378 = vpow2.f32 %v5820_v36  ;;  %v9503_v42 = vld [vmem:[#allocation11 + $0x6c] ss:$16 sps:$4 sm:$0xff]  }
 0x790   :  { %4117 = vmatpush1.bf16.msra.mxu0 %v9176_v34  ;;  %4158 = vmatpush1.bf16.msra.mxu1 %v9179_v17  ;;  %6380 = vpow2.f32 %v5822_v35  ;;  %v11263_v34 = vld [vmem:[#allocation132_spill] sm:$0xff]  ;;  %v11264_v17 = vld [vmem:[#allocation129_spill] sm:$0xff] }
 0x791   :  { %4118 = vmatprep.subr.bf16.mxu0 %v11256_v10  ;;  %4159 = vmatprep.subr.bf16.mxu1 %v11257_v8  ;;  %6382 = vpow2.f32 %v5821_v12  ;;  %v3871_v26 = vadd.f32 %v3864_v16, %v11264_v17  ;;  %v9488_v16 = vld [vmem:[#allocation11 + $0x44] ss:$16 sps:$4 sm:$0xff]   ;;  %v11265_v8 = vld [vmem:[#allocation32_spill] sm:$0xff] }
 0x793   :  { %v5823_v2 = vmul.f32 -1.442695, %v3871_v26  ;;  %v9511_v26 = vld [vmem:[#allocation11 + $0x68] ss:$16 sps:$4 sm:$0xff]  }
 0x794   :  { %4119 = vmatpush1.bf16.msra.mxu0 %v11258_v24  ;;  %4160 = vmatpush1.bf16.msra.mxu1 %v11259_v46  ;;  %v11266_v46 = vld [vmem:[#allocation31_spill] sm:$0xff]  ;;  %11268 = vst [vmem:[#allocation134_spill] sm:$0xff] %v9511_v26 }
 0x795   :  { %4120 = vmatprep.subr.bf16.mxu0 %v11260_v30  ;;  %4161 = vmatprep.subr.bf16.mxu1 %v11261_v27 }
 0x798   :  { %4121 = vmatpush1.bf16.msra.mxu0 %v11262_v49  ;;  %4162 = vmatpush1.bf16.msra.mxu1 %v11263_v34  ;;  %v9508_v34 = vld [vmem:[#allocation11 + $0x60] ss:$16 sps:$4 sm:$0xff]  }
 0x799   :  { %4122 = vmatprep.subr.bf16.mxu0 %v9207_v54  ;;  %4163 = vmatprep.subr.bf16.mxu1 %v9210_v38  ;;  %v6379_v43 = vpop.eup %6378  ;;  %v9468_v38 = vld [vmem:[#allocation11] ss:$16 sps:$4 sm:$0xff]   ;;  %11267 = vst [vmem:[#allocation133_spill] sm:$0xff] %v9508_v34 }
 0x79a   :  { %v6381_v62 = vpop.eup %6380 }
 0x79b   :  { %v6383_v31 = vpop.eup %6382  ;;  %v3886_v7 = vadd.f32 1.0, %v6381_v62  ;;  %v11269_v62 = vld [vmem:[#allocation34_spill] sm:$0xff] }
 0x79c   :  { %4123 = vmatpush1.bf16.msra.mxu0 %v9213_v0  ;;  %4164 = vmatpush1.bf16.msra.mxu1 %v9216_v9  ;;  %v3885_v54 = vadd.f32 1.0, %v6383_v31  ;;  %v3884_v0 = vadd.f32 1.0, %v6379_v43  ;;  %v9471_v9 = vld [vmem:[#allocation11 + $0x8] ss:$16 sps:$4 sm:$0xff]   ;;  %v11270_v31 = vld [vmem:[#allocation33_spill] sm:$0xff] }
 0x79d   :  { %4226 = vmatprep.subr.bf16.mxu0 %v9460_v6  ;;  %4267 = vmatprep.subr.bf16.mxu1 %v9463_v20  ;;  %6384 = vrcp.f32 %v3886_v7 }
 0x79e   :  { %6386 = vpow2.f32 %v5823_v2 }
 0x79f   :  { %4141 = vmatmul.mubr.bf16.vlgmr.msra.gmra.mrb[120].mxu0 %v9372_v18  ;;  %4182 = vmatmul.mubr.bf16.vlgmr.msra.gmra.mrb[120].mxu1 %v9372_v18  ;;  %6388 = vrcp.f32 %v3885_v54  ;;  %v9482_v18 = vld [vmem:[#allocation11 + $0x20] ss:$16 sps:$4 sm:$0xff]  }
 0x7a0   :  { %4227 = vmatpush1.bf16.msra.mxu0 %v9468_v38  ;;  %4268 = vmatpush1.bf16.msra.mxu1 %v9471_v9  ;;  %6390 = vrcp.f32 %v3884_v0 }
 0x7a1   :  { %4228 = vmatprep.subr.bf16.mxu0 %v9474_v60  ;;  %4269 = vmatprep.subr.bf16.mxu1 %v9477_v5 }
 0x7a2   :  { %4258 = vmatprep.mubr.bf16.mxu0 %v10759_v4  ;;  %4299 = vmatprep.mubr.bf16.mxu1 %v10759_v4 }
 0x7a4   :  { %4229 = vmatpush1.bf16.msra.mxu0 %v9482_v18  ;;  %4270 = vmatpush1.bf16.msra.mxu1 %v9485_v1 }
 0x7a5   :  { %4230 = vmatprep.subr.bf16.mxu0 %v9488_v16  ;;  %4271 = vmatprep.subr.bf16.mxu1 %v9491_v52 }
 0x7a7   :  { %v6385_v45 = vpop.eup %6384 }
 0x7a8   :  { %4231 = vmatpush1.bf16.msra.mxu0 %v9494_v50  ;;  %4272 = vmatpush1.bf16.msra.mxu1 %v9497_v48  ;;  %v6387_v22 = vpop.eup %6386  ;;  %v3896_v36 = vmul.f32 2.0, %v6385_v45  ;;  %v3942_v35 = vpop.f32.mrb[112].mxu0  ;;  %v9518_v45 = vld [vmem:[#allocation11 + $0x84] ss:$16 sps:$4 sm:$0xff]  }
 0x7a9   :  { %4232 = vmatprep.subr.bf16.mxu0 %v9500_v3  ;;  %4273 = vmatprep.subr.bf16.mxu1 %v9503_v42  ;;  %v3983_v12 = vpop.f32.mrb[112].mxu1  ;;  %v6389_v10 = vpop.eup %6388  ;;  %v3990_v24 = vadd.f32 %v3942_v35, %v11265_v8  ;;  %v9521_v35 = vld [vmem:[#allocation11 + $0x8c] ss:$16 sps:$4 sm:$0xff]  }
 0x7aa   :  { %v3992_v30 = vadd.f32 %v3983_v12, %v11266_v46  ;;  %v3944_v27 = vpop.f32.mrb[113].mxu0  ;;  %v3985_v49 = vpop.f32.mrb[113].mxu1  ;;  %v5824_v43 = vadd.f32 -1.0, %v3896_v36 }
 0x7ab   :  { %v3991_v2 = vadd.f32 %v3944_v27, %v11269_v62  ;;  %v9516_v7 = vadd.f32 %v3985_v49, %v11270_v31  ;;  %v3946_v54 = vpop.f32.mrb[114].mxu0  ;;  %v3987_v0 = vpop.f32.mrb[114].mxu1  ;;  %v5825_v8 = vmul.f32 -1.442695, %v3990_v24  ;;  %v3898_v27 = vmul.f32 %v6389_v10, %v9248_v19  ;;  %v9525_v31 = vld [vmem:[#allocation11 + $0x80] ss:$16 sps:$4 sm:$0xff]  }
 0x7ac   :  { %4233 = vmatpush1.bf16.msra.mxu0 %v9508_v34  ;;  %4274 = vmatpush1.bf16.msra.mxu1 %v9511_v26  ;;  %v6391_v12 = vpop.eup %6390  ;;  %v5827_v46 = vmul.f32 -1.442695, %v3992_v30  ;;  %v3947_v26 = vpop.f32.mrb[115].mxu0  ;;  %v3887_v49 = vadd.f32 1.0, %v6387_v22  ;;  %v9528_v54 = vld [vmem:[#allocation11 + $0x88] ss:$16 sps:$4 sm:$0xff]  }
 0x7ad   :  { %4234 = vmatprep.subr.bf16.mxu0 %v9518_v45  ;;  %4275 = vmatprep.subr.bf16.mxu1 %v9521_v35  ;;  %v3988_v36 = vpop.f32.mrb[115].mxu1  ;;  %v3899_v34 = vmul.f32 %v6391_v12, %v5824_v43  ;;  %v5826_v62 = vmul.f32 -1.442695, %v3991_v2  ;;  %6392 = vpow2.f32 %v5825_v8  ;;  %v9533_v24 = vld [vmem:[#allocation11 + $0xa4] ss:$16 sps:$4 sm:$0xff]  }
 0x7ae   :  { %6394 = vpow2.f32 %v5827_v46  ;;  %v9536_v30 = vld [vmem:[#allocation11 + $0xac] ss:$16 sps:$4 sm:$0xff]   ;;  %v9539_v19 = vld [vmem:[#allocation11 + $0xa0] ss:$16 sps:$4 sm:$0xff]   ;;  %v9542_v22 = vld [vmem:[#allocation11 + $0xa8] ss:$16 sps:$4 sm:$0xff]  }
 0x7af   :  { %v9531_v0 = vadd.f32 %v3899_v34, %v3898_v27  ;;  %6396 = vpow2.f32 %v5826_v62  ;;  %v9546_v10 = vld [vmem:[#allocation11 + $0xc4] ss:$16 sps:$4 sm:$0xff]   ;;  %v9549_v34 = vld [vmem:[#allocation11 + $0xcc] ss:$16 sps:$4 sm:$0xff]   ;;  %v9552_v26 = vld [vmem:[#allocation11 + $0xc0] ss:$16 sps:$4 sm:$0xff]  }
 0x7b0   :  { %4235 = vmatpush1.bf16.msra.mxu0 %v9525_v31  ;;  %4276 = vmatpush1.bf16.msra.mxu1 %v9528_v54  ;;  %6398 = vrcp.f32 %v3887_v49  ;;  %11271 = vst [vmem:[#allocation135_spill] sm:$0xff] %v9546_v10  ;;  %11272 = vst [vmem:[#allocation24_spill] sm:$0xff] %v9549_v34  ;;  %v9555_v43 = vld [vmem:[#allocation11 + $0xc8] ss:$16 sps:$4 sm:$0xff]   ;;  %v9558_v2 = vld [vmem:[#allocation11 + $0xe4] ss:$16 sps:$4 sm:$0xff]  }
 0x7b1   :  { %4236 = vmatprep.subr.bf16.mxu0 %v9533_v24  ;;  %4277 = vmatprep.subr.bf16.mxu1 %v9536_v30  ;;  %6400 = vtanh.f32 %v9531_v0  ;;  %11273 = vst [vmem:[#allocation23_spill] sm:$0xff] %v9552_v26  ;;  %11274 = vst [vmem:[#allocation26_spill] sm:$0xff] %v9555_v43  ;;  %v9561_v12 = vld [vmem:[#allocation11 + $0xec] ss:$16 sps:$4 sm:$0xff]   ;;  %v9564_v49 = vld [vmem:[#allocation11 + $0xe0] ss:$16 sps:$4 sm:$0xff]  }
 0x7b2   :  { %11275 = vst [vmem:[#allocation25_spill] sm:$0xff] %v9558_v2  ;;  %11276 = vst [vmem:[#allocation28_spill] sm:$0xff] %v9561_v12  ;;  %v9567_v62 = vld [vmem:[#allocation11 + $0xe8] ss:$16 sps:$4 sm:$0xff]  }
 0x7b3   :  { %11277 = vst [vmem:[#allocation27_spill] sm:$0xff] %v9564_v49  ;;  %11278 = vst [vmem:[#allocation39_spill] sm:$0xff] %v9567_v62 }
 0x7b4   :  { %4237 = vmatpush1.bf16.msra.mxu0 %v9539_v19  ;;  %4278 = vmatpush1.bf16.msra.mxu1 %v9542_v22 }
 0x7b5   :  { %4238 = vmatprep.subr.bf16.mxu0 %v9546_v10  ;;  %4279 = vmatprep.subr.bf16.mxu1 %v9549_v34  ;;  %v9570_v34 = vld [vmem:[#allocation9 + $0x4] ss:$16 sps:$4 sm:$0xff]  }
 0x7b6   :  { %11279 = vst [vmem:[#allocation30_spill] sm:$0xff] %v9570_v34 }
 0x7b7   :  { %v6393_v8 = vpop.eup %6392 }
 0x7b8   :  { %4239 = vmatpush1.bf16.msra.mxu0 %v9552_v26  ;;  %4280 = vmatpush1.bf16.msra.mxu1 %v9555_v43  ;;  %v6395_v46 = vpop.eup %6394 }
 0x7b9   :  { %4240 = vmatprep.subr.bf16.mxu0 %v9558_v2  ;;  %4281 = vmatprep.subr.bf16.mxu1 %v9561_v12  ;;  %v6397_v36 = vpop.eup %6396  ;;  %v4008_v27 = vadd.f32 1.0, %v6395_v46  ;;  %v9573_v2 = vld [vmem:[#allocation9 + $0xc] ss:$16 sps:$4 sm:$0xff]   ;;  %v4006_v46 = vadd.f32 1.0, %v6393_v8 }
 0x7ba   :  { %v6399_v43 = vpop.eup %6398  ;;  %v4007_v26 = vadd.f32 1.0, %v6397_v36  ;;  %v9579_v36 = vld [vmem:[#allocation9 + $0x8] ss:$16 sps:$4 sm:$0xff]   ;;  %v9585_v8 = vld [vmem:[#allocation9 + $0x2c] ss:$16 sps:$4 sm:$0xff]  }
 0x7bb   :  { %v6401_v12 = vpop.eup %6400  ;;  %6402 = vrcp.f32 %v4008_v27  ;;  %11281 = vst [vmem:[#allocation40_spill] sm:$0xff] %v9579_v36  ;;  %11283 = vst [vmem:[#allocation42_spill] sm:$0xff] %v9585_v8  ;;  %v9596_v27 = vld [vmem:[#allocation9 + $0x44] ss:$16 sps:$4 sm:$0xff]  }
 0x7bc   :  { %4241 = vmatpush1.bf16.msra.mxu0 %v9564_v49  ;;  %4282 = vmatpush1.bf16.msra.mxu1 %v9567_v62  ;;  %v3902_v10 = vmul.f32 %v6401_v12, %v6399_v43  ;;  %6404 = vrcp.f32 %v4007_v26  ;;  %v9576_v62 = vld [vmem:[#allocation9] ss:$16 sps:$4 sm:$0xff]   ;;  %v9593_v43 = vld [vmem:[#allocation9 + $0x28] ss:$16 sps:$4 sm:$0xff]   ;;  %11286 = vst [vmem:[#allocation45_spill] sm:$0xff] %v9596_v27 }
 0x7bd   :  { %4308 = vmatprep.subr.bf16.mxu0 %v9570_v34  ;;  %4349 = vmatprep.subr.bf16.mxu1 %v9573_v2  ;;  %6406 = vrcp.f32 %v4006_v46  ;;  %11280 = vst [vmem:[#allocation29_spill] sm:$0xff] %v9576_v62  ;;  %v9582_v34 = vld [vmem:[#allocation9 + $0x24] ss:$16 sps:$4 sm:$0xff]   ;;  %v9590_v26 = vld [vmem:[#allocation9 + $0x20] ss:$16 sps:$4 sm:$0xff]   ;;  %11285 = vst [vmem:[#allocation44_spill] sm:$0xff] %v9593_v43 }
 0x7be   :  { %v4225_v49 = vpack.c.bf16 %v3902_v10, %v3902_v10  ;;  %11282 = vst [vmem:[#allocation41_spill] sm:$0xff] %v9582_v34  ;;  %11284 = vst [vmem:[#allocation43_spill] sm:$0xff] %v9590_v26 }
 0x7c0   :  { %4259 = vmatmul.mubr.bf16.vlgmr.msra.gmra.mrb[124].mxu0 %v4225_v49  ;;  %4300 = vmatmul.mubr.bf16.vlgmr.msra.gmra.mrb[124].mxu1 %v4225_v49  ;;  %v9599_v49 = vld [vmem:[#allocation9 + $0x4c] ss:$16 sps:$4 sm:$0xff]  }
 0x7c1   :  { %4309 = vmatpush1.bf16.msra.mxu0 %v9576_v62  ;;  %4350 = vmatpush1.bf16.msra.mxu1 %v9579_v36  ;;  %11287 = vst [vmem:[#allocation46_spill] sm:$0xff] %v9599_v49  ;;  %v9602_v36 = vld [vmem:[#allocation9 + $0x40] ss:$16 sps:$4 sm:$0xff]   ;;  %v9609_v62 = vld [vmem:[#allocation9 + $0x64] ss:$16 sps:$4 sm:$0xff]  }
 0x7c2   :  { %4310 = vmatprep.subr.bf16.mxu0 %v9582_v34  ;;  %4351 = vmatprep.subr.bf16.mxu1 %v9585_v8  ;;  %11288 = vst [vmem:[#allocation47_spill] sm:$0xff] %v9602_v36 }
 0x7c3   :  { %4340 = vmatprep.mubr.bf16.mxu0 %v10759_v4  ;;  %4381 = vmatprep.mubr.bf16.mxu1 %v10759_v4 }
 0x7c5   :  { %v6403_v10 = vpop.eup %6402  ;;  %4311 = vmatpush1.bf16.msra.mxu0 %v9590_v26  ;;  %4352 = vmatpush1.bf16.msra.mxu1 %v9593_v43  ;;  %v9605_v26 = vld [vmem:[#allocation9 + $0x48] ss:$16 sps:$4 sm:$0xff]  }
 0x7c6   :  { %v4018_v12 = vmul.f32 2.0, %v6403_v10  ;;  %4312 = vmatprep.subr.bf16.mxu0 %v9596_v27  ;;  %4353 = vmatprep.subr.bf16.mxu1 %v9599_v49  ;;  %v6405_v46 = vpop.eup %6404  ;;  %v9612_v27 = vld [vmem:[#allocation9 + $0x6c] ss:$16 sps:$4 sm:$0xff]   ;;  %v9617_v49 = vld [vmem:[#allocation9 + $0x60] ss:$16 sps:$4 sm:$0xff]  }
 0x7c7   :  { %v6407_v34 = vpop.eup %6406  ;;  %v4020_v43 = vmul.f32 %v6405_v46, %v9282_v57  ;;  %v9626_v57 = vld [vmem:[#allocation9 + $0x8c] ss:$16 sps:$4 sm:$0xff]   ;;  %v9635_v46 = vld [vmem:[#allocation9 + $0xa4] ss:$16 sps:$4 sm:$0xff]  }
 0x7c8   :  { %v5829_v8 = vadd.f32 -1.0, %v4018_v12  ;;  %11291 = vst [vmem:[#allocation50_spill] sm:$0xff] %v9626_v57  ;;  %11294 = vst [vmem:[#allocation53_spill] sm:$0xff] %v9635_v46 }
 0x7c9   :  { %4313 = vmatpush1.bf16.msra.mxu0 %v9602_v36  ;;  %4354 = vmatpush1.bf16.msra.mxu1 %v9605_v26  ;;  %v9620_v36 = vld [vmem:[#allocation9 + $0x68] ss:$16 sps:$4 sm:$0xff]  }
 0x7ca   :  { %v4021_v10 = vmul.f32 %v6407_v34, %v5829_v8  ;;  %4314 = vmatprep.subr.bf16.mxu0 %v9609_v62  ;;  %4355 = vmatprep.subr.bf16.mxu1 %v9612_v27  ;;  %11289 = vst [vmem:[#allocation48_spill] sm:$0xff] %v9620_v36  ;;  %v9623_v34 = vld [vmem:[#allocation9 + $0x84] ss:$16 sps:$4 sm:$0xff]   ;;  %v9629_v8 = vld [vmem:[#allocation9 + $0x80] ss:$16 sps:$4 sm:$0xff]  }
 0x7cb   :  { %11290 = vst [vmem:[#allocation49_spill] sm:$0xff] %v9623_v34  ;;  %11292 = vst [vmem:[#allocation51_spill] sm:$0xff] %v9629_v8 }
 0x7cc   :  { %v9615_v12 = vadd.f32 %v4021_v10, %v4020_v43  ;;  %v9632_v43 = vld [vmem:[#allocation9 + $0x88] ss:$16 sps:$4 sm:$0xff]   ;;  %v9638_v10 = vld [vmem:[#allocation9 + $0xac] ss:$16 sps:$4 sm:$0xff]  }
 0x7cd   :  { %4315 = vmatpush1.bf16.msra.mxu0 %v9617_v49  ;;  %4356 = vmatpush1.bf16.msra.mxu1 %v9620_v36  ;;  %11293 = vst [vmem:[#allocation52_spill] sm:$0xff] %v9632_v43  ;;  %11295 = vst [vmem:[#allocation54_spill] sm:$0xff] %v9638_v10  ;;  %v9660_v36 = vld [vmem:[#allocation9 + $0xe4] ss:$16 sps:$4 sm:$0xff]  }
 0x7ce   :  { %4316 = vmatprep.subr.bf16.mxu0 %v9623_v34  ;;  %4357 = vmatprep.subr.bf16.mxu1 %v9626_v57  ;;  %v9641_v34 = vld [vmem:[#allocation9 + $0xa0] ss:$16 sps:$4 sm:$0xff]   ;;  %v9644_v57 = vld [vmem:[#allocation9 + $0xa8] ss:$16 sps:$4 sm:$0xff]   ;;  %11300 = vst [vmem:[#allocation59_spill] sm:$0xff] %v9660_v36 }
 0x7cf   :  { %11296 = vst [vmem:[#allocation55_spill] sm:$0xff] %v9641_v34  ;;  %11297 = vst [vmem:[#allocation56_spill] sm:$0xff] %v9644_v57 }
 0x7d1   :  { %4317 = vmatpush1.bf16.msra.mxu0 %v9629_v8  ;;  %4358 = vmatpush1.bf16.msra.mxu1 %v9632_v43  ;;  %v9647_v8 = vld [vmem:[#allocation9 + $0xc4] ss:$16 sps:$4 sm:$0xff]   ;;  %v9650_v43 = vld [vmem:[#allocation9 + $0xcc] ss:$16 sps:$4 sm:$0xff]  }
 0x7d2   :  { %4318 = vmatprep.subr.bf16.mxu0 %v9635_v46  ;;  %4359 = vmatprep.subr.bf16.mxu1 %v9638_v10  ;;  %11298 = vst [vmem:[#allocation57_spill] sm:$0xff] %v9647_v8  ;;  %11299 = vst [vmem:[#allocation58_spill] sm:$0xff] %v9650_v43  ;;  %v9653_v46 = vld [vmem:[#allocation9 + $0xc0] ss:$16 sps:$4 sm:$0xff]   ;;  %v9656_v10 = vld [vmem:[#allocation9 + $0xc8] ss:$16 sps:$4 sm:$0xff]  }
 0x7d5   :  { %4319 = vmatpush1.bf16.msra.mxu0 %v9641_v34  ;;  %4360 = vmatpush1.bf16.msra.mxu1 %v9644_v57  ;;  %v5828_v34 = vmul.f32 -1.442695, %v9516_v7  ;;  %v9663_v57 = vld [vmem:[#allocation9 + $0xec] ss:$16 sps:$4 sm:$0xff]  }
 0x7d6   :  { %4320 = vmatprep.subr.bf16.mxu0 %v9647_v8  ;;  %4361 = vmatprep.subr.bf16.mxu1 %v9650_v43  ;;  %11301 = vst [vmem:[#allocation60_spill] sm:$0xff] %v9663_v57  ;;  %v9666_v8 = vld [vmem:[#allocation9 + $0xe0] ss:$16 sps:$4 sm:$0xff]   ;;  %v9669_v43 = vld [vmem:[#allocation9 + $0xe8] ss:$16 sps:$4 sm:$0xff]  }
 0x7d7   :  { %11302 = vst [vmem:[#allocation61_spill] sm:$0xff] %v9666_v8  ;;  %11303 = vst [vmem:[#allocation62_spill] sm:$0xff] %v9669_v43  ;;  %6408 = vpow2.f32 %v5828_v34  ;;  %v6907_v7 = vld [vmem:[#allocation4 + $0xec] ss:$16 sps:$4 sm:$0xff]  }
 0x7d8   :  { %6410 = vtanh.f32 %v9615_v12 }
 0x7d9   :  { %4321 = vmatpush1.bf16.msra.mxu0 %v9653_v46  ;;  %4362 = vmatpush1.bf16.msra.mxu1 %v9656_v10 }
 0x7da   :  { %4322 = vmatprep.subr.bf16.mxu0 %v9660_v36  ;;  %4363 = vmatprep.subr.bf16.mxu1 %v9663_v57 }
 0x7dd   :  { %4323 = vmatpush1.bf16.msra.mxu0 %v9666_v8  ;;  %4364 = vmatpush1.bf16.msra.mxu1 %v9669_v43 }
 0x7de   :  { %4430 = vmatprep.subr.bf16.mxu0 %v9303_v56  ;;  %4471 = vmatprep.subr.bf16.mxu1 %v9306_v37 }
 0x7e0   :  { %4341 = vmatmul.mubr.bf16.vlgmr.msra.gmra.mrb[128].mxu0 %v9420_v39  ;;  %4382 = vmatmul.mubr.bf16.vlgmr.msra.gmra.mrb[128].mxu1 %v9420_v39  ;;  %v6906_v39 = vld [vmem:[#allocation4 + $0xe4] ss:$16 sps:$4 sm:$0xff]  }
 0x7e1   :  { %4431 = vmatpush1.bf16.msra.mxu0 %v9311_v32  ;;  %4472 = vmatpush1.bf16.msra.mxu1 %v9314_v25  ;;  %v6409_v56 = vpop.eup %6408  ;;  %v6894_v32 = vld [vmem:[#allocation4 + $0x84] ss:$16 sps:$4 sm:$0xff]   ;;  %v6895_v25 = vld [vmem:[#allocation4 + $0x8c] ss:$16 sps:$4 sm:$0xff]  }
 0x7e2   :  { %4432 = vmatprep.subr.bf16.mxu0 %v9317_v44  ;;  %4473 = vmatprep.subr.bf16.mxu1 %v9320_v53  ;;  %v4009_v37 = vadd.f32 1.0, %v6409_v56  ;;  %v6896_v44 = vld [vmem:[#allocation4 + $0x80] ss:$16 sps:$4 sm:$0xff]   ;;  %v6897_v53 = vld [vmem:[#allocation4 + $0x88] ss:$16 sps:$4 sm:$0xff]  }
 0x7e3   :  { %4462 = vmatprep.mubr.bf16.mxu0 %v10759_v4  ;;  %4503 = vmatprep.mubr.bf16.mxu1 %v10759_v4  ;;  %v6908_v56 = vld [vmem:[#allocation4 + $0xe0] ss:$16 sps:$4 sm:$0xff]  }
 0x7e4   :  { %6412 = vrcp.f32 %v4009_v37  ;;  %v6909_v37 = vld [vmem:[#allocation4 + $0xe8] ss:$16 sps:$4 sm:$0xff]  }
 0x7e5   :  { %4433 = vmatpush1.bf16.msra.mxu0 %v9325_v40  ;;  %4474 = vmatpush1.bf16.msra.mxu1 %v9328_v55  ;;  %v6898_v40 = vld [vmem:[#allocation4 + $0xa4] ss:$16 sps:$4 sm:$0xff]   ;;  %v6899_v55 = vld [vmem:[#allocation4 + $0xac] ss:$16 sps:$4 sm:$0xff]  }
 0x7e6   :  { %4434 = vmatprep.subr.bf16.mxu0 %v9331_v13  ;;  %4475 = vmatprep.subr.bf16.mxu1 %v9334_v58  ;;  %v6900_v13 = vld [vmem:[#allocation4 + $0xa0] ss:$16 sps:$4 sm:$0xff]   ;;  %v6901_v58 = vld [vmem:[#allocation4 + $0xa8] ss:$16 sps:$4 sm:$0xff]  }
 0x7e9   :  { %4435 = vmatpush1.bf16.msra.mxu0 %v9337_v33  ;;  %4476 = vmatpush1.bf16.msra.mxu1 %v9340_v28  ;;  %v6902_v33 = vld [vmem:[#allocation4 + $0xc4] ss:$16 sps:$4 sm:$0xff]   ;;  %v6903_v28 = vld [vmem:[#allocation4 + $0xcc] ss:$16 sps:$4 sm:$0xff]  }
 0x7ea   :  { %4436 = vmatprep.subr.bf16.mxu0 %v9343_v41  ;;  %4477 = vmatprep.subr.bf16.mxu1 %v9346_v47  ;;  %v6411_v41 = vpop.eup %6410 }
 0x7ed   :  { %4437 = vmatpush1.bf16.msra.mxu0 %v9349_v29  ;;  %4478 = vmatpush1.bf16.msra.mxu1 %v9352_v21  ;;  %v6904_v29 = vld [vmem:[#allocation4 + $0xc0] ss:$16 sps:$4 sm:$0xff]   ;;  %v6905_v21 = vld [vmem:[#allocation4 + $0xc8] ss:$16 sps:$4 sm:$0xff]  }
 0x7ee   :  { %4438 = vmatprep.subr.bf16.mxu0 %v6894_v32  ;;  %4479 = vmatprep.subr.bf16.mxu1 %v6895_v25  ;;  %v6413_v47 = vpop.eup %6412  ;;  %v9695_v25 = vld [vmem:[#allocation8 + $0x4] ss:$16 sps:$4 sm:$0xff]  }
 0x7ef   :  { %v4024_v34 = vmul.f32 %v6413_v47, %v6411_v41  ;;  %11304 = vst [vmem:[#allocation63_spill] sm:$0xff] %v9695_v25  ;;  %v9726_v41 = vld [vmem:[#allocation8 + $0x4c] ss:$16 sps:$4 sm:$0xff]   ;;  %v9729_v47 = vld [vmem:[#allocation8 + $0x40] ss:$16 sps:$4 sm:$0xff]  }
 0x7f0   :  { %11313 = vst [vmem:[#allocation71_spill] sm:$0xff] %v9726_v41  ;;  %11314 = vst [vmem:[#allocation72_spill] sm:$0xff] %v9729_v47 }
 0x7f1   :  { %4439 = vmatpush1.bf16.msra.mxu0 %v6896_v44  ;;  %4480 = vmatpush1.bf16.msra.mxu1 %v6897_v53  ;;  %v9693_v32 = vpack.c.bf16 %v4024_v34, %v4024_v34  ;;  %v9698_v44 = vld [vmem:[#allocation8 + $0xc] ss:$16 sps:$4 sm:$0xff]   ;;  %v9703_v53 = vld [vmem:[#allocation8] ss:$16 sps:$4 sm:$0xff]   ;;  %v9744_v34 = vld [vmem:[#allocation8 + $0x68] ss:$16 sps:$4 sm:$0xff]  }
 0x7f2   :  { %4440 = vmatprep.subr.bf16.mxu0 %v6898_v40  ;;  %4481 = vmatprep.subr.bf16.mxu1 %v6899_v55  ;;  %11305 = vst [vmem:[#allocation64_spill] sm:$0xff] %v9698_v44  ;;  %11306 = vst [vmem:[#allocation65_spill] sm:$0xff] %v9703_v53  ;;  %v9706_v40 = vld [vmem:[#allocation8 + $0x8] ss:$16 sps:$4 sm:$0xff]   ;;  %v9709_v55 = vld [vmem:[#allocation8 + $0x24] ss:$16 sps:$4 sm:$0xff]  }
 0x7f3   :  { %11307 = vst [vmem:[#allocation66_spill] sm:$0xff] %v9706_v40  ;;  %11308 = vst [vmem:[#allocation67_spill] sm:$0xff] %v9709_v55 }
 0x7f4   :  { %11319 = vst [vmem:[#allocation73_spill] sm:$0xff] %v9744_v34 }
 0x7f5   :  { %4441 = vmatpush1.bf16.msra.mxu0 %v6900_v13  ;;  %4482 = vmatpush1.bf16.msra.mxu1 %v6901_v58  ;;  %v9712_v13 = vld [vmem:[#allocation8 + $0x2c] ss:$16 sps:$4 sm:$0xff]   ;;  %v9717_v58 = vld [vmem:[#allocation8 + $0x20] ss:$16 sps:$4 sm:$0xff]  }
 0x7f6   :  { %4442 = vmatprep.subr.bf16.mxu0 %v6902_v33  ;;  %4483 = vmatprep.subr.bf16.mxu1 %v6903_v28  ;;  %11309 = vst [vmem:[#allocation68_spill] sm:$0xff] %v9712_v13  ;;  %11310 = vst [vmem:[#allocation69_spill] sm:$0xff] %v9717_v58  ;;  %v9720_v33 = vld [vmem:[#allocation8 + $0x28] ss:$16 sps:$4 sm:$0xff]   ;;  %v9723_v28 = vld [vmem:[#allocation8 + $0x44] ss:$16 sps:$4 sm:$0xff]  }
 0x7f7   :  { %11311 = vst [vmem:[#allocation70_spill] sm:$0xff] %v9720_v33  ;;  %11312 = vst [vmem:[#allocation81_spill] sm:$0xff] %v9723_v28 }
 0x7f9   :  { %4443 = vmatpush1.bf16.msra.mxu0 %v6904_v29  ;;  %4484 = vmatpush1.bf16.msra.mxu1 %v6905_v21  ;;  %v9732_v29 = vld [vmem:[#allocation8 + $0x48] ss:$16 sps:$4 sm:$0xff]   ;;  %v9735_v21 = vld [vmem:[#allocation8 + $0x64] ss:$16 sps:$4 sm:$0xff]  }
 0x7fa   :  { %4444 = vmatprep.subr.bf16.mxu0 %v6906_v39  ;;  %4485 = vmatprep.subr.bf16.mxu1 %v6907_v7  ;;  %11315 = vst [vmem:[#allocation20_spill] sm:$0xff] %v9732_v29  ;;  %11316 = vst [vmem:[#allocation19_spill] sm:$0xff] %v9735_v21  ;;  %v9738_v39 = vld [vmem:[#allocation8 + $0x6c] ss:$16 sps:$4 sm:$0xff]   ;;  %v9741_v7 = vld [vmem:[#allocation8 + $0x60] ss:$16 sps:$4 sm:$0xff]  }
 0x7fb   :  { %11317 = vst [vmem:[#allocation22_spill] sm:$0xff] %v9738_v39  ;;  %11318 = vst [vmem:[#allocation21_spill] sm:$0xff] %v9741_v7 }
 0x7fd   :  { %4445 = vmatpush1.bf16.msra.mxu0 %v6908_v56  ;;  %4486 = vmatpush1.bf16.msra.mxu1 %v6909_v37  ;;  %v9747_v56 = vld [vmem:[#allocation8 + $0x84] ss:$16 sps:$4 sm:$0xff]   ;;  %v9750_v37 = vld [vmem:[#allocation8 + $0x8c] ss:$16 sps:$4 sm:$0xff]  }
 0x7fe   :  { %4548 = vmatprep.subr.bf16.mxu0 %v9695_v25  ;;  %4589 = vmatprep.subr.bf16.mxu1 %v9698_v44  ;;  %11320 = vst [vmem:[#allocation74_spill] sm:$0xff] %v9747_v56  ;;  %11321 = vst [vmem:[#allocation75_spill] sm:$0xff] %v9750_v37 }
 0x800   :  { %4463 = vmatmul.mubr.bf16.vlgmr.msra.gmra.mrb[132].mxu0 %v9693_v32  ;;  %4504 = vmatmul.mubr.bf16.vlgmr.msra.gmra.mrb[132].mxu1 %v9693_v32 }
 0x801   :  { %4549 = vmatpush1.bf16.msra.mxu0 %v9703_v53  ;;  %4590 = vmatpush1.bf16.msra.mxu1 %v9706_v40 }
 0x802   :  { %4550 = vmatprep.subr.bf16.mxu0 %v9709_v55  ;;  %4591 = vmatprep.subr.bf16.mxu1 %v9712_v13 }
 0x803   :  { %4580 = vmatprep.mubr.bf16.mxu0 %v10759_v4  ;;  %4621 = vmatprep.mubr.bf16.mxu1 %v10759_v4 }
 0x805   :  { %4551 = vmatpush1.bf16.msra.mxu0 %v9717_v58  ;;  %4592 = vmatpush1.bf16.msra.mxu1 %v9720_v33 }
 0x806   :  { %4552 = vmatprep.subr.bf16.mxu0 %v9723_v28  ;;  %4593 = vmatprep.subr.bf16.mxu1 %v9726_v41 }
 0x809   :  { %4553 = vmatpush1.bf16.msra.mxu0 %v9729_v47  ;;  %4594 = vmatpush1.bf16.msra.mxu1 %v9732_v29 }
 0x80a   :  { %4554 = vmatprep.subr.bf16.mxu0 %v9735_v21  ;;  %4595 = vmatprep.subr.bf16.mxu1 %v9738_v39  ;;  %v9753_v21 = vld [vmem:[#allocation8 + $0x80] ss:$16 sps:$4 sm:$0xff]   ;;  %v9756_v39 = vld [vmem:[#allocation8 + $0x88] ss:$16 sps:$4 sm:$0xff]  }
 0x80b   :  { %11322 = vst [vmem:[#allocation76_spill] sm:$0xff] %v9753_v21  ;;  %11323 = vst [vmem:[#allocation77_spill] sm:$0xff] %v9756_v39 }
 0x80d   :  { %4555 = vmatpush1.bf16.msra.mxu0 %v9741_v7  ;;  %4596 = vmatpush1.bf16.msra.mxu1 %v9744_v34  ;;  %v9759_v7 = vld [vmem:[#allocation8 + $0xa4] ss:$16 sps:$4 sm:$0xff]   ;;  %v9762_v34 = vld [vmem:[#allocation8 + $0xac] ss:$16 sps:$4 sm:$0xff]  }
 0x80e   :  { %4556 = vmatprep.subr.bf16.mxu0 %v9747_v56  ;;  %4597 = vmatprep.subr.bf16.mxu1 %v9750_v37  ;;  %11324 = vst [vmem:[#allocation78_spill] sm:$0xff] %v9759_v7  ;;  %11325 = vst [vmem:[#allocation79_spill] sm:$0xff] %v9762_v34  ;;  %v9765_v56 = vld [vmem:[#allocation8 + $0xa0] ss:$16 sps:$4 sm:$0xff]   ;;  %v9768_v37 = vld [vmem:[#allocation8 + $0xa8] ss:$16 sps:$4 sm:$0xff]  }
 0x80f   :  { %11326 = vst [vmem:[#allocation80_spill] sm:$0xff] %v9765_v56  ;;  %11327 = vst [vmem:[#allocation82_spill] sm:$0xff] %v9768_v37 }
 0x811   :  { %4557 = vmatpush1.bf16.msra.mxu0 %v9753_v21  ;;  %4598 = vmatpush1.bf16.msra.mxu1 %v9756_v39  ;;  %v9771_v21 = vld [vmem:[#allocation8 + $0xc4] ss:$16 sps:$4 sm:$0xff]   ;;  %v9774_v39 = vld [vmem:[#allocation8 + $0xcc] ss:$16 sps:$4 sm:$0xff]  }
 0x812   :  { %4558 = vmatprep.subr.bf16.mxu0 %v9759_v7  ;;  %4599 = vmatprep.subr.bf16.mxu1 %v9762_v34  ;;  %11328 = vst [vmem:[#allocation83_spill] sm:$0xff] %v9771_v21  ;;  %11329 = vst [vmem:[#allocation84_spill] sm:$0xff] %v9774_v39  ;;  %v9777_v7 = vld [vmem:[#allocation8 + $0xc0] ss:$16 sps:$4 sm:$0xff]   ;;  %v9780_v34 = vld [vmem:[#allocation8 + $0xc8] ss:$16 sps:$4 sm:$0xff]  }
 0x813   :  { %11330 = vst [vmem:[#allocation85_spill] sm:$0xff] %v9777_v7  ;;  %11331 = vst [vmem:[#allocation86_spill] sm:$0xff] %v9780_v34 }
 0x815   :  { %4559 = vmatpush1.bf16.msra.mxu0 %v9765_v56  ;;  %4600 = vmatpush1.bf16.msra.mxu1 %v9768_v37  ;;  %v9783_v56 = vld [vmem:[#allocation8 + $0xe4] ss:$16 sps:$4 sm:$0xff]   ;;  %v9786_v37 = vld [vmem:[#allocation8 + $0xec] ss:$16 sps:$4 sm:$0xff]  }
 0x816   :  { %4560 = vmatprep.subr.bf16.mxu0 %v9771_v21  ;;  %4601 = vmatprep.subr.bf16.mxu1 %v9774_v39  ;;  %11332 = vst [vmem:[#allocation87_spill] sm:$0xff] %v9783_v56  ;;  %11333 = vst [vmem:[#allocation88_spill] sm:$0xff] %v9786_v37  ;;  %v9789_v21 = vld [vmem:[#allocation8 + $0xe0] ss:$16 sps:$4 sm:$0xff]   ;;  %v9792_v39 = vld [vmem:[#allocation8 + $0xe8] ss:$16 sps:$4 sm:$0xff]  }
 0x817   :  { %11334 = vst [vmem:[#allocation89_spill] sm:$0xff] %v9789_v21  ;;  %11335 = vst [vmem:[#allocation16_spill] sm:$0xff] %v9792_v39 }
 0x819   :  { %4561 = vmatpush1.bf16.msra.mxu0 %v9777_v7  ;;  %4602 = vmatpush1.bf16.msra.mxu1 %v9780_v34  ;;  %v9795_v7 = vld [vmem:[#allocation6 + $0x4] ss:$16 sps:$4 sm:$0xff]   ;;  %v9798_v34 = vld [vmem:[#allocation6 + $0xc] ss:$16 sps:$4 sm:$0xff]  }
 0x81a   :  { %4562 = vmatprep.subr.bf16.mxu0 %v9783_v56  ;;  %4603 = vmatprep.subr.bf16.mxu1 %v9786_v37  ;;  %11336 = vst [vmem:[#allocation15_spill] sm:$0xff] %v9795_v7  ;;  %11337 = vst [vmem:[#allocation18_spill] sm:$0xff] %v9798_v34 }
 0x81d   :  { %4563 = vmatpush1.bf16.msra.mxu0 %v9789_v21  ;;  %4604 = vmatpush1.bf16.msra.mxu1 %v9792_v39 }
 0x81e   :  { %4630 = vmatprep.subr.bf16.mxu0 %v9795_v7  ;;  %4671 = vmatprep.subr.bf16.mxu1 %v9798_v34 }
 0x852   :  { %v4060_v56 = vpop.f32.mrb[116].mxu0  ;;  %v4101_v29 = vpop.f32.mrb[116].mxu1 }
 0x853   :  { %v4062_v47 = vpop.f32.mrb[117].mxu0  ;;  %v4103_v37 = vpop.f32.mrb[117].mxu1 }
 0x854   :  { %v4064_v41 = vpop.f32.mrb[118].mxu0  ;;  %v4105_v28 = vpop.f32.mrb[118].mxu1 }
 0x855   :  { %v4065_v33 = vpop.f32.mrb[119].mxu0  ;;  %v4106_v21 = vpop.f32.mrb[119].mxu1 }
 0x872   :  { %v4142_v58 = vpop.f32.mrb[120].mxu0  ;;  %v4183_v13 = vpop.f32.mrb[120].mxu1 }
 0x873   :  { %v4143_v55 = vadd.f32 %v4142_v58, %v4060_v56  ;;  %v4184_v39 = vadd.f32 %v4183_v13, %v4101_v29  ;;  %v4144_v40 = vpop.f32.mrb[121].mxu0  ;;  %v4185_v53 = vpop.f32.mrb[121].mxu1 }
 0x874   :  { %v4145_v44 = vadd.f32 %v4144_v40, %v4062_v47  ;;  %v4186_v7 = vadd.f32 %v4185_v53, %v4103_v37  ;;  %v4146_v25 = vpop.f32.mrb[122].mxu0  ;;  %v4187_v43 = vpop.f32.mrb[122].mxu1 }
 0x875   :  { %v4190_v34 = vadd.f32 %v4143_v55, %v7905_v59  ;;  %v4192_v8 = vadd.f32 %v4184_v39, %v7908_v14  ;;  %v4147_v57 = vpop.f32.mrb[123].mxu0  ;;  %v4188_v36 = vpop.f32.mrb[123].mxu1 }
 0x876   :  { %v4191_v28 = vadd.f32 %v4145_v44, %v7913_v61  ;;  %v4193_v13 = vadd.f32 %v4186_v7, %v7927_v23 }
 0x877   :  { %v5830_v33 = vmul.f32 -1.442695, %v4190_v34  ;;  %v5832_v41 = vmul.f32 -1.442695, %v4192_v8 }
 0x878   :  { %v5831_v21 = vmul.f32 -1.442695, %v4191_v28  ;;  %v5833_v25 = vmul.f32 -1.442695, %v4193_v13 }
 0x879   :  { %6414 = vpow2.f32 %v5830_v33 }
 0x87a   :  { %6416 = vpow2.f32 %v5832_v41 }
 0x87b   :  { %6418 = vpow2.f32 %v5831_v21 }
 0x883   :  { %v6415_v40 = vpop.eup %6414 }
 0x884   :  { %v6417_v53 = vpop.eup %6416  ;;  %v4206_v47 = vadd.f32 1.0, %v6415_v40 }
 0x885   :  { %v6419_v43 = vpop.eup %6418  ;;  %v4208_v58 = vadd.f32 1.0, %v6417_v53 }
 0x886   :  { %v4207_v55 = vadd.f32 1.0, %v6419_v43 }
 0x887   :  { %6420 = vrcp.f32 %v4208_v58 }
 0x888   :  { %6422 = vpow2.f32 %v5833_v25 }
 0x889   :  { %6424 = vrcp.f32 %v4207_v55 }
 0x88a   :  { %6426 = vrcp.f32 %v4206_v47 }
 0x891   :  { %v6421_v36 = vpop.eup %6420 }
 0x892   :  { %v6423_v57 = vpop.eup %6422  ;;  %v4218_v8 = vmul.f32 2.0, %v6421_v36  ;;  %v9816_v36 = vld [vmem:[#allocation6 + $0x8] ss:$16 sps:$4 sm:$0xff]  }
 0x893   :  { %v6425_v44 = vpop.eup %6424  ;;  %v4209_v34 = vadd.f32 1.0, %v6423_v57  ;;  %v4260_v37 = vpop.f32.mrb[124].mxu0  ;;  %v9819_v57 = vld [vmem:[#allocation6 + $0x24] ss:$16 sps:$4 sm:$0xff]  }
 0x894   :  { %v5834_v29 = vadd.f32 -1.0, %v4218_v8  ;;  %v6427_v39 = vpop.eup %6426  ;;  %v4220_v7 = vmul.f32 %v6425_v44, %v9417_v51  ;;  %v4301_v28 = vpop.f32.mrb[124].mxu1  ;;  %v9813_v51 = vld [vmem:[#allocation6] ss:$16 sps:$4 sm:$0xff]   ;;  %v9822_v8 = vld [vmem:[#allocation6 + $0x2c] ss:$16 sps:$4 sm:$0xff]  }
 0x895   :  { %v4262_v33 = vpop.f32.mrb[125].mxu0  ;;  %v4303_v41 = vpop.f32.mrb[125].mxu1  ;;  %6428 = vrcp.f32 %v4209_v34  ;;  %11338 = vst [vmem:[#allocation17_spill] sm:$0xff] %v9822_v8  ;;  %v9827_v44 = vld [vmem:[#allocation6 + $0x20] ss:$16 sps:$4 sm:$0xff]  }
 0x896   :  { %v4221_v56 = vmul.f32 %v6427_v39, %v5834_v29  ;;  %v4264_v13 = vpop.f32.mrb[126].mxu0  ;;  %v4305_v40 = vpop.f32.mrb[126].mxu1  ;;  %11339 = vst [vmem:[#allocation90_spill] sm:$0xff] %v9827_v44  ;;  %v9830_v29 = vld [vmem:[#allocation6 + $0x28] ss:$16 sps:$4 sm:$0xff]  }
 0x897   :  { %v4265_v53 = vpop.f32.mrb[127].mxu0  ;;  %v4306_v25 = vpop.f32.mrb[127].mxu1  ;;  %11340 = vst [vmem:[#allocation91_spill] sm:$0xff] %v9830_v29  ;;  %v9833_v39 = vld [vmem:[#allocation6 + $0x44] ss:$16 sps:$4 sm:$0xff]  }
 0x898   :  { %v9806_v21 = vadd.f32 %v4221_v56, %v4220_v7  ;;  %11341 = vst [vmem:[#allocation92_spill] sm:$0xff] %v9833_v39  ;;  %v9836_v34 = vld [vmem:[#allocation6 + $0x4c] ss:$16 sps:$4 sm:$0xff]   ;;  %v9839_v56 = vld [vmem:[#allocation6 + $0x40] ss:$16 sps:$4 sm:$0xff]  }
 0x899   :  { %11342 = vst [vmem:[#allocation93_spill] sm:$0xff] %v9836_v34  ;;  %11343 = vst [vmem:[#allocation94_spill] sm:$0xff] %v9839_v56  ;;  %v9842_v7 = vld [vmem:[#allocation6 + $0x48] ss:$16 sps:$4 sm:$0xff]   ;;  %v9845_v13 = vld [vmem:[#allocation6 + $0x64] ss:$16 sps:$4 sm:$0xff]  }
 0x89a   :  { %6430 = vtanh.f32 %v9806_v21  ;;  %11344 = vst [vmem:[#allocation95_spill] sm:$0xff] %v9842_v7  ;;  %11345 = vst [vmem:[#allocation96_spill] sm:$0xff] %v9845_v13  ;;  %v9848_v40 = vld [vmem:[#allocation6 + $0x6c] ss:$16 sps:$4 sm:$0xff]  }
 0x89b   :  { %11346 = vst [vmem:[#allocation97_spill] sm:$0xff] %v9848_v40 }
 0x89f   :  { %v6429_v43 = vpop.eup %6428 }
 0x8a4   :  { %v6431_v58 = vpop.eup %6430 }
 0x8a5   :  { %v4224_v55 = vmul.f32 %v6431_v58, %v6429_v43  ;;  %v9851_v43 = vld [vmem:[#allocation6 + $0x60] ss:$16 sps:$4 sm:$0xff]   ;;  %v9854_v58 = vld [vmem:[#allocation6 + $0x68] ss:$16 sps:$4 sm:$0xff]  }
 0x8a6   :  { %11347 = vst [vmem:[#allocation98_spill] sm:$0xff] %v9851_v43  ;;  %11348 = vst [vmem:[#allocation99_spill] sm:$0xff] %v9854_v58 }
 0x8a7   :  { %v9809_v47 = vpack.c.bf16 %v4224_v55, %v4224_v55 }
 0x8a9   :  { %4581 = vmatmul.mubr.bf16.vlgmr.msra.gmra.mrb[136].mxu0 %v9809_v47  ;;  %4622 = vmatmul.mubr.bf16.vlgmr.msra.gmra.mrb[136].mxu1 %v9809_v47 }
 0x8aa   :  { %4631 = vmatpush1.bf16.msra.mxu0 %v9813_v51  ;;  %4672 = vmatpush1.bf16.msra.mxu1 %v9816_v36 }
 0x8ab   :  { %4632 = vmatprep.subr.bf16.mxu0 %v9819_v57  ;;  %4673 = vmatprep.subr.bf16.mxu1 %v9822_v8 }
 0x8ac   :  { %4662 = vmatprep.mubr.bf16.mxu0 %v10759_v4  ;;  %4703 = vmatprep.mubr.bf16.mxu1 %v10759_v4 }
 0x8ae   :  { %4633 = vmatpush1.bf16.msra.mxu0 %v9827_v44  ;;  %4674 = vmatpush1.bf16.msra.mxu1 %v9830_v29 }
 0x8af   :  { %4634 = vmatprep.subr.bf16.mxu0 %v9833_v39  ;;  %4675 = vmatprep.subr.bf16.mxu1 %v9836_v34  ;;  %v9857_v39 = vld [vmem:[#allocation6 + $0x84] ss:$16 sps:$4 sm:$0xff]  }
 0x8b0   :  { %11349 = vst [vmem:[#allocation100_spill] sm:$0xff] %v9857_v39 }
 0x8b2   :  { %4635 = vmatpush1.bf16.msra.mxu0 %v9839_v56  ;;  %4676 = vmatpush1.bf16.msra.mxu1 %v9842_v7 }
 0x8b3   :  { %4636 = vmatprep.subr.bf16.mxu0 %v9845_v13  ;;  %4677 = vmatprep.subr.bf16.mxu1 %v9848_v40  ;;  %v4342_v53 = vpop.f32.mrb[128].mxu0  ;;  %v4383_v25 = vpop.f32.mrb[128].mxu1  ;;  %v9860_v13 = vld [vmem:[#allocation6 + $0x8c] ss:$16 sps:$4 sm:$0xff]  }
 0x8b4   :  { %v4343_v55 = vadd.f32 %v4342_v53, %v4260_v37  ;;  %v4384_v7 = vadd.f32 %v4383_v25, %v4301_v28  ;;  %v4344_v56 = vpop.f32.mrb[129].mxu0  ;;  %v4385_v34 = vpop.f32.mrb[129].mxu1  ;;  %v9866_v25 = vld [vmem:[#allocation6 + $0x80] ss:$16 sps:$4 sm:$0xff]  }
 0x8b5   :  { %v4345_v40 = vadd.f32 %v4344_v56, %v4262_v33  ;;  %v4386_v29 = vadd.f32 %v4385_v34, %v4303_v41  ;;  %v4346_v44 = vpop.f32.mrb[130].mxu0  ;;  %v9875_v34 = vld [vmem:[#allocation6 + $0xac] ss:$16 sps:$4 sm:$0xff]  }
 0x8b6   :  { %4637 = vmatpush1.bf16.msra.mxu0 %v9851_v43  ;;  %4678 = vmatpush1.bf16.msra.mxu1 %v9854_v58  ;;  %v4387_v43 = vpop.f32.mrb[130].mxu1  ;;  %v4390_v8 = vadd.f32 %v4343_v55, %v8407_v63  ;;  %v4392_v58 = vadd.f32 %v4384_v7, %v8410_v15  ;;  %v4347_v37 = vpop.f32.mrb[131].mxu0  ;;  %v9872_v44 = vld [vmem:[#allocation6 + $0xa4] ss:$16 sps:$4 sm:$0xff]   ;;  %v9878_v7 = vld [vmem:[#allocation6 + $0xa0] ss:$16 sps:$4 sm:$0xff]  }
 0x8b7   :  { %4638 = vmatprep.subr.bf16.mxu0 %v9857_v39  ;;  %4679 = vmatprep.subr.bf16.mxu1 %v9860_v13  ;;  %v4388_v28 = vpop.f32.mrb[131].mxu1  ;;  %v4391_v53 = vadd.f32 %v4345_v40, %v8419_v11  ;;  %v9869_v39 = vld [vmem:[#allocation6 + $0x88] ss:$16 sps:$4 sm:$0xff]   ;;  %v9887_v43 = vld [vmem:[#allocation6 + $0xcc] ss:$16 sps:$4 sm:$0xff]  }
 0x8b8   :  { %v5835_v33 = vmul.f32 -1.442695, %v4390_v8  ;;  %v5837_v41 = vmul.f32 -1.442695, %v4392_v58  ;;  %v9881_v40 = vld [vmem:[#allocation6 + $0xa8] ss:$16 sps:$4 sm:$0xff]  }
 0x8b9   :  { %v5836_v56 = vmul.f32 -1.442695, %v4391_v53  ;;  %v9884_v8 = vld [vmem:[#allocation6 + $0xc4] ss:$16 sps:$4 sm:$0xff]   ;;  %11350 = vst [vmem:[#allocation101_spill] sm:$0xff] %v9887_v43  ;;  %v4393_v53 = vadd.f32 %v4386_v29, %v11264_v17 }
 0x8ba   :  { %4639 = vmatpush1.bf16.msra.mxu0 %v9866_v25  ;;  %4680 = vmatpush1.bf16.msra.mxu1 %v9869_v39  ;;  %6432 = vpow2.f32 %v5835_v33  ;;  %v9890_v58 = vld [vmem:[#allocation6 + $0xc0] ss:$16 sps:$4 sm:$0xff]   ;;  %v9893_v55 = vld [vmem:[#allocation6 + $0xc8] ss:$16 sps:$4 sm:$0xff]   ;;  %v9896_v37 = vld [vmem:[#allocation6 + $0xe4] ss:$16 sps:$4 sm:$0xff]  }
 0x8bb   :  { %4640 = vmatprep.subr.bf16.mxu0 %v9872_v44  ;;  %4681 = vmatprep.subr.bf16.mxu1 %v9875_v34  ;;  %6434 = vpow2.f32 %v5837_v41  ;;  %11351 = vst [vmem:[#allocation102_spill] sm:$0xff] %v9890_v58  ;;  %11352 = vst [vmem:[#allocation103_spill] sm:$0xff] %v9893_v55  ;;  %v9899_v28 = vld [vmem:[#allocation6 + $0xec] ss:$16 sps:$4 sm:$0xff]   ;;  %v9903_v33 = vld [vmem:[#allocation6 + $0xe0] ss:$16 sps:$4 sm:$0xff]  }
 0x8bc   :  { %6436 = vpow2.f32 %v5836_v56  ;;  %11353 = vst [vmem:[#allocation104_spill] sm:$0xff] %v9896_v37  ;;  %11354 = vst [vmem:[#allocation105_spill] sm:$0xff] %v9903_v33  ;;  %v9906_v41 = vld [vmem:[#allocation6 + $0xe8] ss:$16 sps:$4 sm:$0xff]  }
 0x8be   :  { %4641 = vmatpush1.bf16.msra.mxu0 %v9878_v7  ;;  %4682 = vmatpush1.bf16.msra.mxu1 %v9881_v40 }
 0x8bf   :  { %4642 = vmatprep.subr.bf16.mxu0 %v9884_v8  ;;  %4683 = vmatprep.subr.bf16.mxu1 %v9887_v43 }
 0x8c2   :  { %4643 = vmatpush1.bf16.msra.mxu0 %v9890_v58  ;;  %4684 = vmatpush1.bf16.msra.mxu1 %v9893_v55  ;;  %v5838_v55 = vmul.f32 -1.442695, %v4393_v53 }
 0x8c3   :  { %4644 = vmatprep.subr.bf16.mxu0 %v9896_v37  ;;  %4685 = vmatprep.subr.bf16.mxu1 %v9899_v28 }
 0x8c4   :  { %v6433_v56 = vpop.eup %6432 }
 0x8c5   :  { %v6435_v37 = vpop.eup %6434 }
 0x8c6   :  { %4645 = vmatpush1.bf16.msra.mxu0 %v9903_v33  ;;  %4686 = vmatpush1.bf16.msra.mxu1 %v9906_v41  ;;  %v6437_v58 = vpop.eup %6436  ;;  %v4408_v43 = vadd.f32 1.0, %v6435_v37  ;;  %v4406_v33 = vadd.f32 1.0, %v6433_v56 }
 0x8c7   :  { %4748 = vmatprep.subr.bf16.mxu0 %v9460_v6  ;;  %4789 = vmatprep.subr.bf16.mxu1 %v9463_v20  ;;  %v4407_v29 = vadd.f32 1.0, %v6437_v58 }
 0x8c8   :  { %6438 = vrcp.f32 %v4408_v43 }
 0x8c9   :  { %4663 = vmatmul.mubr.bf16.vlgmr.msra.gmra.mrb[140].mxu0 %v9693_v32  ;;  %4704 = vmatmul.mubr.bf16.vlgmr.msra.gmra.mrb[140].mxu1 %v9693_v32  ;;  %6440 = vpow2.f32 %v5838_v55  ;;  %v11358_v32 = vld [vmem:[#allocation35_spill] sm:$0xff]  ;;  %v11360_v55 = vld [vmem:[#allocation37_spill] sm:$0xff] }
 0x8ca   :  { %4749 = vmatpush1.bf16.msra.mxu0 %v9468_v38  ;;  %4790 = vmatpush1.bf16.msra.mxu1 %v9471_v9  ;;  %6442 = vrcp.f32 %v4407_v29 }
 0x8cb   :  { %4750 = vmatprep.subr.bf16.mxu0 %v9474_v60  ;;  %4791 = vmatprep.subr.bf16.mxu1 %v9477_v5  ;;  %6444 = vrcp.f32 %v4406_v33  ;;  %v11355_v5 = vld [vmem:[#allocation133_spill] sm:$0xff] }
 0x8cc   :  { %4780 = vmatprep.mubr.bf16.mxu0 %v10759_v4  ;;  %4821 = vmatprep.mubr.bf16.mxu1 %v10759_v4 }
 0x8ce   :  { %4751 = vmatpush1.bf16.msra.mxu0 %v9482_v18  ;;  %4792 = vmatpush1.bf16.msra.mxu1 %v9485_v1  ;;  %v11356_v18 = vld [vmem:[#allocation134_spill] sm:$0xff] }
 0x8cf   :  { %4752 = vmatprep.subr.bf16.mxu0 %v9488_v16  ;;  %4793 = vmatprep.subr.bf16.mxu1 %v9491_v52  ;;  %v11357_v16 = vld [vmem:[#allocation36_spill] sm:$0xff] }
 0x8d2   :  { %4753 = vmatpush1.bf16.msra.mxu0 %v9494_v50  ;;  %4794 = vmatpush1.bf16.msra.mxu1 %v9497_v48  ;;  %v6439_v6 = vpop.eup %6438 }
 0x8d3   :  { %4754 = vmatprep.subr.bf16.mxu0 %v9500_v3  ;;  %4795 = vmatprep.subr.bf16.mxu1 %v9503_v42  ;;  %v6441_v20 = vpop.eup %6440  ;;  %v4418_v38 = vmul.f32 2.0, %v6439_v6  ;;  %v4464_v9 = vpop.f32.mrb[132].mxu0  ;;  %v11359_v42 = vld [vmem:[#allocation38_spill] sm:$0xff] }
 0x8d4   :  { %v4505_v60 = vpop.f32.mrb[132].mxu1  ;;  %v6443_v1 = vpop.eup %6442  ;;  %v4512_v52 = vadd.f32 %v4464_v9, %v11357_v16  ;;  %v4409_v16 = vadd.f32 1.0, %v6441_v20 }
 0x8d5   :  { %v4514_v50 = vadd.f32 %v4505_v60, %v11358_v32  ;;  %v4466_v43 = vpop.f32.mrb[133].mxu0  ;;  %v4507_v48 = vpop.f32.mrb[133].mxu1  ;;  %v5839_v3 = vadd.f32 -1.0, %v4418_v38  ;;  %v4420_v60 = vmul.f32 %v6443_v1, %v9531_v0  ;;  %v11362_v0 = vld [vmem:[#allocation24_spill] sm:$0xff] }
 0x8d6   :  { %4755 = vmatpush1.bf16.msra.mxu0 %v11355_v5  ;;  %4796 = vmatpush1.bf16.msra.mxu1 %v11356_v18  ;;  %v4513_v58 = vadd.f32 %v4466_v43, %v11359_v42  ;;  %v4515_v37 = vadd.f32 %v4507_v48, %v11360_v55  ;;  %v4468_v53 = vpop.f32.mrb[134].mxu0  ;;  %v4509_v33 = vpop.f32.mrb[134].mxu1  ;;  %v5840_v29 = vmul.f32 -1.442695, %v4512_v52  ;;  %v11369_v43 = vld [vmem:[#allocation30_spill] sm:$0xff] }
 0x8d7   :  { %4756 = vmatprep.subr.bf16.mxu0 %v9518_v45  ;;  %4797 = vmatprep.subr.bf16.mxu1 %v9521_v35  ;;  %v6445_v56 = vpop.eup %6444  ;;  %v5842_v6 = vmul.f32 -1.442695, %v4514_v50  ;;  %v4469_v5 = vpop.f32.mrb[135].mxu0  ;;  %v11361_v35 = vld [vmem:[#allocation135_spill] sm:$0xff]  ;;  %v11371_v33 = vld [vmem:[#allocation40_spill] sm:$0xff] }
 0x8d8   :  { %v4510_v9 = vpop.f32.mrb[135].mxu1  ;;  %v4421_v18 = vmul.f32 %v6445_v56, %v5839_v3  ;;  %v5841_v32 = vmul.f32 -1.442695, %v4513_v58  ;;  %6446 = vpow2.f32 %v5840_v29  ;;  %v5843_v1 = vmul.f32 -1.442695, %v4515_v37  ;;  %v11370_v37 = vld [vmem:[#allocation29_spill] sm:$0xff] }
 0x8d9   :  { %6448 = vpow2.f32 %v5842_v6  ;;  %v11372_v56 = vld [vmem:[#allocation41_spill] sm:$0xff]  ;;  %v11373_v29 = vld [vmem:[#allocation42_spill] sm:$0xff]  ;;  %v11374_v6 = vld [vmem:[#allocation43_spill] sm:$0xff] }
 0x8da   :  { %4757 = vmatpush1.bf16.msra.mxu0 %v9525_v31  ;;  %4798 = vmatpush1.bf16.msra.mxu1 %v9528_v54  ;;  %v9940_v45 = vadd.f32 %v4421_v18, %v4420_v60  ;;  %6450 = vpow2.f32 %v5841_v32  ;;  %v11363_v31 = vld [vmem:[#allocation23_spill] sm:$0xff]  ;;  %v11364_v54 = vld [vmem:[#allocation26_spill] sm:$0xff]  ;;  %v11375_v5 = vld [vmem:[#allocation44_spill] sm:$0xff] }
 0x8db   :  { %4758 = vmatprep.subr.bf16.mxu0 %v9533_v24  ;;  %4799 = vmatprep.subr.bf16.mxu1 %v9536_v30  ;;  %6452 = vrcp.f32 %v4409_v16  ;;  %v11365_v24 = vld [vmem:[#allocation25_spill] sm:$0xff]  ;;  %v11366_v30 = vld [vmem:[#allocation28_spill] sm:$0xff]  ;;  %v11377_v16 = vld [vmem:[#allocation46_spill] sm:$0xff] }
 0x8dc   :  { %6454 = vtanh.f32 %v9940_v45  ;;  %v11376_v60 = vld [vmem:[#allocation45_spill] sm:$0xff] }
 0x8de   :  { %4759 = vmatpush1.bf16.msra.mxu0 %v9539_v19  ;;  %4800 = vmatpush1.bf16.msra.mxu1 %v9542_v22  ;;  %v11367_v19 = vld [vmem:[#allocation27_spill] sm:$0xff] }
 0x8df   :  { %4760 = vmatprep.subr.bf16.mxu0 %v11361_v35  ;;  %4801 = vmatprep.subr.bf16.mxu1 %v11362_v0  ;;  %v11368_v22 = vld [vmem:[#allocation39_spill] sm:$0xff] }
 0x8e2   :  { %4761 = vmatpush1.bf16.msra.mxu0 %v11363_v31  ;;  %4802 = vmatpush1.bf16.msra.mxu1 %v11364_v54  ;;  %v6447_v20 = vpop.eup %6446  ;;  %v11378_v54 = vld [vmem:[#allocation47_spill] sm:$0xff] }
 0x8e3   :  { %4762 = vmatprep.subr.bf16.mxu0 %v11365_v24  ;;  %4803 = vmatprep.subr.bf16.mxu1 %v11366_v30  ;;  %v6449_v38 = vpop.eup %6448  ;;  %v4528_v58 = vadd.f32 1.0, %v6447_v20 }
 0x8e4   :  { %v6451_v52 = vpop.eup %6450  ;;  %v4530_v50 = vadd.f32 1.0, %v6449_v38  ;;  %v11379_v38 = vld [vmem:[#allocation48_spill] sm:$0xff] }
 0x8e5   :  { %v6453_v48 = vpop.eup %6452  ;;  %v4529_v3 = vadd.f32 1.0, %v6451_v52  ;;  %v11387_v52 = vld [vmem:[#allocation56_spill] sm:$0xff] }
 0x8e6   :  { %4763 = vmatpush1.bf16.msra.mxu0 %v11367_v19  ;;  %4804 = vmatpush1.bf16.msra.mxu1 %v11368_v22  ;;  %v6455_v42 = vpop.eup %6454  ;;  %6456 = vrcp.f32 %v4530_v50  ;;  %v11381_v19 = vld [vmem:[#allocation50_spill] sm:$0xff]  ;;  %v11382_v22 = vld [vmem:[#allocation51_spill] sm:$0xff] }
 0x8e7   :  { %4830 = vmatprep.subr.bf16.mxu0 %v11369_v43  ;;  %4871 = vmatprep.subr.bf16.mxu1 %v9573_v2  ;;  %6458 = vpow2.f32 %v5843_v1  ;;  %v4424_v55 = vmul.f32 %v6455_v42, %v6453_v48  ;;  %v11380_v1 = vld [vmem:[#allocation49_spill] sm:$0xff]  ;;  %v11389_v50 = vld [vmem:[#allocation58_spill] sm:$0xff]  ;;  %v11390_v42 = vld [vmem:[#allocation59_spill] sm:$0xff] }
 0x8e8   :  { %6460 = vrcp.f32 %v4529_v3 }
 0x8e9   :  { %v4747_v53 = vpack.c.bf16 %v4424_v55, %v4424_v55  ;;  %6462 = vrcp.f32 %v4528_v58  ;;  %v11391_v58 = vld [vmem:[#allocation60_spill] sm:$0xff]  ;;  %v11392_v55 = vld [vmem:[#allocation61_spill] sm:$0xff] }
 0x8eb   :  { %4781 = vmatmul.mubr.bf16.vlgmr.msra.gmra.mrb[144].mxu0 %v4747_v53  ;;  %4822 = vmatmul.mubr.bf16.vlgmr.msra.gmra.mrb[144].mxu1 %v4747_v53  ;;  %v11393_v53 = vld [vmem:[#allocation62_spill] sm:$0xff] }
 0x8ec   :  { %4831 = vmatpush1.bf16.msra.mxu0 %v11370_v37  ;;  %4872 = vmatpush1.bf16.msra.mxu1 %v11371_v33  ;;  %v11394_v37 = vld [vmem:[#allocation63_spill] sm:$0xff]  ;;  %v11395_v33 = vld [vmem:[#allocation64_spill] sm:$0xff] }
 0x8ed   :  { %4832 = vmatprep.subr.bf16.mxu0 %v11372_v56  ;;  %4873 = vmatprep.subr.bf16.mxu1 %v11373_v29  ;;  %v11398_v56 = vld [vmem:[#allocation67_spill] sm:$0xff]  ;;  %v11399_v29 = vld [vmem:[#allocation68_spill] sm:$0xff] }
 0x8ee   :  { %4862 = vmatprep.mubr.bf16.mxu0 %v10759_v4  ;;  %4903 = vmatprep.mubr.bf16.mxu1 %v10759_v4 }
 0x8f0   :  { %v6457_v2 = vpop.eup %6456  ;;  %4833 = vmatpush1.bf16.msra.mxu0 %v11374_v6  ;;  %4874 = vmatpush1.bf16.msra.mxu1 %v11375_v5  ;;  %v11401_v6 = vld [vmem:[#allocation70_spill] sm:$0xff]  ;;  %v11402_v5 = vld [vmem:[#allocation81_spill] sm:$0xff] }
 0x8f1   :  { %v6459_v9 = vpop.eup %6458  ;;  %v4540_v18 = vmul.f32 2.0, %v6457_v2  ;;  %4834 = vmatprep.subr.bf16.mxu0 %v11376_v60  ;;  %4875 = vmatprep.subr.bf16.mxu1 %v11377_v16  ;;  %v11400_v2 = vld [vmem:[#allocation69_spill] sm:$0xff]  ;;  %v11406_v60 = vld [vmem:[#allocation19_spill] sm:$0xff]  ;;  %v11407_v16 = vld [vmem:[#allocation22_spill] sm:$0xff] }
 0x8f2   :  { %v6461_v32 = vpop.eup %6460  ;;  %v4531_v31 = vadd.f32 1.0, %v6459_v9  ;;  %v11403_v9 = vld [vmem:[#allocation71_spill] sm:$0xff] }
 0x8f3   :  { %v5844_v35 = vadd.f32 -1.0, %v4540_v18  ;;  %v6463_v0 = vpop.eup %6462  ;;  %v4542_v30 = vmul.f32 %v6461_v32, %v9615_v12  ;;  %v11384_v12 = vld [vmem:[#allocation53_spill] sm:$0xff]  ;;  %v11405_v18 = vld [vmem:[#allocation20_spill] sm:$0xff] }
 0x8f4   :  { %4835 = vmatpush1.bf16.msra.mxu0 %v11378_v54  ;;  %4876 = vmatpush1.bf16.msra.mxu1 %v9605_v26  ;;  %6464 = vrcp.f32 %v4531_v31  ;;  %v11383_v26 = vld [vmem:[#allocation52_spill] sm:$0xff]  ;;  %v11408_v32 = vld [vmem:[#allocation21_spill] sm:$0xff]  ;;  %v11411_v31 = vld [vmem:[#allocation75_spill] sm:$0xff] }
 0x8f5   :  { %v4543_v24 = vmul.f32 %v6463_v0, %v5844_v35  ;;  %4836 = vmatprep.subr.bf16.mxu0 %v9609_v62  ;;  %4877 = vmatprep.subr.bf16.mxu1 %v9612_v27  ;;  %v11385_v62 = vld [vmem:[#allocation54_spill] sm:$0xff]  ;;  %v11386_v27 = vld [vmem:[#allocation55_spill] sm:$0xff]  ;;  %v11409_v35 = vld [vmem:[#allocation73_spill] sm:$0xff] }
 0x8f6   :  { %v11410_v0 = vld [vmem:[#allocation74_spill] sm:$0xff]  ;;  %v11412_v54 = vld [vmem:[#allocation76_spill] sm:$0xff] }
 0x8f7   :  { %v4544_v20 = vadd.f32 %v4543_v24, %v4542_v30  ;;  %v11413_v24 = vld [vmem:[#allocation77_spill] sm:$0xff]  ;;  %v11414_v30 = vld [vmem:[#allocation78_spill] sm:$0xff] }
 0x8f8   :  { %4837 = vmatpush1.bf16.msra.mxu0 %v9617_v49  ;;  %4878 = vmatpush1.bf16.msra.mxu1 %v11379_v38  ;;  %v11388_v49 = vld [vmem:[#allocation57_spill] sm:$0xff]  ;;  %v11416_v38 = vld [vmem:[#allocation80_spill] sm:$0xff] }
 0x8f9   :  { %6466 = vtanh.f32 %v4544_v20  ;;  %4838 = vmatprep.subr.bf16.mxu0 %v11380_v1  ;;  %4879 = vmatprep.subr.bf16.mxu1 %v11381_v19  ;;  %v11415_v20 = vld [vmem:[#allocation79_spill] sm:$0xff]  ;;  %v11417_v1 = vld [vmem:[#allocation82_spill] sm:$0xff] }
 0x8fa   :  { %v11418_v19 = vld [vmem:[#allocation83_spill] sm:$0xff] }
 0x8fc   :  { %4839 = vmatpush1.bf16.msra.mxu0 %v11382_v22  ;;  %4880 = vmatpush1.bf16.msra.mxu1 %v11383_v26  ;;  %v11419_v22 = vld [vmem:[#allocation84_spill] sm:$0xff]  ;;  %v11420_v26 = vld [vmem:[#allocation85_spill] sm:$0xff] }
 0x8fd   :  { %4840 = vmatprep.subr.bf16.mxu0 %v11384_v12  ;;  %4881 = vmatprep.subr.bf16.mxu1 %v11385_v62  ;;  %v11421_v12 = vld [vmem:[#allocation86_spill] sm:$0xff]  ;;  %v11422_v62 = vld [vmem:[#allocation87_spill] sm:$0xff] }
 0x8fe   :  { %v6465_v43 = vpop.eup %6464 }
 0x900   :  { %4841 = vmatpush1.bf16.msra.mxu0 %v11386_v27  ;;  %4882 = vmatpush1.bf16.msra.mxu1 %v11387_v52  ;;  %v11423_v27 = vld [vmem:[#allocation88_spill] sm:$0xff]  ;;  %v11424_v52 = vld [vmem:[#allocation89_spill] sm:$0xff] }
 0x901   :  { %4842 = vmatprep.subr.bf16.mxu0 %v11388_v49  ;;  %4883 = vmatprep.subr.bf16.mxu1 %v11389_v50  ;;  %v11425_v49 = vld [vmem:[#allocation16_spill] sm:$0xff]  ;;  %v11426_v50 = vld [vmem:[#allocation15_spill] sm:$0xff] }
 0x903   :  { %v6467_v48 = vpop.eup %6466 }
 0x904   :  { %4843 = vmatpush1.bf16.msra.mxu0 %v9653_v46  ;;  %4884 = vmatpush1.bf16.msra.mxu1 %v9656_v10  ;;  %v9984_v3 = vmul.f32 %v6467_v48, %v6465_v43  ;;  %v11396_v46 = vld [vmem:[#allocation65_spill] sm:$0xff]  ;;  %v11397_v10 = vld [vmem:[#allocation66_spill] sm:$0xff] }
 0x905   :  { %4844 = vmatprep.subr.bf16.mxu0 %v11390_v42  ;;  %4885 = vmatprep.subr.bf16.mxu1 %v11391_v58  ;;  %v11427_v43 = vld [vmem:[#allocation18_spill] sm:$0xff] }
 0x908   :  { %4845 = vmatpush1.bf16.msra.mxu0 %v11392_v55  ;;  %4886 = vmatpush1.bf16.msra.mxu1 %v11393_v53 }
 0x909   :  { %4949 = vmatprep.subr.bf16.mxu0 %v11394_v37  ;;  %4990 = vmatprep.subr.bf16.mxu1 %v11395_v33 }
 0x90b   :  { %4863 = vmatmul.mubr.bf16.vlgmr.msra.gmra.mrb[148].mxu0 %v9809_v47  ;;  %4904 = vmatmul.mubr.bf16.vlgmr.msra.gmra.mrb[148].mxu1 %v9809_v47  ;;  %v11404_v47 = vld [vmem:[#allocation72_spill] sm:$0xff] }
 0x90c   :  { %4950 = vmatpush1.bf16.msra.mxu0 %v11396_v46  ;;  %4991 = vmatpush1.bf16.msra.mxu1 %v11397_v10 }
 0x90d   :  { %4951 = vmatprep.subr.bf16.mxu0 %v11398_v56  ;;  %4992 = vmatprep.subr.bf16.mxu1 %v11399_v29 }
 0x90e   :  { %4981 = vmatprep.mubr.bf16.mxu0 %v10759_v4  ;;  %5022 = vmatprep.mubr.bf16.mxu1 %v10759_v4 }
 0x910   :  { %4952 = vmatpush1.bf16.msra.mxu0 %v11400_v2  ;;  %4993 = vmatpush1.bf16.msra.mxu1 %v11401_v6 }
 0x911   :  { %4953 = vmatprep.subr.bf16.mxu0 %v11402_v5  ;;  %4994 = vmatprep.subr.bf16.mxu1 %v11403_v9 }
 0x914   :  { %4954 = vmatpush1.bf16.msra.mxu0 %v11404_v47  ;;  %4995 = vmatpush1.bf16.msra.mxu1 %v11405_v18 }
 0x915   :  { %4955 = vmatprep.subr.bf16.mxu0 %v11406_v60  ;;  %4996 = vmatprep.subr.bf16.mxu1 %v11407_v16 }
 0x918   :  { %4956 = vmatpush1.bf16.msra.mxu0 %v11408_v32  ;;  %4997 = vmatpush1.bf16.msra.mxu1 %v11409_v35 }
 0x919   :  { %4957 = vmatprep.subr.bf16.mxu0 %v11410_v0  ;;  %4998 = vmatprep.subr.bf16.mxu1 %v11411_v31 }
 0x91c   :  { %4958 = vmatpush1.bf16.msra.mxu0 %v11412_v54  ;;  %4999 = vmatpush1.bf16.msra.mxu1 %v11413_v24 }
 0x91d   :  { %4959 = vmatprep.subr.bf16.mxu0 %v11414_v30  ;;  %5000 = vmatprep.subr.bf16.mxu1 %v11415_v20 }
 0x920   :  { %4960 = vmatpush1.bf16.msra.mxu0 %v11416_v38  ;;  %5001 = vmatpush1.bf16.msra.mxu1 %v11417_v1 }
 0x921   :  { %4961 = vmatprep.subr.bf16.mxu0 %v11418_v19  ;;  %5002 = vmatprep.subr.bf16.mxu1 %v11419_v22 }
 0x924   :  { %4962 = vmatpush1.bf16.msra.mxu0 %v11420_v26  ;;  %5003 = vmatpush1.bf16.msra.mxu1 %v11421_v12 }
 0x925   :  { %4963 = vmatprep.subr.bf16.mxu0 %v11422_v62  ;;  %5004 = vmatprep.subr.bf16.mxu1 %v11423_v27 }
 0x928   :  { %4964 = vmatpush1.bf16.msra.mxu0 %v11424_v52  ;;  %5005 = vmatpush1.bf16.msra.mxu1 %v11425_v49 }
 0x929   :  { %5031 = vmatprep.subr.bf16.mxu0 %v11426_v50  ;;  %5072 = vmatprep.subr.bf16.mxu1 %v11427_v43 }
 0x97c   :  { %v4582_v48 = vpop.f32.mrb[136].mxu0  ;;  %v4623_v42 = vpop.f32.mrb[136].mxu1 }
 0x97d   :  { %v4584_v58 = vpop.f32.mrb[137].mxu0  ;;  %v4625_v55 = vpop.f32.mrb[137].mxu1 }
 0x97e   :  { %v4586_v53 = vpop.f32.mrb[138].mxu0  ;;  %v4627_v37 = vpop.f32.mrb[138].mxu1 }
 0x97f   :  { %v4587_v33 = vpop.f32.mrb[139].mxu0  ;;  %v4628_v46 = vpop.f32.mrb[139].mxu1 }
 0x99c   :  { %v4664_v10 = vpop.f32.mrb[140].mxu0  ;;  %v4705_v56 = vpop.f32.mrb[140].mxu1 }
 0x99d   :  { %v4665_v29 = vadd.f32 %v4664_v10, %v4582_v48  ;;  %v4706_v2 = vadd.f32 %v4705_v56, %v4623_v42  ;;  %v4666_v6 = vpop.f32.mrb[141].mxu0  ;;  %v4707_v5 = vpop.f32.mrb[141].mxu1 }
 0x99e   :  { %v4667_v9 = vadd.f32 %v4666_v6, %v4584_v58  ;;  %v4708_v47 = vadd.f32 %v4707_v5, %v4625_v55  ;;  %v4668_v18 = vpop.f32.mrb[142].mxu0  ;;  %v4709_v60 = vpop.f32.mrb[142].mxu1 }
 0x99f   :  { %v4712_v16 = vadd.f32 %v4665_v29, %v7905_v59  ;;  %v4714_v32 = vadd.f32 %v4706_v2, %v7908_v14  ;;  %v4669_v35 = vpop.f32.mrb[143].mxu0  ;;  %v4710_v0 = vpop.f32.mrb[143].mxu1  ;;  %v11429_v60 = vld [vmem:[#allocation90_spill] sm:$0xff] }
 0x9a0   :  { %v4713_v31 = vadd.f32 %v4667_v9, %v7913_v61  ;;  %v4715_v20 = vadd.f32 %v4708_v47, %v7927_v23  ;;  %v11432_v35 = vld [vmem:[#allocation93_spill] sm:$0xff]  ;;  %v11433_v0 = vld [vmem:[#allocation94_spill] sm:$0xff] }
 0x9a1   :  { %v5845_v54 = vmul.f32 -1.442695, %v4712_v16  ;;  %v5847_v24 = vmul.f32 -1.442695, %v4714_v32  ;;  %v11430_v16 = vld [vmem:[#allocation91_spill] sm:$0xff]  ;;  %v11431_v32 = vld [vmem:[#allocation92_spill] sm:$0xff] }
 0x9a2   :  { %v5846_v30 = vmul.f32 -1.442695, %v4713_v31  ;;  %v5848_v19 = vmul.f32 -1.442695, %v4715_v20  ;;  %v11437_v31 = vld [vmem:[#allocation98_spill] sm:$0xff]  ;;  %v11439_v20 = vld [vmem:[#allocation100_spill] sm:$0xff] }
 0x9a3   :  { %6468 = vpow2.f32 %v5845_v54  ;;  %v11438_v54 = vld [vmem:[#allocation99_spill] sm:$0xff] }
 0x9a4   :  { %6470 = vpow2.f32 %v5847_v24 }
 0x9a5   :  { %6472 = vpow2.f32 %v5846_v30 }
 0x9ad   :  { %v6469_v38 = vpop.eup %6468 }
 0x9ae   :  { %v6471_v1 = vpop.eup %6470  ;;  %v4728_v62 = vadd.f32 1.0, %v6469_v38 }
 0x9af   :  { %v6473_v22 = vpop.eup %6472  ;;  %v4730_v26 = vadd.f32 1.0, %v6471_v1 }
 0x9b0   :  { %v4729_v12 = vadd.f32 1.0, %v6473_v22 }
 0x9b1   :  { %6474 = vrcp.f32 %v4730_v26 }
 0x9b2   :  { %6476 = vpow2.f32 %v5848_v19 }
 0x9b3   :  { %6478 = vrcp.f32 %v4729_v12 }
 0x9b4   :  { %6480 = vrcp.f32 %v4728_v62 }
 0x9bb   :  { %v6475_v27 = vpop.eup %6474 }
 0x9bc   :  { %v6477_v52 = vpop.eup %6476  ;;  %v4740_v49 = vmul.f32 2.0, %v6475_v27 }
 0x9bd   :  { %v6479_v50 = vpop.eup %6478  ;;  %v4731_v42 = vadd.f32 1.0, %v6477_v52 }
 0x9be   :  { %v5849_v43 = vadd.f32 -1.0, %v4740_v49  ;;  %v6481_v48 = vpop.eup %6480  ;;  %v4742_v55 = vmul.f32 %v6479_v50, %v9806_v21  ;;  %v4782_v53 = vpop.f32.mrb[144].mxu0  ;;  %v11428_v21 = vld [vmem:[#allocation17_spill] sm:$0xff] }
 0x9bf   :  { %v4823_v37 = vpop.f32.mrb[144].mxu1  ;;  %v4784_v46 = vpop.f32.mrb[145].mxu0  ;;  %6482 = vrcp.f32 %v4731_v42 }
 0x9c0   :  { %v4743_v58 = vmul.f32 %v6481_v48, %v5849_v43  ;;  %v4825_v10 = vpop.f32.mrb[145].mxu1  ;;  %v4786_v56 = vpop.f32.mrb[146].mxu0 }
 0x9c1   :  { %v4827_v29 = vpop.f32.mrb[146].mxu1  ;;  %v4787_v2 = vpop.f32.mrb[147].mxu0 }
 0x9c2   :  { %v10033_v33 = vadd.f32 %v4743_v58, %v4742_v55  ;;  %v4828_v6 = vpop.f32.mrb[147].mxu1  ;;  %v11442_v55 = vld [vmem:[#allocation103_spill] sm:$0xff] }
 0x9c3   :  { %v10084_v29 = vld [vmem:[#allocation11] ss:$16 sps:$4 sm:$0xff]   ;;  %v10090_v2 = vld [vmem:[#allocation11 + $0x24] ss:$16 sps:$4 sm:$0xff]   ;;  %v10093_v6 = vld [vmem:[#allocation11 + $0x2c] ss:$16 sps:$4 sm:$0xff]  }
 0x9c4   :  { %6484 = vtanh.f32 %v10033_v33 }
 0x9c9   :  { %v6483_v5 = vpop.eup %6482 }
 0x9ce   :  { %v6485_v9 = vpop.eup %6484 }
 0x9cf   :  { %v4746_v47 = vmul.f32 %v6485_v9, %v6483_v5  ;;  %v10098_v9 = vld [vmem:[#allocation11 + $0x20] ss:$16 sps:$4 sm:$0xff]  }
 0x9d1   :  { %v10036_v18 = vpack.c.bf16 %v4746_v47, %v4746_v47  ;;  %v10101_v47 = vld [vmem:[#allocation11 + $0x28] ss:$16 sps:$4 sm:$0xff]  }
 0x9d3   :  { %4982 = vmatmul.mubr.bf16.vlgmr.msra.gmra.mrb[152].mxu0 %v10036_v18  ;;  %5023 = vmatmul.mubr.bf16.vlgmr.msra.gmra.mrb[152].mxu1 %v10036_v18 }
 0x9d4   :  { %5032 = vmatpush1.bf16.msra.mxu0 %v9813_v51  ;;  %5073 = vmatpush1.bf16.msra.mxu1 %v9816_v36  ;;  %v11434_v51 = vld [vmem:[#allocation95_spill] sm:$0xff]  ;;  %v11435_v36 = vld [vmem:[#allocation96_spill] sm:$0xff] }
 0x9d5   :  { %5033 = vmatprep.subr.bf16.mxu0 %v9819_v57  ;;  %5074 = vmatprep.subr.bf16.mxu1 %v11428_v21  ;;  %v11436_v57 = vld [vmem:[#allocation97_spill] sm:$0xff] }
 0x9d6   :  { %5063 = vmatprep.mubr.bf16.mxu0 %v10759_v4  ;;  %5104 = vmatprep.mubr.bf16.mxu1 %v10759_v4  ;;  %v10104_v21 = vld [vmem:[#allocation11 + $0x44] ss:$16 sps:$4 sm:$0xff]  }
 0x9d8   :  { %5034 = vmatpush1.bf16.msra.mxu0 %v11429_v60  ;;  %5075 = vmatpush1.bf16.msra.mxu1 %v11430_v16  ;;  %v10107_v60 = vld [vmem:[#allocation11 + $0x4c] ss:$16 sps:$4 sm:$0xff]   ;;  %v10110_v16 = vld [vmem:[#allocation11 + $0x40] ss:$16 sps:$4 sm:$0xff]  }
 0x9d9   :  { %5035 = vmatprep.subr.bf16.mxu0 %v11431_v32  ;;  %5076 = vmatprep.subr.bf16.mxu1 %v11432_v35  ;;  %v10113_v32 = vld [vmem:[#allocation11 + $0x48] ss:$16 sps:$4 sm:$0xff]   ;;  %v10116_v35 = vld [vmem:[#allocation11 + $0x64] ss:$16 sps:$4 sm:$0xff]  }
 0x9dc   :  { %5036 = vmatpush1.bf16.msra.mxu0 %v11433_v0  ;;  %5077 = vmatpush1.bf16.msra.mxu1 %v11434_v51  ;;  %v10119_v0 = vld [vmem:[#allocation11 + $0x6c] ss:$16 sps:$4 sm:$0xff]  }
 0x9dd   :  { %5037 = vmatprep.subr.bf16.mxu0 %v11435_v36  ;;  %5078 = vmatprep.subr.bf16.mxu1 %v11436_v57  ;;  %v10122_v36 = vld [vmem:[#allocation11 + $0x60] ss:$16 sps:$4 sm:$0xff]   ;;  %v10125_v57 = vld [vmem:[#allocation11 + $0x68] ss:$16 sps:$4 sm:$0xff]  }
 0x9de   :  { %v4864_v24 = vpop.f32.mrb[148].mxu0  ;;  %v4905_v30 = vpop.f32.mrb[148].mxu1 }
 0x9df   :  { %v4865_v38 = vadd.f32 %v4864_v24, %v4782_v53  ;;  %v4906_v1 = vadd.f32 %v4905_v30, %v4823_v37  ;;  %v4866_v19 = vpop.f32.mrb[149].mxu0  ;;  %v4907_v22 = vpop.f32.mrb[149].mxu1  ;;  %v11444_v53 = vld [vmem:[#allocation105_spill] sm:$0xff]  ;;  %v10131_v30 = vld [vmem:[#allocation11 + $0x8c] ss:$16 sps:$4 sm:$0xff]  }
 0x9e0   :  { %5038 = vmatpush1.bf16.msra.mxu0 %v11437_v31  ;;  %5079 = vmatpush1.bf16.msra.mxu1 %v11438_v54  ;;  %v4867_v26 = vadd.f32 %v4866_v19, %v4784_v46  ;;  %v4908_v12 = vadd.f32 %v4907_v22, %v4825_v10  ;;  %v4868_v62 = vpop.f32.mrb[150].mxu0  ;;  %v4909_v27 = vpop.f32.mrb[150].mxu1  ;;  %v10128_v24 = vld [vmem:[#allocation11 + $0x84] ss:$16 sps:$4 sm:$0xff]   ;;  %v10134_v22 = vld [vmem:[#allocation11 + $0x80] ss:$16 sps:$4 sm:$0xff]  }
 0x9e1   :  { %5039 = vmatprep.subr.bf16.mxu0 %v11439_v20  ;;  %5080 = vmatprep.subr.bf16.mxu1 %v9860_v13  ;;  %v4912_v52 = vadd.f32 %v4865_v38, %v8407_v63  ;;  %v4914_v49 = vadd.f32 %v4906_v1, %v8410_v15  ;;  %v4869_v50 = vpop.f32.mrb[151].mxu0  ;;  %v4910_v43 = vpop.f32.mrb[151].mxu1  ;;  %v10141_v27 = vld [vmem:[#allocation11 + $0xa4] ss:$16 sps:$4 sm:$0xff]  }
 0x9e2   :  { %v4913_v13 = vadd.f32 %v4867_v26, %v8419_v11  ;;  %v10137_v26 = vld [vmem:[#allocation11 + $0x88] ss:$16 sps:$4 sm:$0xff]   ;;  %v10149_v50 = vld [vmem:[#allocation11 + $0xa0] ss:$16 sps:$4 sm:$0xff]  }
 0x9e3   :  { %v5850_v48 = vmul.f32 -1.442695, %v4912_v52  ;;  %v5852_v42 = vmul.f32 -1.442695, %v4914_v49  ;;  %v10144_v52 = vld [vmem:[#allocation11 + $0xac] ss:$16 sps:$4 sm:$0xff]  }
 0x9e4   :  { %5040 = vmatpush1.bf16.msra.mxu0 %v9866_v25  ;;  %5081 = vmatpush1.bf16.msra.mxu1 %v9869_v39  ;;  %v5851_v58 = vmul.f32 -1.442695, %v4913_v13  ;;  %v11440_v25 = vld [vmem:[#allocation101_spill] sm:$0xff]  ;;  %v11441_v39 = vld [vmem:[#allocation102_spill] sm:$0xff] }
 0x9e5   :  { %5041 = vmatprep.subr.bf16.mxu0 %v9872_v44  ;;  %5082 = vmatprep.subr.bf16.mxu1 %v9875_v34  ;;  %6486 = vpow2.f32 %v5850_v48  ;;  %v11443_v44 = vld [vmem:[#allocation104_spill] sm:$0xff]  ;;  %v4915_v34 = vadd.f32 %v4908_v12, %v11264_v17  ;;  %v10162_v48 = vld [vmem:[#allocation11 + $0xc0] ss:$16 sps:$4 sm:$0xff]  }
 0x9e6   :  { %6488 = vpow2.f32 %v5852_v42  ;;  %v10152_v43 = vld [vmem:[#allocation11 + $0xa8] ss:$16 sps:$4 sm:$0xff]   ;;  %v10158_v13 = vld [vmem:[#allocation11 + $0xcc] ss:$16 sps:$4 sm:$0xff]  }
 0x9e7   :  { %6490 = vpow2.f32 %v5851_v58  ;;  %v10165_v42 = vld [vmem:[#allocation11 + $0xc8] ss:$16 sps:$4 sm:$0xff]   ;;  %v10168_v58 = vld [vmem:[#allocation11 + $0xe4] ss:$16 sps:$4 sm:$0xff]  }
 0x9e8   :  { %5042 = vmatpush1.bf16.msra.mxu0 %v9878_v7  ;;  %5083 = vmatpush1.bf16.msra.mxu1 %v9881_v40  ;;  %v4947_v7 = vpack.c.bf16 %v9984_v3, %v9984_v3  ;;  %v10078_v40 = vld [vmem:[#allocation11 + $0x4] ss:$16 sps:$4 sm:$0xff]  }
 0x9e9   :  { %5043 = vmatprep.subr.bf16.mxu0 %v9884_v8  ;;  %5084 = vmatprep.subr.bf16.mxu1 %v11440_v25  ;;  %v10081_v8 = vld [vmem:[#allocation11 + $0xc] ss:$16 sps:$4 sm:$0xff]  }
 0x9ea   :  { %v10171_v25 = vld [vmem:[#allocation11 + $0xec] ss:$16 sps:$4 sm:$0xff]  }
 0x9ec   :  { %5044 = vmatpush1.bf16.msra.mxu0 %v11441_v39  ;;  %5085 = vmatpush1.bf16.msra.mxu1 %v11442_v55  ;;  %v10174_v39 = vld [vmem:[#allocation11 + $0xe0] ss:$16 sps:$4 sm:$0xff]   ;;  %v10177_v55 = vld [vmem:[#allocation11 + $0xe8] ss:$16 sps:$4 sm:$0xff]  }
 0x9ed   :  { %5045 = vmatprep.subr.bf16.mxu0 %v11443_v44  ;;  %5086 = vmatprep.subr.bf16.mxu1 %v9899_v28  ;;  %v5853_v28 = vmul.f32 -1.442695, %v4915_v34  ;;  %v10180_v44 = vld [vmem:[#allocation9 + $0x4] ss:$16 sps:$4 sm:$0xff]   ;;  %v10183_v34 = vld [vmem:[#allocation9 + $0xc] ss:$16 sps:$4 sm:$0xff]  }
 0x9ef   :  { %v6487_v37 = vpop.eup %6486 }
 0x9f0   :  { %5046 = vmatpush1.bf16.msra.mxu0 %v11444_v53  ;;  %5087 = vmatpush1.bf16.msra.mxu1 %v9906_v41  ;;  %v6489_v46 = vpop.eup %6488  ;;  %v10087_v41 = vld [vmem:[#allocation11 + $0x8] ss:$16 sps:$4 sm:$0xff]   ;;  %v4928_v5 = vadd.f32 1.0, %v6487_v37 }
 0x9f1   :  { %5149 = vmatprep.subr.bf16.mxu0 %v10078_v40  ;;  %5190 = vmatprep.subr.bf16.mxu1 %v10081_v8  ;;  %v6491_v10 = vpop.eup %6490  ;;  %v4930_v56 = vadd.f32 1.0, %v6489_v46 }
 0x9f2   :  { %v4929_v3 = vadd.f32 1.0, %v6491_v10  ;;  %v10189_v10 = vld [vmem:[#allocation9 + $0x8] ss:$16 sps:$4 sm:$0xff]  }
 0x9f3   :  { %5064 = vmatmul.mubr.bf16.vlgmr.msra.gmra.mrb[156].mxu0 %v4947_v7  ;;  %5105 = vmatmul.mubr.bf16.vlgmr.msra.gmra.mrb[156].mxu1 %v4947_v7  ;;  %6492 = vrcp.f32 %v4930_v56  ;;  %v10192_v56 = vld [vmem:[#allocation9 + $0x24] ss:$16 sps:$4 sm:$0xff]  }
 0x9f4   :  { %5150 = vmatpush1.bf16.msra.mxu0 %v10084_v29  ;;  %5191 = vmatpush1.bf16.msra.mxu1 %v10087_v41  ;;  %6494 = vpow2.f32 %v5853_v28  ;;  %v10186_v28 = vld [vmem:[#allocation9] ss:$16 sps:$4 sm:$0xff]  }
 0x9f5   :  { %5151 = vmatprep.subr.bf16.mxu0 %v10090_v2  ;;  %5192 = vmatprep.subr.bf16.mxu1 %v10093_v6  ;;  %6496 = vrcp.f32 %v4929_v3  ;;  %v10195_v3 = vld [vmem:[#allocation9 + $0x2c] ss:$16 sps:$4 sm:$0xff]  }
 0x9f6   :  { %5181 = vmatprep.mubr.bf16.mxu0 %v10759_v4  ;;  %5222 = vmatprep.mubr.bf16.mxu1 %v10759_v4  ;;  %6498 = vrcp.f32 %v4928_v5  ;;  %v10200_v5 = vld [vmem:[#allocation9 + $0x20] ss:$16 sps:$4 sm:$0xff]  }
 0x9f8   :  { %5152 = vmatpush1.bf16.msra.mxu0 %v10098_v9  ;;  %5193 = vmatpush1.bf16.msra.mxu1 %v10101_v47 }
 0x9f9   :  { %5153 = vmatprep.subr.bf16.mxu0 %v10104_v21  ;;  %5194 = vmatprep.subr.bf16.mxu1 %v10107_v60 }
 0x9fc   :  { %5154 = vmatpush1.bf16.msra.mxu0 %v10110_v16  ;;  %5195 = vmatpush1.bf16.msra.mxu1 %v10113_v32 }
 0x9fd   :  { %5155 = vmatprep.subr.bf16.mxu0 %v10116_v35  ;;  %5196 = vmatprep.subr.bf16.mxu1 %v10119_v0  ;;  %v6493_v51 = vpop.eup %6492 }
 0x9fe   :  { %v6495_v31 = vpop.eup %6494  ;;  %v4940_v54 = vmul.f32 2.0, %v6493_v51  ;;  %v10203_v51 = vld [vmem:[#allocation9 + $0x28] ss:$16 sps:$4 sm:$0xff]  }
 0x9ff   :  { %v6497_v20 = vpop.eup %6496  ;;  %v4931_v19 = vadd.f32 1.0, %v6495_v31  ;;  %v10206_v31 = vld [vmem:[#allocation9 + $0x44] ss:$16 sps:$4 sm:$0xff]  }
 0xa00   :  { %5156 = vmatpush1.bf16.msra.mxu0 %v10122_v36  ;;  %5197 = vmatpush1.bf16.msra.mxu1 %v10125_v57  ;;  %v5854_v38 = vadd.f32 -1.0, %v4940_v54  ;;  %v6499_v1 = vpop.eup %6498  ;;  %v4942_v62 = vmul.f32 %v6497_v20, %v9940_v45  ;;  %v10155_v45 = vld [vmem:[#allocation11 + $0xc4] ss:$16 sps:$4 sm:$0xff]   ;;  %v10209_v54 = vld [vmem:[#allocation9 + $0x4c] ss:$16 sps:$4 sm:$0xff]  }
 0xa01   :  { %5157 = vmatprep.subr.bf16.mxu0 %v10128_v24  ;;  %5198 = vmatprep.subr.bf16.mxu1 %v10131_v30  ;;  %6500 = vrcp.f32 %v4931_v19  ;;  %v10212_v20 = vld [vmem:[#allocation9 + $0x40] ss:$16 sps:$4 sm:$0xff]   ;;  %v10221_v19 = vld [vmem:[#allocation9 + $0x6c] ss:$16 sps:$4 sm:$0xff]  }
 0xa02   :  { %v4943_v12 = vmul.f32 %v6499_v1, %v5854_v38  ;;  %v10215_v38 = vld [vmem:[#allocation9 + $0x48] ss:$16 sps:$4 sm:$0xff]   ;;  %v10218_v1 = vld [vmem:[#allocation9 + $0x64] ss:$16 sps:$4 sm:$0xff]  }
 0xa04   :  { %5158 = vmatpush1.bf16.msra.mxu0 %v10134_v22  ;;  %5199 = vmatpush1.bf16.msra.mxu1 %v10137_v26  ;;  %v10147_v49 = vadd.f32 %v4943_v12, %v4942_v62  ;;  %v10224_v12 = vld [vmem:[#allocation9 + $0x60] ss:$16 sps:$4 sm:$0xff]   ;;  %v10227_v62 = vld [vmem:[#allocation9 + $0x68] ss:$16 sps:$4 sm:$0xff]  }
 0xa05   :  { %5159 = vmatprep.subr.bf16.mxu0 %v10141_v27  ;;  %5200 = vmatprep.subr.bf16.mxu1 %v10144_v52  ;;  %11445 = vst [vmem:[#allocation106_spill] sm:$0xff] %v10224_v12  ;;  %11446 = vst [vmem:[#allocation107_spill] sm:$0xff] %v10227_v62 }
 0xa06   :  { %6502 = vtanh.f32 %v10147_v49 }
 0xa08   :  { %5160 = vmatpush1.bf16.msra.mxu0 %v10149_v50  ;;  %5201 = vmatpush1.bf16.msra.mxu1 %v10152_v43 }
 0xa09   :  { %5161 = vmatprep.subr.bf16.mxu0 %v10155_v45  ;;  %5202 = vmatprep.subr.bf16.mxu1 %v10158_v13 }
 0xa0b   :  { %v6501_v53 = vpop.eup %6500 }
 0xa0c   :  { %5162 = vmatpush1.bf16.msra.mxu0 %v10162_v48  ;;  %5203 = vmatpush1.bf16.msra.mxu1 %v10165_v42 }
 0xa0d   :  { %5163 = vmatprep.subr.bf16.mxu0 %v10168_v58  ;;  %5204 = vmatprep.subr.bf16.mxu1 %v10171_v25 }
 0xa10   :  { %5164 = vmatpush1.bf16.msra.mxu0 %v10174_v39  ;;  %5205 = vmatpush1.bf16.msra.mxu1 %v10177_v55  ;;  %v6503_v7 = vpop.eup %6502 }
 0xa11   :  { %5231 = vmatprep.subr.bf16.mxu0 %v10180_v44  ;;  %5272 = vmatprep.subr.bf16.mxu1 %v10183_v34  ;;  %v4946_v37 = vmul.f32 %v6503_v7, %v6501_v53  ;;  %v10230_v53 = vld [vmem:[#allocation9 + $0x84] ss:$16 sps:$4 sm:$0xff]   ;;  %v10233_v7 = vld [vmem:[#allocation9 + $0x8c] ss:$16 sps:$4 sm:$0xff]  }
 0xa12   :  { %11447 = vst [vmem:[#allocation108_spill] sm:$0xff] %v10230_v53  ;;  %11448 = vst [vmem:[#allocation109_spill] sm:$0xff] %v10233_v7 }
 0xa13   :  { %v5148_v46 = vpack.c.bf16 %v4946_v37, %v4946_v37  ;;  %v10236_v37 = vld [vmem:[#allocation9 + $0x80] ss:$16 sps:$4 sm:$0xff]  }
 0xa14   :  { %11449 = vst [vmem:[#allocation110_spill] sm:$0xff] %v10236_v37 }
 0xa15   :  { %5182 = vmatmul.mubr.bf16.vlgmr.msra.gmra.mrb[160].mxu0 %v5148_v46  ;;  %5223 = vmatmul.mubr.bf16.vlgmr.msra.gmra.mrb[160].mxu1 %v5148_v46  ;;  %v10239_v46 = vld [vmem:[#allocation9 + $0x88] ss:$16 sps:$4 sm:$0xff]  }
 0xa16   :  { %5232 = vmatpush1.bf16.msra.mxu0 %v10186_v28  ;;  %5273 = vmatpush1.bf16.msra.mxu1 %v10189_v10  ;;  %11450 = vst [vmem:[#allocation111_spill] sm:$0xff] %v10239_v46 }
 0xa17   :  { %5233 = vmatprep.subr.bf16.mxu0 %v10192_v56  ;;  %5274 = vmatprep.subr.bf16.mxu1 %v10195_v3 }
 0xa18   :  { %5263 = vmatprep.mubr.bf16.mxu0 %v10759_v4  ;;  %5304 = vmatprep.mubr.bf16.mxu1 %v10759_v4 }
 0xa1a   :  { %5234 = vmatpush1.bf16.msra.mxu0 %v10200_v5  ;;  %5275 = vmatpush1.bf16.msra.mxu1 %v10203_v51 }
 0xa1b   :  { %5235 = vmatprep.subr.bf16.mxu0 %v10206_v31  ;;  %5276 = vmatprep.subr.bf16.mxu1 %v10209_v54 }
 0xa1e   :  { %5236 = vmatpush1.bf16.msra.mxu0 %v10212_v20  ;;  %5277 = vmatpush1.bf16.msra.mxu1 %v10215_v38 }
 0xa1f   :  { %5237 = vmatprep.subr.bf16.mxu0 %v10218_v1  ;;  %5278 = vmatprep.subr.bf16.mxu1 %v10221_v19 }
 0xa22   :  { %5238 = vmatpush1.bf16.msra.mxu0 %v10224_v12  ;;  %5279 = vmatpush1.bf16.msra.mxu1 %v10227_v62  ;;  %v10242_v12 = vld [vmem:[#allocation9 + $0xa4] ss:$16 sps:$4 sm:$0xff]   ;;  %v10245_v62 = vld [vmem:[#allocation9 + $0xac] ss:$16 sps:$4 sm:$0xff]  }
 0xa23   :  { %5239 = vmatprep.subr.bf16.mxu0 %v10230_v53  ;;  %5280 = vmatprep.subr.bf16.mxu1 %v10233_v7  ;;  %11451 = vst [vmem:[#allocation112_spill] sm:$0xff] %v10242_v12  ;;  %11452 = vst [vmem:[#allocation113_spill] sm:$0xff] %v10245_v62  ;;  %v10248_v53 = vld [vmem:[#allocation9 + $0xa0] ss:$16 sps:$4 sm:$0xff]   ;;  %v10251_v7 = vld [vmem:[#allocation9 + $0xa8] ss:$16 sps:$4 sm:$0xff]  }
 0xa24   :  { %11453 = vst [vmem:[#allocation114_spill] sm:$0xff] %v10248_v53  ;;  %11454 = vst [vmem:[#allocation115_spill] sm:$0xff] %v10251_v7 }
 0xa26   :  { %5240 = vmatpush1.bf16.msra.mxu0 %v10236_v37  ;;  %5281 = vmatpush1.bf16.msra.mxu1 %v10239_v46  ;;  %v10254_v37 = vld [vmem:[#allocation9 + $0xc4] ss:$16 sps:$4 sm:$0xff]   ;;  %v10257_v46 = vld [vmem:[#allocation9 + $0xcc] ss:$16 sps:$4 sm:$0xff]  }
 0xa27   :  { %5241 = vmatprep.subr.bf16.mxu0 %v10242_v12  ;;  %5282 = vmatprep.subr.bf16.mxu1 %v10245_v62  ;;  %11455 = vst [vmem:[#allocation116_spill] sm:$0xff] %v10254_v37  ;;  %11456 = vst [vmem:[#allocation117_spill] sm:$0xff] %v10257_v46  ;;  %v10260_v12 = vld [vmem:[#allocation9 + $0xc0] ss:$16 sps:$4 sm:$0xff]   ;;  %v10263_v62 = vld [vmem:[#allocation9 + $0xc8] ss:$16 sps:$4 sm:$0xff]  }
 0xa2a   :  { %5242 = vmatpush1.bf16.msra.mxu0 %v10248_v53  ;;  %5283 = vmatpush1.bf16.msra.mxu1 %v10251_v7  ;;  %v10266_v53 = vld [vmem:[#allocation9 + $0xe4] ss:$16 sps:$4 sm:$0xff]   ;;  %v10269_v7 = vld [vmem:[#allocation9 + $0xec] ss:$16 sps:$4 sm:$0xff]  }
 0xa2b   :  { %5243 = vmatprep.subr.bf16.mxu0 %v10254_v37  ;;  %5284 = vmatprep.subr.bf16.mxu1 %v10257_v46  ;;  %v10272_v37 = vld [vmem:[#allocation9 + $0xe0] ss:$16 sps:$4 sm:$0xff]   ;;  %v10275_v46 = vld [vmem:[#allocation9 + $0xe8] ss:$16 sps:$4 sm:$0xff]  }
 0xa2e   :  { %5244 = vmatpush1.bf16.msra.mxu0 %v10260_v12  ;;  %5285 = vmatpush1.bf16.msra.mxu1 %v10263_v62 }
 0xa2f   :  { %5245 = vmatprep.subr.bf16.mxu0 %v10266_v53  ;;  %5286 = vmatprep.subr.bf16.mxu1 %v10269_v7 }
 0xa32   :  { %5246 = vmatpush1.bf16.msra.mxu0 %v10272_v37  ;;  %5287 = vmatpush1.bf16.msra.mxu1 %v10275_v46 }
 0xa33   :  { %5350 = vmatprep.subr.bf16.mxu0 %v10078_v40  ;;  %5391 = vmatprep.subr.bf16.mxu1 %v10081_v8 }
 0xa35   :  { %5264 = vmatmul.mubr.bf16.vlgmr.msra.gmra.mrb[164].mxu0 %v10036_v18  ;;  %5305 = vmatmul.mubr.bf16.vlgmr.msra.gmra.mrb[164].mxu1 %v10036_v18 }
 0xa36   :  { %5351 = vmatpush1.bf16.msra.mxu0 %v10084_v29  ;;  %5392 = vmatpush1.bf16.msra.mxu1 %v10087_v41 }
 0xa37   :  { %5352 = vmatprep.subr.bf16.mxu0 %v10090_v2  ;;  %5393 = vmatprep.subr.bf16.mxu1 %v10093_v6 }
 0xa38   :  { %5382 = vmatprep.mubr.bf16.mxu0 %v10759_v4  ;;  %5423 = vmatprep.mubr.bf16.mxu1 %v10759_v4 }
 0xa3a   :  { %5353 = vmatpush1.bf16.msra.mxu0 %v10098_v9  ;;  %5394 = vmatpush1.bf16.msra.mxu1 %v10101_v47 }
 0xa3b   :  { %5354 = vmatprep.subr.bf16.mxu0 %v10104_v21  ;;  %5395 = vmatprep.subr.bf16.mxu1 %v10107_v60 }
 0xa3e   :  { %5355 = vmatpush1.bf16.msra.mxu0 %v10110_v16  ;;  %5396 = vmatpush1.bf16.msra.mxu1 %v10113_v32 }
 0xa3f   :  { %5356 = vmatprep.subr.bf16.mxu0 %v10116_v35  ;;  %5397 = vmatprep.subr.bf16.mxu1 %v10119_v0 }
 0xa42   :  { %5357 = vmatpush1.bf16.msra.mxu0 %v10122_v36  ;;  %5398 = vmatpush1.bf16.msra.mxu1 %v10125_v57 }
 0xa43   :  { %5358 = vmatprep.subr.bf16.mxu0 %v10128_v24  ;;  %5399 = vmatprep.subr.bf16.mxu1 %v10131_v30 }
 0xa46   :  { %5359 = vmatpush1.bf16.msra.mxu0 %v10134_v22  ;;  %5400 = vmatpush1.bf16.msra.mxu1 %v10137_v26 }
 0xa47   :  { %5360 = vmatprep.subr.bf16.mxu0 %v10141_v27  ;;  %5401 = vmatprep.subr.bf16.mxu1 %v10144_v52 }
 0xa4a   :  { %5361 = vmatpush1.bf16.msra.mxu0 %v10149_v50  ;;  %5402 = vmatpush1.bf16.msra.mxu1 %v10152_v43 }
 0xa4b   :  { %5362 = vmatprep.subr.bf16.mxu0 %v10155_v45  ;;  %5403 = vmatprep.subr.bf16.mxu1 %v10158_v13 }
 0xa4e   :  { %5363 = vmatpush1.bf16.msra.mxu0 %v10162_v48  ;;  %5404 = vmatpush1.bf16.msra.mxu1 %v10165_v42 }
 0xa4f   :  { %5364 = vmatprep.subr.bf16.mxu0 %v10168_v58  ;;  %5405 = vmatprep.subr.bf16.mxu1 %v10171_v25 }
 0xa52   :  { %5365 = vmatpush1.bf16.msra.mxu0 %v10174_v39  ;;  %5406 = vmatpush1.bf16.msra.mxu1 %v10177_v55 }
 0xa53   :  { %5432 = vmatprep.subr.bf16.mxu0 %v10180_v44  ;;  %5473 = vmatprep.subr.bf16.mxu1 %v10183_v34 }
 0xaa6   :  { %v4983_v18 = vpop.f32.mrb[152].mxu0  ;;  %v5024_v40 = vpop.f32.mrb[152].mxu1 }
 0xaa7   :  { %v4985_v8 = vpop.f32.mrb[153].mxu0  ;;  %v5026_v29 = vpop.f32.mrb[153].mxu1 }
 0xaa8   :  { %v4987_v41 = vpop.f32.mrb[154].mxu0  ;;  %v5028_v2 = vpop.f32.mrb[154].mxu1 }
 0xaa9   :  { %v4988_v6 = vpop.f32.mrb[155].mxu0  ;;  %v5029_v9 = vpop.f32.mrb[155].mxu1 }
 0xac6   :  { %v5065_v47 = vpop.f32.mrb[156].mxu0  ;;  %v5106_v21 = vpop.f32.mrb[156].mxu1 }
 0xac7   :  { %v5066_v60 = vadd.f32 %v5065_v47, %v4983_v18  ;;  %v5107_v16 = vadd.f32 %v5106_v21, %v5024_v40  ;;  %v5067_v32 = vpop.f32.mrb[157].mxu0  ;;  %v5108_v35 = vpop.f32.mrb[157].mxu1 }
 0xac8   :  { %v5068_v0 = vadd.f32 %v5067_v32, %v4985_v8  ;;  %v5109_v36 = vadd.f32 %v5108_v35, %v5026_v29  ;;  %v5069_v57 = vpop.f32.mrb[158].mxu0  ;;  %v5110_v24 = vpop.f32.mrb[158].mxu1 }
 0xac9   :  { %v5113_v30 = vadd.f32 %v5066_v60, %v7905_v59  ;;  %v5115_v22 = vadd.f32 %v5107_v16, %v7908_v14  ;;  %v5070_v26 = vpop.f32.mrb[159].mxu0  ;;  %v5111_v27 = vpop.f32.mrb[159].mxu1 }
 0xaca   :  { %v5114_v52 = vadd.f32 %v5068_v0, %v7913_v61  ;;  %v5116_v13 = vadd.f32 %v5109_v36, %v7927_v23 }
 0xacb   :  { %v5855_v50 = vmul.f32 -1.442695, %v5113_v30  ;;  %v5857_v43 = vmul.f32 -1.442695, %v5115_v22 }
 0xacc   :  { %v5856_v45 = vmul.f32 -1.442695, %v5114_v52  ;;  %v5858_v58 = vmul.f32 -1.442695, %v5116_v13 }
 0xacd   :  { %6504 = vpow2.f32 %v5855_v50 }
 0xace   :  { %6506 = vpow2.f32 %v5857_v43 }
 0xacf   :  { %6508 = vpow2.f32 %v5856_v45 }
 0xad7   :  { %v6505_v48 = vpop.eup %6504 }
 0xad8   :  { %v6507_v42 = vpop.eup %6506  ;;  %v5129_v55 = vadd.f32 1.0, %v6505_v48 }
 0xad9   :  { %v6509_v25 = vpop.eup %6508  ;;  %v5131_v39 = vadd.f32 1.0, %v6507_v42 }
 0xada   :  { %v5130_v59 = vadd.f32 1.0, %v6509_v25 }
 0xadb   :  { %6510 = vrcp.f32 %v5131_v39 }
 0xadc   :  { %6512 = vpow2.f32 %v5858_v58 }
 0xadd   :  { %6514 = vrcp.f32 %v5130_v59 }
 0xade   :  { %6516 = vrcp.f32 %v5129_v55 }
 0xae5   :  { %v6511_v14 = vpop.eup %6510 }
 0xae6   :  { %v6513_v61 = vpop.eup %6512  ;;  %v5141_v44 = vmul.f32 2.0, %v6511_v14 }
 0xae7   :  { %v6515_v34 = vpop.eup %6514  ;;  %v5132_v8 = vadd.f32 1.0, %v6513_v61 }
 0xae8   :  { %v5859_v18 = vadd.f32 -1.0, %v5141_v44  ;;  %v6517_v40 = vpop.eup %6516  ;;  %v5143_v23 = vmul.f32 %v6515_v34, %v10033_v33  ;;  %v5183_v41 = vpop.f32.mrb[160].mxu0 }
 0xae9   :  { %v5224_v2 = vpop.f32.mrb[160].mxu1  ;;  %v5185_v6 = vpop.f32.mrb[161].mxu0  ;;  %6518 = vrcp.f32 %v5132_v8 }
 0xaea   :  { %v5144_v29 = vmul.f32 %v6517_v40, %v5859_v18  ;;  %v5226_v9 = vpop.f32.mrb[161].mxu1  ;;  %v5187_v21 = vpop.f32.mrb[162].mxu0 }
 0xaeb   :  { %v5228_v60 = vpop.f32.mrb[162].mxu1  ;;  %v5188_v16 = vpop.f32.mrb[163].mxu0 }
 0xaec   :  { %v5145_v47 = vadd.f32 %v5144_v29, %v5143_v23  ;;  %v5229_v32 = vpop.f32.mrb[163].mxu1 }
 0xaee   :  { %6520 = vtanh.f32 %v5145_v47 }
 0xaf3   :  { %v6519_v35 = vpop.eup %6518 }
 0xaf8   :  { %v6521_v0 = vpop.eup %6520 }
 0xaf9   :  { %v10321_v36 = vmul.f32 %v6521_v0, %v6519_v35 }
 0xb08   :  { %v5265_v57 = vpop.f32.mrb[164].mxu0  ;;  %v5306_v24 = vpop.f32.mrb[164].mxu1 }
 0xb09   :  { %v5266_v30 = vadd.f32 %v5265_v57, %v5183_v41  ;;  %v5307_v22 = vadd.f32 %v5306_v24, %v5224_v2  ;;  %v5267_v33 = vpop.f32.mrb[165].mxu0  ;;  %v5308_v26 = vpop.f32.mrb[165].mxu1 }
 0xb0a   :  { %v5268_v27 = vadd.f32 %v5267_v33, %v5185_v6  ;;  %v5309_v52 = vadd.f32 %v5308_v26, %v5226_v9  ;;  %v5269_v50 = vpop.f32.mrb[166].mxu0  ;;  %v5310_v43 = vpop.f32.mrb[166].mxu1 }
 0xb0b   :  { %v5313_v45 = vadd.f32 %v5266_v30, %v8407_v63  ;;  %v5315_v13 = vadd.f32 %v5307_v22, %v8410_v15  ;;  %v5270_v48 = vpop.f32.mrb[167].mxu0  ;;  %v5311_v42 = vpop.f32.mrb[167].mxu1 }
 0xb0c   :  { %v5314_v58 = vadd.f32 %v5268_v27, %v8419_v11  ;;  %v5316_v55 = vadd.f32 %v5309_v52, %v11264_v17 }
 0xb0d   :  { %v5860_v25 = vmul.f32 -1.442695, %v5313_v45  ;;  %v5862_v39 = vmul.f32 -1.442695, %v5315_v13 }
 0xb0e   :  { %v5861_v59 = vmul.f32 -1.442695, %v5314_v58  ;;  %v5863_v44 = vmul.f32 -1.442695, %v5316_v55 }
 0xb0f   :  { %6522 = vpow2.f32 %v5860_v25 }
 0xb10   :  { %6524 = vpow2.f32 %v5862_v39 }
 0xb11   :  { %6526 = vpow2.f32 %v5861_v59 }
 0xb19   :  { %v6523_v14 = vpop.eup %6522 }
 0xb1a   :  { %v6525_v61 = vpop.eup %6524  ;;  %v5329_v8 = vadd.f32 1.0, %v6523_v14 }
 0xb1b   :  { %v6527_v34 = vpop.eup %6526  ;;  %v5331_v18 = vadd.f32 1.0, %v6525_v61 }
 0xb1c   :  { %v5330_v40 = vadd.f32 1.0, %v6527_v34 }
 0xb1d   :  { %6528 = vrcp.f32 %v5331_v18 }
 0xb1e   :  { %6530 = vpow2.f32 %v5863_v44 }
 0xb1f   :  { %6532 = vrcp.f32 %v5330_v40 }
 0xb20   :  { %6534 = vrcp.f32 %v5329_v8 }
 0xb27   :  { %v6529_v29 = vpop.eup %6528 }
 0xb28   :  { %v6531_v23 = vpop.eup %6530  ;;  %v5341_v41 = vmul.f32 2.0, %v6529_v29 }
 0xb29   :  { %v6533_v2 = vpop.eup %6532  ;;  %v5332_v47 = vadd.f32 1.0, %v6531_v23 }
 0xb2a   :  { %v5864_v6 = vadd.f32 -1.0, %v5341_v41  ;;  %v6535_v9 = vpop.eup %6534  ;;  %v5343_v60 = vmul.f32 %v6533_v2, %v10147_v49  ;;  %v11457_v49 = vld [vmem:[#allocation106_spill] sm:$0xff] }
 0xb2b   :  { %6536 = vrcp.f32 %v5332_v47 }
 0xb2c   :  { %v5344_v21 = vmul.f32 %v6535_v9, %v5864_v6 }
 0xb2e   :  { %v10328_v16 = vadd.f32 %v5344_v21, %v5343_v60 }
 0xb30   :  { %6538 = vtanh.f32 %v10328_v16 }
 0xb35   :  { %v6537_v32 = vpop.eup %6536 }
 0xb3a   :  { %v6539_v35 = vpop.eup %6538 }
 0xb3b   :  { %v5347_v0 = vmul.f32 %v6539_v35, %v6537_v32  ;;  %v5870_v32 = vld [vmem:[%s10386_s10] ss:$0 sm:$0xff] }
 0xb3d   :  { %v5349_v57 = vpack.c.bf16 %v5347_v0, %v5347_v0 }
 0xb3f   :  { %5383 = vmatmul.mubr.bf16.vlgmr.msra.gmra.mrb[168].mxu0 %v5349_v57  ;;  %5424 = vmatmul.mubr.bf16.vlgmr.msra.gmra.mrb[168].mxu1 %v5349_v57  ;;  %v5871_v57 = vld [vmem:[#allocation3] ss:$0 sm:$0xff] }
 0xb40   :  { %5433 = vmatpush1.bf16.msra.mxu0 %v10186_v28  ;;  %5474 = vmatpush1.bf16.msra.mxu1 %v10189_v10  ;;  %v11458_v28 = vld [vmem:[#allocation107_spill] sm:$0xff]  ;;  %v11460_v10 = vld [vmem:[#allocation109_spill] sm:$0xff] }
 0xb41   :  { %5434 = vmatprep.subr.bf16.mxu0 %v10192_v56  ;;  %5475 = vmatprep.subr.bf16.mxu1 %v10195_v3  ;;  %v11461_v56 = vld [vmem:[#allocation110_spill] sm:$0xff]  ;;  %v11462_v3 = vld [vmem:[#allocation111_spill] sm:$0xff] }
 0xb42   :  { %5464 = vmatprep.mubr.bf16.mxu0 %v10759_v4  ;;  %5505 = vmatprep.mubr.bf16.mxu1 %v10759_v4  ;;  %v11459_v4 = vld [vmem:[#allocation108_spill] sm:$0xff] }
 0xb44   :  { %5435 = vmatpush1.bf16.msra.mxu0 %v10200_v5  ;;  %5476 = vmatpush1.bf16.msra.mxu1 %v10203_v51  ;;  %v11463_v5 = vld [vmem:[#allocation112_spill] sm:$0xff]  ;;  %v11464_v51 = vld [vmem:[#allocation113_spill] sm:$0xff] }
 0xb45   :  { %5436 = vmatprep.subr.bf16.mxu0 %v10206_v31  ;;  %5477 = vmatprep.subr.bf16.mxu1 %v10209_v54  ;;  %v11465_v31 = vld [vmem:[#allocation114_spill] sm:$0xff]  ;;  %v11466_v54 = vld [vmem:[#allocation115_spill] sm:$0xff] }
 0xb48   :  { %5437 = vmatpush1.bf16.msra.mxu0 %v10212_v20  ;;  %5478 = vmatpush1.bf16.msra.mxu1 %v10215_v38  ;;  %v11467_v20 = vld [vmem:[#allocation116_spill] sm:$0xff]  ;;  %v11468_v38 = vld [vmem:[#allocation117_spill] sm:$0xff] }
 0xb49   :  { %5438 = vmatprep.subr.bf16.mxu0 %v10218_v1  ;;  %5479 = vmatprep.subr.bf16.mxu1 %v10221_v19  ;;  %v5348_v1 = vpack.c.bf16 %v10321_v36, %v10321_v36 }
 0xb4c   :  { %5439 = vmatpush1.bf16.msra.mxu0 %v11457_v49  ;;  %5480 = vmatpush1.bf16.msra.mxu1 %v11458_v28 }
 0xb4d   :  { %5440 = vmatprep.subr.bf16.mxu0 %v11459_v4  ;;  %5481 = vmatprep.subr.bf16.mxu1 %v11460_v10 }
 0xb50   :  { %5441 = vmatpush1.bf16.msra.mxu0 %v11461_v56  ;;  %5482 = vmatpush1.bf16.msra.mxu1 %v11462_v3 }
 0xb51   :  { %5442 = vmatprep.subr.bf16.mxu0 %v11463_v5  ;;  %5483 = vmatprep.subr.bf16.mxu1 %v11464_v51 }
 0xb54   :  { %5443 = vmatpush1.bf16.msra.mxu0 %v11465_v31  ;;  %5484 = vmatpush1.bf16.msra.mxu1 %v11466_v54 }
 0xb55   :  { %5444 = vmatprep.subr.bf16.mxu0 %v11467_v20  ;;  %5485 = vmatprep.subr.bf16.mxu1 %v11468_v38 }
 0xb58   :  { %5445 = vmatpush1.bf16.msra.mxu0 %v10260_v12  ;;  %5486 = vmatpush1.bf16.msra.mxu1 %v10263_v62 }
 0xb59   :  { %5446 = vmatprep.subr.bf16.mxu0 %v10266_v53  ;;  %5487 = vmatprep.subr.bf16.mxu1 %v10269_v7 }
 0xb5c   :  { %5447 = vmatpush1.bf16.msra.mxu0 %v10272_v37  ;;  %5488 = vmatpush1.bf16.msra.mxu1 %v10275_v46 }
 0xb5f   :  { %5465 = vmatmul.mubr.bf16.vlgmr.msra.gmra.mrb[172].mxu0 %v5348_v1  ;;  %5506 = vmatmul.mubr.bf16.vlgmr.msra.gmra.mrb[172].mxu1 %v5348_v1 }
 0xc12   :  { %v5384_v19 = vpop.f32.mrb[168].mxu0  ;;  %v5425_v24 = vpop.f32.mrb[168].mxu1 }
 0xc13   :  { %v5386_v30 = vpop.f32.mrb[169].mxu0  ;;  %v5427_v22 = vpop.f32.mrb[169].mxu1 }
 0xc14   :  { %v5388_v12 = vpop.f32.mrb[170].mxu0  ;;  %v5429_v33 = vpop.f32.mrb[170].mxu1 }
 0xc15   :  { %v5389_v62 = vpop.f32.mrb[171].mxu0  ;;  %v5430_v26 = vpop.f32.mrb[171].mxu1 }
 0xc32   :  { %v5466_v53 = vpop.f32.mrb[172].mxu0  ;;  %v5507_v27 = vpop.f32.mrb[172].mxu1 }
 0xc33   :  { %v5467_v7 = vadd.f32 %v5466_v53, %v5384_v19  ;;  %v5508_v52 = vadd.f32 %v5507_v27, %v5425_v24  ;;  %v5468_v37 = vpop.f32.mrb[173].mxu0  ;;  %v5509_v50 = vpop.f32.mrb[173].mxu1 }
 0xc34   :  { %v5469_v46 = vadd.f32 %v5468_v37, %v5386_v30  ;;  %v5510_v43 = vadd.f32 %v5509_v50, %v5427_v22  ;;  %v5470_v45 = vpop.f32.mrb[174].mxu0  ;;  %v5511_v36 = vpop.f32.mrb[174].mxu1 }
 0xc35   :  { %v5514_v13 = vadd.f32 %v5467_v7, %v8407_v63  ;;  %v5516_v48 = vadd.f32 %v5508_v52, %v8410_v15  ;;  %v5471_v42 = vpop.f32.mrb[175].mxu0  ;;  %v5512_v58 = vpop.f32.mrb[175].mxu1 }
 0xc36   :  { %v5515_v25 = vadd.f32 %v5469_v46, %v8419_v11  ;;  %v5517_v14 = vadd.f32 %v5510_v43, %v11264_v17 }
 0xc37   :  { %v5865_v39 = vmul.f32 -1.442695, %v5514_v13  ;;  %v5867_v59 = vmul.f32 -1.442695, %v5516_v48 }
 0xc38   :  { %v5866_v55 = vmul.f32 -1.442695, %v5515_v25  ;;  %v5868_v34 = vmul.f32 -1.442695, %v5517_v14 }
 0xc39   :  { %6540 = vpow2.f32 %v5865_v39 }
 0xc3a   :  { %6542 = vpow2.f32 %v5867_v59 }
 0xc3b   :  { %6544 = vpow2.f32 %v5866_v55 }
 0xc43   :  { %v6541_v61 = vpop.eup %6540 }
 0xc44   :  { %v6543_v44 = vpop.eup %6542  ;;  %v5530_v8 = vadd.f32 1.0, %v6541_v61 }
 0xc45   :  { %v6545_v18 = vpop.eup %6544  ;;  %v5532_v40 = vadd.f32 1.0, %v6543_v44 }
 0xc46   :  { %v5531_v63 = vadd.f32 1.0, %v6545_v18 }
 0xc47   :  { %6546 = vrcp.f32 %v5532_v40 }
 0xc48   :  { %6548 = vpow2.f32 %v5868_v34 }
 0xc49   :  { %6550 = vrcp.f32 %v5531_v63 }
 0xc4a   :  { %6552 = vrcp.f32 %v5530_v8 }
 0xc51   :  { %v6547_v15 = vpop.eup %6546 }
 0xc52   :  { %v6549_v11 = vpop.eup %6548  ;;  %v5542_v29 = vmul.f32 2.0, %v6547_v15 }
 0xc53   :  { %v6551_v23 = vpop.eup %6550  ;;  %v5533_v6 = vadd.f32 1.0, %v6549_v11 }
 0xc54   :  { %v5869_v41 = vadd.f32 -1.0, %v5542_v29  ;;  %v6553_v2 = vpop.eup %6552  ;;  %v5544_v17 = vmul.f32 %v6551_v23, %v10328_v16 }
 0xc55   :  { %6554 = vrcp.f32 %v5533_v6 }
 0xc56   :  { %v5545_v9 = vmul.f32 %v6553_v2, %v5869_v41 }
 0xc58   :  { %v5546_v47 = vadd.f32 %v5545_v9, %v5544_v17 }
 0xc5a   :  { %6556 = vtanh.f32 %v5546_v47 }
 0xc5f   :  { %v6555_v21 = vpop.eup %6554 }
 0xc64   :  { %v6557_v60 = vpop.eup %6556 }
 0xc65   :  { %v5548_v35 = vmul.f32 %v6557_v60, %v6555_v21 }
 0xc67   :  { %v5556_v0 = vmul.f32 %v5870_v32, %v5548_v35 }
 0xc69   :  { %5557 = vadd.xlane.f32.xlu0 %v5556_v0 }
 0xcf6   :  { %v5558_v49 = vpop.xlane.xlu0 %5557 }
 0xcf7   :  { %v5566_v28 = vadd.f32 %v5871_v57, %v5558_v49 }
 0xcf9   :  { %5568 = vst.msk [vmem:[%s10388_s12] sm:$0xff] %vm5567_vm2, %v5566_v28 }
 0xcfa   :  { %5573 = vsyncpa [#allocation5], 1 }
 0xcfb   :  { %5574 = vsyncpa [#allocation7], 1 }
 0xcfc   :  { %5575 = vsyncpa [#allocation10], 1 }

</bundles_post_ra>
